<compile_context>
chip_gen: v6e
topology: v6e:2x2x1
jax: 0.10.0
libtpu: 0.0.40
codegen_flags: <defaults>
</compile_context>

<pallas_src>
import jax
import jax.numpy as jnp
from jax.experimental import pallas as pl
from jax.experimental.pallas import tpu as pltpu


def _round_up(x, m):
    return (x + m - 1) // m * m


def _choose_tm(m):
    """Row tile: big tiles for big M, but >=2 grid steps whenever M allows (v7x 2 TCs)."""
    mp = _round_up(m, 8)
    if mp <= 8:
        return mp, mp
    tm = min(512, _round_up(-(-mp // 2), 8))
    return tm, _round_up(m, tm)


# ----------------------------------------------------------------------------
# Fused Pallas matmul:  out = epilogue( prologue(A) @ W [+ bias] )
# ----------------------------------------------------------------------------
def fused_matmul(a, w, *, bias=None, prologue_st=None, bn_relu_st=None,
                 out_dtype=jnp.bfloat16):
    """One pallas_call per conv layer (single full-K block, 1-D parallel M grid).

    a           : (M, K)   activations / im2col patches (cast to bf16)
    w           : (Kp, Np) packed bf16 weights, Kp = round_up(K, 8), Np % 128 == 0
    bias        : (1, Np) f32              -> acc += bias       (folded conv+BN bias)
    prologue_st : (s, t) each (1, K) f32   -> A := relu(A*s+t)  (BN1 + ReLU)
    bn_relu_st  : (s, t) each (1, Np) f32  -> acc := relu(acc*s+t) (BN2 + ReLU)
    Returns (Mp, Np) in out_dtype; caller slices the valid region.
    """
    M, K = a.shape
    Kp, Np = w.shape
    assert Np % 128 == 0 and Kp % 8 == 0 and Kp >= K

    if Kp != K:                               # only sublane alignment (K -> mult of 8)
        a = jnp.pad(a, ((0, 0), (0, Kp - K)))
    tm, Mp = _choose_tm(M)
    if Mp != M:
        a = jnp.pad(a, ((0, Mp - M), (0, 0)))
    a = a.astype(jnp.bfloat16)

    operands = [a, w]
    in_specs = [pl.BlockSpec((tm, Kp), lambda i: (i, 0)),
                pl.BlockSpec((Kp, Np), lambda i: (0, 0))]

    have_pro = prologue_st is not None
    if have_pro:
        ps, pt = prologue_st
        ps = jnp.pad(ps.astype(jnp.float32), ((0, 0), (0, Kp - ps.shape[1])))
        pt = jnp.pad(pt.astype(jnp.float32), ((0, 0), (0, Kp - pt.shape[1])))
        operands += [ps, pt]
        in_specs += [pl.BlockSpec((1, Kp), lambda i: (0, 0))] * 2

    have_bias = bias is not None
    if have_bias:
        operands.append(bias.astype(jnp.float32))
        in_specs.append(pl.BlockSpec((1, Np), lambda i: (0, 0)))

    have_bn = bn_relu_st is not None
    if have_bn:
        s2, t2 = bn_relu_st
        operands += [s2.astype(jnp.float32), t2.astype(jnp.float32)]
        in_specs += [pl.BlockSpec((1, Np), lambda i: (0, 0))] * 2

    def kernel(*refs):
        refs = list(refs)
        a_ref = refs.pop(0)
        w_ref = refs.pop(0)
        if have_pro:
            ps_ref = refs.pop(0)
            pt_ref = refs.pop(0)
        if have_bias:
            b_ref = refs.pop(0)
        if have_bn:
            s_ref = refs.pop(0)
            t_ref = refs.pop(0)
        o_ref = refs.pop(0)

        av = a_ref[...]
        if have_pro:                                   # BN1 + ReLU on the input columns
            av = jnp.maximum(av.astype(jnp.float32) * ps_ref[...] + pt_ref[...], 0.0)
            av = av.astype(jnp.bfloat16)
        acc = jnp.dot(av, w_ref[...], preferred_element_type=jnp.float32)
        if have_bias:                                  # folded (a * (conv bias + BN shift))
            acc = acc + b_ref[...]
        if have_bn:                                    # BN2 + ReLU
            acc = jnp.maximum(acc * s_ref[...] + t_ref[...], 0.0)
        o_ref[...] = acc.astype(o_ref.dtype)

    bpe = jnp.dtype(out_dtype).itemsize
    cost = pl.CostEstimate(
        flops=2 * Mp * Kp * Np,
        transcendentals=0,
        bytes_accessed=Mp * Kp * 2 + Kp * Np * 2 + Mp * Np * bpe)

    return pl.pallas_call(
        kernel,
        out_shape=jax.ShapeDtypeStruct((Mp, Np), out_dtype),
        grid_spec=pltpu.PrefetchScalarGridSpec(
            num_scalar_prefetch=0,
            grid=(Mp // tm,),
            in_specs=in_specs,
            out_specs=pl.BlockSpec((tm, Np), lambda i: (i, 0)),
        ),
        compiler_params=pltpu.CompilerParams(
            dimension_semantics=("parallel",),
            vmem_limit_bytes=32 * 1024 * 1024),
        cost_estimate=cost,
    )(*operands)


# ----------------------------------------------------------------------------
# Fused network tail: whole last residual block (padding=0, 1x1 output) + head
# ----------------------------------------------------------------------------
def rb4_tail(a, tp):
    """out = sigmoid((a*BN(conv_ds(x)+b) + b*conv2(relu(bn2(conv1x1(relu(bn1(x))))))) @ Wh + bh)

    Valid because the last block has padding=0 and a single output pixel: its conv2/ds
    patches are just the flattened (kh, kw, c) activation grid, and the pointwise branch
    prologue commutes with that flattening (no padded positions), so the 1x1 conv becomes
    a block-diagonal matmul (w1_bd) on the same patch slab.  One grid=(1,) kernel.
    """
    M, K = a.shape
    Mp = _round_up(M, 8)
    if Mp != M:
        a = jnp.pad(a, ((0, Mp - M), (0, 0)))
    a = a.astype(jnp.bfloat16)

    Kp, Np = tp["w_ds"].shape
    assert Kp == K and tp["w1_bd"].shape == (K, K)
    Nh = tp["head_w"].shape[1]

    def kernel(a_ref, wds_ref, bds_ref, s1_ref, t1_ref, w1_ref, s2_ref, t2_ref,
               w2_ref, hw_ref, hb_ref, o_ref):
        av = a_ref[...]
        # residual path (a, conv bias and BN folded into wds/bds)
        res = jnp.dot(av, wds_ref[...], preferred_element_type=jnp.float32) + bds_ref[...]
        # branch path: BN1+ReLU -> 1x1 conv (block-diag) -> BN2+ReLU -> conv2 (b folded)
        h = jnp.maximum(av.astype(jnp.float32) * s1_ref[...] + t1_ref[...], 0.0)
        h = jnp.dot(h.astype(jnp.bfloat16), w1_ref[...], preferred_element_type=jnp.float32)
        h = jnp.maximum(h * s2_ref[...] + t2_ref[...], 0.0)
        br = jnp.dot(h.astype(jnp.bfloat16), w2_ref[...], preferred_element_type=jnp.float32)
        feat = res + br                                # = a*residual + b*branch  (B, 5*D)
        # classifier head: Linear + Sigmoid            (nn.Dropout is identity in eval)
        logits = jnp.dot(feat.astype(jnp.bfloat16), hw_ref[...],
                         preferred_element_type=jnp.float32) + hb_ref[...]
        o_ref[...] = 1.0 / (1.0 + jnp.exp(-logits))

    operands = [a, tp["w_ds"], tp["b_ds"], tp["s1"], tp["t1"], tp["w1_bd"],
                tp["s2"], tp["t2"], tp["w2"], tp["head_w"], tp["head_b"]]
    in_specs = [pl.BlockSpec(op.shape, lambda i: (0, 0)) for op in operands]

    cost = pl.CostEstimate(
        flops=2 * Mp * (K * Np + K * K + K * Np + Np * Nh),
        transcendentals=Mp * Nh,
        bytes_accessed=int(sum(op.size * op.dtype.itemsize for op in operands)
                           + Mp * Nh * 4))

    return pl.pallas_call(
        kernel,
        out_shape=jax.ShapeDtypeStruct((Mp, Nh), jnp.float32),
        grid_spec=pltpu.PrefetchScalarGridSpec(
            num_scalar_prefetch=0,
            grid=(1,),
            in_specs=in_specs,
            out_specs=pl.BlockSpec((Mp, Nh), lambda i: (0, 0)),
        ),
        compiler_params=pltpu.CompilerParams(
            dimension_semantics=("arbitrary",),
            vmem_limit_bytes=32 * 1024 * 1024),
        cost_estimate=cost,
    )(*operands)


# ----------------------------------------------------------------------------
# im2col glue (data movement only; all FLOPs run inside the Pallas kernels)
# ----------------------------------------------------------------------------
def _im2col(x_nhwc, kh_sz, kw_sz, stride, padding):
    B, H, W, C = x_nhwc.shape
    x_bf = x_nhwc.astype(jnp.bfloat16)                 # cast early: halves concat traffic
    xp = jnp.pad(x_bf, ((0, 0), (padding, padding), (padding, padding), (0, 0)))
    OH = (H + 2 * padding - kh_sz) // stride + 1
    OW = (W + 2 * padding - kw_sz) // stride + 1
    cols = []
    for kh in range(kh_sz):
        for kw in range(kw_sz):
            cols.append(xp[:, kh: kh + stride * OH: stride,
                           kw: kw + stride * OW: stride, :])
    patches = jnp.concatenate(cols, axis=-1).reshape(B * OH * OW, kh_sz * kw_sz * C)
    return patches, (B, OH, OW)


# ----------------------------------------------------------------------------
# FeatureExtractorImg + ClfImg forward (eval mode)
# ----------------------------------------------------------------------------
def _res_block(x, bp, *, ksize, stride, padding, cout):
    """mmvae_hub ResidualBlock2dConv (eval; Dropout2d = identity), two fused kernels:
       K1: BN1+ReLU -> 1x1 conv -> BN2+ReLU     (prologue/epilogue fused in one matmul)
       K2: a*[ds conv -> BN] + b*[conv2]        (single matmul over the K-concatenated
           im2col of [x | h1] with stacked pre-scaled weights; residual combine is free)
    """
    B, H, W, cin = x.shape

    h1 = fused_matmul(x.reshape(B * H * W, cin), bp["w1"],
                      prologue_st=(bp["s1"], bp["t1"]),
                      bn_relu_st=(bp["s2"], bp["t2"]))
    h1 = h1[:B * H * W, :cin].reshape(B, H, W, cin)

    xh = jnp.concatenate([x.astype(jnp.bfloat16), h1], axis=-1)      # channel concat
    patches, (_, OH, OW) = _im2col(xh, ksize, ksize, stride, padding)
    out = fused_matmul(patches, bp["w_stack"], bias=bp["b_stack"])
    M = B * OH * OW
    return out[:M, :cout].reshape(B, OH, OW, cout)


def clf_img_forward(x_nchw, pp, *, dim_img=16, num_classes=40):
    D = dim_img
    x = jnp.transpose(x_nchw, (0, 2, 3, 1)).astype(jnp.float32)       # NCHW -> NHWC
    B = x.shape[0]

    # FeatureExtractorImg.conv1: k3 s2 p2, no bias, no activation.
    p0, (_, OH, OW) = _im2col(x, 3, 3, 2, 2)
    h = fused_matmul(p0, pp["w0"])[:B * OH * OW, :D].reshape(B, OH, OW, D)

    h = _res_block(h, pp["rb1"], ksize=4, stride=2, padding=1, cout=2 * D)
    h = _res_block(h, pp["rb2"], ksize=4, stride=2, padding=1, cout=3 * D)
    h = _res_block(h, pp["rb3"], ksize=4, stride=2, padding=1, cout=4 * D)

    # Last block (k4 s2 p0 -> 1x1 output) + Dropout(identity) + Linear + Sigmoid: 1 kernel.
    Bh, Hh, Wh, Ch = h.shape
    assert Hh == 4 and Wh == 4, (Hh, Wh)   # rb4 window must cover the full grid (64x64 in)
    out = rb4_tail(h.reshape(Bh, Hh * Wh * Ch), pp["rb4"])
    return out[:B, :num_classes]                                       # (B, 40)


# ----------------------------------------------------------------------------
# Parameter initialisation (torch layout) and one-time packing (bf16, BN folded)
# ----------------------------------------------------------------------------
def init_params(key, image_channels=3, dim_img=16):
    D = dim_img
    keys = iter(jax.random.split(key, 80))

    def conv_w(cout, cin, k):
        return 0.03 * jax.random.normal(next(keys), (cout, cin, k, k), jnp.float32)

    def bn(c):  # (gamma, beta, running_mean, running_var) -- non-trivial, exercises folding
        return (1.0 + 0.05 * jax.random.normal(next(keys), (c,), jnp.float32),
                0.05 * jax.random.normal(next(keys), (c,), jnp.float32),
                0.05 * jax.random.normal(next(keys), (c,), jnp.float32),
                1.0 + 0.05 * jnp.abs(jax.random.normal(next(keys), (c,), jnp.float32)))

    def rb(cin, cout, k):
        return dict(bn1=bn(cin), conv1_w=conv_w(cin, cin, 1), bn2=bn(cin),
                    conv2_w=conv_w(cout, cin, k),
                    ds_w=conv_w(cout, cin, k),
                    ds_b=0.03 * jax.random.normal(next(keys), (cout,), jnp.float32),
                    ds_bn=bn(cout))

    return dict(conv1_w=conv_w(D, image_channels, 3),
                rb1=rb(D, 2 * D, 4), rb2=rb(2 * D, 3 * D, 4),
                rb3=rb(3 * D, 4 * D, 4), rb4=rb(4 * D, 5 * D, 4),
                lin_w=0.03 * jax.random.normal(next(keys), (40, 5 * D), jnp.float32),
                lin_b=0.03 * jax.random.normal(next(keys), (40,), jnp.float32))


def prepare_params(raw, a=2.0, b=0.3, eps=1e-5):
    """One-time pre-packing: transpose, fold eval BN + a/b scales, pad N->128 / K->mult-8."""
    def bn_st(p):
        gamma, beta, mean, var = p
        s = gamma / jnp.sqrt(var + eps)
        return s, beta - mean * s

    def row(v, n=128):
        v = jnp.asarray(v, jnp.float32)
        return jnp.zeros((1, n), jnp.float32).at[0, :v.shape[0]].set(v)

    def pack(w, col_scale=None, scale=1.0):
        cout, cin, kh, kw = w.shape
        K = kh * kw * cin
        wm = jnp.transpose(w, (2, 3, 1, 0)).reshape(K, cout).astype(jnp.float32)
        if col_scale is not None:
            wm = wm * col_scale[None, :]
        wm = wm * scale
        Kp, Np = _round_up(K, 8), _round_up(cout, 128)
        return jnp.zeros((Kp, Np), jnp.float32).at[:K, :cout].set(wm).astype(jnp.bfloat16)

    def prep_block(p):
        s1, t1 = bn_st(p["bn1"])
        s2, t2 = bn_st(p["bn2"])
        sd, td = bn_st(p["ds_bn"])
        # a*BN(conv_ds(x)+b_ds) + b*conv2(h1)
        #   = im2col([x | h1]) @ stack(a*sd*Wds, b*W2) + a*(sd*b_ds + td)
        w_stack = jnp.concatenate(
            [a * p["ds_w"] * sd[:, None, None, None], b * p["conv2_w"]], axis=1)
        return dict(
            w1=pack(p["conv1_w"]),
            s1=s1.reshape(1, -1).astype(jnp.float32),
            t1=t1.reshape(1, -1).astype(jnp.float32),
            s2=row(s2), t2=row(t2),
            w_stack=pack(w_stack),
            b_stack=row(a * (p["ds_b"] * sd + td)),
        )

    def prep_tail(p, lin_w, lin_b, ksize=4):
        s1, t1 = bn_st(p["bn1"])
        s2, t2 = bn_st(p["bn2"])
        sd, td = bn_st(p["ds_bn"])
        cin = p["conv1_w"].shape[0]
        slots = ksize * ksize
        # block-diagonal 1x1-conv weight over the (slot, channel) patch columns
        w1m = jnp.transpose(p["conv1_w"][:, :, 0, 0], (1, 0)).astype(jnp.float32)
        bd = jnp.zeros((slots * cin, slots * cin), jnp.float32)
        for s in range(slots):
            bd = bd.at[s * cin:(s + 1) * cin, s * cin:(s + 1) * cin].set(w1m)
        n_in, n_out = lin_w.shape[1], lin_w.shape[0]
        hw = jnp.zeros((_round_up(n_in, 128), _round_up(n_out, 128)), jnp.float32)
        hw = hw.at[:n_in, :n_out].set(lin_w.T.astype(jnp.float32))
        return dict(
            w_ds=pack(p["ds_w"], col_scale=sd, scale=a),
            b_ds=row(a * (p["ds_b"] * sd + td)),
            s1=jnp.tile(s1, slots).reshape(1, -1).astype(jnp.float32),
            t1=jnp.tile(t1, slots).reshape(1, -1).astype(jnp.float32),
            w1_bd=bd.astype(jnp.bfloat16),
            s2=jnp.tile(s2, slots).reshape(1, -1).astype(jnp.float32),
            t2=jnp.tile(t2, slots).reshape(1, -1).astype(jnp.float32),
            w2=pack(p["conv2_w"], scale=b),
            head_w=hw.astype(jnp.bfloat16),
            head_b=row(lin_b, _round_up(n_out, 128)),
        )

    return dict(w0=pack(raw["conv1_w"]),
                rb1=prep_block(raw["rb1"]), rb2=prep_block(raw["rb2"]),
                rb3=prep_block(raw["rb3"]),
                rb4=prep_tail(raw["rb4"], raw["lin_w"], raw["lin_b"]))


# ----------------------------------------------------------------------------
# Pure-JAX f32 reference (independent lax.conv path) for correctness checking
# ----------------------------------------------------------------------------
def _conv_ref(x_nhwc, w_torch, bias, stride, padding):
    w_hwio = jnp.transpose(w_torch, (2, 3, 1, 0))
    out = jax.lax.conv_general_dilated(
        x_nhwc, w_hwio, window_strides=(stride, stride),
        padding=[(padding, padding), (padding, padding)],
        dimension_numbers=("NHWC", "HWIO", "NHWC"))
    if bias is not None:
        out = out + bias
    return out


def clf_img_reference(x_nchw, raw, a=2.0, b=0.3, eps=1e-5):
    def bn(h, p):
        gamma, beta, mean, var = p
        return (h - mean) / jnp.sqrt(var + eps) * gamma + beta

    def block(h, p, stride, padding):
        residual = bn(_conv_ref(h, p["ds_w"], p["ds_b"], stride, padding), p["ds_bn"])
        out = jax.nn.relu(bn(h, p["bn1"]))
        out = _conv_ref(out, p["conv1_w"], None, 1, 0)
        out = jax.nn.relu(bn(out, p["bn2"]))
        out = _conv_ref(out, p["conv2_w"], None, stride, padding)
        return a * residual + b * out

    x = jnp.transpose(x_nchw, (0, 2, 3, 1)).astype(jnp.float32)
    h = _conv_ref(x, raw["conv1_w"], None, 2, 2)
    h = block(h, raw["rb1"], 2, 1)
    h = block(h, raw["rb2"], 2, 1)
    h = block(h, raw["rb3"], 2, 1)
    h = block(h, raw["rb4"], 2, 0)
    h = h.reshape(h.shape[0], -1)
    return jax.nn.sigmoid(h @ raw["lin_w"].T + raw["lin_b"])


# ----------------------------------------------------------------------------
if __name__ == "__main__":
    key = jax.random.PRNGKey(0)
    kx, kp = jax.random.split(key)

    # flags: image_channels=3, DIM_img=16, num_layers_img=5; 64x64 CelebA images
    B, C, H, W = 2, 3, 64, 64
    x = jax.random.normal(kx, (B, C, H, W), jnp.float32)
    raw = init_params(kp, image_channels=C, dim_img=16)
    packed = prepare_params(raw)             # one-time weight packing (outside jit)

    fwd = jax.jit(clf_img_forward)
    out = jax.block_until_ready(fwd(x, packed))

    ref = jax.block_until_ready(jax.jit(clf_img_reference)(x, raw))

    assert out.shape == (B, 40), out.shape
    assert bool(jnp.all(jnp.isfinite(out)))
    assert bool(jnp.all((out >= 0.0) & (out <= 1.0)))        # sigmoid range
    max_err = float(jnp.max(jnp.abs(out - ref)))
    assert max_err < 3e-2, f"max abs err vs f32 reference: {max_err}"
    print("KERNEL_OK")
</pallas_src>

<mosaic_0001>
module attributes {stable_mosaic.version = 11 : i64} {
  func.func @kernel(%arg0: i32, %arg1: memref<512x32xbf16, #tpu.memory_space<vmem>>, %arg2: memref<32x128xbf16, #tpu.memory_space<vmem>>, %arg3: memref<512x128xbf16, #tpu.memory_space<vmem>>) attributes {dimension_semantics = [#tpu.dimension_semantics<parallel>], iteration_bounds = array<i64: 5>, scalar_prefetch = 0 : i64, scratch_operands = 0 : i64, tpu.core_type = #tpu.core_type<tc>, window_params = [{transform_indices = @transform_0, window_bounds = array<i64: 512, 32>}, {pipeline_mode = #tpu.pipeline_mode<synchronous>, transform_indices = @transform_1, window_bounds = array<i64: 32, 128>}, {transform_indices = @transform_2, window_bounds = array<i64: 512, 128>}]} {
    %c0 = arith.constant 0 : index
    %c0_0 = arith.constant 0 : index
    %0 = vector.load %arg1[%c0, %c0_0] : memref<512x32xbf16, #tpu.memory_space<vmem>>, vector<512x32xbf16>
    %c0_1 = arith.constant 0 : index
    %c0_2 = arith.constant 0 : index
    %1 = vector.load %arg2[%c0_1, %c0_2] : memref<32x128xbf16, #tpu.memory_space<vmem>>, vector<32x128xbf16>
    %cst = arith.constant dense<0.000000e+00> : vector<512x128xf32>
    %2 = tpu.matmul %0, %1, %cst {dimension_numbers = #tpu.dot_dimension_numbers<[1], [0], [0], [1], [0, 0, 1, 1], [], []>} : vector<512x32xbf16>, vector<32x128xbf16>, vector<512x128xf32> -> vector<512x128xf32>
    %3 = arith.truncf %2 : vector<512x128xf32> to vector<512x128xbf16>
    %c0_3 = arith.constant 0 : index
    %c0_4 = arith.constant 0 : index
    %4 = vector.load %arg3[%c0_3, %c0_4] : memref<512x128xbf16, #tpu.memory_space<vmem>>, vector<512x128xbf16>
    tpu.vector_store %arg3[%c0_3, %c0_4], %3 {strides = array<i32>} : memref<512x128xbf16, #tpu.memory_space<vmem>>, vector<512x128xbf16>,
    return
  }
  func.func @transform_0(%arg0: i32) -> (i32, i32) {
    %c0_i32 = arith.constant 0 : i32
    %c0_i32_0 = arith.constant 0 : i32
    return %arg0, %c0_i32 : i32, i32
  }
  func.func @transform_1(%arg0: i32) -> (i32, i32) {
    %c0_i32 = arith.constant 0 : i32
    %c0_i32_0 = arith.constant 0 : i32
    %c0_i32_1 = arith.constant 0 : i32
    return %c0_i32, %c0_i32_0 : i32, i32
  }
  func.func @transform_2(%arg0: i32) -> (i32, i32) {
    %c0_i32 = arith.constant 0 : i32
    %c0_i32_0 = arith.constant 0 : i32
    return %arg0, %c0_i32 : i32, i32
  }
}

module attributes {stable_mosaic.version = 11 : i64} {
  func.func @kernel(%arg0: i32, %arg1: memref<512x16xbf16, #tpu.memory_space<vmem>>, %arg2: memref<16x128xbf16, #tpu.memory_space<vmem>>, %arg3: memref<1x16xf32, #tpu.memory_space<vmem>>, %arg4: memref<1x16xf32, #tpu.memory_space<vmem>>, %arg5: memref<1x128xf32, #tpu.memory_space<vmem>>, %arg6: memref<1x128xf32, #tpu.memory_space<vmem>>, %arg7: memref<512x128xbf16, #tpu.memory_space<vmem>>) attributes {dimension_semantics = [#tpu.dimension_semantics<parallel>], iteration_bounds = array<i64: 5>, scalar_prefetch = 0 : i64, scratch_operands = 0 : i64, tpu.core_type = #tpu.core_type<tc>, window_params = [{transform_indices = @transform_0, window_bounds = array<i64: 512, 16>}, {pipeline_mode = #tpu.pipeline_mode<synchronous>, transform_indices = @transform_1, window_bounds = array<i64: 16, 128>}, {pipeline_mode = #tpu.pipeline_mode<synchronous>, transform_indices = @transform_2, window_bounds = array<i64: 1, 16>}, {pipeline_mode = #tpu.pipeline_mode<synchronous>, transform_indices = @transform_3, window_bounds = array<i64: 1, 16>}, {pipeline_mode = #tpu.pipeline_mode<synchronous>, transform_indices = @transform_4, window_bounds = array<i64: 1, 128>}, {pipeline_mode = #tpu.pipeline_mode<synchronous>, transform_indices = @transform_5, window_bounds = array<i64: 1, 128>}, {transform_indices = @transform_6, window_bounds = array<i64: 512, 128>}]} {
    %c0 = arith.constant 0 : index
    %c0_0 = arith.constant 0 : index
    %0 = vector.load %arg1[%c0, %c0_0] : memref<512x16xbf16, #tpu.memory_space<vmem>>, vector<512x16xbf16>
    %1 = arith.extf %0 : vector<512x16xbf16> to vector<512x16xf32>
    %c0_1 = arith.constant 0 : index
    %c0_2 = arith.constant 0 : index
    %2 = vector.load %arg3[%c0_1, %c0_2] : memref<1x16xf32, #tpu.memory_space<vmem>>, vector<1x16xf32>
    %3 = vector.broadcast %2 : vector<1x16xf32> to vector<512x16xf32>
    %4 = arith.mulf %1, %3 : vector<512x16xf32>
    %c0_3 = arith.constant 0 : index
    %c0_4 = arith.constant 0 : index
    %5 = vector.load %arg4[%c0_3, %c0_4] : memref<1x16xf32, #tpu.memory_space<vmem>>, vector<1x16xf32>
    %6 = vector.broadcast %5 : vector<1x16xf32> to vector<512x16xf32>
    %7 = arith.addf %4, %6 : vector<512x16xf32>
    %cst = arith.constant 0.000000e+00 : f32
    %8 = vector.broadcast %cst : f32 to vector<512x16xf32>
    %9 = arith.maximumf %7, %8 : vector<512x16xf32>
    %10 = arith.truncf %9 : vector<512x16xf32> to vector<512x16xbf16>
    %c0_5 = arith.constant 0 : index
    %c0_6 = arith.constant 0 : index
    %11 = vector.load %arg2[%c0_5, %c0_6] : memref<16x128xbf16, #tpu.memory_space<vmem>>, vector<16x128xbf16>
    %cst_7 = arith.constant dense<0.000000e+00> : vector<512x128xf32>
    %12 = tpu.matmul %10, %11, %cst_7 {dimension_numbers = #tpu.dot_dimension_numbers<[1], [0], [0], [1], [0, 0, 1, 1], [], []>} : vector<512x16xbf16>, vector<16x128xbf16>, vector<512x128xf32> -> vector<512x128xf32>
    %c0_8 = arith.constant 0 : index
    %c0_9 = arith.constant 0 : index
    %13 = vector.load %arg5[%c0_8, %c0_9] : memref<1x128xf32, #tpu.memory_space<vmem>>, vector<1x128xf32>
    %14 = vector.broadcast %13 : vector<1x128xf32> to vector<512x128xf32>
    %15 = arith.mulf %12, %14 : vector<512x128xf32>
    %c0_10 = arith.constant 0 : index
    %c0_11 = arith.constant 0 : index
    %16 = vector.load %arg6[%c0_10, %c0_11] : memref<1x128xf32, #tpu.memory_space<vmem>>, vector<1x128xf32>
    %17 = vector.broadcast %16 : vector<1x128xf32> to vector<512x128xf32>
    %18 = arith.addf %15, %17 : vector<512x128xf32>
    %cst_12 = arith.constant 0.000000e+00 : f32
    %19 = vector.broadcast %cst_12 : f32 to vector<512x128xf32>
    %20 = arith.maximumf %18, %19 : vector<512x128xf32>
    %21 = arith.truncf %20 : vector<512x128xf32> to vector<512x128xbf16>
    %c0_13 = arith.constant 0 : index
    %c0_14 = arith.constant 0 : index
    %22 = vector.load %arg7[%c0_13, %c0_14] : memref<512x128xbf16, #tpu.memory_space<vmem>>, vector<512x128xbf16>
    tpu.vector_store %arg7[%c0_13, %c0_14], %21 {strides = array<i32>} : memref<512x128xbf16, #tpu.memory_space<vmem>>, vector<512x128xbf16>,
    return
  }
  func.func @transform_0(%arg0: i32) -> (i32, i32) {
    %c0_i32 = arith.constant 0 : i32
    %c0_i32_0 = arith.constant 0 : i32
    return %arg0, %c0_i32 : i32, i32
  }
  func.func @transform_1(%arg0: i32) -> (i32, i32) {
    %c0_i32 = arith.constant 0 : i32
    %c0_i32_0 = arith.constant 0 : i32
    %c0_i32_1 = arith.constant 0 : i32
    return %c0_i32, %c0_i32_0 : i32, i32
  }
  func.func @transform_2(%arg0: i32) -> (i32, i32) {
    %c0_i32 = arith.constant 0 : i32
    %c0_i32_0 = arith.constant 0 : i32
    %c0_i32_1 = arith.constant 0 : i32
    return %c0_i32, %c0_i32_0 : i32, i32
  }
  func.func @transform_3(%arg0: i32) -> (i32, i32) {
    %c0_i32 = arith.constant 0 : i32
    %c0_i32_0 = arith.constant 0 : i32
    %c0_i32_1 = arith.constant 0 : i32
    return %c0_i32, %c0_i32_0 : i32, i32
  }
  func.func @transform_4(%arg0: i32) -> (i32, i32) {
    %c0_i32 = arith.constant 0 : i32
    %c0_i32_0 = arith.constant 0 : i32
    %c0_i32_1 = arith.constant 0 : i32
    return %c0_i32, %c0_i32_0 : i32, i32
  }
  func.func @transform_5(%arg0: i32) -> (i32, i32) {
    %c0_i32 = arith.constant 0 : i32
    %c0_i32_0 = arith.constant 0 : i32
    %c0_i32_1 = arith.constant 0 : i32
    return %c0_i32, %c0_i32_0 : i32, i32
  }
  func.func @transform_6(%arg0: i32) -> (i32, i32) {
    %c0_i32 = arith.constant 0 : i32
    %c0_i32_0 = arith.constant 0 : i32
    return %arg0, %c0_i32 : i32, i32
  }
}

module attributes {stable_mosaic.version = 11 : i64} {
  func.func @kernel(%arg0: i32, %arg1: memref<256x512xbf16, #tpu.memory_space<vmem>>, %arg2: memref<512x128xbf16, #tpu.memory_space<vmem>>, %arg3: memref<1x128xf32, #tpu.memory_space<vmem>>, %arg4: memref<256x128xbf16, #tpu.memory_space<vmem>>) attributes {dimension_semantics = [#tpu.dimension_semantics<parallel>], iteration_bounds = array<i64: 2>, scalar_prefetch = 0 : i64, scratch_operands = 0 : i64, tpu.core_type = #tpu.core_type<tc>, window_params = [{transform_indices = @transform_0, window_bounds = array<i64: 256, 512>}, {pipeline_mode = #tpu.pipeline_mode<synchronous>, transform_indices = @transform_1, window_bounds = array<i64: 512, 128>}, {pipeline_mode = #tpu.pipeline_mode<synchronous>, transform_indices = @transform_2, window_bounds = array<i64: 1, 128>}, {transform_indices = @transform_3, window_bounds = array<i64: 256, 128>}]} {
    %c0 = arith.constant 0 : index
    %c0_0 = arith.constant 0 : index
    %0 = vector.load %arg1[%c0, %c0_0] : memref<256x512xbf16, #tpu.memory_space<vmem>>, vector<256x512xbf16>
    %c0_1 = arith.constant 0 : index
    %c0_2 = arith.constant 0 : index
    %1 = vector.load %arg2[%c0_1, %c0_2] : memref<512x128xbf16, #tpu.memory_space<vmem>>, vector<512x128xbf16>
    %cst = arith.constant dense<0.000000e+00> : vector<256x128xf32>
    %2 = tpu.matmul %0, %1, %cst {dimension_numbers = #tpu.dot_dimension_numbers<[1], [0], [0], [1], [0, 0, 1, 1], [], []>} : vector<256x512xbf16>, vector<512x128xbf16>, vector<256x128xf32> -> vector<256x128xf32>
    %c0_3 = arith.constant 0 : index
    %c0_4 = arith.constant 0 : index
    %3 = vector.load %arg3[%c0_3, %c0_4] : memref<1x128xf32, #tpu.memory_space<vmem>>, vector<1x128xf32>
    %4 = vector.broadcast %3 : vector<1x128xf32> to vector<256x128xf32>
    %5 = arith.addf %2, %4 : vector<256x128xf32>
    %6 = arith.truncf %5 : vector<256x128xf32> to vector<256x128xbf16>
    %c0_5 = arith.constant 0 : index
    %c0_6 = arith.constant 0 : index
    %7 = vector.load %arg4[%c0_5, %c0_6] : memref<256x128xbf16, #tpu.memory_space<vmem>>, vector<256x128xbf16>
    tpu.vector_store %arg4[%c0_5, %c0_6], %6 {strides = array<i32>} : memref<256x128xbf16, #tpu.memory_space<vmem>>, vector<256x128xbf16>,
    return
  }
  func.func @transform_0(%arg0: i32) -> (i32, i32) {
    %c0_i32 = arith.constant 0 : i32
    %c0_i32_0 = arith.constant 0 : i32
    return %arg0, %c0_i32 : i32, i32
  }
  func.func @transform_1(%arg0: i32) -> (i32, i32) {
    %c0_i32 = arith.constant 0 : i32
    %c0_i32_0 = arith.constant 0 : i32
    %c0_i32_1 = arith.constant 0 : i32
    return %c0_i32, %c0_i32_0 : i32, i32
  }
  func.func @transform_2(%arg0: i32) -> (i32, i32) {
    %c0_i32 = arith.constant 0 : i32
    %c0_i32_0 = arith.constant 0 : i32
    %c0_i32_1 = arith.constant 0 : i32
    return %c0_i32, %c0_i32_0 : i32, i32
  }
  func.func @transform_3(%arg0: i32) -> (i32, i32) {
    %c0_i32 = arith.constant 0 : i32
    %c0_i32_0 = arith.constant 0 : i32
    return %arg0, %c0_i32 : i32, i32
  }
}

module attributes {stable_mosaic.version = 11 : i64} {
  func.func @kernel(%arg0: i32, %arg1: memref<256x32xbf16, #tpu.memory_space<vmem>>, %arg2: memref<32x128xbf16, #tpu.memory_space<vmem>>, %arg3: memref<1x32xf32, #tpu.memory_space<vmem>>, %arg4: memref<1x32xf32, #tpu.memory_space<vmem>>, %arg5: memref<1x128xf32, #tpu.memory_space<vmem>>, %arg6: memref<1x128xf32, #tpu.memory_space<vmem>>, %arg7: memref<256x128xbf16, #tpu.memory_space<vmem>>) attributes {dimension_semantics = [#tpu.dimension_semantics<parallel>], iteration_bounds = array<i64: 2>, scalar_prefetch = 0 : i64, scratch_operands = 0 : i64, tpu.core_type = #tpu.core_type<tc>, window_params = [{transform_indices = @transform_0, window_bounds = array<i64: 256, 32>}, {pipeline_mode = #tpu.pipeline_mode<synchronous>, transform_indices = @transform_1, window_bounds = array<i64: 32, 128>}, {pipeline_mode = #tpu.pipeline_mode<synchronous>, transform_indices = @transform_2, window_bounds = array<i64: 1, 32>}, {pipeline_mode = #tpu.pipeline_mode<synchronous>, transform_indices = @transform_3, window_bounds = array<i64: 1, 32>}, {pipeline_mode = #tpu.pipeline_mode<synchronous>, transform_indices = @transform_4, window_bounds = array<i64: 1, 128>}, {pipeline_mode = #tpu.pipeline_mode<synchronous>, transform_indices = @transform_5, window_bounds = array<i64: 1, 128>}, {transform_indices = @transform_6, window_bounds = array<i64: 256, 128>}]} {
    %c0 = arith.constant 0 : index
    %c0_0 = arith.constant 0 : index
    %0 = vector.load %arg1[%c0, %c0_0] : memref<256x32xbf16, #tpu.memory_space<vmem>>, vector<256x32xbf16>
    %1 = arith.extf %0 : vector<256x32xbf16> to vector<256x32xf32>
    %c0_1 = arith.constant 0 : index
    %c0_2 = arith.constant 0 : index
    %2 = vector.load %arg3[%c0_1, %c0_2] : memref<1x32xf32, #tpu.memory_space<vmem>>, vector<1x32xf32>
    %3 = vector.broadcast %2 : vector<1x32xf32> to vector<256x32xf32>
    %4 = arith.mulf %1, %3 : vector<256x32xf32>
    %c0_3 = arith.constant 0 : index
    %c0_4 = arith.constant 0 : index
    %5 = vector.load %arg4[%c0_3, %c0_4] : memref<1x32xf32, #tpu.memory_space<vmem>>, vector<1x32xf32>
    %6 = vector.broadcast %5 : vector<1x32xf32> to vector<256x32xf32>
    %7 = arith.addf %4, %6 : vector<256x32xf32>
    %cst = arith.constant 0.000000e+00 : f32
    %8 = vector.broadcast %cst : f32 to vector<256x32xf32>
    %9 = arith.maximumf %7, %8 : vector<256x32xf32>
    %10 = arith.truncf %9 : vector<256x32xf32> to vector<256x32xbf16>
    %c0_5 = arith.constant 0 : index
    %c0_6 = arith.constant 0 : index
    %11 = vector.load %arg2[%c0_5, %c0_6] : memref<32x128xbf16, #tpu.memory_space<vmem>>, vector<32x128xbf16>
    %cst_7 = arith.constant dense<0.000000e+00> : vector<256x128xf32>
    %12 = tpu.matmul %10, %11, %cst_7 {dimension_numbers = #tpu.dot_dimension_numbers<[1], [0], [0], [1], [0, 0, 1, 1], [], []>} : vector<256x32xbf16>, vector<32x128xbf16>, vector<256x128xf32> -> vector<256x128xf32>
    %c0_8 = arith.constant 0 : index
    %c0_9 = arith.constant 0 : index
    %13 = vector.load %arg5[%c0_8, %c0_9] : memref<1x128xf32, #tpu.memory_space<vmem>>, vector<1x128xf32>
    %14 = vector.broadcast %13 : vector<1x128xf32> to vector<256x128xf32>
    %15 = arith.mulf %12, %14 : vector<256x128xf32>
    %c0_10 = arith.constant 0 : index
    %c0_11 = arith.constant 0 : index
    %16 = vector.load %arg6[%c0_10, %c0_11] : memref<1x128xf32, #tpu.memory_space<vmem>>, vector<1x128xf32>
    %17 = vector.broadcast %16 : vector<1x128xf32> to vector<256x128xf32>
    %18 = arith.addf %15, %17 : vector<256x128xf32>
    %cst_12 = arith.constant 0.000000e+00 : f32
    %19 = vector.broadcast %cst_12 : f32 to vector<256x128xf32>
    %20 = arith.maximumf %18, %19 : vector<256x128xf32>
    %21 = arith.truncf %20 : vector<256x128xf32> to vector<256x128xbf16>
    %c0_13 = arith.constant 0 : index
    %c0_14 = arith.constant 0 : index
    %22 = vector.load %arg7[%c0_13, %c0_14] : memref<256x128xbf16, #tpu.memory_space<vmem>>, vector<256x128xbf16>
    tpu.vector_store %arg7[%c0_13, %c0_14], %21 {strides = array<i32>} : memref<256x128xbf16, #tpu.memory_space<vmem>>, vector<256x128xbf16>,
    return
  }
  func.func @transform_0(%arg0: i32) -> (i32, i32) {
    %c0_i32 = arith.constant 0 : i32
    %c0_i32_0 = arith.constant 0 : i32
    return %arg0, %c0_i32 : i32, i32
  }
  func.func @transform_1(%arg0: i32) -> (i32, i32) {
    %c0_i32 = arith.constant 0 : i32
    %c0_i32_0 = arith.constant 0 : i32
    %c0_i32_1 = arith.constant 0 : i32
    return %c0_i32, %c0_i32_0 : i32, i32
  }
  func.func @transform_2(%arg0: i32) -> (i32, i32) {
    %c0_i32 = arith.constant 0 : i32
    %c0_i32_0 = arith.constant 0 : i32
    %c0_i32_1 = arith.constant 0 : i32
    return %c0_i32, %c0_i32_0 : i32, i32
  }
  func.func @transform_3(%arg0: i32) -> (i32, i32) {
    %c0_i32 = arith.constant 0 : i32
    %c0_i32_0 = arith.constant 0 : i32
    %c0_i32_1 = arith.constant 0 : i32
    return %c0_i32, %c0_i32_0 : i32, i32
  }
  func.func @transform_4(%arg0: i32) -> (i32, i32) {
    %c0_i32 = arith.constant 0 : i32
    %c0_i32_0 = arith.constant 0 : i32
    %c0_i32_1 = arith.constant 0 : i32
    return %c0_i32, %c0_i32_0 : i32, i32
  }
  func.func @transform_5(%arg0: i32) -> (i32, i32) {
    %c0_i32 = arith.constant 0 : i32
    %c0_i32_0 = arith.constant 0 : i32
    %c0_i32_1 = arith.constant 0 : i32
    return %c0_i32, %c0_i32_0 : i32, i32
  }
  func.func @transform_6(%arg0: i32) -> (i32, i32) {
    %c0_i32 = arith.constant 0 : i32
    %c0_i32_0 = arith.constant 0 : i32
    return %arg0, %c0_i32 : i32, i32
  }
}

module attributes {stable_mosaic.version = 11 : i64} {
  func.func @kernel(%arg0: i32, %arg1: memref<64x1024xbf16, #tpu.memory_space<vmem>>, %arg2: memref<1024x128xbf16, #tpu.memory_space<vmem>>, %arg3: memref<1x128xf32, #tpu.memory_space<vmem>>, %arg4: memref<64x128xbf16, #tpu.memory_space<vmem>>) attributes {dimension_semantics = [#tpu.dimension_semantics<parallel>], iteration_bounds = array<i64: 2>, scalar_prefetch = 0 : i64, scratch_operands = 0 : i64, tpu.core_type = #tpu.core_type<tc>, window_params = [{transform_indices = @transform_0, window_bounds = array<i64: 64, 1024>}, {pipeline_mode = #tpu.pipeline_mode<synchronous>, transform_indices = @transform_1, window_bounds = array<i64: 1024, 128>}, {pipeline_mode = #tpu.pipeline_mode<synchronous>, transform_indices = @transform_2, window_bounds = array<i64: 1, 128>}, {transform_indices = @transform_3, window_bounds = array<i64: 64, 128>}]} {
    %c0 = arith.constant 0 : index
    %c0_0 = arith.constant 0 : index
    %0 = vector.load %arg1[%c0, %c0_0] : memref<64x1024xbf16, #tpu.memory_space<vmem>>, vector<64x1024xbf16>
    %c0_1 = arith.constant 0 : index
    %c0_2 = arith.constant 0 : index
    %1 = vector.load %arg2[%c0_1, %c0_2] : memref<1024x128xbf16, #tpu.memory_space<vmem>>, vector<1024x128xbf16>
    %cst = arith.constant dense<0.000000e+00> : vector<64x128xf32>
    %2 = tpu.matmul %0, %1, %cst {dimension_numbers = #tpu.dot_dimension_numbers<[1], [0], [0], [1], [0, 0, 1, 1], [], []>} : vector<64x1024xbf16>, vector<1024x128xbf16>, vector<64x128xf32> -> vector<64x128xf32>
    %c0_3 = arith.constant 0 : index
    %c0_4 = arith.constant 0 : index
    %3 = vector.load %arg3[%c0_3, %c0_4] : memref<1x128xf32, #tpu.memory_space<vmem>>, vector<1x128xf32>
    %4 = vector.broadcast %3 : vector<1x128xf32> to vector<64x128xf32>
    %5 = arith.addf %2, %4 : vector<64x128xf32>
    %6 = arith.truncf %5 : vector<64x128xf32> to vector<64x128xbf16>
    %c0_5 = arith.constant 0 : index
    %c0_6 = arith.constant 0 : index
    %7 = vector.load %arg4[%c0_5, %c0_6] : memref<64x128xbf16, #tpu.memory_space<vmem>>, vector<64x128xbf16>
    tpu.vector_store %arg4[%c0_5, %c0_6], %6 {strides = array<i32>} : memref<64x128xbf16, #tpu.memory_space<vmem>>, vector<64x128xbf16>,
    return
  }
  func.func @transform_0(%arg0: i32) -> (i32, i32) {
    %c0_i32 = arith.constant 0 : i32
    %c0_i32_0 = arith.constant 0 : i32
    return %arg0, %c0_i32 : i32, i32
  }
  func.func @transform_1(%arg0: i32) -> (i32, i32) {
    %c0_i32 = arith.constant 0 : i32
    %c0_i32_0 = arith.constant 0 : i32
    %c0_i32_1 = arith.constant 0 : i32
    return %c0_i32, %c0_i32_0 : i32, i32
  }
  func.func @transform_2(%arg0: i32) -> (i32, i32) {
    %c0_i32 = arith.constant 0 : i32
    %c0_i32_0 = arith.constant 0 : i32
    %c0_i32_1 = arith.constant 0 : i32
    return %c0_i32, %c0_i32_0 : i32, i32
  }
  func.func @transform_3(%arg0: i32) -> (i32, i32) {
    %c0_i32 = arith.constant 0 : i32
    %c0_i32_0 = arith.constant 0 : i32
    return %arg0, %c0_i32 : i32, i32
  }
}

module attributes {stable_mosaic.version = 11 : i64} {
  func.func @kernel(%arg0: i32, %arg1: memref<64x48xbf16, #tpu.memory_space<vmem>>, %arg2: memref<48x128xbf16, #tpu.memory_space<vmem>>, %arg3: memref<1x48xf32, #tpu.memory_space<vmem>>, %arg4: memref<1x48xf32, #tpu.memory_space<vmem>>, %arg5: memref<1x128xf32, #tpu.memory_space<vmem>>, %arg6: memref<1x128xf32, #tpu.memory_space<vmem>>, %arg7: memref<64x128xbf16, #tpu.memory_space<vmem>>) attributes {dimension_semantics = [#tpu.dimension_semantics<parallel>], iteration_bounds = array<i64: 2>, scalar_prefetch = 0 : i64, scratch_operands = 0 : i64, tpu.core_type = #tpu.core_type<tc>, window_params = [{transform_indices = @transform_0, window_bounds = array<i64: 64, 48>}, {pipeline_mode = #tpu.pipeline_mode<synchronous>, transform_indices = @transform_1, window_bounds = array<i64: 48, 128>}, {pipeline_mode = #tpu.pipeline_mode<synchronous>, transform_indices = @transform_2, window_bounds = array<i64: 1, 48>}, {pipeline_mode = #tpu.pipeline_mode<synchronous>, transform_indices = @transform_3, window_bounds = array<i64: 1, 48>}, {pipeline_mode = #tpu.pipeline_mode<synchronous>, transform_indices = @transform_4, window_bounds = array<i64: 1, 128>}, {pipeline_mode = #tpu.pipeline_mode<synchronous>, transform_indices = @transform_5, window_bounds = array<i64: 1, 128>}, {transform_indices = @transform_6, window_bounds = array<i64: 64, 128>}]} {
    %c0 = arith.constant 0 : index
    %c0_0 = arith.constant 0 : index
    %0 = vector.load %arg1[%c0, %c0_0] : memref<64x48xbf16, #tpu.memory_space<vmem>>, vector<64x48xbf16>
    %1 = arith.extf %0 : vector<64x48xbf16> to vector<64x48xf32>
    %c0_1 = arith.constant 0 : index
    %c0_2 = arith.constant 0 : index
    %2 = vector.load %arg3[%c0_1, %c0_2] : memref<1x48xf32, #tpu.memory_space<vmem>>, vector<1x48xf32>
    %3 = vector.broadcast %2 : vector<1x48xf32> to vector<64x48xf32>
    %4 = arith.mulf %1, %3 : vector<64x48xf32>
    %c0_3 = arith.constant 0 : index
    %c0_4 = arith.constant 0 : index
    %5 = vector.load %arg4[%c0_3, %c0_4] : memref<1x48xf32, #tpu.memory_space<vmem>>, vector<1x48xf32>
    %6 = vector.broadcast %5 : vector<1x48xf32> to vector<64x48xf32>
    %7 = arith.addf %4, %6 : vector<64x48xf32>
    %cst = arith.constant 0.000000e+00 : f32
    %8 = vector.broadcast %cst : f32 to vector<64x48xf32>
    %9 = arith.maximumf %7, %8 : vector<64x48xf32>
    %10 = arith.truncf %9 : vector<64x48xf32> to vector<64x48xbf16>
    %c0_5 = arith.constant 0 : index
    %c0_6 = arith.constant 0 : index
    %11 = vector.load %arg2[%c0_5, %c0_6] : memref<48x128xbf16, #tpu.memory_space<vmem>>, vector<48x128xbf16>
    %cst_7 = arith.constant dense<0.000000e+00> : vector<64x128xf32>
    %12 = tpu.matmul %10, %11, %cst_7 {dimension_numbers = #tpu.dot_dimension_numbers<[1], [0], [0], [1], [0, 0, 1, 1], [], []>} : vector<64x48xbf16>, vector<48x128xbf16>, vector<64x128xf32> -> vector<64x128xf32>
    %c0_8 = arith.constant 0 : index
    %c0_9 = arith.constant 0 : index
    %13 = vector.load %arg5[%c0_8, %c0_9] : memref<1x128xf32, #tpu.memory_space<vmem>>, vector<1x128xf32>
    %14 = vector.broadcast %13 : vector<1x128xf32> to vector<64x128xf32>
    %15 = arith.mulf %12, %14 : vector<64x128xf32>
    %c0_10 = arith.constant 0 : index
    %c0_11 = arith.constant 0 : index
    %16 = vector.load %arg6[%c0_10, %c0_11] : memref<1x128xf32, #tpu.memory_space<vmem>>, vector<1x128xf32>
    %17 = vector.broadcast %16 : vector<1x128xf32> to vector<64x128xf32>
    %18 = arith.addf %15, %17 : vector<64x128xf32>
    %cst_12 = arith.constant 0.000000e+00 : f32
    %19 = vector.broadcast %cst_12 : f32 to vector<64x128xf32>
    %20 = arith.maximumf %18, %19 : vector<64x128xf32>
    %21 = arith.truncf %20 : vector<64x128xf32> to vector<64x128xbf16>
    %c0_13 = arith.constant 0 : index
    %c0_14 = arith.constant 0 : index
    %22 = vector.load %arg7[%c0_13, %c0_14] : memref<64x128xbf16, #tpu.memory_space<vmem>>, vector<64x128xbf16>
    tpu.vector_store %arg7[%c0_13, %c0_14], %21 {strides = array<i32>} : memref<64x128xbf16, #tpu.memory_space<vmem>>, vector<64x128xbf16>,
    return
  }
  func.func @transform_0(%arg0: i32) -> (i32, i32) {
    %c0_i32 = arith.constant 0 : i32
    %c0_i32_0 = arith.constant 0 : i32
    return %arg0, %c0_i32 : i32, i32
  }
  func.func @transform_1(%arg0: i32) -> (i32, i32) {
    %c0_i32 = arith.constant 0 : i32
    %c0_i32_0 = arith.constant 0 : i32
    %c0_i32_1 = arith.constant 0 : i32
    return %c0_i32, %c0_i32_0 : i32, i32
  }
  func.func @transform_2(%arg0: i32) -> (i32, i32) {
    %c0_i32 = arith.constant 0 : i32
    %c0_i32_0 = arith.constant 0 : i32
    %c0_i32_1 = arith.constant 0 : i32
    return %c0_i32, %c0_i32_0 : i32, i32
  }
  func.func @transform_3(%arg0: i32) -> (i32, i32) {
    %c0_i32 = arith.constant 0 : i32
    %c0_i32_0 = arith.constant 0 : i32
    %c0_i32_1 = arith.constant 0 : i32
    return %c0_i32, %c0_i32_0 : i32, i32
  }
  func.func @transform_4(%arg0: i32) -> (i32, i32) {
    %c0_i32 = arith.constant 0 : i32
    %c0_i32_0 = arith.constant 0 : i32
    %c0_i32_1 = arith.constant 0 : i32
    return %c0_i32, %c0_i32_0 : i32, i32
  }
  func.func @transform_5(%arg0: i32) -> (i32, i32) {
    %c0_i32 = arith.constant 0 : i32
    %c0_i32_0 = arith.constant 0 : i32
    %c0_i32_1 = arith.constant 0 : i32
    return %c0_i32, %c0_i32_0 : i32, i32
  }
  func.func @transform_6(%arg0: i32) -> (i32, i32) {
    %c0_i32 = arith.constant 0 : i32
    %c0_i32_0 = arith.constant 0 : i32
    return %arg0, %c0_i32 : i32, i32
  }
}

module attributes {stable_mosaic.version = 11 : i64} {
  func.func @kernel(%arg0: i32, %arg1: memref<16x1536xbf16, #tpu.memory_space<vmem>>, %arg2: memref<1536x128xbf16, #tpu.memory_space<vmem>>, %arg3: memref<1x128xf32, #tpu.memory_space<vmem>>, %arg4: memref<16x128xbf16, #tpu.memory_space<vmem>>) attributes {dimension_semantics = [#tpu.dimension_semantics<parallel>], iteration_bounds = array<i64: 2>, scalar_prefetch = 0 : i64, scratch_operands = 0 : i64, tpu.core_type = #tpu.core_type<tc>, window_params = [{transform_indices = @transform_0, window_bounds = array<i64: 16, 1536>}, {pipeline_mode = #tpu.pipeline_mode<synchronous>, transform_indices = @transform_1, window_bounds = array<i64: 1536, 128>}, {pipeline_mode = #tpu.pipeline_mode<synchronous>, transform_indices = @transform_2, window_bounds = array<i64: 1, 128>}, {transform_indices = @transform_3, window_bounds = array<i64: 16, 128>}]} {
    %c0 = arith.constant 0 : index
    %c0_0 = arith.constant 0 : index
    %0 = vector.load %arg1[%c0, %c0_0] : memref<16x1536xbf16, #tpu.memory_space<vmem>>, vector<16x1536xbf16>
    %c0_1 = arith.constant 0 : index
    %c0_2 = arith.constant 0 : index
    %1 = vector.load %arg2[%c0_1, %c0_2] : memref<1536x128xbf16, #tpu.memory_space<vmem>>, vector<1536x128xbf16>
    %cst = arith.constant dense<0.000000e+00> : vector<16x128xf32>
    %2 = tpu.matmul %0, %1, %cst {dimension_numbers = #tpu.dot_dimension_numbers<[1], [0], [0], [1], [0, 0, 1, 1], [], []>} : vector<16x1536xbf16>, vector<1536x128xbf16>, vector<16x128xf32> -> vector<16x128xf32>
    %c0_3 = arith.constant 0 : index
    %c0_4 = arith.constant 0 : index
    %3 = vector.load %arg3[%c0_3, %c0_4] : memref<1x128xf32, #tpu.memory_space<vmem>>, vector<1x128xf32>
    %4 = vector.broadcast %3 : vector<1x128xf32> to vector<16x128xf32>
    %5 = arith.addf %2, %4 : vector<16x128xf32>
    %6 = arith.truncf %5 : vector<16x128xf32> to vector<16x128xbf16>
    %c0_5 = arith.constant 0 : index
    %c0_6 = arith.constant 0 : index
    %7 = vector.load %arg4[%c0_5, %c0_6] : memref<16x128xbf16, #tpu.memory_space<vmem>>, vector<16x128xbf16>
    tpu.vector_store %arg4[%c0_5, %c0_6], %6 {strides = array<i32>} : memref<16x128xbf16, #tpu.memory_space<vmem>>, vector<16x128xbf16>,
    return
  }
  func.func @transform_0(%arg0: i32) -> (i32, i32) {
    %c0_i32 = arith.constant 0 : i32
    %c0_i32_0 = arith.constant 0 : i32
    return %arg0, %c0_i32 : i32, i32
  }
  func.func @transform_1(%arg0: i32) -> (i32, i32) {
    %c0_i32 = arith.constant 0 : i32
    %c0_i32_0 = arith.constant 0 : i32
    %c0_i32_1 = arith.constant 0 : i32
    return %c0_i32, %c0_i32_0 : i32, i32
  }
  func.func @transform_2(%arg0: i32) -> (i32, i32) {
    %c0_i32 = arith.constant 0 : i32
    %c0_i32_0 = arith.constant 0 : i32
    %c0_i32_1 = arith.constant 0 : i32
    return %c0_i32, %c0_i32_0 : i32, i32
  }
  func.func @transform_3(%arg0: i32) -> (i32, i32) {
    %c0_i32 = arith.constant 0 : i32
    %c0_i32_0 = arith.constant 0 : i32
    return %arg0, %c0_i32 : i32, i32
  }
}

module attributes {stable_mosaic.version = 11 : i64} {
  func.func @kernel(%arg0: i32, %arg1: memref<8x1024xbf16, #tpu.memory_space<vmem>>, %arg2: memref<1024x128xbf16, #tpu.memory_space<vmem>>, %arg3: memref<1x128xf32, #tpu.memory_space<vmem>>, %arg4: memref<1x1024xf32, #tpu.memory_space<vmem>>, %arg5: memref<1x1024xf32, #tpu.memory_space<vmem>>, %arg6: memref<1024x1024xbf16, #tpu.memory_space<vmem>>, %arg7: memref<1x1024xf32, #tpu.memory_space<vmem>>, %arg8: memref<1x1024xf32, #tpu.memory_space<vmem>>, %arg9: memref<1024x128xbf16, #tpu.memory_space<vmem>>, %arg10: memref<128x128xbf16, #tpu.memory_space<vmem>>, %arg11: memref<1x128xf32, #tpu.memory_space<vmem>>, %arg12: memref<8x128xf32, #tpu.memory_space<vmem>>) attributes {dimension_semantics = [#tpu.dimension_semantics<arbitrary>], iteration_bounds = array<i64: 1>, scalar_prefetch = 0 : i64, scratch_operands = 0 : i64, tpu.core_type = #tpu.core_type<tc>, window_params = [{pipeline_mode = #tpu.pipeline_mode<synchronous>, transform_indices = @transform_0, window_bounds = array<i64: 8, 1024>}, {pipeline_mode = #tpu.pipeline_mode<synchronous>, transform_indices = @transform_1, window_bounds = array<i64: 1024, 128>}, {pipeline_mode = #tpu.pipeline_mode<synchronous>, transform_indices = @transform_2, window_bounds = array<i64: 1, 128>}, {pipeline_mode = #tpu.pipeline_mode<synchronous>, transform_indices = @transform_3, window_bounds = array<i64: 1, 1024>}, {pipeline_mode = #tpu.pipeline_mode<synchronous>, transform_indices = @transform_4, window_bounds = array<i64: 1, 1024>}, {pipeline_mode = #tpu.pipeline_mode<synchronous>, transform_indices = @transform_5, window_bounds = array<i64: 1024, 1024>}, {pipeline_mode = #tpu.pipeline_mode<synchronous>, transform_indices = @transform_6, window_bounds = array<i64: 1, 1024>}, {pipeline_mode = #tpu.pipeline_mode<synchronous>, transform_indices = @transform_7, window_bounds = array<i64: 1, 1024>}, {pipeline_mode = #tpu.pipeline_mode<synchronous>, transform_indices = @transform_8, window_bounds = array<i64: 1024, 128>}, {pipeline_mode = #tpu.pipeline_mode<synchronous>, transform_indices = @transform_9, window_bounds = array<i64: 128, 128>}, {pipeline_mode = #tpu.pipeline_mode<synchronous>, transform_indices = @transform_10, window_bounds = array<i64: 1, 128>}, {pipeline_mode = #tpu.pipeline_mode<synchronous>, transform_indices = @transform_11, window_bounds = array<i64: 8, 128>}]} {
    %c0 = arith.constant 0 : index
    %c0_0 = arith.constant 0 : index
    %0 = vector.load %arg1[%c0, %c0_0] : memref<8x1024xbf16, #tpu.memory_space<vmem>>, vector<8x1024xbf16>
    %c0_1 = arith.constant 0 : index
    %c0_2 = arith.constant 0 : index
    %1 = vector.load %arg2[%c0_1, %c0_2] : memref<1024x128xbf16, #tpu.memory_space<vmem>>, vector<1024x128xbf16>
    %cst = arith.constant dense<0.000000e+00> : vector<8x128xf32>
    %2 = tpu.matmul %0, %1, %cst {dimension_numbers = #tpu.dot_dimension_numbers<[1], [0], [0], [1], [0, 0, 1, 1], [], []>} : vector<8x1024xbf16>, vector<1024x128xbf16>, vector<8x128xf32> -> vector<8x128xf32>
    %c0_3 = arith.constant 0 : index
    %c0_4 = arith.constant 0 : index
    %3 = vector.load %arg3[%c0_3, %c0_4] : memref<1x128xf32, #tpu.memory_space<vmem>>, vector<1x128xf32>
    %4 = vector.broadcast %3 : vector<1x128xf32> to vector<8x128xf32>
    %5 = arith.addf %2, %4 : vector<8x128xf32>
    %6 = arith.extf %0 : vector<8x1024xbf16> to vector<8x1024xf32>
    %c0_5 = arith.constant 0 : index
    %c0_6 = arith.constant 0 : index
    %7 = vector.load %arg4[%c0_5, %c0_6] : memref<1x1024xf32, #tpu.memory_space<vmem>>, vector<1x1024xf32>
    %8 = vector.broadcast %7 : vector<1x1024xf32> to vector<8x1024xf32>
    %9 = arith.mulf %6, %8 : vector<8x1024xf32>
    %c0_7 = arith.constant 0 : index
    %c0_8 = arith.constant 0 : index
    %10 = vector.load %arg5[%c0_7, %c0_8] : memref<1x1024xf32, #tpu.memory_space<vmem>>, vector<1x1024xf32>
    %11 = vector.broadcast %10 : vector<1x1024xf32> to vector<8x1024xf32>
    %12 = arith.addf %9, %11 : vector<8x1024xf32>
    %cst_9 = arith.constant 0.000000e+00 : f32
    %13 = vector.broadcast %cst_9 : f32 to vector<8x1024xf32>
    %14 = arith.maximumf %12, %13 : vector<8x1024xf32>
    %15 = arith.truncf %14 : vector<8x1024xf32> to vector<8x1024xbf16>
    %c0_10 = arith.constant 0 : index
    %c0_11 = arith.constant 0 : index
    %16 = vector.load %arg6[%c0_10, %c0_11] : memref<1024x1024xbf16, #tpu.memory_space<vmem>>, vector<1024x1024xbf16>
    %cst_12 = arith.constant dense<0.000000e+00> : vector<8x1024xf32>
    %17 = tpu.matmul %15, %16, %cst_12 {dimension_numbers = #tpu.dot_dimension_numbers<[1], [0], [0], [1], [0, 0, 1, 1], [], []>} : vector<8x1024xbf16>, vector<1024x1024xbf16>, vector<8x1024xf32> -> vector<8x1024xf32>
    %c0_13 = arith.constant 0 : index
    %c0_14 = arith.constant 0 : index
    %18 = vector.load %arg7[%c0_13, %c0_14] : memref<1x1024xf32, #tpu.memory_space<vmem>>, vector<1x1024xf32>
    %19 = vector.broadcast %18 : vector<1x1024xf32> to vector<8x1024xf32>
    %20 = arith.mulf %17, %19 : vector<8x1024xf32>
    %c0_15 = arith.constant 0 : index
    %c0_16 = arith.constant 0 : index
    %21 = vector.load %arg8[%c0_15, %c0_16] : memref<1x1024xf32, #tpu.memory_space<vmem>>, vector<1x1024xf32>
    %22 = vector.broadcast %21 : vector<1x1024xf32> to vector<8x1024xf32>
    %23 = arith.addf %20, %22 : vector<8x1024xf32>
    %cst_17 = arith.constant 0.000000e+00 : f32
    %24 = vector.broadcast %cst_17 : f32 to vector<8x1024xf32>
    %25 = arith.maximumf %23, %24 : vector<8x1024xf32>
    %26 = arith.truncf %25 : vector<8x1024xf32> to vector<8x1024xbf16>
    %c0_18 = arith.constant 0 : index
    %c0_19 = arith.constant 0 : index
    %27 = vector.load %arg9[%c0_18, %c0_19] : memref<1024x128xbf16, #tpu.memory_space<vmem>>, vector<1024x128xbf16>
    %cst_20 = arith.constant dense<0.000000e+00> : vector<8x128xf32>
    %28 = tpu.matmul %26, %27, %cst_20 {dimension_numbers = #tpu.dot_dimension_numbers<[1], [0], [0], [1], [0, 0, 1, 1], [], []>} : vector<8x1024xbf16>, vector<1024x128xbf16>, vector<8x128xf32> -> vector<8x128xf32>
    %29 = arith.addf %5, %28 : vector<8x128xf32>
    %30 = arith.truncf %29 : vector<8x128xf32> to vector<8x128xbf16>
    %c0_21 = arith.constant 0 : index
    %c0_22 = arith.constant 0 : index
    %31 = vector.load %arg10[%c0_21, %c0_22] : memref<128x128xbf16, #tpu.memory_space<vmem>>, vector<128x128xbf16>
    %cst_23 = arith.constant dense<0.000000e+00> : vector<8x128xf32>
    %32 = tpu.matmul %30, %31, %cst_23 {dimension_numbers = #tpu.dot_dimension_numbers<[1], [0], [0], [1], [0, 0, 1, 1], [], []>} : vector<8x128xbf16>, vector<128x128xbf16>, vector<8x128xf32> -> vector<8x128xf32>
    %c0_24 = arith.constant 0 : index
    %c0_25 = arith.constant 0 : index
    %33 = vector.load %arg11[%c0_24, %c0_25] : memref<1x128xf32, #tpu.memory_space<vmem>>, vector<1x128xf32>
    %34 = vector.broadcast %33 : vector<1x128xf32> to vector<8x128xf32>
    %35 = arith.addf %32, %34 : vector<8x128xf32>
    %cst_26 = arith.constant 0.000000e+00 : f32
    %36 = vector.broadcast %cst_26 : f32 to vector<8x128xf32>
    %37 = arith.subf %36, %35 : vector<8x128xf32>
    %38 = math.exp %37 : vector<8x128xf32>
    %cst_27 = arith.constant 1.000000e+00 : f32
    %39 = vector.broadcast %cst_27 : f32 to vector<8x128xf32>
    %40 = arith.addf %39, %38 : vector<8x128xf32>
    %cst_28 = arith.constant 1.000000e+00 : f32
    %41 = vector.broadcast %cst_28 : f32 to vector<8x128xf32>
    %42 = arith.divf %41, %40 : vector<8x128xf32>
    %c0_29 = arith.constant 0 : index
    %c0_30 = arith.constant 0 : index
    %43 = vector.load %arg12[%c0_29, %c0_30] : memref<8x128xf32, #tpu.memory_space<vmem>>, vector<8x128xf32>
    tpu.vector_store %arg12[%c0_29, %c0_30], %42 {strides = array<i32>} : memref<8x128xf32, #tpu.memory_space<vmem>>, vector<8x128xf32>,
    return
  }
  func.func @transform_0(%arg0: i32) -> (i32, i32) {
    %c0_i32 = arith.constant 0 : i32
    %c0_i32_0 = arith.constant 0 : i32
    %c0_i32_1 = arith.constant 0 : i32
    return %c0_i32, %c0_i32_0 : i32, i32
  }
  func.func @transform_1(%arg0: i32) -> (i32, i32) {
    %c0_i32 = arith.constant 0 : i32
    %c0_i32_0 = arith.constant 0 : i32
    %c0_i32_1 = arith.constant 0 : i32
    return %c0_i32, %c0_i32_0 : i32, i32
  }
  func.func @transform_2(%arg0: i32) -> (i32, i32) {
    %c0_i32 = arith.constant 0 : i32
    %c0_i32_0 = arith.constant 0 : i32
    %c0_i32_1 = arith.constant 0 : i32
    return %c0_i32, %c0_i32_0 : i32, i32
  }
  func.func @transform_3(%arg0: i32) -> (i32, i32) {
    %c0_i32 = arith.constant 0 : i32
    %c0_i32_0 = arith.constant 0 : i32
    %c0_i32_1 = arith.constant 0 : i32
    return %c0_i32, %c0_i32_0 : i32, i32
  }
  func.func @transform_4(%arg0: i32) -> (i32, i32) {
    %c0_i32 = arith.constant 0 : i32
    %c0_i32_0 = arith.constant 0 : i32
    %c0_i32_1 = arith.constant 0 : i32
    return %c0_i32, %c0_i32_0 : i32, i32
  }
  func.func @transform_5(%arg0: i32) -> (i32, i32) {
    %c0_i32 = arith.constant 0 : i32
    %c0_i32_0 = arith.constant 0 : i32
    %c0_i32_1 = arith.constant 0 : i32
    return %c0_i32, %c0_i32_0 : i32, i32
  }
  func.func @transform_6(%arg0: i32) -> (i32, i32) {
    %c0_i32 = arith.constant 0 : i32
    %c0_i32_0 = arith.constant 0 : i32
    %c0_i32_1 = arith.constant 0 : i32
    return %c0_i32, %c0_i32_0 : i32, i32
  }
  func.func @transform_7(%arg0: i32) -> (i32, i32) {
    %c0_i32 = arith.constant 0 : i32
    %c0_i32_0 = arith.constant 0 : i32
    %c0_i32_1 = arith.constant 0 : i32
    return %c0_i32, %c0_i32_0 : i32, i32
  }
  func.func @transform_8(%arg0: i32) -> (i32, i32) {
    %c0_i32 = arith.constant 0 : i32
    %c0_i32_0 = arith.constant 0 : i32
    %c0_i32_1 = arith.constant 0 : i32
    return %c0_i32, %c0_i32_0 : i32, i32
  }
  func.func @transform_9(%arg0: i32) -> (i32, i32) {
    %c0_i32 = arith.constant 0 : i32
    %c0_i32_0 = arith.constant 0 : i32
    %c0_i32_1 = arith.constant 0 : i32
    return %c0_i32, %c0_i32_0 : i32, i32
  }
  func.func @transform_10(%arg0: i32) -> (i32, i32) {
    %c0_i32 = arith.constant 0 : i32
    %c0_i32_0 = arith.constant 0 : i32
    %c0_i32_1 = arith.constant 0 : i32
    return %c0_i32, %c0_i32_0 : i32, i32
  }
  func.func @transform_11(%arg0: i32) -> (i32, i32) {
    %c0_i32 = arith.constant 0 : i32
    %c0_i32_0 = arith.constant 0 : i32
    %c0_i32_1 = arith.constant 0 : i32
    return %c0_i32, %c0_i32_0 : i32, i32
  }
}

</mosaic_0001>

<bundles_post_ra>
// kernel: clf_img_forward.8
= control target key start
LH: loop header
LB: loop body
LE: loop exit
PB: predicated region body
PF: predicated region fallthrough
CT: control target
= control target key end

     0   :  { %s1717_s9 = smov 0   ;;  %s1847_s0 = inlined_call_operand.vmem [shape: bf16[2560,32], index: 0, kind: input, shape index: {}]   ;;  %s1848_s1 = inlined_call_operand.vmem [shape: bf16[32,128], index: 1, kind: input, shape index: {}]   ;;  %s1849_s2 = inlined_call_operand.vmem [shape: bf16[2560,128], index: 2, kind: output, shape index: {}]  }
   0x1 LB: > { %s1150_s10 = sadd.s32 4294967295, %s1700_s9   ;;  %p1154_p0 = scmp.ge.s32.totalorder %s1700_s9, 1  ;;  %s1700_s9 = sphi %s1717_s9, %s12_s9  }
   0x2   : > { %p113_p1 = scmp.lt.s32.totalorder %s1700_s9, 6 }
   0x4   : > { %p114_p2 = pnand %p1154_p0, %p113_p1 }
   0x5   : > { %s1155_s13 = sshll.u32 (!%p114_p2), %s1150_s10, 6 }
   0x6   : > { %117 = sbr.rel (%p114_p2) target bundleno = 278 (0x116), region = 28  ;;  %p136_p3 = scmp.lt.s32.totalorder (!%p114_p2), %s1155_s13, 319 }
   0xb   : > { %v1660_v0 = vld [vmem:[%s1848_s1 + $0x8] sm:$0xff]   ;;  %v1661_v1 = vld [vmem:[%s1848_s1] sm:$0xff]   ;;  %s1851_s13 = smov (!%p136_p3, %s1155_s13), 319  ;;  %vm388_vm0 = vcmask 261120  }
   0xc   : > { %1580 = vmatprep.subr.bf16.mxu0 %v1660_v0  ;;  %1648 = vmatprep.subr.bf16.mxu1 %v1660_v0  ;;  %s1156_s16 = sshll.u32 %s1851_s13, 2 }
   0xd   : > { %1581 = vmatpush3.bf16.msra.mxu0 %v1660_v0  ;;  %1650 = vmatpush3.bf16.msra.mxu1 %v1660_v0  ;;  %s1739_s19 = scalar_lea.vmem %s1847_s0, %s1156_s16  ;;  %s1810_s22 = scalar_lea.vmem %s1849_s2, %s1156_s16 }
   0xe   : > { %1582 = vmatprep.subr.bf16.mxu0 %v1661_v1  ;;  %1649 = vmatprep.subr.bf16.mxu1 %v1661_v1  ;;  %v1662_v2 = vld [vmem:[%s1739_s19] sm:$0xff]   ;;  %v1664_v4 = vld [vmem:[%s1739_s19 + $0x8] sm:$0xff]   ;;  %v1666_v6 = vld [vmem:[%s1739_s19 + $0x10] sm:$0xff]  }
   0xf   : > { %v1663_v3 = vld [vmem:[%s1739_s19 + $0x80] sm:$0xff]   ;;  %1584 = vmatprep.mubr.msk.bf16.mxu0 %vm388_vm0, %v1662_v2  ;;  %v1665_v5 = vld [vmem:[%s1739_s19 + $0x88] sm:$0xff]   ;;  %v1667_v7 = vld [vmem:[%s1739_s19 + $0x90] sm:$0xff]  }
  0x10   : > { %1616 = vmatprep.mubr.msk.bf16.mxu1 %vm388_vm0, %v1663_v3  ;;  %v1668_v8 = vld [vmem:[%s1739_s19 + $0x18] sm:$0xff]   ;;  %v1670_v10 = vld [vmem:[%s1739_s19 + $0x20] sm:$0xff]   ;;  %v1672_v12 = vld [vmem:[%s1739_s19 + $0x28] sm:$0xff]  }
  0x11   : > { %1583 = vmatpush3.bf16.msra.mxu0 %v1661_v1  ;;  %1651 = vmatpush3.bf16.msra.mxu1 %v1661_v1  ;;  %v1669_v9 = vld [vmem:[%s1739_s19 + $0x98] sm:$0xff]   ;;  %v1671_v11 = vld [vmem:[%s1739_s19 + $0xa0] sm:$0xff]   ;;  %v1673_v13 = vld [vmem:[%s1739_s19 + $0xa8] sm:$0xff]  }
  0x12   : > { %v1674_v14 = vld [vmem:[%s1739_s19 + $0x30] sm:$0xff]   ;;  %v1676_v16 = vld [vmem:[%s1739_s19 + $0x38] sm:$0xff]   ;;  %v1678_v18 = vld [vmem:[%s1739_s19 + $0x40] sm:$0xff]  }
  0x13   : > { %v1675_v15 = vld [vmem:[%s1739_s19 + $0xb0] sm:$0xff]   ;;  %v1677_v17 = vld [vmem:[%s1739_s19 + $0xb8] sm:$0xff]   ;;  %v1679_v19 = vld [vmem:[%s1739_s19 + $0xc0] sm:$0xff]  }
  0x14   : > { %1585 = vmatmul.mubr.msk.bf16.vlgmr.msra.gmra.mxu0 %vm388_vm0, %v1664_v4  ;;  %1617 = vmatmul.mubr.msk.bf16.vlgmr.msra.gmra.mxu1 %vm388_vm0, %v1665_v5  ;;  %v1680_v20 = vld [vmem:[%s1739_s19 + $0x48] sm:$0xff]   ;;  %v1682_v22 = vld [vmem:[%s1739_s19 + $0x50] sm:$0xff]   ;;  %v1684_v24 = vld [vmem:[%s1739_s19 + $0x58] sm:$0xff]  }
  0x15   : > { %1588 = vmatprep.mubr.msk.bf16.mxu0 %vm388_vm0, %v1666_v6  ;;  %1620 = vmatprep.mubr.msk.bf16.mxu1 %vm388_vm0, %v1667_v7  ;;  %v1681_v21 = vld [vmem:[%s1739_s19 + $0xc8] sm:$0xff]   ;;  %v1683_v23 = vld [vmem:[%s1739_s19 + $0xd0] sm:$0xff]   ;;  %v1685_v25 = vld [vmem:[%s1739_s19 + $0xd8] sm:$0xff]  }
  0x16   : > { %v1686_v26 = vld [vmem:[%s1739_s19 + $0x60] sm:$0xff]   ;;  %v1688_v28 = vld [vmem:[%s1739_s19 + $0x68] sm:$0xff]   ;;  %v1690_v30 = vld [vmem:[%s1739_s19 + $0x70] sm:$0xff]  }
  0x17   : > { %v1687_v27 = vld [vmem:[%s1739_s19 + $0xe0] sm:$0xff]   ;;  %v1689_v29 = vld [vmem:[%s1739_s19 + $0xe8] sm:$0xff]   ;;  %v1691_v31 = vld [vmem:[%s1739_s19 + $0xf0] sm:$0xff]  }
  0x18   : > { %v1692_v32 = vld [vmem:[%s1739_s19 + $0x78] sm:$0xff]  }
  0x19   : > { %v1693_v33 = vld [vmem:[%s1739_s19 + $0xf8] sm:$0xff]  }
  0x1c   : > { %1589 = vmatmul.mubr.msk.bf16.gmra.mxu0 %vm388_vm0, %v1668_v8  ;;  %1621 = vmatmul.mubr.msk.bf16.gmra.mxu1 %vm388_vm0, %v1669_v9 }
  0x1d   : > { %1592 = vmatprep.mubr.msk.bf16.mxu0 %vm388_vm0, %v1670_v10  ;;  %1624 = vmatprep.mubr.msk.bf16.mxu1 %vm388_vm0, %v1671_v11 }
  0x24   : > { %1593 = vmatmul.mubr.msk.bf16.gmra.mxu0 %vm388_vm0, %v1672_v12  ;;  %1625 = vmatmul.mubr.msk.bf16.gmra.mxu1 %vm388_vm0, %v1673_v13 }
  0x25   : > { %1596 = vmatprep.mubr.msk.bf16.mxu0 %vm388_vm0, %v1674_v14  ;;  %1628 = vmatprep.mubr.msk.bf16.mxu1 %vm388_vm0, %v1675_v15 }
  0x2c   : > { %1597 = vmatmul.mubr.msk.bf16.gmra.mxu0 %vm388_vm0, %v1676_v16  ;;  %1629 = vmatmul.mubr.msk.bf16.gmra.mxu1 %vm388_vm0, %v1677_v17 }
  0x2d   : > { %1600 = vmatprep.mubr.msk.bf16.mxu0 %vm388_vm0, %v1678_v18  ;;  %1632 = vmatprep.mubr.msk.bf16.mxu1 %vm388_vm0, %v1679_v19 }
  0x34   : > { %1601 = vmatmul.mubr.msk.bf16.gmra.mxu0 %vm388_vm0, %v1680_v20  ;;  %1633 = vmatmul.mubr.msk.bf16.gmra.mxu1 %vm388_vm0, %v1681_v21 }
  0x35   : > { %1604 = vmatprep.mubr.msk.bf16.mxu0 %vm388_vm0, %v1682_v22  ;;  %1636 = vmatprep.mubr.msk.bf16.mxu1 %vm388_vm0, %v1683_v23 }
  0x3c   : > { %1605 = vmatmul.mubr.msk.bf16.gmra.mxu0 %vm388_vm0, %v1684_v24  ;;  %1637 = vmatmul.mubr.msk.bf16.gmra.mxu1 %vm388_vm0, %v1685_v25 }
  0x3d   : > { %1608 = vmatprep.mubr.msk.bf16.mxu0 %vm388_vm0, %v1686_v26  ;;  %1640 = vmatprep.mubr.msk.bf16.mxu1 %vm388_vm0, %v1687_v27 }
  0x44   : > { %1609 = vmatmul.mubr.msk.bf16.gmra.mxu0 %vm388_vm0, %v1688_v28  ;;  %1641 = vmatmul.mubr.msk.bf16.gmra.mxu1 %vm388_vm0, %v1689_v29 }
  0x45   : > { %1612 = vmatprep.mubr.msk.bf16.mxu0 %vm388_vm0, %v1690_v30  ;;  %1644 = vmatprep.mubr.msk.bf16.mxu1 %vm388_vm0, %v1691_v31 }
  0x4c   : > { %1613 = vmatmul.mubr.msk.bf16.gmra.mxu0 %vm388_vm0, %v1692_v32  ;;  %1645 = vmatmul.mubr.msk.bf16.gmra.mxu1 %vm388_vm0, %v1693_v33 }
  0xd4   : > { %v1586_v34 = vpop.f32.mrf.mxu0  ;;  %v1618_v35 = vpop.f32.mrf.mxu1 }
  0xd6   : > { %v519_v36 = vpop.f32.mrf.mxu0  ;;  %v647_v37 = vpop.f32.mrf.mxu1 }
  0xd8   : > { %v1587_v38 = vpop.f32.mrf.mxu0  ;;  %v1619_v40 = vpop.f32.mrf.mxu1 }
  0xd9   : > { %v1363_v39 = vpack.c.bf16 %v1587_v38, %v1586_v34  ;;  %v1443_v41 = vpack.c.bf16 %v1619_v40, %v1618_v35 }
  0xda   : > { %v522_v42 = vpop.f32.mrf.mxu0  ;;  %v650_v44 = vpop.f32.mrf.mxu1 }
  0xdb   : > { %1515 = vst [vmem:[%s1810_s22 + $0x8] sm:$0xff] %v1363_v39   ;;  %v1358_v43 = vpack.c.bf16 %v522_v42, %v519_v36  ;;  %1531 = vst [vmem:[%s1810_s22 + $0x88] sm:$0xff] %v1443_v41   ;;  %v1438_v45 = vpack.c.bf16 %v650_v44, %v647_v37 }
  0xdc   : > { %v1590_v46 = vpop.f32.mrf.mxu0  ;;  %v1622_v47 = vpop.f32.mrf.mxu1 }
  0xdd   : > { %1359 = vst [vmem:[%s1810_s22] sm:$0xff] %v1358_v43   ;;  %1530 = vst [vmem:[%s1810_s22 + $0x80] sm:$0xff] %v1438_v45  }
  0xde   : > { %v535_v48 = vpop.f32.mrf.mxu0  ;;  %v663_v49 = vpop.f32.mrf.mxu1 }
  0xe0   : > { %v1591_v50 = vpop.f32.mrf.mxu0  ;;  %v1623_v52 = vpop.f32.mrf.mxu1 }
  0xe1   : > { %v1373_v51 = vpack.c.bf16 %v1591_v50, %v1590_v46  ;;  %v1453_v53 = vpack.c.bf16 %v1623_v52, %v1622_v47 }
  0xe2   : > { %v538_v54 = vpop.f32.mrf.mxu0  ;;  %v666_v56 = vpop.f32.mrf.mxu1 }
  0xe3   : > { %1517 = vst [vmem:[%s1810_s22 + $0x18] sm:$0xff] %v1373_v51   ;;  %v1368_v55 = vpack.c.bf16 %v538_v54, %v535_v48  ;;  %1533 = vst [vmem:[%s1810_s22 + $0x98] sm:$0xff] %v1453_v53   ;;  %v1448_v57 = vpack.c.bf16 %v666_v56, %v663_v49 }
  0xe4   : > { %v1594_v58 = vpop.f32.mrf.mxu0  ;;  %v1626_v59 = vpop.f32.mrf.mxu1 }
  0xe5   : > { %1516 = vst [vmem:[%s1810_s22 + $0x10] sm:$0xff] %v1368_v55   ;;  %1532 = vst [vmem:[%s1810_s22 + $0x90] sm:$0xff] %v1448_v57  }
  0xe6   : > { %v551_v60 = vpop.f32.mrf.mxu0  ;;  %v679_v61 = vpop.f32.mrf.mxu1 }
  0xe8   : > { %v1595_v62 = vpop.f32.mrf.mxu0  ;;  %v1627_v0 = vpop.f32.mrf.mxu1 }
  0xe9   : > { %v1383_v63 = vpack.c.bf16 %v1595_v62, %v1594_v58  ;;  %v1463_v1 = vpack.c.bf16 %v1627_v0, %v1626_v59 }
  0xea   : > { %v554_v2 = vpop.f32.mrf.mxu0  ;;  %v682_v4 = vpop.f32.mrf.mxu1 }
  0xeb   : > { %1519 = vst [vmem:[%s1810_s22 + $0x28] sm:$0xff] %v1383_v63   ;;  %v1378_v3 = vpack.c.bf16 %v554_v2, %v551_v60  ;;  %1535 = vst [vmem:[%s1810_s22 + $0xa8] sm:$0xff] %v1463_v1   ;;  %v1458_v5 = vpack.c.bf16 %v682_v4, %v679_v61 }
  0xec   : > { %v1598_v6 = vpop.f32.mrf.mxu0  ;;  %v1630_v7 = vpop.f32.mrf.mxu1 }
  0xed   : > { %1518 = vst [vmem:[%s1810_s22 + $0x20] sm:$0xff] %v1378_v3   ;;  %1534 = vst [vmem:[%s1810_s22 + $0xa0] sm:$0xff] %v1458_v5  }
  0xee   : > { %v567_v8 = vpop.f32.mrf.mxu0  ;;  %v695_v9 = vpop.f32.mrf.mxu1 }
  0xf0   : > { %v1599_v10 = vpop.f32.mrf.mxu0  ;;  %v1631_v12 = vpop.f32.mrf.mxu1 }
  0xf1   : > { %v1393_v11 = vpack.c.bf16 %v1599_v10, %v1598_v6  ;;  %v1473_v13 = vpack.c.bf16 %v1631_v12, %v1630_v7 }
  0xf2   : > { %v570_v14 = vpop.f32.mrf.mxu0  ;;  %v698_v16 = vpop.f32.mrf.mxu1 }
  0xf3   : > { %1521 = vst [vmem:[%s1810_s22 + $0x38] sm:$0xff] %v1393_v11   ;;  %v1388_v15 = vpack.c.bf16 %v570_v14, %v567_v8  ;;  %1537 = vst [vmem:[%s1810_s22 + $0xb8] sm:$0xff] %v1473_v13   ;;  %v1468_v17 = vpack.c.bf16 %v698_v16, %v695_v9 }
  0xf4   : > { %v1602_v18 = vpop.f32.mrf.mxu0  ;;  %v1634_v19 = vpop.f32.mrf.mxu1 }
  0xf5   : > { %1520 = vst [vmem:[%s1810_s22 + $0x30] sm:$0xff] %v1388_v15   ;;  %1536 = vst [vmem:[%s1810_s22 + $0xb0] sm:$0xff] %v1468_v17  }
  0xf6   : > { %v583_v20 = vpop.f32.mrf.mxu0  ;;  %v711_v21 = vpop.f32.mrf.mxu1 }
  0xf8   : > { %v1603_v22 = vpop.f32.mrf.mxu0  ;;  %v1635_v24 = vpop.f32.mrf.mxu1 }
  0xf9   : > { %v1403_v23 = vpack.c.bf16 %v1603_v22, %v1602_v18  ;;  %v1483_v25 = vpack.c.bf16 %v1635_v24, %v1634_v19 }
  0xfa   : > { %v586_v26 = vpop.f32.mrf.mxu0  ;;  %v714_v28 = vpop.f32.mrf.mxu1 }
  0xfb   : > { %1523 = vst [vmem:[%s1810_s22 + $0x48] sm:$0xff] %v1403_v23   ;;  %v1398_v27 = vpack.c.bf16 %v586_v26, %v583_v20  ;;  %1539 = vst [vmem:[%s1810_s22 + $0xc8] sm:$0xff] %v1483_v25   ;;  %v1478_v29 = vpack.c.bf16 %v714_v28, %v711_v21 }
  0xfc   : > { %v1606_v30 = vpop.f32.mrf.mxu0  ;;  %v1638_v31 = vpop.f32.mrf.mxu1 }
  0xfd   : > { %1522 = vst [vmem:[%s1810_s22 + $0x40] sm:$0xff] %v1398_v27   ;;  %1538 = vst [vmem:[%s1810_s22 + $0xc0] sm:$0xff] %v1478_v29  }
  0xfe   : > { %v599_v32 = vpop.f32.mrf.mxu0  ;;  %v727_v33 = vpop.f32.mrf.mxu1 }
 0x100   : > { %v1607_v34 = vpop.f32.mrf.mxu0  ;;  %v1639_v36 = vpop.f32.mrf.mxu1 }
 0x101   : > { %v1413_v35 = vpack.c.bf16 %v1607_v34, %v1606_v30  ;;  %v1493_v37 = vpack.c.bf16 %v1639_v36, %v1638_v31 }
 0x102   : > { %v602_v38 = vpop.f32.mrf.mxu0  ;;  %v730_v40 = vpop.f32.mrf.mxu1 }
 0x103   : > { %1525 = vst [vmem:[%s1810_s22 + $0x58] sm:$0xff] %v1413_v35   ;;  %v1408_v39 = vpack.c.bf16 %v602_v38, %v599_v32  ;;  %1541 = vst [vmem:[%s1810_s22 + $0xd8] sm:$0xff] %v1493_v37   ;;  %v1488_v41 = vpack.c.bf16 %v730_v40, %v727_v33 }
 0x104   : > { %v1610_v42 = vpop.f32.mrf.mxu0  ;;  %v1642_v43 = vpop.f32.mrf.mxu1 }
 0x105   : > { %1524 = vst [vmem:[%s1810_s22 + $0x50] sm:$0xff] %v1408_v39   ;;  %1540 = vst [vmem:[%s1810_s22 + $0xd0] sm:$0xff] %v1488_v41  }
 0x106   : > { %v615_v44 = vpop.f32.mrf.mxu0  ;;  %v743_v45 = vpop.f32.mrf.mxu1 }
 0x108   : > { %v1611_v46 = vpop.f32.mrf.mxu0  ;;  %v1643_v48 = vpop.f32.mrf.mxu1 }
 0x109   : > { %v1423_v47 = vpack.c.bf16 %v1611_v46, %v1610_v42  ;;  %v1503_v49 = vpack.c.bf16 %v1643_v48, %v1642_v43 }
 0x10a   : > { %v618_v50 = vpop.f32.mrf.mxu0  ;;  %v746_v52 = vpop.f32.mrf.mxu1 }
 0x10b   : > { %1527 = vst [vmem:[%s1810_s22 + $0x68] sm:$0xff] %v1423_v47   ;;  %v1418_v51 = vpack.c.bf16 %v618_v50, %v615_v44  ;;  %1543 = vst [vmem:[%s1810_s22 + $0xe8] sm:$0xff] %v1503_v49   ;;  %v1498_v53 = vpack.c.bf16 %v746_v52, %v743_v45 }
 0x10c   : > { %v1614_v54 = vpop.f32.mrf.mxu0  ;;  %v1646_v55 = vpop.f32.mrf.mxu1 }
 0x10d   : > { %1526 = vst [vmem:[%s1810_s22 + $0x60] sm:$0xff] %v1418_v51   ;;  %1542 = vst [vmem:[%s1810_s22 + $0xe0] sm:$0xff] %v1498_v53  }
 0x10e   : > { %v631_v56 = vpop.f32.mrf.mxu0  ;;  %v759_v57 = vpop.f32.mrf.mxu1 }
 0x110   : > { %v1615_v58 = vpop.f32.mrf.mxu0  ;;  %v1647_v60 = vpop.f32.mrf.mxu1 }
 0x111   : > { %v1433_v59 = vpack.c.bf16 %v1615_v58, %v1614_v54  ;;  %v1513_v61 = vpack.c.bf16 %v1647_v60, %v1646_v55 }
 0x112   : > { %v634_v62 = vpop.f32.mrf.mxu0  ;;  %v762_v0 = vpop.f32.mrf.mxu1 }
 0x113   : > { %1529 = vst [vmem:[%s1810_s22 + $0x78] sm:$0xff] %v1433_v59   ;;  %v1428_v63 = vpack.c.bf16 %v634_v62, %v631_v56  ;;  %1545 = vst [vmem:[%s1810_s22 + $0xf8] sm:$0xff] %v1513_v61   ;;  %v1508_v1 = vpack.c.bf16 %v762_v0, %v759_v57 }
 0x115   : > { %1528 = vst [vmem:[%s1810_s22 + $0x70] sm:$0xff] %v1428_v63   ;;  %1544 = vst [vmem:[%s1810_s22 + $0xf0] sm:$0xff] %v1508_v1  }
 0x116 PF: > { %s12_s9 = sadd.s32 1, %s1700_s9  }
 0x117   : > { %p9_p4 = scmp.ge.s32.totalorder %s12_s9, 7  }
 0x119   :  { %11 = sbr.rel (!%p9_p4) target bundleno = 1 (0x1), region = 58 }

// kernel: clf_img_forward.9
= control target key start
LH: loop header
LB: loop body
LE: loop exit
PB: predicated region body
PF: predicated region fallthrough
CT: control target
= control target key end

     0   :  { %s2277_s21 = smov 0   ;;  %s2680_s0 = inlined_call_operand.vmem [shape: bf16[2560,16], index: 0, kind: input, shape index: {}]   ;;  %s2681_s1 = inlined_call_operand.vmem [shape: bf16[16,128], index: 1, kind: input, shape index: {}]   ;;  %s2682_s2 = inlined_call_operand.vmem [shape: f32[1,16], index: 2, kind: input, shape index: {}]   ;;  %s2683_s3 = inlined_call_operand.vmem [shape: f32[1,16], index: 3, kind: input, shape index: {}]   ;;  %s2684_s4 = inlined_call_operand.vmem [shape: f32[1,128], index: 4, kind: input, shape index: {}]   ;;  %s2685_s5 = inlined_call_operand.vmem [shape: f32[1,128], index: 5, kind: input, shape index: {}]   ;;  %s2686_s6 = inlined_call_operand.vmem [shape: bf16[2560,128], index: 6, kind: output, shape index: {}]  }
   0x1 LB: > { %s1598_s22 = sadd.s32 4294967295, %s2240_s21   ;;  %p1602_p0 = scmp.ge.s32.totalorder %s2240_s21, 1  ;;  %s2240_s21 = sphi %s2277_s21, %s16_s21  }
   0x2   : > { %p213_p1 = scmp.lt.s32.totalorder %s2240_s21, 6 }
   0x4   : > { %p214_p2 = pnand %p1602_p0, %p213_p1 }
   0x5   : > { %s1603_s25 = sshll.u32 (!%p214_p2), %s1598_s22, 6 }
   0x6   : > { %217 = sbr.rel (%p214_p2) target bundleno = 300 (0x12c), region = 44  ;;  %p244_p3 = scmp.lt.s32.totalorder (!%p214_p2), %s1603_s25, 319 }
   0xb   : > { %v2233_v0 = vld [vmem:[%s2681_s1] sm:$0xff]   ;;  %s2688_s25 = smov (!%p244_p3, %s1603_s25), 319  ;;  %vm630_vm0 = vcmask 130048  }
   0xc   : > { %2157 = vmatprep.subr.bf16.mxu0 %v2233_v0  ;;  %2223 = vmatprep.subr.bf16.mxu1 %v2233_v0  ;;  %s1604_s26 = sshll.u32 %s2688_s25, 2  ;;  %v2301_v1 = vld [vmem:[%s2682_s2] ss:$0 sm:$0xff] }
   0xd   : > { %2158 = vmatpush3.bf16.msra.mxu0 %v2233_v0  ;;  %2224 = vmatpush3.bf16.msra.mxu1 %v2233_v0  ;;  %s2296_s29 = scalar_lea.vmem %s2680_s0, %s1604_s26  ;;  %v2310_v10 = vld [vmem:[%s2683_s3] ss:$0 sm:$0xff]  ;;  %s2532_s16 = scalar_lea.vmem %s2686_s6, %s1604_s26 }
   0xe   : > { %v1775_v2 = vld [vmem:[%s2296_s29] sm:$0xff]   ;;  %v2062_v4 = vld [vmem:[%s2296_s29 + $0x8] sm:$0xff]   ;;  %v2063_v31 = vld [vmem:[%s2296_s29 + $0x10] sm:$0xff]  }
   0xf   : > { %v2077_v3 = vld [vmem:[%s2296_s29 + $0x80] sm:$0xff]   ;;  %v1776_v5 = vunpack.c.l.bf16 %v1775_v2  ;;  %v1777_v6 = vunpack.c.h.bf16 %v1775_v2  ;;  %v2078_v9 = vld [vmem:[%s2296_s29 + $0x88] sm:$0xff]   ;;  %v1780_v11 = vunpack.c.l.bf16 %v2062_v4  ;;  %v1781_v12 = vunpack.c.h.bf16 %v2062_v4  ;;  %v2079_v36 = vld [vmem:[%s2296_s29 + $0x90] sm:$0xff]  }
  0x10   : > { %v1840_v7 = vunpack.c.l.bf16 %v2077_v3  ;;  %v1841_v8 = vunpack.c.h.bf16 %v2077_v3  ;;  %v1844_v13 = vunpack.c.l.bf16 %v2078_v9  ;;  %v1845_v14 = vunpack.c.h.bf16 %v2078_v9  ;;  %v2064_v41 = vld [vmem:[%s2296_s29 + $0x18] sm:$0xff]   ;;  %v2065_v4 = vld [vmem:[%s2296_s29 + $0x20] sm:$0xff]  }
  0x11   : > { %v391_v15 = vmul.f32 %v1776_v5, %v2301_v1  ;;  %v392_v16 = vmul.f32 %v1777_v6, %v2301_v1  ;;  %v393_v19 = vmul.f32 %v1780_v11, %v2301_v1  ;;  %v394_v20 = vmul.f32 %v1781_v12, %v2301_v1  ;;  %v2080_v46 = vld [vmem:[%s2296_s29 + $0x98] sm:$0xff]  }
  0x12   : > { %v423_v17 = vmul.f32 %v1840_v7, %v2301_v1  ;;  %v424_v18 = vmul.f32 %v1841_v8, %v2301_v1  ;;  %v425_v21 = vmul.f32 %v1844_v13, %v2301_v1  ;;  %v426_v22 = vmul.f32 %v1845_v14, %v2301_v1  ;;  %v2081_v14 = vld [vmem:[%s2296_s29 + $0xa0] sm:$0xff]  }
  0x13   : > { %v462_v23 = vadd.f32 %v2310_v10, %v391_v15  ;;  %v463_v24 = vadd.f32 %v2310_v10, %v392_v16  ;;  %v464_v27 = vadd.f32 %v2310_v10, %v393_v19  ;;  %v465_v28 = vadd.f32 %v2310_v10, %v394_v20  ;;  %v2066_v19 = vld [vmem:[%s2296_s29 + $0x28] sm:$0xff]  }
  0x14   : > { %v494_v25 = vadd.f32 %v2310_v10, %v423_v17  ;;  %v495_v26 = vadd.f32 %v2310_v10, %v424_v18  ;;  %v496_v29 = vadd.f32 %v2310_v10, %v425_v21  ;;  %v497_v30 = vadd.f32 %v2310_v10, %v426_v22 }
  0x15   : > { %v526_v32 = vmax.f32 %v462_v23, 0.0  ;;  %v527_v33 = vmax.f32 %v463_v24, 0.0  ;;  %v528_v37 = vmax.f32 %v464_v27, 0.0  ;;  %v529_v38 = vmax.f32 %v465_v28, 0.0  ;;  %v2082_v24 = vld [vmem:[%s2296_s29 + $0xa8] sm:$0xff]  }
  0x16   : > { %v558_v34 = vmax.f32 %v494_v25, 0.0  ;;  %v559_v35 = vmax.f32 %v495_v26, 0.0  ;;  %v560_v39 = vmax.f32 %v496_v29, 0.0  ;;  %v561_v40 = vmax.f32 %v497_v30, 0.0 }
  0x17   : > { %v590_v42 = vpack.c.bf16 %v527_v33, %v526_v32  ;;  %v1784_v44 = vunpack.c.l.bf16 %v2063_v31  ;;  %v1785_v45 = vunpack.c.h.bf16 %v2063_v31  ;;  %v591_v47 = vpack.c.bf16 %v529_v38, %v528_v37 }
  0x18   : > { %v606_v43 = vpack.c.bf16 %v559_v35, %v558_v34  ;;  %v607_v48 = vpack.c.bf16 %v561_v40, %v560_v39  ;;  %v1848_v49 = vunpack.c.l.bf16 %v2079_v36  ;;  %v1849_v50 = vunpack.c.h.bf16 %v2079_v36 }
  0x19   : > { %2159 = vmatprep.mubr.msk.bf16.mxu0 %vm630_vm0, %v590_v42  ;;  %v395_v51 = vmul.f32 %v1784_v44, %v2301_v1  ;;  %v396_v52 = vmul.f32 %v1785_v45, %v2301_v1  ;;  %v1788_v53 = vunpack.c.l.bf16 %v2064_v41  ;;  %v1789_v54 = vunpack.c.h.bf16 %v2064_v41  ;;  %v2067_v41 = vld [vmem:[%s2296_s29 + $0x30] sm:$0xff]  }
  0x1a   : > { %2191 = vmatprep.mubr.msk.bf16.mxu1 %vm630_vm0, %v606_v43  ;;  %2160 = vmatmul.mubr.msk.bf16.vlgmr.msra.gmra.mxu0 %vm630_vm0, %v591_v47  ;;  %v427_v55 = vmul.f32 %v1848_v49, %v2301_v1  ;;  %v428_v56 = vmul.f32 %v1849_v50, %v2301_v1  ;;  %v1852_v57 = vunpack.c.l.bf16 %v2080_v46  ;;  %v1853_v58 = vunpack.c.h.bf16 %v2080_v46 }
  0x1b   : > { %2192 = vmatmul.mubr.msk.bf16.vlgmr.msra.gmra.mxu1 %vm630_vm0, %v607_v48  ;;  %v466_v59 = vadd.f32 %v2310_v10, %v395_v51  ;;  %v467_v60 = vadd.f32 %v2310_v10, %v396_v52  ;;  %v397_v61 = vmul.f32 %v1788_v53, %v2301_v1  ;;  %v398_v62 = vmul.f32 %v1789_v54, %v2301_v1  ;;  %v2083_v54 = vld [vmem:[%s2296_s29 + $0xb0] sm:$0xff]  }
  0x1c   : > { %v498_v63 = vadd.f32 %v2310_v10, %v427_v55  ;;  %v499_v0 = vadd.f32 %v2310_v10, %v428_v56  ;;  %v429_v2 = vmul.f32 %v1852_v57, %v2301_v1  ;;  %v430_v3 = vmul.f32 %v1853_v58, %v2301_v1 }
  0x1d   : > { %v530_v5 = vmax.f32 %v466_v59, 0.0  ;;  %v531_v6 = vmax.f32 %v467_v60, 0.0  ;;  %v468_v7 = vadd.f32 %v2310_v10, %v397_v61  ;;  %v469_v8 = vadd.f32 %v2310_v10, %v398_v62  ;;  %v2068_v59 = vld [vmem:[%s2296_s29 + $0x38] sm:$0xff]  }
  0x1e   : > { %v562_v9 = vmax.f32 %v498_v63, 0.0  ;;  %v563_v11 = vmax.f32 %v499_v0, 0.0  ;;  %v500_v12 = vadd.f32 %v2310_v10, %v429_v2  ;;  %v501_v13 = vadd.f32 %v2310_v10, %v430_v3  ;;  %v2084_v0 = vld [vmem:[%s2296_s29 + $0xb8] sm:$0xff]  }
  0x1f   : > { %v592_v15 = vpack.c.bf16 %v531_v6, %v530_v5  ;;  %v532_v16 = vmax.f32 %v468_v7, 0.0  ;;  %v533_v17 = vmax.f32 %v469_v8, 0.0  ;;  %v1792_v18 = vunpack.c.l.bf16 %v2065_v4 }
  0x20   : > { %v608_v20 = vpack.c.bf16 %v563_v11, %v562_v9  ;;  %v564_v21 = vmax.f32 %v500_v12, 0.0  ;;  %v565_v22 = vmax.f32 %v501_v13, 0.0  ;;  %v1793_v23 = vunpack.c.h.bf16 %v2065_v4 }
  0x21   : > { %2163 = vmatprep.mubr.msk.bf16.mxu0 %vm630_vm0, %v592_v15  ;;  %v593_v25 = vpack.c.bf16 %v533_v17, %v532_v16  ;;  %v399_v26 = vmul.f32 %v1792_v18, %v2301_v1  ;;  %v1856_v27 = vunpack.c.l.bf16 %v2081_v14  ;;  %v1857_v28 = vunpack.c.h.bf16 %v2081_v14  ;;  %v2069_v15 = vld [vmem:[%s2296_s29 + $0x40] sm:$0xff]  }
  0x22   : > { %2195 = vmatprep.mubr.msk.bf16.mxu1 %vm630_vm0, %v608_v20  ;;  %v609_v29 = vpack.c.bf16 %v565_v22, %v564_v21  ;;  %v400_v30 = vmul.f32 %v1793_v23, %v2301_v1  ;;  %v1796_v31 = vunpack.c.l.bf16 %v2066_v19  ;;  %v1797_v32 = vunpack.c.h.bf16 %v2066_v19 }
  0x23   : > { %2164 = vmatmul.mubr.msk.bf16.gmra.mxu0 %vm630_vm0, %v593_v25  ;;  %v470_v33 = vadd.f32 %v2310_v10, %v399_v26  ;;  %v431_v34 = vmul.f32 %v1856_v27, %v2301_v1  ;;  %v432_v35 = vmul.f32 %v1857_v28, %v2301_v1  ;;  %v1860_v36 = vunpack.c.l.bf16 %v2082_v24 }
  0x24   : > { %2196 = vmatmul.mubr.msk.bf16.gmra.mxu1 %vm630_vm0, %v609_v29  ;;  %v471_v37 = vadd.f32 %v2310_v10, %v400_v30  ;;  %v401_v38 = vmul.f32 %v1796_v31, %v2301_v1  ;;  %v402_v39 = vmul.f32 %v1797_v32, %v2301_v1  ;;  %v1861_v40 = vunpack.c.h.bf16 %v2082_v24  ;;  %v2085_v32 = vld [vmem:[%s2296_s29 + $0xc0] sm:$0xff]  }
  0x25   : > { %v534_v42 = vmax.f32 %v470_v33, 0.0  ;;  %v502_v43 = vadd.f32 %v2310_v10, %v431_v34  ;;  %v503_v44 = vadd.f32 %v2310_v10, %v432_v35  ;;  %v433_v45 = vmul.f32 %v1860_v36, %v2301_v1 }
  0x26   : > { %v535_v46 = vmax.f32 %v471_v37, 0.0  ;;  %v472_v47 = vadd.f32 %v2310_v10, %v401_v38  ;;  %v473_v48 = vadd.f32 %v2310_v10, %v402_v39  ;;  %v434_v49 = vmul.f32 %v1861_v40, %v2301_v1  ;;  %v2070_v37 = vld [vmem:[%s2296_s29 + $0x48] sm:$0xff]  }
  0x27   : > { %v566_v50 = vmax.f32 %v502_v43, 0.0  ;;  %v567_v51 = vmax.f32 %v503_v44, 0.0  ;;  %v504_v52 = vadd.f32 %v2310_v10, %v433_v45  ;;  %v1800_v53 = vunpack.c.l.bf16 %v2067_v41 }
  0x28   : > { %v594_v55 = vpack.c.bf16 %v535_v46, %v534_v42  ;;  %v536_v56 = vmax.f32 %v472_v47, 0.0  ;;  %v537_v57 = vmax.f32 %v473_v48, 0.0  ;;  %v505_v58 = vadd.f32 %v2310_v10, %v434_v49  ;;  %v2086_v42 = vld [vmem:[%s2296_s29 + $0xc8] sm:$0xff]  }
  0x29   : > { %v610_v60 = vpack.c.bf16 %v567_v51, %v566_v50  ;;  %v568_v61 = vmax.f32 %v504_v52, 0.0  ;;  %v1801_v62 = vunpack.c.h.bf16 %v2067_v41  ;;  %v403_v63 = vmul.f32 %v1800_v53, %v2301_v1 }
  0x2a   : > { %2167 = vmatprep.mubr.msk.bf16.mxu0 %vm630_vm0, %v594_v55  ;;  %v595_v2 = vpack.c.bf16 %v537_v57, %v536_v56  ;;  %v569_v3 = vmax.f32 %v505_v58, 0.0  ;;  %v1864_v4 = vunpack.c.l.bf16 %v2083_v54  ;;  %v1865_v5 = vunpack.c.h.bf16 %v2083_v54  ;;  %v2071_v55 = vld [vmem:[%s2296_s29 + $0x50] sm:$0xff]  }
  0x2b   : > { %2199 = vmatprep.mubr.msk.bf16.mxu1 %vm630_vm0, %v610_v60  ;;  %v404_v6 = vmul.f32 %v1801_v62, %v2301_v1  ;;  %v474_v7 = vadd.f32 %v2310_v10, %v403_v63  ;;  %v1804_v8 = vunpack.c.l.bf16 %v2068_v59  ;;  %v1805_v9 = vunpack.c.h.bf16 %v2068_v59 }
  0x2c   : > { %2168 = vmatmul.mubr.msk.bf16.gmra.mxu0 %vm630_vm0, %v595_v2  ;;  %v611_v11 = vpack.c.bf16 %v569_v3, %v568_v61  ;;  %v435_v12 = vmul.f32 %v1864_v4, %v2301_v1  ;;  %v436_v13 = vmul.f32 %v1865_v5, %v2301_v1  ;;  %v1868_v14 = vunpack.c.l.bf16 %v2084_v0  ;;  %v2087_v5 = vld [vmem:[%s2296_s29 + $0xd0] sm:$0xff]  }
  0x2d   : > { %v475_v16 = vadd.f32 %v2310_v10, %v404_v6  ;;  %v538_v17 = vmax.f32 %v474_v7, 0.0  ;;  %v405_v18 = vmul.f32 %v1804_v8, %v2301_v1  ;;  %v406_v19 = vmul.f32 %v1805_v9, %v2301_v1 }
  0x2e   : > { %2200 = vmatmul.mubr.msk.bf16.gmra.mxu1 %vm630_vm0, %v611_v11  ;;  %v506_v20 = vadd.f32 %v2310_v10, %v435_v12  ;;  %v507_v21 = vadd.f32 %v2310_v10, %v436_v13  ;;  %v1869_v22 = vunpack.c.h.bf16 %v2084_v0  ;;  %v437_v23 = vmul.f32 %v1868_v14, %v2301_v1 }
  0x2f   : > { %v539_v24 = vmax.f32 %v475_v16, 0.0  ;;  %v476_v25 = vadd.f32 %v2310_v10, %v405_v18  ;;  %v477_v26 = vadd.f32 %v2310_v10, %v406_v19  ;;  %v1808_v27 = vunpack.c.l.bf16 %v2069_v15 }
  0x30   : > { %v570_v28 = vmax.f32 %v506_v20, 0.0  ;;  %v571_v29 = vmax.f32 %v507_v21, 0.0  ;;  %v438_v30 = vmul.f32 %v1869_v22, %v2301_v1  ;;  %v508_v31 = vadd.f32 %v2310_v10, %v437_v23  ;;  %v2088_v20 = vld [vmem:[%s2296_s29 + $0xd8] sm:$0xff]  }
  0x31   : > { %v596_v33 = vpack.c.bf16 %v539_v24, %v538_v17  ;;  %v540_v34 = vmax.f32 %v476_v25, 0.0  ;;  %v541_v35 = vmax.f32 %v477_v26, 0.0  ;;  %v1809_v36 = vunpack.c.h.bf16 %v2069_v15  ;;  %v2072_v15 = vld [vmem:[%s2296_s29 + $0x58] sm:$0xff]  }
  0x32   : > { %v612_v38 = vpack.c.bf16 %v571_v29, %v570_v28  ;;  %v509_v39 = vadd.f32 %v2310_v10, %v438_v30  ;;  %v572_v40 = vmax.f32 %v508_v31, 0.0  ;;  %v407_v41 = vmul.f32 %v1808_v27, %v2301_v1 }
  0x33   : > { %2171 = vmatprep.mubr.msk.bf16.mxu0 %vm630_vm0, %v596_v33  ;;  %v597_v43 = vpack.c.bf16 %v541_v35, %v540_v34  ;;  %v408_v44 = vmul.f32 %v1809_v36, %v2301_v1  ;;  %v1872_v45 = vunpack.c.l.bf16 %v2085_v32  ;;  %v1873_v46 = vunpack.c.h.bf16 %v2085_v32  ;;  %v2073_v33 = vld [vmem:[%s2296_s29 + $0x60] sm:$0xff]  }
  0x34   : > { %2203 = vmatprep.mubr.msk.bf16.mxu1 %vm630_vm0, %v612_v38  ;;  %v573_v47 = vmax.f32 %v509_v39, 0.0  ;;  %v478_v48 = vadd.f32 %v2310_v10, %v407_v41  ;;  %v1812_v49 = vunpack.c.l.bf16 %v2070_v37  ;;  %v1813_v50 = vunpack.c.h.bf16 %v2070_v37 }
  0x35   : > { %2172 = vmatmul.mubr.msk.bf16.gmra.mxu0 %vm630_vm0, %v597_v43  ;;  %v479_v51 = vadd.f32 %v2310_v10, %v408_v44  ;;  %v439_v52 = vmul.f32 %v1872_v45, %v2301_v1  ;;  %v440_v53 = vmul.f32 %v1873_v46, %v2301_v1  ;;  %v1876_v54 = vunpack.c.l.bf16 %v2086_v42  ;;  %v2089_v46 = vld [vmem:[%s2296_s29 + $0xe0] sm:$0xff]  }
  0x36   : > { %v613_v56 = vpack.c.bf16 %v573_v47, %v572_v40  ;;  %v542_v57 = vmax.f32 %v478_v48, 0.0  ;;  %v409_v58 = vmul.f32 %v1812_v49, %v2301_v1  ;;  %v410_v59 = vmul.f32 %v1813_v50, %v2301_v1 }
  0x37   : > { %v543_v60 = vmax.f32 %v479_v51, 0.0  ;;  %v510_v61 = vadd.f32 %v2310_v10, %v439_v52  ;;  %v511_v62 = vadd.f32 %v2310_v10, %v440_v53  ;;  %v1877_v63 = vunpack.c.h.bf16 %v2086_v42 }
  0x38   : > { %2204 = vmatmul.mubr.msk.bf16.gmra.mxu1 %vm630_vm0, %v613_v56  ;;  %v480_v0 = vadd.f32 %v2310_v10, %v409_v58  ;;  %v481_v2 = vadd.f32 %v2310_v10, %v410_v59  ;;  %v441_v3 = vmul.f32 %v1876_v54, %v2301_v1  ;;  %v1816_v4 = vunpack.c.l.bf16 %v2071_v55 }
  0x39   : > { %v598_v6 = vpack.c.bf16 %v543_v60, %v542_v57  ;;  %v574_v7 = vmax.f32 %v510_v61, 0.0  ;;  %v575_v8 = vmax.f32 %v511_v62, 0.0  ;;  %v442_v9 = vmul.f32 %v1877_v63, %v2301_v1 }
  0x3a   : > { %v544_v11 = vmax.f32 %v480_v0, 0.0  ;;  %v545_v12 = vmax.f32 %v481_v2, 0.0  ;;  %v512_v13 = vadd.f32 %v2310_v10, %v441_v3  ;;  %v1817_v14 = vunpack.c.h.bf16 %v2071_v55  ;;  %v2074_v55 = vld [vmem:[%s2296_s29 + $0x68] sm:$0xff]  }
  0x3b   : > { %2175 = vmatprep.mubr.msk.bf16.mxu0 %vm630_vm0, %v598_v6  ;;  %v614_v16 = vpack.c.bf16 %v575_v8, %v574_v7  ;;  %v513_v17 = vadd.f32 %v2310_v10, %v442_v9  ;;  %v411_v18 = vmul.f32 %v1816_v4, %v2301_v1  ;;  %v1880_v19 = vunpack.c.l.bf16 %v2087_v5  ;;  %v2090_v0 = vld [vmem:[%s2296_s29 + $0xe8] sm:$0xff]  }
  0x3c   : > { %v599_v21 = vpack.c.bf16 %v545_v12, %v544_v11  ;;  %v576_v22 = vmax.f32 %v512_v13, 0.0  ;;  %v412_v23 = vmul.f32 %v1817_v14, %v2301_v1  ;;  %v1881_v24 = vunpack.c.h.bf16 %v2087_v5  ;;  %v2075_v11 = vld [vmem:[%s2296_s29 + $0x70] sm:$0xff]  }
  0x3d   : > { %2207 = vmatprep.mubr.msk.bf16.mxu1 %vm630_vm0, %v614_v16  ;;  %v577_v25 = vmax.f32 %v513_v17, 0.0  ;;  %v482_v26 = vadd.f32 %v2310_v10, %v411_v18  ;;  %v443_v27 = vmul.f32 %v1880_v19, %v2301_v1  ;;  %v1820_v28 = vunpack.c.l.bf16 %v2072_v15 }
  0x3e   : > { %2176 = vmatmul.mubr.msk.bf16.gmra.mxu0 %vm630_vm0, %v599_v21  ;;  %v483_v29 = vadd.f32 %v2310_v10, %v412_v23  ;;  %v444_v30 = vmul.f32 %v1881_v24, %v2301_v1  ;;  %v1821_v31 = vunpack.c.h.bf16 %v2072_v15  ;;  %v1884_v32 = vunpack.c.l.bf16 %v2088_v20  ;;  %v2091_v24 = vld [vmem:[%s2296_s29 + $0xf0] sm:$0xff]  }
  0x3f   : > { %v615_v34 = vpack.c.bf16 %v577_v25, %v576_v22  ;;  %v546_v35 = vmax.f32 %v482_v26, 0.0  ;;  %v514_v36 = vadd.f32 %v2310_v10, %v443_v27  ;;  %v413_v37 = vmul.f32 %v1820_v28, %v2301_v1 }
  0x40   : > { %v547_v38 = vmax.f32 %v483_v29, 0.0  ;;  %v515_v39 = vadd.f32 %v2310_v10, %v444_v30  ;;  %v414_v40 = vmul.f32 %v1821_v31, %v2301_v1  ;;  %v1885_v41 = vunpack.c.h.bf16 %v2088_v20 }
  0x41   : > { %2208 = vmatmul.mubr.msk.bf16.gmra.mxu1 %vm630_vm0, %v615_v34  ;;  %v578_v42 = vmax.f32 %v514_v36, 0.0  ;;  %v484_v43 = vadd.f32 %v2310_v10, %v413_v37  ;;  %v445_v44 = vmul.f32 %v1884_v32, %v2301_v1  ;;  %v1824_v45 = vunpack.c.l.bf16 %v2073_v33 }
  0x42   : > { %v600_v47 = vpack.c.bf16 %v547_v38, %v546_v35  ;;  %v579_v48 = vmax.f32 %v515_v39, 0.0  ;;  %v485_v49 = vadd.f32 %v2310_v10, %v414_v40  ;;  %v446_v50 = vmul.f32 %v1885_v41, %v2301_v1 }
  0x43   : > { %v548_v51 = vmax.f32 %v484_v43, 0.0  ;;  %v516_v52 = vadd.f32 %v2310_v10, %v445_v44  ;;  %v1825_v53 = vunpack.c.h.bf16 %v2073_v33  ;;  %v415_v54 = vmul.f32 %v1824_v45, %v2301_v1  ;;  %v2076_v33 = vld [vmem:[%s2296_s29 + $0x78] sm:$0xff]  }
  0x44   : > { %2179 = vmatprep.mubr.msk.bf16.mxu0 %vm630_vm0, %v600_v47  ;;  %v616_v56 = vpack.c.bf16 %v579_v48, %v578_v42  ;;  %v549_v57 = vmax.f32 %v485_v49, 0.0  ;;  %v517_v58 = vadd.f32 %v2310_v10, %v446_v50  ;;  %v1888_v59 = vunpack.c.l.bf16 %v2089_v46  ;;  %v2092_v42 = vld [vmem:[%s2296_s29 + $0xf8] sm:$0xff]  }
  0x45   : > { %v580_v60 = vmax.f32 %v516_v52, 0.0  ;;  %v416_v61 = vmul.f32 %v1825_v53, %v2301_v1  ;;  %v486_v62 = vadd.f32 %v2310_v10, %v415_v54  ;;  %v1889_v63 = vunpack.c.h.bf16 %v2089_v46 }
  0x46   : > { %2211 = vmatprep.mubr.msk.bf16.mxu1 %vm630_vm0, %v616_v56  ;;  %v601_v2 = vpack.c.bf16 %v549_v57, %v548_v51  ;;  %v581_v3 = vmax.f32 %v517_v58, 0.0  ;;  %v447_v4 = vmul.f32 %v1888_v59, %v2301_v1  ;;  %v1828_v5 = vunpack.c.l.bf16 %v2074_v55 }
  0x47   : > { %v487_v6 = vadd.f32 %v2310_v10, %v416_v61  ;;  %v550_v7 = vmax.f32 %v486_v62, 0.0  ;;  %v448_v8 = vmul.f32 %v1889_v63, %v2301_v1  ;;  %v1829_v9 = vunpack.c.h.bf16 %v2074_v55 }
  0x48   : > { %2180 = vmatmul.mubr.msk.bf16.gmra.mxu0 %vm630_vm0, %v601_v2  ;;  %v617_v12 = vpack.c.bf16 %v581_v3, %v580_v60  ;;  %v518_v13 = vadd.f32 %v2310_v10, %v447_v4  ;;  %v417_v14 = vmul.f32 %v1828_v5, %v2301_v1  ;;  %v1892_v15 = vunpack.c.l.bf16 %v2090_v0 }
  0x49   : > { %v551_v16 = vmax.f32 %v487_v6, 0.0  ;;  %v519_v17 = vadd.f32 %v2310_v10, %v448_v8  ;;  %v418_v18 = vmul.f32 %v1829_v9, %v2301_v1  ;;  %v1893_v19 = vunpack.c.h.bf16 %v2090_v0 }
  0x4a   : > { %2212 = vmatmul.mubr.msk.bf16.gmra.mxu1 %vm630_vm0, %v617_v12  ;;  %v582_v20 = vmax.f32 %v518_v13, 0.0  ;;  %v488_v21 = vadd.f32 %v2310_v10, %v417_v14  ;;  %v449_v22 = vmul.f32 %v1892_v15, %v2301_v1  ;;  %v1832_v23 = vunpack.c.l.bf16 %v2075_v11 }
  0x4b   : > { %v602_v25 = vpack.c.bf16 %v551_v16, %v550_v7  ;;  %v583_v26 = vmax.f32 %v519_v17, 0.0  ;;  %v489_v27 = vadd.f32 %v2310_v10, %v418_v18  ;;  %v450_v28 = vmul.f32 %v1893_v19, %v2301_v1  ;;  %v2510_v16 = vld [vmem:[%s2685_s5] ss:$0 sm:$0xff] }
  0x4c   : > { %v552_v29 = vmax.f32 %v488_v21, 0.0  ;;  %v520_v30 = vadd.f32 %v2310_v10, %v449_v22  ;;  %v1833_v31 = vunpack.c.h.bf16 %v2075_v11  ;;  %v419_v32 = vmul.f32 %v1832_v23, %v2301_v1 }
  0x4d   : > { %2183 = vmatprep.mubr.msk.bf16.mxu0 %vm630_vm0, %v602_v25  ;;  %v618_v34 = vpack.c.bf16 %v583_v26, %v582_v20  ;;  %v553_v35 = vmax.f32 %v489_v27, 0.0  ;;  %v521_v36 = vadd.f32 %v2310_v10, %v450_v28  ;;  %v1896_v37 = vunpack.c.l.bf16 %v2091_v24 }
  0x4e   : > { %v584_v38 = vmax.f32 %v520_v30, 0.0  ;;  %v420_v39 = vmul.f32 %v1833_v31, %v2301_v1  ;;  %v490_v40 = vadd.f32 %v2310_v10, %v419_v32  ;;  %v1897_v41 = vunpack.c.h.bf16 %v2091_v24 }
  0x4f   : > { %2215 = vmatprep.mubr.msk.bf16.mxu1 %vm630_vm0, %v618_v34  ;;  %v603_v43 = vpack.c.bf16 %v553_v35, %v552_v29  ;;  %v585_v44 = vmax.f32 %v521_v36, 0.0  ;;  %v451_v45 = vmul.f32 %v1896_v37, %v2301_v1  ;;  %v1836_v46 = vunpack.c.l.bf16 %v2076_v33 }
  0x50   : > { %v491_v47 = vadd.f32 %v2310_v10, %v420_v39  ;;  %v554_v48 = vmax.f32 %v490_v40, 0.0  ;;  %v452_v49 = vmul.f32 %v1897_v41, %v2301_v1  ;;  %v1837_v50 = vunpack.c.h.bf16 %v2076_v33 }
  0x51   : > { %2184 = vmatmul.mubr.msk.bf16.gmra.mxu0 %vm630_vm0, %v603_v43  ;;  %v619_v51 = vpack.c.bf16 %v585_v44, %v584_v38  ;;  %v522_v52 = vadd.f32 %v2310_v10, %v451_v45  ;;  %v421_v53 = vmul.f32 %v1836_v46, %v2301_v1  ;;  %v1900_v54 = vunpack.c.l.bf16 %v2092_v42 }
  0x52   : > { %v555_v55 = vmax.f32 %v491_v47, 0.0  ;;  %v523_v56 = vadd.f32 %v2310_v10, %v452_v49  ;;  %v422_v57 = vmul.f32 %v1837_v50, %v2301_v1  ;;  %v1901_v58 = vunpack.c.h.bf16 %v2092_v42 }
  0x53   : > { %2216 = vmatmul.mubr.msk.bf16.gmra.mxu1 %vm630_vm0, %v619_v51  ;;  %v586_v59 = vmax.f32 %v522_v52, 0.0  ;;  %v492_v60 = vadd.f32 %v2310_v10, %v421_v53  ;;  %v453_v61 = vmul.f32 %v1900_v54, %v2301_v1 }
  0x54   : > { %v604_v62 = vpack.c.bf16 %v555_v55, %v554_v48  ;;  %v587_v63 = vmax.f32 %v523_v56, 0.0  ;;  %v493_v0 = vadd.f32 %v2310_v10, %v422_v57  ;;  %v454_v2 = vmul.f32 %v1901_v58, %v2301_v1  ;;  %v2503_v1 = vld [vmem:[%s2684_s4] ss:$0 sm:$0xff] }
  0x55   : > { %v556_v3 = vmax.f32 %v492_v60, 0.0  ;;  %v524_v4 = vadd.f32 %v2310_v10, %v453_v61 }
  0x56   : > { %2187 = vmatprep.mubr.msk.bf16.mxu0 %vm630_vm0, %v604_v62  ;;  %v620_v5 = vpack.c.bf16 %v587_v63, %v586_v59  ;;  %v557_v6 = vmax.f32 %v493_v0, 0.0  ;;  %v525_v7 = vadd.f32 %v2310_v10, %v454_v2 }
  0x57   : > { %v588_v8 = vmax.f32 %v524_v4, 0.0 }
  0x58   : > { %2219 = vmatprep.mubr.msk.bf16.mxu1 %vm630_vm0, %v620_v5  ;;  %v605_v9 = vpack.c.bf16 %v557_v6, %v556_v3  ;;  %v589_v11 = vmax.f32 %v525_v7, 0.0 }
  0x5a   : > { %2188 = vmatmul.mubr.msk.bf16.gmra.mxu0 %vm630_vm0, %v605_v9  ;;  %v621_v12 = vpack.c.bf16 %v589_v11, %v588_v8 }
  0x5c   : > { %2220 = vmatmul.mubr.msk.bf16.gmra.mxu1 %vm630_vm0, %v621_v12 }
  0xda   : > { %v2161_v13 = vpop.f32.mrf.mxu0 }
  0xdb   : > { %v2193_v14 = vpop.f32.mrf.mxu1  ;;  %v1025_v15 = vmul.f32 %v2161_v13, %v2503_v1 }
  0xdc   : > { %v1057_v10 = vmul.f32 %v2193_v14, %v2503_v1  ;;  %v761_v17 = vpop.f32.mrf.mxu0 }
  0xdd   : > { %v889_v18 = vpop.f32.mrf.mxu1  ;;  %v1023_v19 = vmul.f32 %v2503_v1, %v761_v17  ;;  %v1096_v23 = vadd.f32 %v2510_v16, %v1025_v15 }
  0xde   : > { %v1055_v20 = vmul.f32 %v2503_v1, %v889_v18  ;;  %v2162_v21 = vpop.f32.mrf.mxu0  ;;  %v1128_v24 = vadd.f32 %v2510_v16, %v1057_v10 }
  0xdf   : > { %v2194_v22 = vpop.f32.mrf.mxu1  ;;  %v1094_v25 = vadd.f32 %v2510_v16, %v1023_v19  ;;  %v1026_v26 = vmul.f32 %v2162_v21, %v2503_v1  ;;  %v1160_v35 = vmax.f32 %v1096_v23, 0.0 }
  0xe0   : > { %v1058_v27 = vmul.f32 %v2194_v22, %v2503_v1  ;;  %v764_v28 = vpop.f32.mrf.mxu0  ;;  %v1126_v30 = vadd.f32 %v2510_v16, %v1055_v20  ;;  %v1192_v36 = vmax.f32 %v1128_v24, 0.0 }
  0xe1   : > { %v892_v29 = vpop.f32.mrf.mxu1  ;;  %v1024_v31 = vmul.f32 %v2503_v1, %v764_v28  ;;  %v1097_v33 = vadd.f32 %v2510_v16, %v1026_v26  ;;  %v1158_v40 = vmax.f32 %v1094_v25, 0.0 }
  0xe2   : > { %v1056_v32 = vmul.f32 %v2503_v1, %v892_v29  ;;  %v1129_v34 = vadd.f32 %v2510_v16, %v1058_v27  ;;  %v1190_v45 = vmax.f32 %v1126_v30, 0.0 }
  0xe3   : > { %v1095_v37 = vadd.f32 %v2510_v16, %v1024_v31  ;;  %v2165_v39 = vpop.f32.mrf.mxu0  ;;  %v1161_v41 = vmax.f32 %v1097_v33, 0.0 }
  0xe4   : > { %v1127_v38 = vadd.f32 %v2510_v16, %v1056_v32  ;;  %v1193_v42 = vmax.f32 %v1129_v34, 0.0  ;;  %v1029_v43 = vmul.f32 %v2165_v39, %v2503_v1  ;;  %v2197_v44 = vpop.f32.mrf.mxu1 }
  0xe5   : > { %v1159_v46 = vmax.f32 %v1095_v37, 0.0  ;;  %v1061_v48 = vmul.f32 %v2197_v44, %v2503_v1  ;;  %v777_v49 = vpop.f32.mrf.mxu0  ;;  %v1910_v50 = vpack.c.bf16 %v1161_v41, %v1160_v35 }
  0xe6   : > { %v1191_v47 = vmax.f32 %v1127_v38, 0.0  ;;  %v1990_v51 = vpack.c.bf16 %v1193_v42, %v1192_v36  ;;  %v1027_v52 = vmul.f32 %v2503_v1, %v777_v49  ;;  %v905_v53 = vpop.f32.mrf.mxu1  ;;  %v1100_v58 = vadd.f32 %v2510_v16, %v1029_v43 }
  0xe7   : > { %v1905_v54 = vpack.c.bf16 %v1159_v46, %v1158_v40  ;;  %v1059_v56 = vmul.f32 %v2503_v1, %v905_v53  ;;  %v2166_v57 = vpop.f32.mrf.mxu0  ;;  %2093 = vst [vmem:[%s2532_s16 + $0x8] sm:$0xff] %v1910_v50   ;;  %v1132_v61 = vadd.f32 %v2510_v16, %v1061_v48 }
  0xe8   : > { %v1985_v55 = vpack.c.bf16 %v1191_v47, %v1190_v45  ;;  %2109 = vst [vmem:[%s2532_s16 + $0x88] sm:$0xff] %v1990_v51   ;;  %v1030_v59 = vmul.f32 %v2166_v57, %v2503_v1  ;;  %v2198_v60 = vpop.f32.mrf.mxu1  ;;  %v1098_v0 = vadd.f32 %v2510_v16, %v1027_v52  ;;  %v1164_v8 = vmax.f32 %v1100_v58, 0.0 }
  0xe9   : > { %1906 = vst [vmem:[%s2532_s16] sm:$0xff] %v1905_v54   ;;  %v1062_v62 = vmul.f32 %v2198_v60, %v2503_v1  ;;  %v780_v63 = vpop.f32.mrf.mxu0  ;;  %v1130_v5 = vadd.f32 %v2510_v16, %v1059_v56  ;;  %v1196_v13 = vmax.f32 %v1132_v61, 0.0 }
  0xea   : > { %2108 = vst [vmem:[%s2532_s16 + $0x80] sm:$0xff] %v1985_v55   ;;  %v1101_v2 = vadd.f32 %v2510_v16, %v1030_v59  ;;  %v1028_v3 = vmul.f32 %v2503_v1, %v780_v63  ;;  %v908_v4 = vpop.f32.mrf.mxu1  ;;  %v1162_v10 = vmax.f32 %v1098_v0, 0.0 }
  0xeb   : > { %v1133_v6 = vadd.f32 %v2510_v16, %v1062_v62  ;;  %v1060_v7 = vmul.f32 %v2503_v1, %v908_v4  ;;  %v1194_v22 = vmax.f32 %v1130_v5, 0.0 }
  0xec   : > { %v1165_v9 = vmax.f32 %v1101_v2, 0.0  ;;  %v1099_v11 = vadd.f32 %v2510_v16, %v1028_v3  ;;  %v2169_v12 = vpop.f32.mrf.mxu0 }
  0xed   : > { %v1197_v14 = vmax.f32 %v1133_v6, 0.0  ;;  %v1131_v15 = vadd.f32 %v2510_v16, %v1060_v7  ;;  %v1033_v19 = vmul.f32 %v2169_v12, %v2503_v1 }
  0xee   : > { %v1920_v17 = vpack.c.bf16 %v1165_v9, %v1164_v8  ;;  %v1163_v18 = vmax.f32 %v1099_v11, 0.0  ;;  %v2201_v20 = vpop.f32.mrf.mxu1  ;;  %v793_v21 = vpop.f32.mrf.mxu0 }
  0xef   : > { %v2000_v23 = vpack.c.bf16 %v1197_v14, %v1196_v13  ;;  %v1195_v24 = vmax.f32 %v1131_v15, 0.0  ;;  %v1065_v25 = vmul.f32 %v2201_v20, %v2503_v1  ;;  %v1031_v27 = vmul.f32 %v2503_v1, %v793_v21 }
  0xf0   : > { %2095 = vst [vmem:[%s2532_s16 + $0x18] sm:$0xff] %v1920_v17   ;;  %v1915_v26 = vpack.c.bf16 %v1163_v18, %v1162_v10  ;;  %v921_v28 = vpop.f32.mrf.mxu1  ;;  %v2170_v29 = vpop.f32.mrf.mxu0  ;;  %v1104_v32 = vadd.f32 %v2510_v16, %v1033_v19 }
  0xf1   : > { %2111 = vst [vmem:[%s2532_s16 + $0x98] sm:$0xff] %v2000_v23   ;;  %v1995_v30 = vpack.c.bf16 %v1195_v24, %v1194_v22  ;;  %v1063_v31 = vmul.f32 %v2503_v1, %v921_v28  ;;  %v1136_v33 = vadd.f32 %v2510_v16, %v1065_v25  ;;  %v1034_v34 = vmul.f32 %v2170_v29, %v2503_v1 }
  0xf2   : > { %2094 = vst [vmem:[%s2532_s16 + $0x10] sm:$0xff] %v1915_v26   ;;  %v2202_v35 = vpop.f32.mrf.mxu1  ;;  %v796_v36 = vpop.f32.mrf.mxu0  ;;  %v1102_v37 = vadd.f32 %v2510_v16, %v1031_v27  ;;  %v1168_v47 = vmax.f32 %v1104_v32, 0.0 }
  0xf3   : > { %2110 = vst [vmem:[%s2532_s16 + $0x90] sm:$0xff] %v1995_v30   ;;  %v1066_v38 = vmul.f32 %v2202_v35, %v2503_v1  ;;  %v1032_v39 = vmul.f32 %v2503_v1, %v796_v36  ;;  %v1134_v40 = vadd.f32 %v2510_v16, %v1063_v31  ;;  %v1105_v41 = vadd.f32 %v2510_v16, %v1034_v34 }
  0xf4   : > { %v924_v42 = vpop.f32.mrf.mxu1  ;;  %v1200_v48 = vmax.f32 %v1136_v33, 0.0  ;;  %v1166_v51 = vmax.f32 %v1102_v37, 0.0 }
  0xf5   : > { %v1137_v43 = vadd.f32 %v2510_v16, %v1066_v38  ;;  %v1103_v44 = vadd.f32 %v2510_v16, %v1032_v39  ;;  %v1064_v45 = vmul.f32 %v2503_v1, %v924_v42  ;;  %v2173_v46 = vpop.f32.mrf.mxu0  ;;  %v1169_v49 = vmax.f32 %v1105_v41, 0.0 }
  0xf6   : > { %v1037_v50 = vmul.f32 %v2173_v46, %v2503_v1  ;;  %v1198_v56 = vmax.f32 %v1134_v40, 0.0 }
  0xf7   : > { %v1201_v52 = vmax.f32 %v1137_v43, 0.0  ;;  %v1167_v53 = vmax.f32 %v1103_v44, 0.0  ;;  %v1135_v54 = vadd.f32 %v2510_v16, %v1064_v45  ;;  %v809_v55 = vpop.f32.mrf.mxu0  ;;  %v1930_v57 = vpack.c.bf16 %v1169_v49, %v1168_v47 }
  0xf8   : > { %v2205_v58 = vpop.f32.mrf.mxu1  ;;  %v1035_v59 = vmul.f32 %v2503_v1, %v809_v55  ;;  %v1108_v2 = vadd.f32 %v2510_v16, %v1037_v50 }
  0xf9   : > { %v2010_v60 = vpack.c.bf16 %v1201_v52, %v1200_v48  ;;  %v1925_v61 = vpack.c.bf16 %v1167_v53, %v1166_v51  ;;  %v1199_v62 = vmax.f32 %v1135_v54, 0.0  ;;  %v1069_v63 = vmul.f32 %v2205_v58, %v2503_v1  ;;  %v2174_v0 = vpop.f32.mrf.mxu0  ;;  %2097 = vst [vmem:[%s2532_s16 + $0x28] sm:$0xff] %v1930_v57  }
  0xfa   : > { %v937_v3 = vpop.f32.mrf.mxu1  ;;  %v1038_v4 = vmul.f32 %v2174_v0, %v2503_v1  ;;  %v1106_v8 = vadd.f32 %v2510_v16, %v1035_v59  ;;  %v1172_v15 = vmax.f32 %v1108_v2, 0.0 }
  0xfb   : > { %2113 = vst [vmem:[%s2532_s16 + $0xa8] sm:$0xff] %v2010_v60   ;;  %2096 = vst [vmem:[%s2532_s16 + $0x20] sm:$0xff] %v1925_v61   ;;  %v2005_v5 = vpack.c.bf16 %v1199_v62, %v1198_v56  ;;  %v1067_v6 = vmul.f32 %v2503_v1, %v937_v3  ;;  %v812_v7 = vpop.f32.mrf.mxu0  ;;  %v1140_v13 = vadd.f32 %v2510_v16, %v1069_v63 }
  0xfc   : > { %v1109_v9 = vadd.f32 %v2510_v16, %v1038_v4  ;;  %v2206_v11 = vpop.f32.mrf.mxu1  ;;  %v1036_v12 = vmul.f32 %v2503_v1, %v812_v7  ;;  %v1170_v24 = vmax.f32 %v1106_v8, 0.0 }
  0xfd   : > { %2112 = vst [vmem:[%s2532_s16 + $0xa0] sm:$0xff] %v2005_v5   ;;  %v1070_v14 = vmul.f32 %v2206_v11, %v2503_v1  ;;  %v1138_v20 = vadd.f32 %v2510_v16, %v1067_v6  ;;  %v1204_v28 = vmax.f32 %v1140_v13, 0.0 }
  0xfe   : > { %v1173_v10 = vmax.f32 %v1109_v9, 0.0  ;;  %v1107_v17 = vadd.f32 %v2510_v16, %v1036_v12  ;;  %v940_v18 = vpop.f32.mrf.mxu1  ;;  %v2177_v19 = vpop.f32.mrf.mxu0 }
  0xff   : > { %v1141_v21 = vadd.f32 %v2510_v16, %v1070_v14  ;;  %v1068_v22 = vmul.f32 %v2503_v1, %v940_v18  ;;  %v1041_v23 = vmul.f32 %v2177_v19, %v2503_v1  ;;  %v1202_v36 = vmax.f32 %v1138_v20, 0.0 }
 0x100   : > { %v1940_v25 = vpack.c.bf16 %v1173_v10, %v1172_v15  ;;  %v1171_v26 = vmax.f32 %v1107_v17, 0.0  ;;  %v825_v27 = vpop.f32.mrf.mxu0 }
 0x101   : > { %v1205_v29 = vmax.f32 %v1141_v21, 0.0  ;;  %v1139_v30 = vadd.f32 %v2510_v16, %v1068_v22  ;;  %v2209_v31 = vpop.f32.mrf.mxu1  ;;  %v1039_v32 = vmul.f32 %v2503_v1, %v825_v27  ;;  %v1112_v39 = vadd.f32 %v2510_v16, %v1041_v23 }
 0x102   : > { %2099 = vst [vmem:[%s2532_s16 + $0x38] sm:$0xff] %v1940_v25   ;;  %v1935_v33 = vpack.c.bf16 %v1171_v26, %v1170_v24  ;;  %v1073_v34 = vmul.f32 %v2209_v31, %v2503_v1  ;;  %v2178_v35 = vpop.f32.mrf.mxu0 }
 0x103   : > { %v2020_v37 = vpack.c.bf16 %v1205_v29, %v1204_v28  ;;  %v1203_v38 = vmax.f32 %v1139_v30, 0.0  ;;  %v953_v40 = vpop.f32.mrf.mxu1  ;;  %v1042_v42 = vmul.f32 %v2178_v35, %v2503_v1  ;;  %v1110_v46 = vadd.f32 %v2510_v16, %v1039_v32 }
 0x104   : > { %2098 = vst [vmem:[%s2532_s16 + $0x30] sm:$0xff] %v1935_v33   ;;  %v1071_v41 = vmul.f32 %v2503_v1, %v953_v40  ;;  %v828_v43 = vpop.f32.mrf.mxu0  ;;  %v1144_v45 = vadd.f32 %v2510_v16, %v1073_v34  ;;  %v1176_v51 = vmax.f32 %v1112_v39, 0.0 }
 0x105   : > { %2115 = vst [vmem:[%s2532_s16 + $0xb8] sm:$0xff] %v2020_v37   ;;  %v2015_v44 = vpack.c.bf16 %v1203_v38, %v1202_v36  ;;  %v2210_v47 = vpop.f32.mrf.mxu1  ;;  %v1040_v48 = vmul.f32 %v2503_v1, %v828_v43  ;;  %v1113_v49 = vadd.f32 %v2510_v16, %v1042_v42  ;;  %v1174_v60 = vmax.f32 %v1110_v46, 0.0 }
 0x106   : > { %v1074_v50 = vmul.f32 %v2210_v47, %v2503_v1  ;;  %v1142_v54 = vadd.f32 %v2510_v16, %v1071_v41  ;;  %v1208_v59 = vmax.f32 %v1144_v45, 0.0 }
 0x107   : > { %2114 = vst [vmem:[%s2532_s16 + $0xb0] sm:$0xff] %v2015_v44   ;;  %v1111_v52 = vadd.f32 %v2510_v16, %v1040_v48  ;;  %v956_v53 = vpop.f32.mrf.mxu1  ;;  %v1177_v55 = vmax.f32 %v1113_v49, 0.0 }
 0x108   : > { %v1145_v56 = vadd.f32 %v2510_v16, %v1074_v50  ;;  %v1072_v57 = vmul.f32 %v2503_v1, %v956_v53  ;;  %v2181_v58 = vpop.f32.mrf.mxu0  ;;  %v1206_v7 = vmax.f32 %v1142_v54, 0.0 }
 0x109   : > { %v1175_v61 = vmax.f32 %v1111_v52, 0.0  ;;  %v1950_v62 = vpack.c.bf16 %v1177_v55, %v1176_v51  ;;  %v1045_v2 = vmul.f32 %v2181_v58, %v2503_v1 }
 0x10a   : > { %v1209_v63 = vmax.f32 %v1145_v56, 0.0  ;;  %v1143_v0 = vadd.f32 %v2510_v16, %v1072_v57  ;;  %v2213_v3 = vpop.f32.mrf.mxu1  ;;  %v841_v4 = vpop.f32.mrf.mxu0 }
 0x10b   : > { %v1945_v5 = vpack.c.bf16 %v1175_v61, %v1174_v60  ;;  %v1077_v6 = vmul.f32 %v2213_v3, %v2503_v1  ;;  %2101 = vst [vmem:[%s2532_s16 + $0x48] sm:$0xff] %v1950_v62   ;;  %v1043_v11 = vmul.f32 %v2503_v1, %v841_v4  ;;  %v1116_v10 = vadd.f32 %v2510_v16, %v1045_v2 }
 0x10c   : > { %v2030_v8 = vpack.c.bf16 %v1209_v63, %v1208_v59  ;;  %v1207_v9 = vmax.f32 %v1143_v0, 0.0  ;;  %v969_v12 = vpop.f32.mrf.mxu1  ;;  %v2182_v13 = vpop.f32.mrf.mxu0 }
 0x10d   : > { %2100 = vst [vmem:[%s2532_s16 + $0x40] sm:$0xff] %v1945_v5   ;;  %v1075_v14 = vmul.f32 %v2503_v1, %v969_v12  ;;  %v1046_v17 = vmul.f32 %v2182_v13, %v2503_v1  ;;  %v1148_v20 = vadd.f32 %v2510_v16, %v1077_v6  ;;  %v1114_v22 = vadd.f32 %v2510_v16, %v1043_v11 }
 0x10e   : > { %2117 = vst [vmem:[%s2532_s16 + $0xc8] sm:$0xff] %v2030_v8   ;;  %v2025_v15 = vpack.c.bf16 %v1207_v9, %v1206_v7  ;;  %v2214_v18 = vpop.f32.mrf.mxu1  ;;  %v844_v19 = vpop.f32.mrf.mxu0  ;;  %v1180_v30 = vmax.f32 %v1116_v10, 0.0 }
 0x10f   : > { %v1078_v21 = vmul.f32 %v2214_v18, %v2503_v1  ;;  %v1117_v23 = vadd.f32 %v2510_v16, %v1046_v17  ;;  %v1044_v24 = vmul.f32 %v2503_v1, %v844_v19  ;;  %v1146_v26 = vadd.f32 %v2510_v16, %v1075_v14 }
 0x110   : > { %2116 = vst [vmem:[%s2532_s16 + $0xc0] sm:$0xff] %v2025_v15   ;;  %v972_v25 = vpop.f32.mrf.mxu1  ;;  %v1212_v34 = vmax.f32 %v1148_v20, 0.0  ;;  %v1178_v39 = vmax.f32 %v1114_v22, 0.0 }
 0x111   : > { %v1149_v27 = vadd.f32 %v2510_v16, %v1078_v21  ;;  %v1076_v28 = vmul.f32 %v2503_v1, %v972_v25  ;;  %v2185_v29 = vpop.f32.mrf.mxu0  ;;  %v1181_v31 = vmax.f32 %v1117_v23, 0.0  ;;  %v1115_v32 = vadd.f32 %v2510_v16, %v1044_v24 }
 0x112   : > { %v1049_v33 = vmul.f32 %v2185_v29, %v2503_v1  ;;  %v1210_v43 = vmax.f32 %v1146_v26, 0.0 }
 0x113   : > { %v1213_v35 = vmax.f32 %v1149_v27, 0.0  ;;  %v1147_v36 = vadd.f32 %v2510_v16, %v1076_v28  ;;  %v2217_v37 = vpop.f32.mrf.mxu1  ;;  %v857_v38 = vpop.f32.mrf.mxu0  ;;  %v1960_v40 = vpack.c.bf16 %v1181_v31, %v1180_v30  ;;  %v1179_v41 = vmax.f32 %v1115_v32, 0.0 }
 0x114   : > { %v1081_v42 = vmul.f32 %v2217_v37, %v2503_v1  ;;  %v1047_v46 = vmul.f32 %v2503_v1, %v857_v38  ;;  %v1120_v50 = vadd.f32 %v2510_v16, %v1049_v33 }
 0x115   : > { %v2040_v44 = vpack.c.bf16 %v1213_v35, %v1212_v34  ;;  %v1211_v45 = vmax.f32 %v1147_v36, 0.0  ;;  %v985_v47 = vpop.f32.mrf.mxu1  ;;  %v2186_v48 = vpop.f32.mrf.mxu0  ;;  %2103 = vst [vmem:[%s2532_s16 + $0x58] sm:$0xff] %v1960_v40   ;;  %v1955_v49 = vpack.c.bf16 %v1179_v41, %v1178_v39 }
 0x116   : > { %v1079_v51 = vmul.f32 %v2503_v1, %v985_v47  ;;  %v1152_v53 = vadd.f32 %v2510_v16, %v1081_v42  ;;  %v1118_v54 = vadd.f32 %v2510_v16, %v1047_v46  ;;  %v1050_v55 = vmul.f32 %v2186_v48, %v2503_v1 }
 0x117   : > { %2119 = vst [vmem:[%s2532_s16 + $0xd8] sm:$0xff] %v2040_v44   ;;  %v2035_v52 = vpack.c.bf16 %v1211_v45, %v1210_v43  ;;  %v2218_v56 = vpop.f32.mrf.mxu1  ;;  %v860_v57 = vpop.f32.mrf.mxu0  ;;  %2102 = vst [vmem:[%s2532_s16 + $0x50] sm:$0xff] %v1955_v49   ;;  %v1184_v4 = vmax.f32 %v1120_v50, 0.0 }
 0x118   : > { %v1082_v58 = vmul.f32 %v2218_v56, %v2503_v1  ;;  %v1048_v59 = vmul.f32 %v2503_v1, %v860_v57  ;;  %v1150_v60 = vadd.f32 %v2510_v16, %v1079_v51  ;;  %v1121_v61 = vadd.f32 %v2510_v16, %v1050_v55 }
 0x119   : > { %2118 = vst [vmem:[%s2532_s16 + $0xd0] sm:$0xff] %v2035_v52   ;;  %v988_v62 = vpop.f32.mrf.mxu1  ;;  %v1216_v5 = vmax.f32 %v1152_v53, 0.0  ;;  %v1182_v6 = vmax.f32 %v1118_v54, 0.0 }
 0x11a   : > { %v1153_v63 = vadd.f32 %v2510_v16, %v1082_v58  ;;  %v1119_v0 = vadd.f32 %v2510_v16, %v1048_v59  ;;  %v1080_v2 = vmul.f32 %v2503_v1, %v988_v62  ;;  %v2189_v3 = vpop.f32.mrf.mxu0  ;;  %v1185_v7 = vmax.f32 %v1121_v61, 0.0 }
 0x11b   : > { %v1053_v12 = vmul.f32 %v2189_v3, %v2503_v1  ;;  %v1214_v15 = vmax.f32 %v1150_v60, 0.0 }
 0x11c   : > { %v1217_v8 = vmax.f32 %v1153_v63, 0.0  ;;  %v1183_v9 = vmax.f32 %v1119_v0, 0.0  ;;  %v1151_v11 = vadd.f32 %v2510_v16, %v1080_v2  ;;  %v2221_v13 = vpop.f32.mrf.mxu1  ;;  %v873_v14 = vpop.f32.mrf.mxu0  ;;  %v1970_v10 = vpack.c.bf16 %v1185_v7, %v1184_v4 }
 0x11d   : > { %v1085_v17 = vmul.f32 %v2221_v13, %v2503_v1  ;;  %v1051_v21 = vmul.f32 %v2503_v1, %v873_v14  ;;  %v1124_v26 = vadd.f32 %v2510_v16, %v1053_v12 }
 0x11e   : > { %v2050_v18 = vpack.c.bf16 %v1217_v8, %v1216_v5  ;;  %v1965_v19 = vpack.c.bf16 %v1183_v9, %v1182_v6  ;;  %v1215_v20 = vmax.f32 %v1151_v11, 0.0  ;;  %v1001_v22 = vpop.f32.mrf.mxu1  ;;  %v2190_v23 = vpop.f32.mrf.mxu0  ;;  %2105 = vst [vmem:[%s2532_s16 + $0x68] sm:$0xff] %v1970_v10  }
 0x11f   : > { %v1083_v24 = vmul.f32 %v2503_v1, %v1001_v22  ;;  %v1054_v27 = vmul.f32 %v2190_v23, %v2503_v1  ;;  %v1156_v30 = vadd.f32 %v2510_v16, %v1085_v17  ;;  %v1122_v32 = vadd.f32 %v2510_v16, %v1051_v21 }
 0x120   : > { %2121 = vst [vmem:[%s2532_s16 + $0xe8] sm:$0xff] %v2050_v18   ;;  %2104 = vst [vmem:[%s2532_s16 + $0x60] sm:$0xff] %v1965_v19   ;;  %v2045_v25 = vpack.c.bf16 %v1215_v20, %v1214_v15  ;;  %v2222_v28 = vpop.f32.mrf.mxu1  ;;  %v876_v29 = vpop.f32.mrf.mxu0  ;;  %v1188_v39 = vmax.f32 %v1124_v26, 0.0 }
 0x121   : > { %v1086_v31 = vmul.f32 %v2222_v28, %v2503_v1  ;;  %v1125_v33 = vadd.f32 %v2510_v16, %v1054_v27  ;;  %v1052_v34 = vmul.f32 %v2503_v1, %v876_v29  ;;  %v1154_v36 = vadd.f32 %v2510_v16, %v1083_v24 }
 0x122   : > { %2120 = vst [vmem:[%s2532_s16 + $0xe0] sm:$0xff] %v2045_v25   ;;  %v1004_v35 = vpop.f32.mrf.mxu1  ;;  %v1220_v42 = vmax.f32 %v1156_v30, 0.0  ;;  %v1186_v45 = vmax.f32 %v1122_v32, 0.0 }
 0x123   : > { %v1157_v37 = vadd.f32 %v2510_v16, %v1086_v31  ;;  %v1084_v38 = vmul.f32 %v2503_v1, %v1004_v35  ;;  %v1189_v40 = vmax.f32 %v1125_v33, 0.0  ;;  %v1123_v41 = vadd.f32 %v2510_v16, %v1052_v34 }
 0x124   : > { %v1218_v48 = vmax.f32 %v1154_v36, 0.0 }
 0x125   : > { %v1221_v43 = vmax.f32 %v1157_v37, 0.0  ;;  %v1155_v44 = vadd.f32 %v2510_v16, %v1084_v38  ;;  %v1980_v46 = vpack.c.bf16 %v1189_v40, %v1188_v39  ;;  %v1187_v47 = vmax.f32 %v1123_v41, 0.0 }
 0x127   : > { %v2060_v49 = vpack.c.bf16 %v1221_v43, %v1220_v42  ;;  %v1219_v50 = vmax.f32 %v1155_v44, 0.0  ;;  %2107 = vst [vmem:[%s2532_s16 + $0x78] sm:$0xff] %v1980_v46   ;;  %v1975_v51 = vpack.c.bf16 %v1187_v47, %v1186_v45 }
 0x129   : > { %2123 = vst [vmem:[%s2532_s16 + $0xf8] sm:$0xff] %v2060_v49   ;;  %v2055_v1 = vpack.c.bf16 %v1219_v50, %v1218_v48  ;;  %2106 = vst [vmem:[%s2532_s16 + $0x70] sm:$0xff] %v1975_v51  }
 0x12b   : > { %2122 = vst [vmem:[%s2532_s16 + $0xf0] sm:$0xff] %v2055_v1  }
 0x12c PF: > { %s16_s21 = sadd.s32 1, %s2240_s21  }
 0x12d   : > { %p13_p4 = scmp.ge.s32.totalorder %s16_s21, 7  }
 0x12f   :  { %15 = sbr.rel (!%p13_p4) target bundleno = 1 (0x1), region = 74 }

// kernel: clf_img_forward.11
= control target key start
LH: loop header
LB: loop body
LE: loop exit
PB: predicated region body
PF: predicated region fallthrough
CT: control target
= control target key end

     0   :  { %s1380_s21 = smov 0   ;;  %s1610_s0 = inlined_call_operand.vmem [shape: bf16[512,32], index: 0, kind: input, shape index: {}]   ;;  %s1611_s1 = inlined_call_operand.vmem [shape: bf16[32,128], index: 1, kind: input, shape index: {}]   ;;  %s1612_s2 = inlined_call_operand.vmem [shape: f32[1,32], index: 2, kind: input, shape index: {}]   ;;  %s1613_s3 = inlined_call_operand.vmem [shape: f32[1,32], index: 3, kind: input, shape index: {}]   ;;  %s1614_s4 = inlined_call_operand.vmem [shape: f32[1,128], index: 4, kind: input, shape index: {}]   ;;  %s1615_s5 = inlined_call_operand.vmem [shape: f32[1,128], index: 5, kind: input, shape index: {}]   ;;  %s1616_s6 = inlined_call_operand.vmem [shape: bf16[512,128], index: 6, kind: output, shape index: {}]  }
   0x1 LB: > { %s998_s22 = sadd.s32 4294967295, %s1343_s21   ;;  %p1002_p0 = scmp.ge.s32.totalorder %s1343_s21, 1  ;;  %s1343_s21 = sphi %s1380_s21, %s16_s21  }
   0x2   : > { %p213_p1 = scmp.lt.s32.totalorder %s1343_s21, 3 }
   0x4   : > { %p214_p2 = pnand %p1002_p0, %p213_p1 }
   0x5   : > { %s1003_s25 = sshll.u32 (!%p214_p2), %s998_s22, 5 }
   0x6   : > { %217 = sbr.rel (%p214_p2) target bundleno = 264 (0x108), region = 44  ;;  %p244_p3 = scmp.lt.s32.totalorder (!%p214_p2), %s1003_s25, 63 }
   0xb   : > { %v1335_v0 = vld [vmem:[%s1611_s1 + $0x8] sm:$0xff]   ;;  %v1336_v1 = vld [vmem:[%s1611_s1] sm:$0xff]   ;;  %s1618_s25 = smov (!%p244_p3, %s1003_s25), 63  ;;  %vm462_vm0 = vcmask 261120  }
   0xc   : > { %1287 = vmatprep.subr.bf16.mxu0 %v1335_v0  ;;  %1323 = vmatprep.subr.bf16.mxu1 %v1335_v0  ;;  %s1004_s28 = sshll.u32 %s1618_s25, 2  ;;  %v1407_v2 = vld [vmem:[%s1612_s2] ss:$0 sm:$0xff] }
   0xd   : > { %1288 = vmatpush3.bf16.msra.mxu0 %v1335_v0  ;;  %1325 = vmatpush3.bf16.msra.mxu1 %v1335_v0  ;;  %s1402_s7 = scalar_lea.vmem %s1610_s0, %s1004_s28  ;;  %v1416_v11 = vld [vmem:[%s1613_s3] ss:$0 sm:$0xff]  ;;  %s1542_s18 = scalar_lea.vmem %s1616_s6, %s1004_s28 }
   0xe   : > { %1289 = vmatprep.subr.bf16.mxu0 %v1336_v1  ;;  %1324 = vmatprep.subr.bf16.mxu1 %v1336_v1  ;;  %v1096_v3 = vld [vmem:[%s1402_s7] sm:$0xff]   ;;  %v1239_v5 = vld [vmem:[%s1402_s7 + $0x8] sm:$0xff]   ;;  %v1240_v32 = vld [vmem:[%s1402_s7 + $0x10] sm:$0xff]  }
   0xf   : > { %v1246_v4 = vld [vmem:[%s1402_s7 + $0x40] sm:$0xff]   ;;  %v1097_v6 = vunpack.c.l.bf16 %v1096_v3  ;;  %v1098_v7 = vunpack.c.h.bf16 %v1096_v3  ;;  %v1247_v10 = vld [vmem:[%s1402_s7 + $0x48] sm:$0xff]   ;;  %v1101_v12 = vunpack.c.l.bf16 %v1239_v5  ;;  %v1102_v13 = vunpack.c.h.bf16 %v1239_v5  ;;  %v1248_v37 = vld [vmem:[%s1402_s7 + $0x50] sm:$0xff]  }
  0x10   : > { %v1129_v8 = vunpack.c.l.bf16 %v1246_v4  ;;  %v1130_v9 = vunpack.c.h.bf16 %v1246_v4  ;;  %v1133_v14 = vunpack.c.l.bf16 %v1247_v10  ;;  %v1134_v15 = vunpack.c.h.bf16 %v1247_v10  ;;  %v1241_v42 = vld [vmem:[%s1402_s7 + $0x18] sm:$0xff]   ;;  %v1242_v5 = vld [vmem:[%s1402_s7 + $0x20] sm:$0xff]  }
  0x11   : > { %1290 = vmatpush3.bf16.msra.mxu0 %v1336_v1  ;;  %1326 = vmatpush3.bf16.msra.mxu1 %v1336_v1  ;;  %v327_v16 = vmul.f32 %v1097_v6, %v1407_v2  ;;  %v328_v17 = vmul.f32 %v1098_v7, %v1407_v2  ;;  %v329_v20 = vmul.f32 %v1101_v12, %v1407_v2  ;;  %v1105_v45 = vunpack.c.l.bf16 %v1240_v32  ;;  %v1249_v47 = vld [vmem:[%s1402_s7 + $0x58] sm:$0xff]  }
  0x12   : > { %v343_v18 = vmul.f32 %v1129_v8, %v1407_v2  ;;  %v344_v19 = vmul.f32 %v1130_v9, %v1407_v2  ;;  %v330_v21 = vmul.f32 %v1102_v13, %v1407_v2  ;;  %v345_v22 = vmul.f32 %v1133_v14, %v1407_v2 }
  0x13   : > { %v346_v23 = vmul.f32 %v1134_v15, %v1407_v2  ;;  %v366_v24 = vadd.f32 %v1416_v11, %v327_v16  ;;  %v367_v25 = vadd.f32 %v1416_v11, %v328_v17  ;;  %v368_v28 = vadd.f32 %v1416_v11, %v329_v20  ;;  %v1250_v15 = vld [vmem:[%s1402_s7 + $0x60] sm:$0xff]   ;;  %v1243_v20 = vld [vmem:[%s1402_s7 + $0x28] sm:$0xff]  }
  0x14   : > { %v382_v26 = vadd.f32 %v1416_v11, %v343_v18  ;;  %v383_v27 = vadd.f32 %v1416_v11, %v344_v19  ;;  %v369_v29 = vadd.f32 %v1416_v11, %v330_v21  ;;  %v384_v30 = vadd.f32 %v1416_v11, %v345_v22 }
  0x15   : > { %v385_v31 = vadd.f32 %v1416_v11, %v346_v23  ;;  %v398_v33 = vmax.f32 %v366_v24, 0.0  ;;  %v399_v34 = vmax.f32 %v367_v25, 0.0  ;;  %v400_v38 = vmax.f32 %v368_v28, 0.0  ;;  %v1251_v25 = vld [vmem:[%s1402_s7 + $0x68] sm:$0xff]  }
  0x16   : > { %v414_v35 = vmax.f32 %v382_v26, 0.0  ;;  %v415_v36 = vmax.f32 %v383_v27, 0.0  ;;  %v401_v39 = vmax.f32 %v369_v29, 0.0  ;;  %v416_v40 = vmax.f32 %v384_v30, 0.0 }
  0x17   : > { %v417_v41 = vmax.f32 %v385_v31, 0.0  ;;  %v430_v43 = vpack.c.bf16 %v399_v34, %v398_v33  ;;  %v1106_v46 = vunpack.c.h.bf16 %v1240_v32  ;;  %v1137_v50 = vunpack.c.l.bf16 %v1248_v37 }
  0x18   : > { %v438_v44 = vpack.c.bf16 %v415_v36, %v414_v35  ;;  %v431_v48 = vpack.c.bf16 %v401_v39, %v400_v38  ;;  %v1138_v51 = vunpack.c.h.bf16 %v1248_v37  ;;  %v331_v52 = vmul.f32 %v1105_v45, %v1407_v2 }
  0x19   : > { %v439_v49 = vpack.c.bf16 %v417_v41, %v416_v40  ;;  %1291 = vmatprep.mubr.msk.bf16.mxu0 %vm462_vm0, %v430_v43  ;;  %v332_v53 = vmul.f32 %v1106_v46, %v1407_v2  ;;  %v1109_v54 = vunpack.c.l.bf16 %v1241_v42  ;;  %v1110_v55 = vunpack.c.h.bf16 %v1241_v42  ;;  %v1244_v42 = vld [vmem:[%s1402_s7 + $0x30] sm:$0xff]  }
  0x1a   : > { %1307 = vmatprep.mubr.msk.bf16.mxu1 %vm462_vm0, %v438_v44  ;;  %1292 = vmatmul.mubr.msk.bf16.vlgmr.msra.gmra.mxu0 %vm462_vm0, %v431_v48  ;;  %v347_v56 = vmul.f32 %v1137_v50, %v1407_v2  ;;  %v348_v57 = vmul.f32 %v1138_v51, %v1407_v2  ;;  %v1141_v58 = vunpack.c.l.bf16 %v1249_v47  ;;  %v1142_v59 = vunpack.c.h.bf16 %v1249_v47 }
  0x1b   : > { %1308 = vmatmul.mubr.msk.bf16.vlgmr.msra.gmra.mxu1 %vm462_vm0, %v439_v49  ;;  %v370_v60 = vadd.f32 %v1416_v11, %v331_v52  ;;  %v371_v61 = vadd.f32 %v1416_v11, %v332_v53  ;;  %v333_v62 = vmul.f32 %v1109_v54, %v1407_v2  ;;  %v334_v63 = vmul.f32 %v1110_v55, %v1407_v2  ;;  %v1252_v55 = vld [vmem:[%s1402_s7 + $0x70] sm:$0xff]  }
  0x1c   : > { %v386_v0 = vadd.f32 %v1416_v11, %v347_v56  ;;  %v387_v1 = vadd.f32 %v1416_v11, %v348_v57  ;;  %v349_v3 = vmul.f32 %v1141_v58, %v1407_v2  ;;  %v350_v4 = vmul.f32 %v1142_v59, %v1407_v2 }
  0x1d   : > { %v402_v6 = vmax.f32 %v370_v60, 0.0  ;;  %v403_v7 = vmax.f32 %v371_v61, 0.0  ;;  %v372_v8 = vadd.f32 %v1416_v11, %v333_v62  ;;  %v373_v9 = vadd.f32 %v1416_v11, %v334_v63  ;;  %v1245_v60 = vld [vmem:[%s1402_s7 + $0x38] sm:$0xff]  }
  0x1e   : > { %v418_v10 = vmax.f32 %v386_v0, 0.0  ;;  %v419_v12 = vmax.f32 %v387_v1, 0.0  ;;  %v388_v13 = vadd.f32 %v1416_v11, %v349_v3  ;;  %v389_v14 = vadd.f32 %v1416_v11, %v350_v4  ;;  %v1253_v1 = vld [vmem:[%s1402_s7 + $0x78] sm:$0xff]  }
  0x1f   : > { %v432_v16 = vpack.c.bf16 %v403_v7, %v402_v6  ;;  %v404_v17 = vmax.f32 %v372_v8, 0.0  ;;  %v405_v18 = vmax.f32 %v373_v9, 0.0  ;;  %v1113_v19 = vunpack.c.l.bf16 %v1242_v5 }
  0x20   : > { %v440_v21 = vpack.c.bf16 %v419_v12, %v418_v10  ;;  %v420_v22 = vmax.f32 %v388_v13, 0.0  ;;  %v421_v23 = vmax.f32 %v389_v14, 0.0  ;;  %v1114_v24 = vunpack.c.h.bf16 %v1242_v5 }
  0x21   : > { %1295 = vmatprep.mubr.msk.bf16.mxu0 %vm462_vm0, %v432_v16  ;;  %v433_v26 = vpack.c.bf16 %v405_v18, %v404_v17  ;;  %v335_v27 = vmul.f32 %v1113_v19, %v1407_v2  ;;  %v1145_v28 = vunpack.c.l.bf16 %v1250_v15  ;;  %v1146_v29 = vunpack.c.h.bf16 %v1250_v15 }
  0x22   : > { %1311 = vmatprep.mubr.msk.bf16.mxu1 %vm462_vm0, %v440_v21  ;;  %v441_v30 = vpack.c.bf16 %v421_v23, %v420_v22  ;;  %v336_v31 = vmul.f32 %v1114_v24, %v1407_v2  ;;  %v1117_v32 = vunpack.c.l.bf16 %v1243_v20  ;;  %v1118_v33 = vunpack.c.h.bf16 %v1243_v20 }
  0x23   : > { %1296 = vmatmul.mubr.msk.bf16.gmra.mxu0 %vm462_vm0, %v433_v26  ;;  %v374_v34 = vadd.f32 %v1416_v11, %v335_v27  ;;  %v351_v35 = vmul.f32 %v1145_v28, %v1407_v2  ;;  %v352_v36 = vmul.f32 %v1146_v29, %v1407_v2  ;;  %v1149_v37 = vunpack.c.l.bf16 %v1251_v25 }
  0x24   : > { %1312 = vmatmul.mubr.msk.bf16.gmra.mxu1 %vm462_vm0, %v441_v30  ;;  %v375_v38 = vadd.f32 %v1416_v11, %v336_v31  ;;  %v337_v39 = vmul.f32 %v1117_v32, %v1407_v2  ;;  %v338_v40 = vmul.f32 %v1118_v33, %v1407_v2  ;;  %v1150_v41 = vunpack.c.h.bf16 %v1251_v25 }
  0x25   : > { %v406_v43 = vmax.f32 %v374_v34, 0.0  ;;  %v390_v44 = vadd.f32 %v1416_v11, %v351_v35  ;;  %v391_v45 = vadd.f32 %v1416_v11, %v352_v36  ;;  %v353_v46 = vmul.f32 %v1149_v37, %v1407_v2 }
  0x26   : > { %v407_v47 = vmax.f32 %v375_v38, 0.0  ;;  %v376_v48 = vadd.f32 %v1416_v11, %v337_v39  ;;  %v377_v49 = vadd.f32 %v1416_v11, %v338_v40  ;;  %v354_v50 = vmul.f32 %v1150_v41, %v1407_v2 }
  0x27   : > { %v422_v51 = vmax.f32 %v390_v44, 0.0  ;;  %v423_v52 = vmax.f32 %v391_v45, 0.0  ;;  %v392_v53 = vadd.f32 %v1416_v11, %v353_v46  ;;  %v1121_v54 = vunpack.c.l.bf16 %v1244_v42 }
  0x28   : > { %v434_v56 = vpack.c.bf16 %v407_v47, %v406_v43  ;;  %v408_v57 = vmax.f32 %v376_v48, 0.0  ;;  %v409_v58 = vmax.f32 %v377_v49, 0.0  ;;  %v393_v59 = vadd.f32 %v1416_v11, %v354_v50  ;;  %v1520_v43 = vld [vmem:[%s1615_s5] ss:$0 sm:$0xff] }
  0x29   : > { %v442_v61 = vpack.c.bf16 %v423_v52, %v422_v51  ;;  %v424_v62 = vmax.f32 %v392_v53, 0.0  ;;  %v1122_v63 = vunpack.c.h.bf16 %v1244_v42  ;;  %v339_v0 = vmul.f32 %v1121_v54, %v1407_v2 }
  0x2a   : > { %1299 = vmatprep.mubr.msk.bf16.mxu0 %vm462_vm0, %v434_v56  ;;  %v435_v3 = vpack.c.bf16 %v409_v58, %v408_v57  ;;  %v425_v4 = vmax.f32 %v393_v59, 0.0  ;;  %v1153_v5 = vunpack.c.l.bf16 %v1252_v55  ;;  %v1154_v6 = vunpack.c.h.bf16 %v1252_v55 }
  0x2b   : > { %1315 = vmatprep.mubr.msk.bf16.mxu1 %vm462_vm0, %v442_v61  ;;  %v340_v7 = vmul.f32 %v1122_v63, %v1407_v2  ;;  %v378_v8 = vadd.f32 %v1416_v11, %v339_v0  ;;  %v1125_v9 = vunpack.c.l.bf16 %v1245_v60  ;;  %v1126_v10 = vunpack.c.h.bf16 %v1245_v60 }
  0x2c   : > { %1300 = vmatmul.mubr.msk.bf16.gmra.mxu0 %vm462_vm0, %v435_v3  ;;  %v443_v12 = vpack.c.bf16 %v425_v4, %v424_v62  ;;  %v355_v13 = vmul.f32 %v1153_v5, %v1407_v2  ;;  %v356_v14 = vmul.f32 %v1154_v6, %v1407_v2  ;;  %v1157_v15 = vunpack.c.l.bf16 %v1253_v1 }
  0x2d   : > { %v379_v16 = vadd.f32 %v1416_v11, %v340_v7  ;;  %v410_v17 = vmax.f32 %v378_v8, 0.0  ;;  %v341_v18 = vmul.f32 %v1125_v9, %v1407_v2  ;;  %v342_v19 = vmul.f32 %v1126_v10, %v1407_v2 }
  0x2e   : > { %1316 = vmatmul.mubr.msk.bf16.gmra.mxu1 %vm462_vm0, %v443_v12  ;;  %v394_v20 = vadd.f32 %v1416_v11, %v355_v13  ;;  %v395_v21 = vadd.f32 %v1416_v11, %v356_v14  ;;  %v1158_v22 = vunpack.c.h.bf16 %v1253_v1  ;;  %v357_v23 = vmul.f32 %v1157_v15, %v1407_v2 }
  0x2f   : > { %v411_v24 = vmax.f32 %v379_v16, 0.0  ;;  %v380_v25 = vadd.f32 %v1416_v11, %v341_v18  ;;  %v381_v26 = vadd.f32 %v1416_v11, %v342_v19 }
  0x30   : > { %v426_v27 = vmax.f32 %v394_v20, 0.0  ;;  %v427_v28 = vmax.f32 %v395_v21, 0.0  ;;  %v358_v29 = vmul.f32 %v1158_v22, %v1407_v2  ;;  %v396_v30 = vadd.f32 %v1416_v11, %v357_v23  ;;  %v1513_v2 = vld [vmem:[%s1614_s4] ss:$0 sm:$0xff] }
  0x31   : > { %v436_v31 = vpack.c.bf16 %v411_v24, %v410_v17  ;;  %v412_v32 = vmax.f32 %v380_v25, 0.0  ;;  %v413_v33 = vmax.f32 %v381_v26, 0.0 }
  0x32   : > { %v444_v34 = vpack.c.bf16 %v427_v28, %v426_v27  ;;  %v397_v35 = vadd.f32 %v1416_v11, %v358_v29  ;;  %v428_v36 = vmax.f32 %v396_v30, 0.0 }
  0x33   : > { %1303 = vmatprep.mubr.msk.bf16.mxu0 %vm462_vm0, %v436_v31  ;;  %v437_v37 = vpack.c.bf16 %v413_v33, %v412_v32 }
  0x34   : > { %1319 = vmatprep.mubr.msk.bf16.mxu1 %vm462_vm0, %v444_v34  ;;  %v429_v38 = vmax.f32 %v397_v35, 0.0 }
  0x35   : > { %1304 = vmatmul.mubr.msk.bf16.gmra.mxu0 %vm462_vm0, %v437_v37 }
  0x36   : > { %v445_v39 = vpack.c.bf16 %v429_v38, %v428_v36 }
  0x38   : > { %1320 = vmatmul.mubr.msk.bf16.gmra.mxu1 %vm462_vm0, %v445_v39 }
  0xda   : > { %v1293_v40 = vpop.f32.mrf.mxu0 }
  0xdb   : > { %v1309_v41 = vpop.f32.mrf.mxu1  ;;  %v681_v11 = vmul.f32 %v1293_v40, %v1513_v2 }
  0xdc   : > { %v697_v42 = vmul.f32 %v1309_v41, %v1513_v2  ;;  %v545_v44 = vpop.f32.mrf.mxu0 }
  0xdd   : > { %v609_v45 = vpop.f32.mrf.mxu1  ;;  %v679_v46 = vmul.f32 %v1513_v2, %v545_v44  ;;  %v720_v50 = vadd.f32 %v1520_v43, %v681_v11 }
  0xde   : > { %v695_v47 = vmul.f32 %v1513_v2, %v609_v45  ;;  %v1294_v48 = vpop.f32.mrf.mxu0  ;;  %v736_v51 = vadd.f32 %v1520_v43, %v697_v42 }
  0xdf   : > { %v1310_v49 = vpop.f32.mrf.mxu1  ;;  %v718_v52 = vadd.f32 %v1520_v43, %v679_v46  ;;  %v682_v53 = vmul.f32 %v1294_v48, %v1513_v2  ;;  %v752_v62 = vmax.f32 %v720_v50, 0.0 }
  0xe0   : > { %v698_v54 = vmul.f32 %v1310_v49, %v1513_v2  ;;  %v548_v55 = vpop.f32.mrf.mxu0  ;;  %v734_v57 = vadd.f32 %v1520_v43, %v695_v47  ;;  %v768_v63 = vmax.f32 %v736_v51, 0.0 }
  0xe1   : > { %v612_v56 = vpop.f32.mrf.mxu1  ;;  %v680_v58 = vmul.f32 %v1513_v2, %v548_v55  ;;  %v721_v60 = vadd.f32 %v1520_v43, %v682_v53  ;;  %v750_v4 = vmax.f32 %v718_v52, 0.0 }
  0xe2   : > { %v696_v59 = vmul.f32 %v1513_v2, %v612_v56  ;;  %v737_v61 = vadd.f32 %v1520_v43, %v698_v54  ;;  %v766_v9 = vmax.f32 %v734_v57, 0.0 }
  0xe3   : > { %v719_v0 = vadd.f32 %v1520_v43, %v680_v58  ;;  %v1297_v3 = vpop.f32.mrf.mxu0  ;;  %v753_v5 = vmax.f32 %v721_v60, 0.0 }
  0xe4   : > { %v735_v1 = vadd.f32 %v1520_v43, %v696_v59  ;;  %v769_v6 = vmax.f32 %v737_v61, 0.0  ;;  %v685_v7 = vmul.f32 %v1297_v3, %v1513_v2  ;;  %v1313_v8 = vpop.f32.mrf.mxu1 }
  0xe5   : > { %v751_v10 = vmax.f32 %v719_v0, 0.0  ;;  %v701_v13 = vmul.f32 %v1313_v8, %v1513_v2  ;;  %v561_v14 = vpop.f32.mrf.mxu0  ;;  %v1167_v15 = vpack.c.bf16 %v753_v5, %v752_v62 }
  0xe6   : > { %v767_v12 = vmax.f32 %v735_v1, 0.0  ;;  %v1207_v16 = vpack.c.bf16 %v769_v6, %v768_v63  ;;  %v683_v17 = vmul.f32 %v1513_v2, %v561_v14  ;;  %v625_v18 = vpop.f32.mrf.mxu1  ;;  %v724_v23 = vadd.f32 %v1520_v43, %v685_v7 }
  0xe7   : > { %v1162_v19 = vpack.c.bf16 %v751_v10, %v750_v4  ;;  %v699_v21 = vmul.f32 %v1513_v2, %v625_v18  ;;  %v1298_v22 = vpop.f32.mrf.mxu0  ;;  %1254 = vst [vmem:[%s1542_s18 + $0x8] sm:$0xff] %v1167_v15   ;;  %v740_v26 = vadd.f32 %v1520_v43, %v701_v13 }
  0xe8   : > { %v1202_v20 = vpack.c.bf16 %v767_v12, %v766_v9  ;;  %1262 = vst [vmem:[%s1542_s18 + $0x48] sm:$0xff] %v1207_v16   ;;  %v686_v24 = vmul.f32 %v1298_v22, %v1513_v2  ;;  %v1314_v25 = vpop.f32.mrf.mxu1  ;;  %v722_v29 = vadd.f32 %v1520_v43, %v683_v17  ;;  %v756_v36 = vmax.f32 %v724_v23, 0.0 }
  0xe9   : > { %1163 = vst [vmem:[%s1542_s18] sm:$0xff] %v1162_v19   ;;  %v702_v27 = vmul.f32 %v1314_v25, %v1513_v2  ;;  %v564_v28 = vpop.f32.mrf.mxu0  ;;  %v738_v33 = vadd.f32 %v1520_v43, %v699_v21  ;;  %v772_v40 = vmax.f32 %v740_v26, 0.0 }
  0xea   : > { %1261 = vst [vmem:[%s1542_s18 + $0x40] sm:$0xff] %v1202_v20   ;;  %v725_v30 = vadd.f32 %v1520_v43, %v686_v24  ;;  %v684_v31 = vmul.f32 %v1513_v2, %v564_v28  ;;  %v628_v32 = vpop.f32.mrf.mxu1  ;;  %v754_v42 = vmax.f32 %v722_v29, 0.0 }
  0xeb   : > { %v741_v34 = vadd.f32 %v1520_v43, %v702_v27  ;;  %v700_v35 = vmul.f32 %v1513_v2, %v628_v32  ;;  %v770_v49 = vmax.f32 %v738_v33, 0.0 }
  0xec   : > { %v757_v37 = vmax.f32 %v725_v30, 0.0  ;;  %v723_v38 = vadd.f32 %v1520_v43, %v684_v31  ;;  %v1301_v39 = vpop.f32.mrf.mxu0 }
  0xed   : > { %v773_v41 = vmax.f32 %v741_v34, 0.0  ;;  %v739_v11 = vadd.f32 %v1520_v43, %v700_v35  ;;  %v689_v46 = vmul.f32 %v1301_v39, %v1513_v2 }
  0xee   : > { %v1177_v44 = vpack.c.bf16 %v757_v37, %v756_v36  ;;  %v755_v45 = vmax.f32 %v723_v38, 0.0  ;;  %v1317_v47 = vpop.f32.mrf.mxu1  ;;  %v577_v48 = vpop.f32.mrf.mxu0 }
  0xef   : > { %v1217_v50 = vpack.c.bf16 %v773_v41, %v772_v40  ;;  %v771_v51 = vmax.f32 %v739_v11, 0.0  ;;  %v705_v52 = vmul.f32 %v1317_v47, %v1513_v2  ;;  %v687_v54 = vmul.f32 %v1513_v2, %v577_v48 }
  0xf0   : > { %1256 = vst [vmem:[%s1542_s18 + $0x18] sm:$0xff] %v1177_v44   ;;  %v1172_v53 = vpack.c.bf16 %v755_v45, %v754_v42  ;;  %v641_v55 = vpop.f32.mrf.mxu1  ;;  %v1302_v56 = vpop.f32.mrf.mxu0  ;;  %v728_v59 = vadd.f32 %v1520_v43, %v689_v46 }
  0xf1   : > { %1264 = vst [vmem:[%s1542_s18 + $0x58] sm:$0xff] %v1217_v50   ;;  %v1212_v57 = vpack.c.bf16 %v771_v51, %v770_v49  ;;  %v703_v58 = vmul.f32 %v1513_v2, %v641_v55  ;;  %v744_v60 = vadd.f32 %v1520_v43, %v705_v52  ;;  %v690_v61 = vmul.f32 %v1302_v56, %v1513_v2 }
  0xf2   : > { %1255 = vst [vmem:[%s1542_s18 + $0x10] sm:$0xff] %v1172_v53   ;;  %v1318_v62 = vpop.f32.mrf.mxu1  ;;  %v580_v63 = vpop.f32.mrf.mxu0  ;;  %v726_v0 = vadd.f32 %v1520_v43, %v687_v54  ;;  %v760_v12 = vmax.f32 %v728_v59, 0.0 }
  0xf3   : > { %1263 = vst [vmem:[%s1542_s18 + $0x50] sm:$0xff] %v1212_v57   ;;  %v706_v1 = vmul.f32 %v1318_v62, %v1513_v2  ;;  %v688_v3 = vmul.f32 %v1513_v2, %v580_v63  ;;  %v742_v4 = vadd.f32 %v1520_v43, %v703_v58  ;;  %v729_v5 = vadd.f32 %v1520_v43, %v690_v61 }
  0xf4   : > { %v644_v6 = vpop.f32.mrf.mxu1  ;;  %v776_v13 = vmax.f32 %v744_v60, 0.0  ;;  %v758_v16 = vmax.f32 %v726_v0, 0.0 }
  0xf5   : > { %v745_v7 = vadd.f32 %v1520_v43, %v706_v1  ;;  %v727_v8 = vadd.f32 %v1520_v43, %v688_v3  ;;  %v704_v9 = vmul.f32 %v1513_v2, %v644_v6  ;;  %v1305_v10 = vpop.f32.mrf.mxu0  ;;  %v761_v14 = vmax.f32 %v729_v5, 0.0 }
  0xf6   : > { %v693_v15 = vmul.f32 %v1305_v10, %v1513_v2  ;;  %v774_v21 = vmax.f32 %v742_v4, 0.0 }
  0xf7   : > { %v777_v17 = vmax.f32 %v745_v7, 0.0  ;;  %v759_v18 = vmax.f32 %v727_v8, 0.0  ;;  %v743_v19 = vadd.f32 %v1520_v43, %v704_v9  ;;  %v593_v20 = vpop.f32.mrf.mxu0  ;;  %v1187_v22 = vpack.c.bf16 %v761_v14, %v760_v12 }
  0xf8   : > { %v1321_v23 = vpop.f32.mrf.mxu1  ;;  %v691_v24 = vmul.f32 %v1513_v2, %v593_v20  ;;  %v732_v30 = vadd.f32 %v1520_v43, %v693_v15 }
  0xf9   : > { %v1227_v25 = vpack.c.bf16 %v777_v17, %v776_v13  ;;  %v1182_v26 = vpack.c.bf16 %v759_v18, %v758_v16  ;;  %v775_v27 = vmax.f32 %v743_v19, 0.0  ;;  %v709_v28 = vmul.f32 %v1321_v23, %v1513_v2  ;;  %v1306_v29 = vpop.f32.mrf.mxu0  ;;  %1258 = vst [vmem:[%s1542_s18 + $0x28] sm:$0xff] %v1187_v22  }
  0xfa   : > { %v657_v31 = vpop.f32.mrf.mxu1  ;;  %v694_v32 = vmul.f32 %v1306_v29, %v1513_v2  ;;  %v730_v36 = vadd.f32 %v1520_v43, %v691_v24  ;;  %v764_v11 = vmax.f32 %v732_v30, 0.0 }
  0xfb   : > { %1266 = vst [vmem:[%s1542_s18 + $0x68] sm:$0xff] %v1227_v25   ;;  %1257 = vst [vmem:[%s1542_s18 + $0x20] sm:$0xff] %v1182_v26   ;;  %v1222_v33 = vpack.c.bf16 %v775_v27, %v774_v21  ;;  %v707_v34 = vmul.f32 %v1513_v2, %v657_v31  ;;  %v596_v35 = vpop.f32.mrf.mxu0  ;;  %v748_v40 = vadd.f32 %v1520_v43, %v709_v28 }
  0xfc   : > { %v733_v37 = vadd.f32 %v1520_v43, %v694_v32  ;;  %v1322_v38 = vpop.f32.mrf.mxu1  ;;  %v692_v39 = vmul.f32 %v1513_v2, %v596_v35  ;;  %v762_v49 = vmax.f32 %v730_v36, 0.0 }
  0xfd   : > { %1265 = vst [vmem:[%s1542_s18 + $0x60] sm:$0xff] %v1222_v33   ;;  %v710_v41 = vmul.f32 %v1322_v38, %v1513_v2  ;;  %v746_v46 = vadd.f32 %v1520_v43, %v707_v34  ;;  %v780_v52 = vmax.f32 %v748_v40, 0.0 }
  0xfe   : > { %v765_v42 = vmax.f32 %v733_v37, 0.0  ;;  %v731_v44 = vadd.f32 %v1520_v43, %v692_v39  ;;  %v660_v45 = vpop.f32.mrf.mxu1 }
  0xff   : > { %v749_v47 = vadd.f32 %v1520_v43, %v710_v41  ;;  %v708_v48 = vmul.f32 %v1513_v2, %v660_v45  ;;  %v778_v56 = vmax.f32 %v746_v46, 0.0 }
 0x100   : > { %v1197_v50 = vpack.c.bf16 %v765_v42, %v764_v11  ;;  %v763_v51 = vmax.f32 %v731_v44, 0.0 }
 0x101   : > { %v781_v53 = vmax.f32 %v749_v47, 0.0  ;;  %v747_v54 = vadd.f32 %v1520_v43, %v708_v48 }
 0x102   : > { %1260 = vst [vmem:[%s1542_s18 + $0x38] sm:$0xff] %v1197_v50   ;;  %v1192_v55 = vpack.c.bf16 %v763_v51, %v762_v49 }
 0x103   : > { %v1237_v57 = vpack.c.bf16 %v781_v53, %v780_v52  ;;  %v779_v58 = vmax.f32 %v747_v54, 0.0 }
 0x104   : > { %1259 = vst [vmem:[%s1542_s18 + $0x30] sm:$0xff] %v1192_v55  }
 0x105   : > { %1268 = vst [vmem:[%s1542_s18 + $0x78] sm:$0xff] %v1237_v57   ;;  %v1232_v59 = vpack.c.bf16 %v779_v58, %v778_v56 }
 0x107   : > { %1267 = vst [vmem:[%s1542_s18 + $0x70] sm:$0xff] %v1232_v59  }
 0x108 PF: > { %s16_s21 = sadd.s32 1, %s1343_s21  }
 0x109   : > { %p13_p4 = scmp.ge.s32.totalorder %s16_s21, 4  }
 0x10b   :  { %15 = sbr.rel (!%p13_p4) target bundleno = 1 (0x1), region = 74 }

// kernel: clf_img_forward.10
= control target key start
LH: loop header
LB: loop body
LE: loop exit
PB: predicated region body
PF: predicated region fallthrough
CT: control target
= control target key end

     0   :  { %s2020_s12 = smov 0   ;;  %s2260_s0 = inlined_call_operand.vmem [shape: bf16[512,512], index: 0, kind: input, shape index: {}]   ;;  %s2261_s1 = inlined_call_operand.vmem [shape: bf16[512,128], index: 1, kind: input, shape index: {}]   ;;  %s2262_s2 = inlined_call_operand.vmem [shape: f32[1,128], index: 2, kind: input, shape index: {}]   ;;  %s2263_s3 = inlined_call_operand.vmem [shape: bf16[512,128], index: 3, kind: output, shape index: {}]  }
   0x1 LB: > { %s1363_s13 = sadd.s32 4294967295, %s1998_s12   ;;  %p1367_p0 = scmp.ge.s32.totalorder %s1998_s12, 1  ;;  %s1998_s12 = sphi %s2020_s12, %s13_s12  }
   0x2   : > { %p139_p1 = scmp.lt.s32.totalorder %s1998_s12, 3 }
   0x4   : > { %p140_p2 = pnand %p1367_p0, %p139_p1 }
   0x5   : > { %s1368_s21 = sshll.u32 (!%p140_p2), %s1363_s13, 5 }
   0x6   : > { %143 = sbr.rel (%p140_p2) target bundleno = 373 (0x175), region = 32  ;;  %p165_p3 = scmp.lt.s32.totalorder (!%p140_p2), %s1368_s21, 63 }
   0xb   : > { %v1864_v0 = vld [vmem:[%s2261_s1 + $0x78] sm:$0xff]   ;;  %v1868_v4 = vld [vmem:[%s2261_s1 + $0x70] sm:$0xff]   ;;  %v1872_v8 = vld [vmem:[%s2261_s1 + $0x68] sm:$0xff]   ;;  %s2265_s21 = smov (!%p165_p3, %s1368_s21), 63 }
   0xc   : > { %v1865_v1 = vld [vmem:[%s2261_s1 + $0xf8] sm:$0xff]   ;;  %1632 = vmatprep.subr.bf16.mxu0 %v1864_v0  ;;  %v1869_v5 = vld [vmem:[%s2261_s1 + $0xf0] sm:$0xff]   ;;  %v1873_v9 = vld [vmem:[%s2261_s1 + $0xe8] sm:$0xff]   ;;  %s1504_s18 = sshll.u32 %s2265_s21, 4  ;;  %s1372_s7 = sshll.u32 %s2265_s21, 2 }
   0xd   : > { %v1866_v2 = vld [vmem:[%s2261_s1 + $0x38] sm:$0xff]   ;;  %1744 = vmatprep.subr.bf16.mxu1 %v1865_v1  ;;  %v1870_v6 = vld [vmem:[%s2261_s1 + $0x30] sm:$0xff]   ;;  %v1874_v10 = vld [vmem:[%s2261_s1 + $0x28] sm:$0xff]   ;;  %s2126_s28 = scalar_lea.vmem %s2260_s0, %s1504_s18  ;;  %s2209_s10 = scalar_lea.vmem %s2263_s3, %s1372_s7 }
   0xe   : > { %v1867_v3 = vld [vmem:[%s2261_s1 + $0xb8] sm:$0xff]   ;;  %1633 = vmatpush3.bf16.msra.mxu0 %v1866_v2  ;;  %v1871_v7 = vld [vmem:[%s2261_s1 + $0xb0] sm:$0xff]   ;;  %v1875_v11 = vld [vmem:[%s2261_s1 + $0xa8] sm:$0xff]  }
   0xf   : > { %1745 = vmatpush3.bf16.msra.mxu1 %v1867_v3  ;;  %1634 = vmatprep.subr.bf16.mxu0 %v1868_v4  ;;  %v1876_v12 = vld [vmem:[%s2261_s1 + $0x60] sm:$0xff]   ;;  %v1880_v16 = vld [vmem:[%s2261_s1 + $0x58] sm:$0xff]   ;;  %v1884_v20 = vld [vmem:[%s2261_s1 + $0x50] sm:$0xff]  }
  0x10   : > { %1746 = vmatprep.subr.bf16.mxu1 %v1869_v5  ;;  %v1877_v13 = vld [vmem:[%s2261_s1 + $0xe0] sm:$0xff]   ;;  %v1881_v17 = vld [vmem:[%s2261_s1 + $0xd8] sm:$0xff]   ;;  %v1885_v21 = vld [vmem:[%s2261_s1 + $0xd0] sm:$0xff]  }
  0x11   : > { %v1878_v14 = vld [vmem:[%s2261_s1 + $0x20] sm:$0xff]   ;;  %v1882_v18 = vld [vmem:[%s2261_s1 + $0x18] sm:$0xff]   ;;  %v1886_v22 = vld [vmem:[%s2261_s1 + $0x10] sm:$0xff]  }
  0x12   : > { %1635 = vmatpush3.bf16.msra.mxu0 %v1870_v6  ;;  %v1879_v15 = vld [vmem:[%s2261_s1 + $0xa0] sm:$0xff]   ;;  %v1883_v19 = vld [vmem:[%s2261_s1 + $0x98] sm:$0xff]   ;;  %v1887_v23 = vld [vmem:[%s2261_s1 + $0x90] sm:$0xff]  }
  0x13   : > { %1747 = vmatpush3.bf16.msra.mxu1 %v1871_v7  ;;  %1636 = vmatprep.subr.bf16.mxu0 %v1872_v8  ;;  %v1888_v24 = vld [vmem:[%s2261_s1 + $0x48] sm:$0xff]   ;;  %v1892_v28 = vld [vmem:[%s2261_s1 + $0x40] sm:$0xff]  }
  0x14   : > { %1748 = vmatprep.subr.bf16.mxu1 %v1873_v9  ;;  %v1889_v25 = vld [vmem:[%s2261_s1 + $0xc8] sm:$0xff]   ;;  %v1893_v29 = vld [vmem:[%s2261_s1 + $0xc0] sm:$0xff]  }
  0x15   : > { %v1890_v26 = vld [vmem:[%s2261_s1 + $0x8] sm:$0xff]   ;;  %v1894_v30 = vld [vmem:[%s2261_s1] sm:$0xff]  }
  0x16   : > { %1637 = vmatpush3.bf16.msra.mxu0 %v1874_v10  ;;  %v1891_v27 = vld [vmem:[%s2261_s1 + $0x88] sm:$0xff]   ;;  %v1895_v31 = vld [vmem:[%s2261_s1 + $0x80] sm:$0xff]  }
  0x17   : > { %1749 = vmatpush3.bf16.msra.mxu1 %v1875_v11  ;;  %1638 = vmatprep.subr.bf16.mxu0 %v1876_v12  ;;  %v1896_v32 = vld [vmem:[%s2126_s28] ss:$16 sps:$4 sm:$0xff]   ;;  %v1898_v33 = vld [vmem:[%s2126_s28 + $0x4] ss:$16 sps:$4 sm:$0xff]   ;;  %v1899_v34 = vld [vmem:[%s2126_s28 + $0x8] ss:$16 sps:$4 sm:$0xff]  }
  0x18   : > { %1750 = vmatprep.subr.bf16.mxu1 %v1877_v13  ;;  %v1901_v35 = vld [vmem:[%s2126_s28 + $0xc] ss:$16 sps:$4 sm:$0xff]   ;;  %857 = vmatprep.mubr.bf16.mxu0 %v1898_v33  ;;  %v1902_v36 = vld [vmem:[%s2126_s28 + $0x24] ss:$16 sps:$4 sm:$0xff]   ;;  %v1906_v38 = vld [vmem:[%s2126_s28 + $0x20] ss:$16 sps:$4 sm:$0xff]  }
  0x19   : > { %1018 = vmatprep.mubr.bf16.mxu1 %v1901_v35  ;;  %v1904_v37 = vld [vmem:[%s2126_s28 + $0x2c] ss:$16 sps:$4 sm:$0xff]   ;;  %v1907_v39 = vld [vmem:[%s2126_s28 + $0x28] ss:$16 sps:$4 sm:$0xff]   ;;  %v1908_v40 = vld [vmem:[%s2126_s28 + $0x44] ss:$16 sps:$4 sm:$0xff]  }
  0x1a   : > { %1639 = vmatpush3.bf16.msra.mxu0 %v1878_v14  ;;  %v1910_v41 = vld [vmem:[%s2126_s28 + $0x4c] ss:$16 sps:$4 sm:$0xff]   ;;  %v1912_v42 = vld [vmem:[%s2126_s28 + $0x40] ss:$16 sps:$4 sm:$0xff]   ;;  %v1913_v43 = vld [vmem:[%s2126_s28 + $0x48] ss:$16 sps:$4 sm:$0xff]  }
  0x1b   : > { %1751 = vmatpush3.bf16.msra.mxu1 %v1879_v15  ;;  %1640 = vmatprep.subr.bf16.mxu0 %v1880_v16  ;;  %v1914_v44 = vld [vmem:[%s2126_s28 + $0x64] ss:$16 sps:$4 sm:$0xff]   ;;  %v1916_v45 = vld [vmem:[%s2126_s28 + $0x6c] ss:$16 sps:$4 sm:$0xff]   ;;  %v1918_v46 = vld [vmem:[%s2126_s28 + $0x60] ss:$16 sps:$4 sm:$0xff]  }
  0x1c   : > { %1752 = vmatprep.subr.bf16.mxu1 %v1881_v17  ;;  %v1919_v47 = vld [vmem:[%s2126_s28 + $0x68] ss:$16 sps:$4 sm:$0xff]   ;;  %v1920_v48 = vld [vmem:[%s2126_s28 + $0x84] ss:$16 sps:$4 sm:$0xff]   ;;  %v1922_v49 = vld [vmem:[%s2126_s28 + $0x8c] ss:$16 sps:$4 sm:$0xff]  }
  0x1d   : > { %v1924_v50 = vld [vmem:[%s2126_s28 + $0x80] ss:$16 sps:$4 sm:$0xff]   ;;  %v1925_v51 = vld [vmem:[%s2126_s28 + $0x88] ss:$16 sps:$4 sm:$0xff]   ;;  %v1926_v52 = vld [vmem:[%s2126_s28 + $0xa4] ss:$16 sps:$4 sm:$0xff]  }
  0x1e   : > { %1641 = vmatpush3.bf16.msra.mxu0 %v1882_v18  ;;  %v1928_v53 = vld [vmem:[%s2126_s28 + $0xac] ss:$16 sps:$4 sm:$0xff]   ;;  %v1930_v54 = vld [vmem:[%s2126_s28 + $0xa0] ss:$16 sps:$4 sm:$0xff]   ;;  %v1931_v55 = vld [vmem:[%s2126_s28 + $0xa8] ss:$16 sps:$4 sm:$0xff]  }
  0x1f   : > { %1753 = vmatpush3.bf16.msra.mxu1 %v1883_v19  ;;  %1642 = vmatprep.subr.bf16.mxu0 %v1884_v20  ;;  %v1932_v56 = vld [vmem:[%s2126_s28 + $0xc4] ss:$16 sps:$4 sm:$0xff]   ;;  %v1934_v57 = vld [vmem:[%s2126_s28 + $0xcc] ss:$16 sps:$4 sm:$0xff]   ;;  %v1936_v58 = vld [vmem:[%s2126_s28 + $0xc0] ss:$16 sps:$4 sm:$0xff]  }
  0x20   : > { %1754 = vmatprep.subr.bf16.mxu1 %v1885_v21  ;;  %v1937_v59 = vld [vmem:[%s2126_s28 + $0xc8] ss:$16 sps:$4 sm:$0xff]   ;;  %v1938_v60 = vld [vmem:[%s2126_s28 + $0xe4] ss:$16 sps:$4 sm:$0xff]   ;;  %v1940_v61 = vld [vmem:[%s2126_s28 + $0xec] ss:$16 sps:$4 sm:$0xff]  }
  0x21   : > { %v1942_v62 = vld [vmem:[%s2126_s28 + $0xe0] ss:$16 sps:$4 sm:$0xff]   ;;  %v1943_v63 = vld [vmem:[%s2126_s28 + $0xe8] ss:$16 sps:$4 sm:$0xff]   ;;  %v1944_v0 = vld [vmem:[%s2126_s28 + $0x104] ss:$16 sps:$4 sm:$0xff]  }
  0x22   : > { %1643 = vmatpush3.bf16.msra.mxu0 %v1886_v22  ;;  %v1946_v1 = vld [vmem:[%s2126_s28 + $0x10c] ss:$16 sps:$4 sm:$0xff]   ;;  %v1948_v2 = vld [vmem:[%s2126_s28 + $0x100] ss:$16 sps:$4 sm:$0xff]   ;;  %v1949_v3 = vld [vmem:[%s2126_s28 + $0x108] ss:$16 sps:$4 sm:$0xff]  }
  0x23   : > { %1755 = vmatpush3.bf16.msra.mxu1 %v1887_v23  ;;  %1644 = vmatprep.subr.bf16.mxu0 %v1888_v24  ;;  %v1950_v4 = vld [vmem:[%s2126_s28 + $0x124] ss:$16 sps:$4 sm:$0xff]   ;;  %v1952_v5 = vld [vmem:[%s2126_s28 + $0x12c] ss:$16 sps:$4 sm:$0xff]   ;;  %v1954_v6 = vld [vmem:[%s2126_s28 + $0x120] ss:$16 sps:$4 sm:$0xff]  }
  0x24   : > { %1756 = vmatprep.subr.bf16.mxu1 %v1889_v25  ;;  %v1955_v7 = vld [vmem:[%s2126_s28 + $0x128] ss:$16 sps:$4 sm:$0xff]   ;;  %v1956_v8 = vld [vmem:[%s2126_s28 + $0x144] ss:$16 sps:$4 sm:$0xff]   ;;  %v1958_v9 = vld [vmem:[%s2126_s28 + $0x14c] ss:$16 sps:$4 sm:$0xff]  }
  0x25   : > { %v1960_v10 = vld [vmem:[%s2126_s28 + $0x140] ss:$16 sps:$4 sm:$0xff]   ;;  %v1961_v11 = vld [vmem:[%s2126_s28 + $0x148] ss:$16 sps:$4 sm:$0xff]   ;;  %v1962_v12 = vld [vmem:[%s2126_s28 + $0x164] ss:$16 sps:$4 sm:$0xff]  }
  0x26   : > { %1645 = vmatpush3.bf16.msra.mxu0 %v1890_v26  ;;  %v1964_v13 = vld [vmem:[%s2126_s28 + $0x16c] ss:$16 sps:$4 sm:$0xff]   ;;  %v1966_v14 = vld [vmem:[%s2126_s28 + $0x160] ss:$16 sps:$4 sm:$0xff]   ;;  %v1967_v15 = vld [vmem:[%s2126_s28 + $0x168] ss:$16 sps:$4 sm:$0xff]  }
  0x27   : > { %1757 = vmatpush3.bf16.msra.mxu1 %v1891_v27  ;;  %1646 = vmatprep.subr.bf16.mxu0 %v1892_v28  ;;  %v1968_v16 = vld [vmem:[%s2126_s28 + $0x184] ss:$16 sps:$4 sm:$0xff]   ;;  %v1970_v17 = vld [vmem:[%s2126_s28 + $0x18c] ss:$16 sps:$4 sm:$0xff]   ;;  %v1972_v18 = vld [vmem:[%s2126_s28 + $0x180] ss:$16 sps:$4 sm:$0xff]  }
  0x28   : > { %1758 = vmatprep.subr.bf16.mxu1 %v1893_v29  ;;  %v1973_v19 = vld [vmem:[%s2126_s28 + $0x188] ss:$16 sps:$4 sm:$0xff]   ;;  %v1974_v20 = vld [vmem:[%s2126_s28 + $0x1a4] ss:$16 sps:$4 sm:$0xff]   ;;  %v1976_v21 = vld [vmem:[%s2126_s28 + $0x1ac] ss:$16 sps:$4 sm:$0xff]  }
  0x29   : > { %v1978_v22 = vld [vmem:[%s2126_s28 + $0x1a0] ss:$16 sps:$4 sm:$0xff]   ;;  %v1979_v23 = vld [vmem:[%s2126_s28 + $0x1a8] ss:$16 sps:$4 sm:$0xff]   ;;  %v1980_v24 = vld [vmem:[%s2126_s28 + $0x1c4] ss:$16 sps:$4 sm:$0xff]  }
  0x2a   : > { %1647 = vmatpush3.bf16.msra.mxu0 %v1894_v30  ;;  %v1982_v25 = vld [vmem:[%s2126_s28 + $0x1cc] ss:$16 sps:$4 sm:$0xff]   ;;  %v1984_v26 = vld [vmem:[%s2126_s28 + $0x1c0] ss:$16 sps:$4 sm:$0xff]   ;;  %v1985_v27 = vld [vmem:[%s2126_s28 + $0x1c8] ss:$16 sps:$4 sm:$0xff]  }
  0x2b   : > { %1759 = vmatpush3.bf16.msra.mxu1 %v1895_v31  ;;  %v1986_v28 = vld [vmem:[%s2126_s28 + $0x1e4] ss:$16 sps:$4 sm:$0xff]   ;;  %v1988_v29 = vld [vmem:[%s2126_s28 + $0x1ec] ss:$16 sps:$4 sm:$0xff]   ;;  %v1990_v30 = vld [vmem:[%s2126_s28 + $0x1e0] ss:$16 sps:$4 sm:$0xff]  }
  0x2c   : > { %v1991_v31 = vld [vmem:[%s2126_s28 + $0x1e8] ss:$16 sps:$4 sm:$0xff]  }
  0x2d   : > { %858 = vmatmul.mubr.bf16.vlgmr.msra.gmra.mxu0 %v1896_v32 }
  0x2e   : > { %1019 = vmatmul.mubr.bf16.vlgmr.msra.gmra.mxu1 %v1899_v34  ;;  %865 = vmatprep.mubr.bf16.mxu0 %v1902_v36 }
  0x2f   : > { %1026 = vmatprep.mubr.bf16.mxu1 %v1904_v37  ;;  %v2201_v37 = vld [vmem:[%s2262_s2] ss:$0 sm:$0xff] }
  0x35   : > { %866 = vmatmul.mubr.bf16.gmra.mxu0 %v1906_v38 }
  0x36   : > { %1027 = vmatmul.mubr.bf16.gmra.mxu1 %v1907_v39  ;;  %873 = vmatprep.mubr.bf16.mxu0 %v1908_v40 }
  0x37   : > { %1034 = vmatprep.mubr.bf16.mxu1 %v1910_v41 }
  0x3d   : > { %874 = vmatmul.mubr.bf16.gmra.mxu0 %v1912_v42 }
  0x3e   : > { %1035 = vmatmul.mubr.bf16.gmra.mxu1 %v1913_v43  ;;  %881 = vmatprep.mubr.bf16.mxu0 %v1914_v44 }
  0x3f   : > { %1042 = vmatprep.mubr.bf16.mxu1 %v1916_v45 }
  0x45   : > { %882 = vmatmul.mubr.bf16.gmra.mxu0 %v1918_v46 }
  0x46   : > { %1043 = vmatmul.mubr.bf16.gmra.mxu1 %v1919_v47  ;;  %889 = vmatprep.mubr.bf16.mxu0 %v1920_v48 }
  0x47   : > { %1050 = vmatprep.mubr.bf16.mxu1 %v1922_v49 }
  0x4d   : > { %890 = vmatmul.mubr.bf16.gmra.mxu0 %v1924_v50 }
  0x4e   : > { %1051 = vmatmul.mubr.bf16.gmra.mxu1 %v1925_v51  ;;  %897 = vmatprep.mubr.bf16.mxu0 %v1926_v52 }
  0x4f   : > { %1058 = vmatprep.mubr.bf16.mxu1 %v1928_v53 }
  0x55   : > { %898 = vmatmul.mubr.bf16.gmra.mxu0 %v1930_v54 }
  0x56   : > { %1059 = vmatmul.mubr.bf16.gmra.mxu1 %v1931_v55  ;;  %905 = vmatprep.mubr.bf16.mxu0 %v1932_v56 }
  0x57   : > { %1066 = vmatprep.mubr.bf16.mxu1 %v1934_v57 }
  0x5d   : > { %906 = vmatmul.mubr.bf16.gmra.mxu0 %v1936_v58 }
  0x5e   : > { %1067 = vmatmul.mubr.bf16.gmra.mxu1 %v1937_v59  ;;  %913 = vmatprep.mubr.bf16.mxu0 %v1938_v60 }
  0x5f   : > { %1074 = vmatprep.mubr.bf16.mxu1 %v1940_v61 }
  0x65   : > { %914 = vmatmul.mubr.bf16.gmra.mxu0 %v1942_v62 }
  0x66   : > { %1075 = vmatmul.mubr.bf16.gmra.mxu1 %v1943_v63  ;;  %921 = vmatprep.mubr.bf16.mxu0 %v1944_v0 }
  0x67   : > { %1082 = vmatprep.mubr.bf16.mxu1 %v1946_v1 }
  0x6d   : > { %922 = vmatmul.mubr.bf16.gmra.mxu0 %v1948_v2 }
  0x6e   : > { %1083 = vmatmul.mubr.bf16.gmra.mxu1 %v1949_v3  ;;  %929 = vmatprep.mubr.bf16.mxu0 %v1950_v4 }
  0x6f   : > { %1090 = vmatprep.mubr.bf16.mxu1 %v1952_v5 }
  0x75   : > { %930 = vmatmul.mubr.bf16.gmra.mxu0 %v1954_v6 }
  0x76   : > { %1091 = vmatmul.mubr.bf16.gmra.mxu1 %v1955_v7  ;;  %937 = vmatprep.mubr.bf16.mxu0 %v1956_v8 }
  0x77   : > { %1098 = vmatprep.mubr.bf16.mxu1 %v1958_v9 }
  0x7d   : > { %938 = vmatmul.mubr.bf16.gmra.mxu0 %v1960_v10 }
  0x7e   : > { %1099 = vmatmul.mubr.bf16.gmra.mxu1 %v1961_v11  ;;  %945 = vmatprep.mubr.bf16.mxu0 %v1962_v12 }
  0x7f   : > { %1106 = vmatprep.mubr.bf16.mxu1 %v1964_v13 }
  0x85   : > { %946 = vmatmul.mubr.bf16.gmra.mxu0 %v1966_v14 }
  0x86   : > { %1107 = vmatmul.mubr.bf16.gmra.mxu1 %v1967_v15  ;;  %953 = vmatprep.mubr.bf16.mxu0 %v1968_v16 }
  0x87   : > { %1114 = vmatprep.mubr.bf16.mxu1 %v1970_v17 }
  0x8d   : > { %954 = vmatmul.mubr.bf16.gmra.mxu0 %v1972_v18 }
  0x8e   : > { %1115 = vmatmul.mubr.bf16.gmra.mxu1 %v1973_v19  ;;  %961 = vmatprep.mubr.bf16.mxu0 %v1974_v20 }
  0x8f   : > { %1122 = vmatprep.mubr.bf16.mxu1 %v1976_v21 }
  0x95   : > { %962 = vmatmul.mubr.bf16.gmra.mxu0 %v1978_v22 }
  0x96   : > { %1123 = vmatmul.mubr.bf16.gmra.mxu1 %v1979_v23  ;;  %969 = vmatprep.mubr.bf16.mxu0 %v1980_v24 }
  0x97   : > { %1130 = vmatprep.mubr.bf16.mxu1 %v1982_v25 }
  0x9d   : > { %970 = vmatmul.mubr.bf16.gmra.mxu0 %v1984_v26 }
  0x9e   : > { %1131 = vmatmul.mubr.bf16.gmra.mxu1 %v1985_v27  ;;  %977 = vmatprep.mubr.bf16.mxu0 %v1986_v28 }
  0x9f   : > { %1138 = vmatprep.mubr.bf16.mxu1 %v1988_v29 }
  0xa5   : > { %978 = vmatmul.mubr.bf16.gmra.mxu0 %v1990_v30 }
  0xa6   : > { %1139 = vmatmul.mubr.bf16.gmra.mxu1 %v1991_v31 }
  0xed   : > { %v1648_v32 = vpop.f32.mrf.mxu0 }
  0xee   : > { %v1760_v33 = vpop.f32.mrf.mxu1 }
  0xef   : > { %v1649_v34 = vpop.f32.mrf.mxu0 }
  0xf0   : > { %v1650_v35 = vadd.f32 %v1649_v34, %v1648_v32  ;;  %v1761_v36 = vpop.f32.mrf.mxu1 }
  0xf1   : > { %v1651_v38 = vpop.f32.mrf.mxu0  ;;  %v1762_v45 = vadd.f32 %v1761_v36, %v1760_v33 }
  0xf2   : > { %v1763_v39 = vpop.f32.mrf.mxu1  ;;  %v860_v41 = vadd.f32 %v1650_v35, %v2201_v37 }
  0xf3   : > { %v1652_v40 = vpop.f32.mrf.mxu0 }
  0xf4   : > { %v1653_v42 = vadd.f32 %v1652_v40, %v1651_v38  ;;  %v1764_v43 = vpop.f32.mrf.mxu1  ;;  %v1021_v50 = vadd.f32 %v1762_v45, %v860_v41 }
  0xf5   : > { %v1654_v44 = vpop.f32.mrf.mxu0  ;;  %v1765_v47 = vadd.f32 %v1764_v43, %v1763_v39 }
  0xf6   : > { %v863_v46 = vadd.f32 %v1653_v42, %v2201_v37  ;;  %v1766_v48 = vpop.f32.mrf.mxu1 }
  0xf7   : > { %v1655_v49 = vpop.f32.mrf.mxu0 }
  0xf8   : > { %v1024_v51 = vadd.f32 %v1765_v47, %v863_v46  ;;  %v1656_v52 = vadd.f32 %v1655_v49, %v1654_v44  ;;  %v1767_v53 = vpop.f32.mrf.mxu1 }
  0xf9   : > { %v1657_v54 = vpop.f32.mrf.mxu0  ;;  %v1768_v62 = vadd.f32 %v1767_v53, %v1766_v48 }
  0xfa   : > { %v1540_v55 = vpack.c.bf16 %v1024_v51, %v1021_v50  ;;  %v1769_v56 = vpop.f32.mrf.mxu1  ;;  %v868_v58 = vadd.f32 %v1656_v52, %v2201_v37 }
  0xfb   : > { %v1658_v57 = vpop.f32.mrf.mxu0 }
  0xfc   : > { %1541 = vst [vmem:[%s2209_s10] sm:$0xff] %v1540_v55   ;;  %v1659_v59 = vadd.f32 %v1658_v57, %v1657_v54  ;;  %v1770_v60 = vpop.f32.mrf.mxu1  ;;  %v1029_v3 = vadd.f32 %v1768_v62, %v868_v58 }
  0xfd   : > { %v1660_v61 = vpop.f32.mrf.mxu0  ;;  %v1771_v0 = vadd.f32 %v1770_v60, %v1769_v56 }
  0xfe   : > { %v871_v63 = vadd.f32 %v1659_v59, %v2201_v37  ;;  %v1772_v1 = vpop.f32.mrf.mxu1 }
  0xff   : > { %v1661_v2 = vpop.f32.mrf.mxu0 }
 0x100   : > { %v1032_v4 = vadd.f32 %v1771_v0, %v871_v63  ;;  %v1662_v5 = vadd.f32 %v1661_v2, %v1660_v61  ;;  %v1773_v6 = vpop.f32.mrf.mxu1 }
 0x101   : > { %v1663_v7 = vpop.f32.mrf.mxu0  ;;  %v1774_v15 = vadd.f32 %v1773_v6, %v1772_v1 }
 0x102   : > { %v1545_v8 = vpack.c.bf16 %v1032_v4, %v1029_v3  ;;  %v1775_v9 = vpop.f32.mrf.mxu1  ;;  %v876_v11 = vadd.f32 %v1662_v5, %v2201_v37 }
 0x103   : > { %v1664_v10 = vpop.f32.mrf.mxu0 }
 0x104   : > { %1617 = vst [vmem:[%s2209_s10 + $0x8] sm:$0xff] %v1545_v8   ;;  %v1665_v12 = vadd.f32 %v1664_v10, %v1663_v7  ;;  %v1776_v13 = vpop.f32.mrf.mxu1  ;;  %v1037_v20 = vadd.f32 %v1774_v15, %v876_v11 }
 0x105   : > { %v1666_v14 = vpop.f32.mrf.mxu0  ;;  %v1777_v17 = vadd.f32 %v1776_v13, %v1775_v9 }
 0x106   : > { %v879_v16 = vadd.f32 %v1665_v12, %v2201_v37  ;;  %v1778_v18 = vpop.f32.mrf.mxu1 }
 0x107   : > { %v1667_v19 = vpop.f32.mrf.mxu0 }
 0x108   : > { %v1040_v21 = vadd.f32 %v1777_v17, %v879_v16  ;;  %v1668_v22 = vadd.f32 %v1667_v19, %v1666_v14  ;;  %v1779_v23 = vpop.f32.mrf.mxu1 }
 0x109   : > { %v1669_v24 = vpop.f32.mrf.mxu0  ;;  %v1780_v32 = vadd.f32 %v1779_v23, %v1778_v18 }
 0x10a   : > { %v1550_v25 = vpack.c.bf16 %v1040_v21, %v1037_v20  ;;  %v1781_v26 = vpop.f32.mrf.mxu1  ;;  %v884_v28 = vadd.f32 %v1668_v22, %v2201_v37 }
 0x10b   : > { %v1670_v27 = vpop.f32.mrf.mxu0 }
 0x10c   : > { %1618 = vst [vmem:[%s2209_s10 + $0x10] sm:$0xff] %v1550_v25   ;;  %v1671_v29 = vadd.f32 %v1670_v27, %v1669_v24  ;;  %v1782_v30 = vpop.f32.mrf.mxu1  ;;  %v1045_v38 = vadd.f32 %v1780_v32, %v884_v28 }
 0x10d   : > { %v1672_v31 = vpop.f32.mrf.mxu0  ;;  %v1783_v34 = vadd.f32 %v1782_v30, %v1781_v26 }
 0x10e   : > { %v887_v33 = vadd.f32 %v1671_v29, %v2201_v37  ;;  %v1784_v35 = vpop.f32.mrf.mxu1 }
 0x10f   : > { %v1673_v36 = vpop.f32.mrf.mxu0 }
 0x110   : > { %v1048_v39 = vadd.f32 %v1783_v34, %v887_v33  ;;  %v1674_v40 = vadd.f32 %v1673_v36, %v1672_v31  ;;  %v1785_v41 = vpop.f32.mrf.mxu1 }
 0x111   : > { %v1675_v42 = vpop.f32.mrf.mxu0  ;;  %v1786_v50 = vadd.f32 %v1785_v41, %v1784_v35 }
 0x112   : > { %v1555_v43 = vpack.c.bf16 %v1048_v39, %v1045_v38  ;;  %v1787_v44 = vpop.f32.mrf.mxu1  ;;  %v892_v46 = vadd.f32 %v1674_v40, %v2201_v37 }
 0x113   : > { %v1676_v45 = vpop.f32.mrf.mxu0 }
 0x114   : > { %1619 = vst [vmem:[%s2209_s10 + $0x18] sm:$0xff] %v1555_v43   ;;  %v1677_v47 = vadd.f32 %v1676_v45, %v1675_v42  ;;  %v1788_v48 = vpop.f32.mrf.mxu1  ;;  %v1053_v55 = vadd.f32 %v1786_v50, %v892_v46 }
 0x115   : > { %v1678_v49 = vpop.f32.mrf.mxu0  ;;  %v1789_v52 = vadd.f32 %v1788_v48, %v1787_v44 }
 0x116   : > { %v895_v51 = vadd.f32 %v1677_v47, %v2201_v37  ;;  %v1790_v53 = vpop.f32.mrf.mxu1 }
 0x117   : > { %v1679_v54 = vpop.f32.mrf.mxu0 }
 0x118   : > { %v1056_v56 = vadd.f32 %v1789_v52, %v895_v51  ;;  %v1680_v57 = vadd.f32 %v1679_v54, %v1678_v49  ;;  %v1791_v58 = vpop.f32.mrf.mxu1 }
 0x119   : > { %v1681_v59 = vpop.f32.mrf.mxu0  ;;  %v1792_v3 = vadd.f32 %v1791_v58, %v1790_v53 }
 0x11a   : > { %v1560_v60 = vpack.c.bf16 %v1056_v56, %v1053_v55  ;;  %v1793_v61 = vpop.f32.mrf.mxu1  ;;  %v900_v63 = vadd.f32 %v1680_v57, %v2201_v37 }
 0x11b   : > { %v1682_v62 = vpop.f32.mrf.mxu0 }
 0x11c   : > { %1620 = vst [vmem:[%s2209_s10 + $0x20] sm:$0xff] %v1560_v60   ;;  %v1683_v0 = vadd.f32 %v1682_v62, %v1681_v59  ;;  %v1794_v1 = vpop.f32.mrf.mxu1  ;;  %v1061_v8 = vadd.f32 %v1792_v3, %v900_v63 }
 0x11d   : > { %v1684_v2 = vpop.f32.mrf.mxu0  ;;  %v1795_v5 = vadd.f32 %v1794_v1, %v1793_v61 }
 0x11e   : > { %v903_v4 = vadd.f32 %v1683_v0, %v2201_v37  ;;  %v1796_v6 = vpop.f32.mrf.mxu1 }
 0x11f   : > { %v1685_v7 = vpop.f32.mrf.mxu0 }
 0x120   : > { %v1064_v9 = vadd.f32 %v1795_v5, %v903_v4  ;;  %v1686_v10 = vadd.f32 %v1685_v7, %v1684_v2  ;;  %v1797_v11 = vpop.f32.mrf.mxu1 }
 0x121   : > { %v1687_v12 = vpop.f32.mrf.mxu0  ;;  %v1798_v20 = vadd.f32 %v1797_v11, %v1796_v6 }
 0x122   : > { %v1565_v13 = vpack.c.bf16 %v1064_v9, %v1061_v8  ;;  %v1799_v14 = vpop.f32.mrf.mxu1  ;;  %v908_v16 = vadd.f32 %v1686_v10, %v2201_v37 }
 0x123   : > { %v1688_v15 = vpop.f32.mrf.mxu0 }
 0x124   : > { %1621 = vst [vmem:[%s2209_s10 + $0x28] sm:$0xff] %v1565_v13   ;;  %v1689_v17 = vadd.f32 %v1688_v15, %v1687_v12  ;;  %v1800_v18 = vpop.f32.mrf.mxu1  ;;  %v1069_v25 = vadd.f32 %v1798_v20, %v908_v16 }
 0x125   : > { %v1690_v19 = vpop.f32.mrf.mxu0  ;;  %v1801_v22 = vadd.f32 %v1800_v18, %v1799_v14 }
 0x126   : > { %v911_v21 = vadd.f32 %v1689_v17, %v2201_v37  ;;  %v1802_v23 = vpop.f32.mrf.mxu1 }
 0x127   : > { %v1691_v24 = vpop.f32.mrf.mxu0 }
 0x128   : > { %v1072_v26 = vadd.f32 %v1801_v22, %v911_v21  ;;  %v1692_v27 = vadd.f32 %v1691_v24, %v1690_v19  ;;  %v1803_v28 = vpop.f32.mrf.mxu1 }
 0x129   : > { %v1693_v29 = vpop.f32.mrf.mxu0  ;;  %v1804_v38 = vadd.f32 %v1803_v28, %v1802_v23 }
 0x12a   : > { %v1570_v30 = vpack.c.bf16 %v1072_v26, %v1069_v25  ;;  %v1805_v31 = vpop.f32.mrf.mxu1  ;;  %v916_v33 = vadd.f32 %v1692_v27, %v2201_v37 }
 0x12b   : > { %v1694_v32 = vpop.f32.mrf.mxu0 }
 0x12c   : > { %1622 = vst [vmem:[%s2209_s10 + $0x30] sm:$0xff] %v1570_v30   ;;  %v1695_v34 = vadd.f32 %v1694_v32, %v1693_v29  ;;  %v1806_v35 = vpop.f32.mrf.mxu1  ;;  %v1077_v43 = vadd.f32 %v1804_v38, %v916_v33 }
 0x12d   : > { %v1696_v36 = vpop.f32.mrf.mxu0  ;;  %v1807_v40 = vadd.f32 %v1806_v35, %v1805_v31 }
 0x12e   : > { %v919_v39 = vadd.f32 %v1695_v34, %v2201_v37  ;;  %v1808_v41 = vpop.f32.mrf.mxu1 }
 0x12f   : > { %v1697_v42 = vpop.f32.mrf.mxu0 }
 0x130   : > { %v1080_v44 = vadd.f32 %v1807_v40, %v919_v39  ;;  %v1698_v45 = vadd.f32 %v1697_v42, %v1696_v36  ;;  %v1809_v46 = vpop.f32.mrf.mxu1 }
 0x131   : > { %v1699_v47 = vpop.f32.mrf.mxu0  ;;  %v1810_v55 = vadd.f32 %v1809_v46, %v1808_v41 }
 0x132   : > { %v1575_v48 = vpack.c.bf16 %v1080_v44, %v1077_v43  ;;  %v1811_v49 = vpop.f32.mrf.mxu1  ;;  %v924_v51 = vadd.f32 %v1698_v45, %v2201_v37 }
 0x133   : > { %v1700_v50 = vpop.f32.mrf.mxu0 }
 0x134   : > { %1623 = vst [vmem:[%s2209_s10 + $0x38] sm:$0xff] %v1575_v48   ;;  %v1701_v52 = vadd.f32 %v1700_v50, %v1699_v47  ;;  %v1812_v53 = vpop.f32.mrf.mxu1  ;;  %v1085_v60 = vadd.f32 %v1810_v55, %v924_v51 }
 0x135   : > { %v1702_v54 = vpop.f32.mrf.mxu0  ;;  %v1813_v57 = vadd.f32 %v1812_v53, %v1811_v49 }
 0x136   : > { %v927_v56 = vadd.f32 %v1701_v52, %v2201_v37  ;;  %v1814_v58 = vpop.f32.mrf.mxu1 }
 0x137   : > { %v1703_v59 = vpop.f32.mrf.mxu0 }
 0x138   : > { %v1088_v61 = vadd.f32 %v1813_v57, %v927_v56  ;;  %v1704_v62 = vadd.f32 %v1703_v59, %v1702_v54  ;;  %v1815_v63 = vpop.f32.mrf.mxu1 }
 0x139   : > { %v1705_v0 = vpop.f32.mrf.mxu0  ;;  %v1816_v8 = vadd.f32 %v1815_v63, %v1814_v58 }
 0x13a   : > { %v1580_v1 = vpack.c.bf16 %v1088_v61, %v1085_v60  ;;  %v1817_v2 = vpop.f32.mrf.mxu1  ;;  %v932_v4 = vadd.f32 %v1704_v62, %v2201_v37 }
 0x13b   : > { %v1706_v3 = vpop.f32.mrf.mxu0 }
 0x13c   : > { %1624 = vst [vmem:[%s2209_s10 + $0x40] sm:$0xff] %v1580_v1   ;;  %v1707_v5 = vadd.f32 %v1706_v3, %v1705_v0  ;;  %v1818_v6 = vpop.f32.mrf.mxu1  ;;  %v1093_v13 = vadd.f32 %v1816_v8, %v932_v4 }
 0x13d   : > { %v1708_v7 = vpop.f32.mrf.mxu0  ;;  %v1819_v10 = vadd.f32 %v1818_v6, %v1817_v2 }
 0x13e   : > { %v935_v9 = vadd.f32 %v1707_v5, %v2201_v37  ;;  %v1820_v11 = vpop.f32.mrf.mxu1 }
 0x13f   : > { %v1709_v12 = vpop.f32.mrf.mxu0 }
 0x140   : > { %v1096_v14 = vadd.f32 %v1819_v10, %v935_v9  ;;  %v1710_v15 = vadd.f32 %v1709_v12, %v1708_v7  ;;  %v1821_v16 = vpop.f32.mrf.mxu1 }
 0x141   : > { %v1711_v17 = vpop.f32.mrf.mxu0  ;;  %v1822_v25 = vadd.f32 %v1821_v16, %v1820_v11 }
 0x142   : > { %v1585_v18 = vpack.c.bf16 %v1096_v14, %v1093_v13  ;;  %v1823_v19 = vpop.f32.mrf.mxu1  ;;  %v940_v21 = vadd.f32 %v1710_v15, %v2201_v37 }
 0x143   : > { %v1712_v20 = vpop.f32.mrf.mxu0 }
 0x144   : > { %1625 = vst [vmem:[%s2209_s10 + $0x48] sm:$0xff] %v1585_v18   ;;  %v1713_v22 = vadd.f32 %v1712_v20, %v1711_v17  ;;  %v1824_v23 = vpop.f32.mrf.mxu1  ;;  %v1101_v30 = vadd.f32 %v1822_v25, %v940_v21 }
 0x145   : > { %v1714_v24 = vpop.f32.mrf.mxu0  ;;  %v1825_v27 = vadd.f32 %v1824_v23, %v1823_v19 }
 0x146   : > { %v943_v26 = vadd.f32 %v1713_v22, %v2201_v37  ;;  %v1826_v28 = vpop.f32.mrf.mxu1 }
 0x147   : > { %v1715_v29 = vpop.f32.mrf.mxu0 }
 0x148   : > { %v1104_v31 = vadd.f32 %v1825_v27, %v943_v26  ;;  %v1716_v32 = vadd.f32 %v1715_v29, %v1714_v24  ;;  %v1827_v33 = vpop.f32.mrf.mxu1 }
 0x149   : > { %v1717_v34 = vpop.f32.mrf.mxu0  ;;  %v1828_v43 = vadd.f32 %v1827_v33, %v1826_v28 }
 0x14a   : > { %v1590_v35 = vpack.c.bf16 %v1104_v31, %v1101_v30  ;;  %v1829_v36 = vpop.f32.mrf.mxu1  ;;  %v948_v39 = vadd.f32 %v1716_v32, %v2201_v37 }
 0x14b   : > { %v1718_v38 = vpop.f32.mrf.mxu0 }
 0x14c   : > { %1626 = vst [vmem:[%s2209_s10 + $0x50] sm:$0xff] %v1590_v35   ;;  %v1719_v40 = vadd.f32 %v1718_v38, %v1717_v34  ;;  %v1830_v41 = vpop.f32.mrf.mxu1  ;;  %v1109_v48 = vadd.f32 %v1828_v43, %v948_v39 }
 0x14d   : > { %v1720_v42 = vpop.f32.mrf.mxu0  ;;  %v1831_v45 = vadd.f32 %v1830_v41, %v1829_v36 }
 0x14e   : > { %v951_v44 = vadd.f32 %v1719_v40, %v2201_v37  ;;  %v1832_v46 = vpop.f32.mrf.mxu1 }
 0x14f   : > { %v1721_v47 = vpop.f32.mrf.mxu0 }
 0x150   : > { %v1112_v49 = vadd.f32 %v1831_v45, %v951_v44  ;;  %v1722_v50 = vadd.f32 %v1721_v47, %v1720_v42  ;;  %v1833_v51 = vpop.f32.mrf.mxu1 }
 0x151   : > { %v1723_v52 = vpop.f32.mrf.mxu0  ;;  %v1834_v60 = vadd.f32 %v1833_v51, %v1832_v46 }
 0x152   : > { %v1595_v53 = vpack.c.bf16 %v1112_v49, %v1109_v48  ;;  %v1835_v54 = vpop.f32.mrf.mxu1  ;;  %v956_v56 = vadd.f32 %v1722_v50, %v2201_v37 }
 0x153   : > { %v1724_v55 = vpop.f32.mrf.mxu0 }
 0x154   : > { %1627 = vst [vmem:[%s2209_s10 + $0x58] sm:$0xff] %v1595_v53   ;;  %v1725_v57 = vadd.f32 %v1724_v55, %v1723_v52  ;;  %v1836_v58 = vpop.f32.mrf.mxu1  ;;  %v1117_v1 = vadd.f32 %v1834_v60, %v956_v56 }
 0x155   : > { %v1726_v59 = vpop.f32.mrf.mxu0  ;;  %v1837_v62 = vadd.f32 %v1836_v58, %v1835_v54 }
 0x156   : > { %v959_v61 = vadd.f32 %v1725_v57, %v2201_v37  ;;  %v1838_v63 = vpop.f32.mrf.mxu1 }
 0x157   : > { %v1727_v0 = vpop.f32.mrf.mxu0 }
 0x158   : > { %v1120_v2 = vadd.f32 %v1837_v62, %v959_v61  ;;  %v1728_v3 = vadd.f32 %v1727_v0, %v1726_v59  ;;  %v1839_v4 = vpop.f32.mrf.mxu1 }
 0x159   : > { %v1729_v5 = vpop.f32.mrf.mxu0  ;;  %v1840_v13 = vadd.f32 %v1839_v4, %v1838_v63 }
 0x15a   : > { %v1600_v6 = vpack.c.bf16 %v1120_v2, %v1117_v1  ;;  %v1841_v7 = vpop.f32.mrf.mxu1  ;;  %v964_v9 = vadd.f32 %v1728_v3, %v2201_v37 }
 0x15b   : > { %v1730_v8 = vpop.f32.mrf.mxu0 }
 0x15c   : > { %1628 = vst [vmem:[%s2209_s10 + $0x60] sm:$0xff] %v1600_v6   ;;  %v1731_v10 = vadd.f32 %v1730_v8, %v1729_v5  ;;  %v1842_v11 = vpop.f32.mrf.mxu1  ;;  %v1125_v18 = vadd.f32 %v1840_v13, %v964_v9 }
 0x15d   : > { %v1732_v12 = vpop.f32.mrf.mxu0  ;;  %v1843_v15 = vadd.f32 %v1842_v11, %v1841_v7 }
 0x15e   : > { %v967_v14 = vadd.f32 %v1731_v10, %v2201_v37  ;;  %v1844_v16 = vpop.f32.mrf.mxu1 }
 0x15f   : > { %v1733_v17 = vpop.f32.mrf.mxu0 }
 0x160   : > { %v1128_v19 = vadd.f32 %v1843_v15, %v967_v14  ;;  %v1734_v20 = vadd.f32 %v1733_v17, %v1732_v12  ;;  %v1845_v21 = vpop.f32.mrf.mxu1 }
 0x161   : > { %v1735_v22 = vpop.f32.mrf.mxu0  ;;  %v1846_v30 = vadd.f32 %v1845_v21, %v1844_v16 }
 0x162   : > { %v1605_v23 = vpack.c.bf16 %v1128_v19, %v1125_v18  ;;  %v1847_v24 = vpop.f32.mrf.mxu1  ;;  %v972_v26 = vadd.f32 %v1734_v20, %v2201_v37 }
 0x163   : > { %v1736_v25 = vpop.f32.mrf.mxu0 }
 0x164   : > { %1629 = vst [vmem:[%s2209_s10 + $0x68] sm:$0xff] %v1605_v23   ;;  %v1737_v27 = vadd.f32 %v1736_v25, %v1735_v22  ;;  %v1848_v28 = vpop.f32.mrf.mxu1  ;;  %v1133_v35 = vadd.f32 %v1846_v30, %v972_v26 }
 0x165   : > { %v1738_v29 = vpop.f32.mrf.mxu0  ;;  %v1849_v32 = vadd.f32 %v1848_v28, %v1847_v24 }
 0x166   : > { %v975_v31 = vadd.f32 %v1737_v27, %v2201_v37  ;;  %v1850_v33 = vpop.f32.mrf.mxu1 }
 0x167   : > { %v1739_v34 = vpop.f32.mrf.mxu0 }
 0x168   : > { %v1136_v36 = vadd.f32 %v1849_v32, %v975_v31  ;;  %v1740_v38 = vadd.f32 %v1739_v34, %v1738_v29  ;;  %v1851_v39 = vpop.f32.mrf.mxu1 }
 0x169   : > { %v1741_v40 = vpop.f32.mrf.mxu0  ;;  %v1852_v47 = vadd.f32 %v1851_v39, %v1850_v33 }
 0x16a   : > { %v1610_v41 = vpack.c.bf16 %v1136_v36, %v1133_v35  ;;  %v1853_v42 = vpop.f32.mrf.mxu1  ;;  %v980_v44 = vadd.f32 %v1740_v38, %v2201_v37 }
 0x16b   : > { %v1742_v43 = vpop.f32.mrf.mxu0 }
 0x16c   : > { %1630 = vst [vmem:[%s2209_s10 + $0x70] sm:$0xff] %v1610_v41   ;;  %v1743_v45 = vadd.f32 %v1742_v43, %v1741_v40  ;;  %v1854_v46 = vpop.f32.mrf.mxu1  ;;  %v1141_v50 = vadd.f32 %v1852_v47, %v980_v44 }
 0x16d   : > { %v1855_v49 = vadd.f32 %v1854_v46, %v1853_v42 }
 0x16e   : > { %v983_v48 = vadd.f32 %v1743_v45, %v2201_v37 }
 0x170   : > { %v1144_v51 = vadd.f32 %v1855_v49, %v983_v48 }
 0x172   : > { %v1615_v52 = vpack.c.bf16 %v1144_v51, %v1141_v50 }
 0x174   : > { %1631 = vst [vmem:[%s2209_s10 + $0x78] sm:$0xff] %v1615_v52  }
 0x175 PF: > { %s13_s12 = sadd.s32 1, %s1998_s12  }
 0x176   : > { %p10_p4 = scmp.ge.s32.totalorder %s13_s12, 4  }
 0x178   :  { %12 = sbr.rel (!%p10_p4) target bundleno = 1 (0x1), region = 62 }

// kernel: clf_img_forward.13
= control target key start
LH: loop header
LB: loop body
LE: loop exit
PB: predicated region body
PF: predicated region fallthrough
CT: control target
= control target key end

     0   :  { %s711_s21 = smov 0   ;;  %s760_s0 = inlined_call_operand.vmem [shape: bf16[128,48], index: 0, kind: input, shape index: {}]   ;;  %s761_s1 = inlined_call_operand.vmem [shape: bf16[48,128], index: 1, kind: input, shape index: {}]   ;;  %s762_s2 = inlined_call_operand.vmem [shape: f32[1,48], index: 2, kind: input, shape index: {}]   ;;  %s763_s3 = inlined_call_operand.vmem [shape: f32[1,48], index: 3, kind: input, shape index: {}]   ;;  %s764_s4 = inlined_call_operand.vmem [shape: f32[1,128], index: 4, kind: input, shape index: {}]   ;;  %s765_s5 = inlined_call_operand.vmem [shape: f32[1,128], index: 5, kind: input, shape index: {}]   ;;  %s766_s6 = inlined_call_operand.vmem [shape: bf16[128,128], index: 6, kind: output, shape index: {}]  }
   0x1 LB: > { %s550_s22 = sadd.s32 4294967295, %s674_s21   ;;  %p554_p0 = scmp.ge.s32.totalorder %s674_s21, 1  ;;  %s674_s21 = sphi %s711_s21, %s16_s21  }
   0x2   : > { %p213_p1 = scmp.lt.s32.totalorder %s674_s21, 3 }
   0x4   : > { %p214_p2 = pnand %p554_p0, %p213_p1 }
   0x5   : > { %s555_s25 = sshll.u32 (!%p214_p2), %s550_s22, 3 }
   0x6   : > { %217 = sbr.rel (%p214_p2) target bundleno = 236 (0xec), region = 44  ;;  %p244_p3 = scmp.lt.s32.totalorder (!%p214_p2), %s555_s25, 15 }
   0xb   : > { %v665_v0 = vld [vmem:[%s761_s1 + $0x10] sm:$0xff]   ;;  %v666_v1 = vld [vmem:[%s761_s1 + $0x8] sm:$0xff]   ;;  %s768_s25 = smov (!%p244_p3, %s555_s25), 15  ;;  %v667_v2 = vld [vmem:[%s761_s1] sm:$0xff]   ;;  %vm338_vm0 = vcmask 392192  }
   0xc   : > { %637 = vmatprep.subr.bf16.mxu0 %v665_v0  ;;  %651 = vmatprep.subr.bf16.mxu1 %v665_v0  ;;  %s556_s30 = sshll.u32 %s768_s25, 2  ;;  %v559_v3 = vld [vmem:[%s762_s2] ss:$0 sm:$0xff] }
   0xd   : > { %638 = vmatpush3.bf16.msra.mxu0 %v665_v0  ;;  %654 = vmatpush3.bf16.msra.mxu1 %v665_v0  ;;  %s247_s9 = scalar_lea.vmem %s760_s0, %s556_s30  ;;  %v560_v12 = vld [vmem:[%s763_s3] ss:$0 sm:$0xff]  ;;  %s253_s20 = scalar_lea.vmem %s766_s6, %s556_s30 }
   0xe   : > { %639 = vmatprep.subr.bf16.mxu0 %v666_v1  ;;  %652 = vmatprep.subr.bf16.mxu1 %v666_v1  ;;  %v589_v4 = vld [vmem:[%s247_s9] sm:$0xff]   ;;  %v625_v5 = vld [vmem:[%s247_s9 + $0x10] sm:$0xff]   ;;  %v624_v6 = vld [vmem:[%s247_s9 + $0x8] sm:$0xff]  }
   0xf   : > { %v590_v7 = vunpack.c.l.bf16 %v589_v4  ;;  %v591_v8 = vunpack.c.h.bf16 %v589_v4  ;;  %v598_v9 = vunpack.c.l.bf16 %v625_v5  ;;  %v599_v10 = vunpack.c.h.bf16 %v625_v5  ;;  %v626_v11 = vld [vmem:[%s247_s9 + $0x18] sm:$0xff]   ;;  %v568_v45 = vld [vmem:[%s764_s4] ss:$0 sm:$0xff] }
  0x10   : > { %v594_v13 = vunpack.c.l.bf16 %v624_v6  ;;  %v595_v14 = vunpack.c.h.bf16 %v624_v6  ;;  %v602_v15 = vunpack.c.l.bf16 %v626_v11  ;;  %v603_v16 = vunpack.c.h.bf16 %v626_v11  ;;  %v569_v50 = vld [vmem:[%s765_s5] ss:$0 sm:$0xff] }
  0x11   : > { %640 = vmatpush3.bf16.msra.mxu0 %v666_v1  ;;  %655 = vmatpush3.bf16.msra.mxu1 %v666_v1  ;;  %v279_v17 = vmul.f32 %v590_v7, %v559_v3  ;;  %v280_v18 = vmul.f32 %v591_v8, %v559_v3  ;;  %v283_v19 = vmul.f32 %v598_v9, %v559_v3 }
  0x12   : > { %641 = vmatprep.subr.bf16.mxu0 %v667_v2  ;;  %653 = vmatprep.subr.bf16.mxu1 %v667_v2  ;;  %v284_v20 = vmul.f32 %v599_v10, %v559_v3  ;;  %v281_v21 = vmul.f32 %v594_v13, %v559_v3  ;;  %v282_v22 = vmul.f32 %v595_v14, %v559_v3 }
  0x13   : > { %v285_v23 = vmul.f32 %v602_v15, %v559_v3  ;;  %v294_v24 = vadd.f32 %v560_v12, %v279_v17  ;;  %v295_v25 = vadd.f32 %v560_v12, %v280_v18  ;;  %v298_v26 = vadd.f32 %v560_v12, %v283_v19 }
  0x14   : > { %v299_v27 = vadd.f32 %v560_v12, %v284_v20  ;;  %v296_v28 = vadd.f32 %v560_v12, %v281_v21  ;;  %v297_v29 = vadd.f32 %v560_v12, %v282_v22  ;;  %v286_v30 = vmul.f32 %v603_v16, %v559_v3 }
  0x15   : > { %642 = vmatpush3.bf16.msra.mxu0 %v667_v2  ;;  %656 = vmatpush3.bf16.msra.mxu1 %v667_v2  ;;  %v300_v31 = vadd.f32 %v560_v12, %v285_v23  ;;  %v302_v32 = vmax.f32 %v294_v24, 0.0  ;;  %v303_v33 = vmax.f32 %v295_v25, 0.0  ;;  %v306_v34 = vmax.f32 %v298_v26, 0.0 }
  0x16   : > { %v307_v35 = vmax.f32 %v299_v27, 0.0  ;;  %v304_v36 = vmax.f32 %v296_v28, 0.0  ;;  %v305_v37 = vmax.f32 %v297_v29, 0.0  ;;  %v301_v38 = vadd.f32 %v560_v12, %v286_v30 }
  0x17   : > { %v308_v39 = vmax.f32 %v300_v31, 0.0  ;;  %v310_v40 = vpack.c.bf16 %v303_v33, %v302_v32 }
  0x18   : > { %v312_v41 = vpack.c.bf16 %v307_v35, %v306_v34  ;;  %v311_v42 = vpack.c.bf16 %v305_v37, %v304_v36  ;;  %v309_v43 = vmax.f32 %v301_v38, 0.0 }
  0x19   : > { %643 = vmatprep.mubr.msk.bf16.mxu0 %vm338_vm0, %v310_v40 }
  0x1a   : > { %647 = vmatprep.mubr.msk.bf16.mxu1 %vm338_vm0, %v312_v41  ;;  %644 = vmatmul.mubr.msk.bf16.vlgmr.msra.gmra.mxu0 %vm338_vm0, %v311_v42  ;;  %v313_v44 = vpack.c.bf16 %v309_v43, %v308_v39 }
  0x1c   : > { %648 = vmatmul.mubr.msk.bf16.vlgmr.msra.gmra.mxu1 %vm338_vm0, %v313_v44 }
  0xda   : > { %v645_v46 = vpop.f32.mrf.mxu0 }
  0xdb   : > { %v425_v47 = vmul.f32 %v645_v46, %v568_v45 }
  0xdc   : > { %v649_v48 = vpop.f32.mrf.mxu1  ;;  %v385_v49 = vpop.f32.mrf.mxu0 }
  0xdd   : > { %v429_v51 = vmul.f32 %v649_v48, %v568_v45  ;;  %v423_v52 = vmul.f32 %v568_v45, %v385_v49  ;;  %v440_v56 = vadd.f32 %v569_v50, %v425_v47 }
  0xde   : > { %v401_v53 = vpop.f32.mrf.mxu1  ;;  %v646_v54 = vpop.f32.mrf.mxu0 }
  0xdf   : > { %v427_v55 = vmul.f32 %v568_v45, %v401_v53  ;;  %v426_v57 = vmul.f32 %v646_v54, %v568_v45  ;;  %v444_v60 = vadd.f32 %v569_v50, %v429_v51  ;;  %v438_v62 = vadd.f32 %v569_v50, %v423_v52 }
  0xe0   : > { %v650_v58 = vpop.f32.mrf.mxu1  ;;  %v388_v59 = vpop.f32.mrf.mxu0  ;;  %v448_v5 = vmax.f32 %v440_v56, 0.0 }
  0xe1   : > { %v430_v61 = vmul.f32 %v650_v58, %v568_v45  ;;  %v441_v63 = vadd.f32 %v569_v50, %v426_v57  ;;  %v424_v0 = vmul.f32 %v568_v45, %v388_v59  ;;  %v442_v2 = vadd.f32 %v569_v50, %v427_v55 }
  0xe2   : > { %v404_v1 = vpop.f32.mrf.mxu1  ;;  %v452_v8 = vmax.f32 %v444_v60, 0.0  ;;  %v446_v11 = vmax.f32 %v438_v62, 0.0 }
  0xe3   : > { %v445_v3 = vadd.f32 %v569_v50, %v430_v61  ;;  %v428_v4 = vmul.f32 %v568_v45, %v404_v1  ;;  %v449_v6 = vmax.f32 %v441_v63, 0.0  ;;  %v439_v7 = vadd.f32 %v569_v50, %v424_v0 }
  0xe4   : > { %v450_v14 = vmax.f32 %v442_v2, 0.0 }
  0xe5   : > { %v453_v9 = vmax.f32 %v445_v3, 0.0  ;;  %v443_v10 = vadd.f32 %v569_v50, %v428_v4  ;;  %v612_v12 = vpack.c.bf16 %v449_v6, %v448_v5  ;;  %v447_v13 = vmax.f32 %v439_v7, 0.0 }
  0xe7   : > { %v622_v15 = vpack.c.bf16 %v453_v9, %v452_v8  ;;  %v451_v16 = vmax.f32 %v443_v10, 0.0  ;;  %627 = vst [vmem:[%s253_s20 + $0x8] sm:$0xff] %v612_v12   ;;  %v607_v17 = vpack.c.bf16 %v447_v13, %v446_v11 }
  0xe9   : > { %629 = vst [vmem:[%s253_s20 + $0x18] sm:$0xff] %v622_v15   ;;  %v617_v18 = vpack.c.bf16 %v451_v16, %v450_v14  ;;  %608 = vst [vmem:[%s253_s20] sm:$0xff] %v607_v17  }
  0xeb   : > { %628 = vst [vmem:[%s253_s20 + $0x10] sm:$0xff] %v617_v18  }
  0xec PF: > { %s16_s21 = sadd.s32 1, %s674_s21  }
  0xed   : > { %p13_p4 = scmp.ge.s32.totalorder %s16_s21, 4  }
  0xef   :  { %15 = sbr.rel (!%p13_p4) target bundleno = 1 (0x1), region = 74 }

// kernel: clf_img_forward.12
= control target key start
LH: loop header
LB: loop body
LE: loop exit
PB: predicated region body
PF: predicated region fallthrough
CT: control target
= control target key end

     0   :  { %s1654_s12 = smov 0   ;;  %s1958_s0 = inlined_call_operand.vmem [shape: bf16[128,1024], index: 0, kind: input, shape index: {}]   ;;  %s1959_s1 = inlined_call_operand.vmem [shape: bf16[1024,128], index: 1, kind: input, shape index: {}]   ;;  %s1960_s2 = inlined_call_operand.vmem [shape: f32[1,128], index: 2, kind: input, shape index: {}]   ;;  %s1961_s3 = inlined_call_operand.vmem [shape: bf16[128,128], index: 3, kind: output, shape index: {}]  }
   0x1 LB: > { %s1245_s13 = sadd.s32 4294967295, %s1632_s12   ;;  %p1249_p0 = scmp.ge.s32.totalorder %s1632_s12, 1  ;;  %s1632_s12 = sphi %s1654_s12, %s13_s12  }
   0x2   : > { %p139_p1 = scmp.lt.s32.totalorder %s1632_s12, 3 }
   0x4   : > { %p140_p2 = pnand %p1249_p0, %p139_p1 }
   0x5   : > { %s1250_s21 = sshll.u32 (!%p140_p2), %s1245_s13, 3 }
   0x6   : > { %143 = sbr.rel (%p140_p2) target bundleno = 309 (0x135), region = 32  ;;  %p165_p3 = scmp.lt.s32.totalorder (!%p140_p2), %s1250_s21, 15 }
   0xb   : > { %v1562_v0 = vld [vmem:[%s1959_s1 + $0x78] sm:$0xff]   ;;  %v1566_v4 = vld [vmem:[%s1959_s1 + $0x70] sm:$0xff]   ;;  %v1570_v8 = vld [vmem:[%s1959_s1 + $0x68] sm:$0xff]   ;;  %s1963_s21 = smov (!%p165_p3, %s1250_s21), 15 }
   0xc   : > { %v1563_v1 = vld [vmem:[%s1959_s1 + $0xf8] sm:$0xff]   ;;  %1394 = vmatprep.subr.bf16.mxu0 %v1562_v0  ;;  %v1567_v5 = vld [vmem:[%s1959_s1 + $0xf0] sm:$0xff]   ;;  %v1571_v9 = vld [vmem:[%s1959_s1 + $0xe8] sm:$0xff]   ;;  %s1362_s18 = sshll.u32 %s1963_s21, 5  ;;  %s1254_s25 = sshll.u32 %s1963_s21, 2 }
   0xd   : > { %v1564_v2 = vld [vmem:[%s1959_s1 + $0x38] sm:$0xff]   ;;  %1434 = vmatprep.subr.bf16.mxu1 %v1563_v1  ;;  %v1568_v6 = vld [vmem:[%s1959_s1 + $0x30] sm:$0xff]   ;;  %v1572_v10 = vld [vmem:[%s1959_s1 + $0x28] sm:$0xff]   ;;  %s1760_s28 = scalar_lea.vmem %s1958_s0, %s1362_s18  ;;  %s1933_s29 = scalar_lea.vmem %s1961_s3, %s1254_s25 }
   0xe   : > { %v1565_v3 = vld [vmem:[%s1959_s1 + $0xb8] sm:$0xff]   ;;  %1395 = vmatpush3.bf16.msra.mxu0 %v1564_v2  ;;  %v1569_v7 = vld [vmem:[%s1959_s1 + $0xb0] sm:$0xff]   ;;  %v1573_v11 = vld [vmem:[%s1959_s1 + $0xa8] sm:$0xff]  }
   0xf   : > { %1435 = vmatpush3.bf16.msra.mxu1 %v1565_v3  ;;  %1396 = vmatprep.subr.bf16.mxu0 %v1566_v4  ;;  %v1574_v12 = vld [vmem:[%s1959_s1 + $0x60] sm:$0xff]   ;;  %v1578_v16 = vld [vmem:[%s1959_s1 + $0x58] sm:$0xff]   ;;  %v1582_v20 = vld [vmem:[%s1959_s1 + $0x50] sm:$0xff]  }
  0x10   : > { %1436 = vmatprep.subr.bf16.mxu1 %v1567_v5  ;;  %v1575_v13 = vld [vmem:[%s1959_s1 + $0xe0] sm:$0xff]   ;;  %v1579_v17 = vld [vmem:[%s1959_s1 + $0xd8] sm:$0xff]   ;;  %v1583_v21 = vld [vmem:[%s1959_s1 + $0xd0] sm:$0xff]  }
  0x11   : > { %v1576_v14 = vld [vmem:[%s1959_s1 + $0x20] sm:$0xff]   ;;  %v1580_v18 = vld [vmem:[%s1959_s1 + $0x18] sm:$0xff]   ;;  %v1584_v22 = vld [vmem:[%s1959_s1 + $0x10] sm:$0xff]  }
  0x12   : > { %1397 = vmatpush3.bf16.msra.mxu0 %v1568_v6  ;;  %v1577_v15 = vld [vmem:[%s1959_s1 + $0xa0] sm:$0xff]   ;;  %v1581_v19 = vld [vmem:[%s1959_s1 + $0x98] sm:$0xff]   ;;  %v1585_v23 = vld [vmem:[%s1959_s1 + $0x90] sm:$0xff]  }
  0x13   : > { %1437 = vmatpush3.bf16.msra.mxu1 %v1569_v7  ;;  %1398 = vmatprep.subr.bf16.mxu0 %v1570_v8  ;;  %v1586_v24 = vld [vmem:[%s1959_s1 + $0x48] sm:$0xff]   ;;  %v1590_v28 = vld [vmem:[%s1959_s1 + $0x40] sm:$0xff]   ;;  %v1594_v40 = vld [vmem:[%s1959_s1 + $0x178] sm:$0xff]  }
  0x14   : > { %1438 = vmatprep.subr.bf16.mxu1 %v1571_v9  ;;  %v1587_v25 = vld [vmem:[%s1959_s1 + $0xc8] sm:$0xff]   ;;  %v1591_v29 = vld [vmem:[%s1959_s1 + $0xc0] sm:$0xff]   ;;  %v1595_v41 = vld [vmem:[%s1959_s1 + $0x1f8] sm:$0xff]  }
  0x15   : > { %v1588_v26 = vld [vmem:[%s1959_s1 + $0x8] sm:$0xff]   ;;  %v1592_v30 = vld [vmem:[%s1959_s1] sm:$0xff]   ;;  %v1596_v42 = vld [vmem:[%s1959_s1 + $0x138] sm:$0xff]  }
  0x16   : > { %1399 = vmatpush3.bf16.msra.mxu0 %v1572_v10  ;;  %v1589_v27 = vld [vmem:[%s1959_s1 + $0x88] sm:$0xff]   ;;  %v1593_v31 = vld [vmem:[%s1959_s1 + $0x80] sm:$0xff]   ;;  %v1597_v43 = vld [vmem:[%s1959_s1 + $0x1b8] sm:$0xff]  }
  0x17   : > { %1439 = vmatpush3.bf16.msra.mxu1 %v1573_v11  ;;  %1400 = vmatprep.subr.bf16.mxu0 %v1574_v12  ;;  %v178_v32 = vld [vmem:[%s1760_s28] sm:$0xff]  ;;  %v179_v34 = vld [vmem:[%s1760_s28 + $0x8] sm:$0xff]  ;;  %v1598_v44 = vld [vmem:[%s1959_s1 + $0x170] sm:$0xff]  }
  0x18   : > { %1440 = vmatprep.subr.bf16.mxu1 %v1575_v13  ;;  %v182_v33 = vld [vmem:[%s1760_s28 + $0x20] sm:$0xff]  ;;  %v183_v37 = vld [vmem:[%s1760_s28 + $0x28] sm:$0xff]  ;;  %v1599_v45 = vld [vmem:[%s1959_s1 + $0x1f0] sm:$0xff]  }
  0x19   : > { %v1256_v35 = vcombine.low %v178_v32, %v182_v33  ;;  %v1257_v36 = vcombine.high %v178_v32, %v182_v33  ;;  %v1258_v38 = vcombine.low %v179_v34, %v183_v37  ;;  %v1259_v39 = vcombine.high %v179_v34, %v183_v37  ;;  %v1600_v46 = vld [vmem:[%s1959_s1 + $0x130] sm:$0xff]   ;;  %v186_v48 = vld [vmem:[%s1760_s28 + $0x40] sm:$0xff]  ;;  %v187_v51 = vld [vmem:[%s1760_s28 + $0x48] sm:$0xff] }
  0x1a   : > { %1401 = vmatpush3.bf16.msra.mxu0 %v1576_v14  ;;  %v1601_v47 = vld [vmem:[%s1959_s1 + $0x1b0] sm:$0xff]   ;;  %v190_v49 = vld [vmem:[%s1760_s28 + $0x60] sm:$0xff]  ;;  %v191_v52 = vld [vmem:[%s1760_s28 + $0x68] sm:$0xff] }
  0x1b   : > { %1441 = vmatpush3.bf16.msra.mxu1 %v1577_v15  ;;  %1402 = vmatprep.subr.bf16.mxu0 %v1578_v16  ;;  %v1265_v50 = vcombine.high %v186_v48, %v190_v49  ;;  %v1264_v53 = vcombine.low %v186_v48, %v190_v49  ;;  %v1267_v54 = vcombine.high %v187_v51, %v191_v52  ;;  %v1602_v56 = vld [vmem:[%s1959_s1 + $0x168] sm:$0xff]   ;;  %v1606_v60 = vld [vmem:[%s1959_s1 + $0x160] sm:$0xff]   ;;  %v1610_v8 = vld [vmem:[%s1959_s1 + $0x158] sm:$0xff]  }
  0x1c   : > { %1442 = vmatprep.subr.bf16.mxu1 %v1579_v17  ;;  %921 = vmatprep.mubr.bf16.mxu0 %v1257_v36  ;;  %v1266_v55 = vcombine.low %v187_v51, %v191_v52  ;;  %v1603_v57 = vld [vmem:[%s1959_s1 + $0x1e8] sm:$0xff]   ;;  %v1607_v61 = vld [vmem:[%s1959_s1 + $0x1e0] sm:$0xff]   ;;  %v1611_v9 = vld [vmem:[%s1959_s1 + $0x1d8] sm:$0xff]  }
  0x1d   : > { %986 = vmatprep.mubr.bf16.mxu1 %v1259_v39  ;;  %v1604_v58 = vld [vmem:[%s1959_s1 + $0x128] sm:$0xff]   ;;  %v1608_v62 = vld [vmem:[%s1959_s1 + $0x120] sm:$0xff]   ;;  %v1612_v10 = vld [vmem:[%s1959_s1 + $0x118] sm:$0xff]  }
  0x1e   : > { %1403 = vmatpush3.bf16.msra.mxu0 %v1580_v18  ;;  %v1605_v59 = vld [vmem:[%s1959_s1 + $0x1a8] sm:$0xff]   ;;  %v1609_v63 = vld [vmem:[%s1959_s1 + $0x1a0] sm:$0xff]   ;;  %v1613_v11 = vld [vmem:[%s1959_s1 + $0x198] sm:$0xff]  }
  0x1f   : > { %1443 = vmatpush3.bf16.msra.mxu1 %v1581_v19  ;;  %1404 = vmatprep.subr.bf16.mxu0 %v1582_v20  ;;  %v194_v0 = vld [vmem:[%s1760_s28 + $0x80] sm:$0xff]  ;;  %v195_v2 = vld [vmem:[%s1760_s28 + $0x88] sm:$0xff]  ;;  %v1614_v12 = vld [vmem:[%s1959_s1 + $0x150] sm:$0xff]  }
  0x20   : > { %1444 = vmatprep.subr.bf16.mxu1 %v1583_v21  ;;  %v198_v1 = vld [vmem:[%s1760_s28 + $0xa0] sm:$0xff]  ;;  %v199_v3 = vld [vmem:[%s1760_s28 + $0xa8] sm:$0xff]  ;;  %v1615_v13 = vld [vmem:[%s1959_s1 + $0x1d0] sm:$0xff]  }
  0x21   : > { %v1273_v4 = vcombine.high %v194_v0, %v198_v1  ;;  %v1275_v5 = vcombine.high %v195_v2, %v199_v3  ;;  %v1272_v6 = vcombine.low %v194_v0, %v198_v1  ;;  %v1274_v7 = vcombine.low %v195_v2, %v199_v3  ;;  %v1616_v14 = vld [vmem:[%s1959_s1 + $0x110] sm:$0xff]   ;;  %v202_v16 = vld [vmem:[%s1760_s28 + $0xc0] sm:$0xff]  ;;  %v203_v18 = vld [vmem:[%s1760_s28 + $0xc8] sm:$0xff] }
  0x22   : > { %1405 = vmatpush3.bf16.msra.mxu0 %v1584_v22  ;;  %v1617_v15 = vld [vmem:[%s1959_s1 + $0x190] sm:$0xff]   ;;  %v206_v17 = vld [vmem:[%s1760_s28 + $0xe0] sm:$0xff]  ;;  %v207_v20 = vld [vmem:[%s1760_s28 + $0xe8] sm:$0xff] }
  0x23   : > { %1445 = vmatpush3.bf16.msra.mxu1 %v1585_v23  ;;  %1406 = vmatprep.subr.bf16.mxu0 %v1586_v24  ;;  %v1281_v19 = vcombine.high %v202_v16, %v206_v17  ;;  %v1280_v21 = vcombine.low %v202_v16, %v206_v17  ;;  %v1283_v22 = vcombine.high %v203_v18, %v207_v20  ;;  %v1618_v24 = vld [vmem:[%s1959_s1 + $0x148] sm:$0xff]   ;;  %v180_v32 = vld [vmem:[%s1760_s28 + $0x10] sm:$0xff]  ;;  %v181_v36 = vld [vmem:[%s1760_s28 + $0x18] sm:$0xff] }
  0x24   : > { %1446 = vmatprep.subr.bf16.mxu1 %v1587_v25  ;;  %v1282_v23 = vcombine.low %v203_v18, %v207_v20  ;;  %v1619_v25 = vld [vmem:[%s1959_s1 + $0x1c8] sm:$0xff]   ;;  %v184_v33 = vld [vmem:[%s1760_s28 + $0x30] sm:$0xff]  ;;  %v185_v37 = vld [vmem:[%s1760_s28 + $0x38] sm:$0xff] }
  0x25   : > { %v1260_v34 = vcombine.low %v180_v32, %v184_v33  ;;  %v1262_v39 = vcombine.low %v181_v36, %v185_v37  ;;  %v197_v48 = vld [vmem:[%s1760_s28 + $0x98] sm:$0xff] }
  0x26   : > { %1407 = vmatpush3.bf16.msra.mxu0 %v1588_v26  ;;  %v1620_v26 = vld [vmem:[%s1959_s1 + $0x108] sm:$0xff]   ;;  %v201_v49 = vld [vmem:[%s1760_s28 + $0xb8] sm:$0xff] }
  0x27   : > { %1447 = vmatpush3.bf16.msra.mxu1 %v1589_v27  ;;  %1408 = vmatprep.subr.bf16.mxu0 %v1590_v28  ;;  %v1621_v27 = vld [vmem:[%s1959_s1 + $0x188] sm:$0xff]   ;;  %v1622_v28 = vld [vmem:[%s1959_s1 + $0x140] sm:$0xff]  }
  0x28   : > { %1448 = vmatprep.subr.bf16.mxu1 %v1591_v29  ;;  %v1623_v29 = vld [vmem:[%s1959_s1 + $0x1c0] sm:$0xff]  }
  0x2a   : > { %1409 = vmatpush3.bf16.msra.mxu0 %v1592_v30  ;;  %v1624_v30 = vld [vmem:[%s1959_s1 + $0x100] sm:$0xff]  }
  0x2b   : > { %1449 = vmatpush3.bf16.msra.mxu1 %v1593_v31  ;;  %1474 = vmatprep.subr.bf16.mxu0 %v1594_v40  ;;  %v1625_v31 = vld [vmem:[%s1959_s1 + $0x180] sm:$0xff]   ;;  %v1263_v40 = vcombine.high %v181_v36, %v185_v37 }
  0x2c   : > { %1514 = vmatprep.subr.bf16.mxu1 %v1595_v41  ;;  %v192_v41 = vld [vmem:[%s1760_s28 + $0x70] sm:$0xff] }
  0x2d   : > { %922 = vmatmul.mubr.bf16.vlgmr.msra.gmra.mxu0 %v1256_v35  ;;  %v1261_v35 = vcombine.high %v180_v32, %v184_v33  ;;  %v1921_v32 = vld [vmem:[%s1960_s2] ss:$0 sm:$0xff] }
  0x2e   : > { %987 = vmatmul.mubr.bf16.vlgmr.msra.gmra.mxu1 %v1258_v38  ;;  %1475 = vmatpush3.bf16.msra.mxu0 %v1596_v42  ;;  %v188_v38 = vld [vmem:[%s1760_s28 + $0x50] sm:$0xff]  ;;  %v189_v42 = vld [vmem:[%s1760_s28 + $0x58] sm:$0xff] }
  0x2f   : > { %1515 = vmatpush3.bf16.msra.mxu1 %v1597_v43  ;;  %1476 = vmatprep.subr.bf16.mxu0 %v1598_v44  ;;  %v193_v43 = vld [vmem:[%s1760_s28 + $0x78] sm:$0xff]  ;;  %v1269_v44 = vcombine.high %v188_v38, %v192_v41 }
  0x30   : > { %1516 = vmatprep.subr.bf16.mxu1 %v1599_v45  ;;  %929 = vmatprep.mubr.bf16.mxu0 %v1265_v50  ;;  %v1271_v45 = vcombine.high %v189_v42, %v193_v43  ;;  %v1268_v50 = vcombine.low %v188_v38, %v192_v41  ;;  %v1270_v51 = vcombine.low %v189_v42, %v193_v43 }
  0x31   : > { %994 = vmatprep.mubr.bf16.mxu1 %v1267_v54  ;;  %v204_v54 = vld [vmem:[%s1760_s28 + $0xd0] sm:$0xff] }
  0x32   : > { %1477 = vmatpush3.bf16.msra.mxu0 %v1600_v46  ;;  %v196_v46 = vld [vmem:[%s1760_s28 + $0x90] sm:$0xff] }
  0x33   : > { %1517 = vmatpush3.bf16.msra.mxu1 %v1601_v47  ;;  %1478 = vmatprep.subr.bf16.mxu0 %v1602_v56  ;;  %v200_v47 = vld [vmem:[%s1760_s28 + $0xb0] sm:$0xff]  ;;  %v205_v56 = vld [vmem:[%s1760_s28 + $0xd8] sm:$0xff] }
  0x34   : > { %1518 = vmatprep.subr.bf16.mxu1 %v1603_v57  ;;  %v1277_v52 = vcombine.high %v196_v46, %v200_v47  ;;  %v209_v57 = vld [vmem:[%s1760_s28 + $0xf8] sm:$0xff] }
  0x35   : > { %930 = vmatmul.mubr.bf16.gmra.mxu0 %v1264_v53  ;;  %v1279_v53 = vcombine.high %v197_v48, %v201_v49 }
  0x36   : > { %995 = vmatmul.mubr.bf16.gmra.mxu1 %v1266_v55  ;;  %1479 = vmatpush3.bf16.msra.mxu0 %v1604_v58  ;;  %v208_v55 = vld [vmem:[%s1760_s28 + $0xf0] sm:$0xff]  ;;  %v1276_v58 = vcombine.low %v196_v46, %v200_v47 }
  0x37   : > { %1519 = vmatpush3.bf16.msra.mxu1 %v1605_v59  ;;  %1480 = vmatprep.subr.bf16.mxu0 %v1606_v60  ;;  %v1278_v59 = vcombine.low %v197_v48, %v201_v49  ;;  %v1285_v60 = vcombine.high %v204_v54, %v208_v55 }
  0x38   : > { %1520 = vmatprep.subr.bf16.mxu1 %v1607_v61  ;;  %937 = vmatprep.mubr.bf16.mxu0 %v1273_v4  ;;  %v1287_v61 = vcombine.high %v205_v56, %v209_v57 }
  0x39   : > { %1002 = vmatprep.mubr.bf16.mxu1 %v1275_v5 }
  0x3a   : > { %1481 = vmatpush3.bf16.msra.mxu0 %v1608_v62  ;;  %v1284_v62 = vcombine.low %v204_v54, %v208_v55 }
  0x3b   : > { %1521 = vmatpush3.bf16.msra.mxu1 %v1609_v63  ;;  %1482 = vmatprep.subr.bf16.mxu0 %v1610_v8  ;;  %v1286_v63 = vcombine.low %v205_v56, %v209_v57 }
  0x3c   : > { %1522 = vmatprep.subr.bf16.mxu1 %v1611_v9 }
  0x3d   : > { %938 = vmatmul.mubr.bf16.gmra.mxu0 %v1272_v6 }
  0x3e   : > { %1003 = vmatmul.mubr.bf16.gmra.mxu1 %v1274_v7  ;;  %1483 = vmatpush3.bf16.msra.mxu0 %v1612_v10 }
  0x3f   : > { %1523 = vmatpush3.bf16.msra.mxu1 %v1613_v11  ;;  %1484 = vmatprep.subr.bf16.mxu0 %v1614_v12 }
  0x40   : > { %1524 = vmatprep.subr.bf16.mxu1 %v1615_v13  ;;  %945 = vmatprep.mubr.bf16.mxu0 %v1281_v19 }
  0x41   : > { %1010 = vmatprep.mubr.bf16.mxu1 %v1283_v22 }
  0x42   : > { %1485 = vmatpush3.bf16.msra.mxu0 %v1616_v14 }
  0x43   : > { %1525 = vmatpush3.bf16.msra.mxu1 %v1617_v15  ;;  %1486 = vmatprep.subr.bf16.mxu0 %v1618_v24 }
  0x44   : > { %1526 = vmatprep.subr.bf16.mxu1 %v1619_v25 }
  0x45   : > { %946 = vmatmul.mubr.bf16.gmra.mxu0 %v1280_v21 }
  0x46   : > { %1011 = vmatmul.mubr.bf16.gmra.mxu1 %v1282_v23  ;;  %1487 = vmatpush3.bf16.msra.mxu0 %v1620_v26 }
  0x47   : > { %1527 = vmatpush3.bf16.msra.mxu1 %v1621_v27  ;;  %1488 = vmatprep.subr.bf16.mxu0 %v1622_v28 }
  0x48   : > { %1528 = vmatprep.subr.bf16.mxu1 %v1623_v29  ;;  %1051 = vmatprep.mubr.bf16.mxu0 %v1261_v35 }
  0x49   : > { %1116 = vmatprep.mubr.bf16.mxu1 %v1263_v40 }
  0x4a   : > { %1489 = vmatpush3.bf16.msra.mxu0 %v1624_v30 }
  0x4b   : > { %1529 = vmatpush3.bf16.msra.mxu1 %v1625_v31 }
  0x4d   : > { %1052 = vmatmul.mubr.bf16.vlgmr.msra.gmra.mxu0 %v1260_v34 }
  0x4e   : > { %1117 = vmatmul.mubr.bf16.vlgmr.msra.gmra.mxu1 %v1262_v39  ;;  %1059 = vmatprep.mubr.bf16.mxu0 %v1269_v44 }
  0x4f   : > { %1124 = vmatprep.mubr.bf16.mxu1 %v1271_v45 }
  0x55   : > { %1060 = vmatmul.mubr.bf16.gmra.mxu0 %v1268_v50 }
  0x56   : > { %1125 = vmatmul.mubr.bf16.gmra.mxu1 %v1270_v51  ;;  %1067 = vmatprep.mubr.bf16.mxu0 %v1277_v52 }
  0x57   : > { %1132 = vmatprep.mubr.bf16.mxu1 %v1279_v53 }
  0x5d   : > { %1068 = vmatmul.mubr.bf16.gmra.mxu0 %v1276_v58 }
  0x5e   : > { %1133 = vmatmul.mubr.bf16.gmra.mxu1 %v1278_v59  ;;  %1075 = vmatprep.mubr.bf16.mxu0 %v1285_v60 }
  0x5f   : > { %1140 = vmatprep.mubr.bf16.mxu1 %v1287_v61 }
  0x65   : > { %1076 = vmatmul.mubr.bf16.gmra.mxu0 %v1284_v62 }
  0x66   : > { %1141 = vmatmul.mubr.bf16.gmra.mxu1 %v1286_v63 }
  0xed   : > { %v1410_v0 = vpop.f32.mrf.mxu0 }
  0xee   : > { %v1450_v1 = vpop.f32.mrf.mxu1 }
  0xef   : > { %v1411_v2 = vpop.f32.mrf.mxu0 }
  0xf0   : > { %v1451_v3 = vpop.f32.mrf.mxu1  ;;  %v1412_v30 = vadd.f32 %v1411_v2, %v1410_v0 }
  0xf1   : > { %v1413_v4 = vpop.f32.mrf.mxu0  ;;  %v1452_v39 = vadd.f32 %v1451_v3, %v1450_v1 }
  0xf2   : > { %v1453_v5 = vpop.f32.mrf.mxu1  ;;  %v924_v36 = vadd.f32 %v1412_v30, %v1921_v32 }
  0xf3   : > { %v1414_v6 = vpop.f32.mrf.mxu0 }
  0xf4   : > { %v1454_v7 = vpop.f32.mrf.mxu1  ;;  %v1415_v34 = vadd.f32 %v1414_v6, %v1413_v4  ;;  %v989_v44 = vadd.f32 %v1452_v39, %v924_v36 }
  0xf5   : > { %v1416_v8 = vpop.f32.mrf.mxu0  ;;  %v1455_v45 = vadd.f32 %v1454_v7, %v1453_v5 }
  0xf6   : > { %v1456_v9 = vpop.f32.mrf.mxu1  ;;  %v927_v40 = vadd.f32 %v1415_v34, %v1921_v32 }
  0xf7   : > { %v1417_v10 = vpop.f32.mrf.mxu0 }
  0xf8   : > { %v1457_v11 = vpop.f32.mrf.mxu1  ;;  %v1418_v46 = vadd.f32 %v1417_v10, %v1416_v8  ;;  %v992_v49 = vadd.f32 %v1455_v45, %v927_v40 }
  0xf9   : > { %v1419_v12 = vpop.f32.mrf.mxu0  ;;  %v1458_v60 = vadd.f32 %v1457_v11, %v1456_v9 }
  0xfa   : > { %v1459_v13 = vpop.f32.mrf.mxu1  ;;  %v932_v55 = vadd.f32 %v1418_v46, %v1921_v32 }
  0xfb   : > { %v1420_v14 = vpop.f32.mrf.mxu0 }
  0xfc   : > { %v1460_v15 = vpop.f32.mrf.mxu1  ;;  %v1421_v50 = vadd.f32 %v1420_v14, %v1419_v12  ;;  %v997_v4 = vadd.f32 %v1458_v60, %v932_v55 }
  0xfd   : > { %v1422_v16 = vpop.f32.mrf.mxu0  ;;  %v1461_v5 = vadd.f32 %v1460_v15, %v1459_v13 }
  0xfe   : > { %v1896_v17 = vpop.f32.mrf.mxu1  ;;  %v935_v62 = vadd.f32 %v1421_v50, %v1921_v32 }
  0xff   : > { %v1423_v18 = vpop.f32.mrf.mxu0 }
 0x100   : > { %v1898_v19 = vpop.f32.mrf.mxu1  ;;  %v1424_v6 = vadd.f32 %v1423_v18, %v1422_v16  ;;  %v1000_v10 = vadd.f32 %v1461_v5, %v935_v62 }
 0x101   : > { %v1425_v20 = vpop.f32.mrf.mxu0  ;;  %v1464_v13 = vadd.f32 %v1898_v19, %v1896_v17 }
 0x102   : > { %v1900_v21 = vpop.f32.mrf.mxu1 }
 0x103   : > { %v1426_v22 = vpop.f32.mrf.mxu0 }
 0x104   : > { %v1902_v23 = vpop.f32.mrf.mxu1  ;;  %v1427_v11 = vadd.f32 %v1426_v22, %v1425_v20 }
 0x105   : > { %v1904_v24 = vpop.f32.mrf.mxu0 }
 0x106   : > { %v1906_v25 = vpop.f32.mrf.mxu1  ;;  %v943_v16 = vadd.f32 %v1427_v11, %v1921_v32 }
 0x107   : > { %v1908_v26 = vpop.f32.mrf.mxu0 }
 0x108   : > { %v1910_v27 = vpop.f32.mrf.mxu1 }
 0x109   : > { %v1912_v28 = vpop.f32.mrf.mxu0 }
 0x10a   : > { %v1914_v29 = vpop.f32.mrf.mxu1 }
 0x10b   : > { %v1916_v31 = vpop.f32.mrf.mxu0 }
 0x10c   : > { %v1923_v33 = vpop.f32.mrf.mxu1  ;;  %v1433_v19 = vadd.f32 %v1916_v31, %v1912_v28 }
 0x10d   : > { %v1490_v35 = vpop.f32.mrf.mxu0  ;;  %v1473_v60 = vadd.f32 %v1923_v33, %v1914_v29 }
 0x10e   : > { %v1530_v37 = vpop.f32.mrf.mxu1  ;;  %v951_v55 = vadd.f32 %v1433_v19, %v1921_v32 }
 0x10f   : > { %v1491_v38 = vpop.f32.mrf.mxu0 }
 0x110   : > { %v1492_v41 = vadd.f32 %v1491_v38, %v1490_v35  ;;  %v1531_v42 = vpop.f32.mrf.mxu1  ;;  %v940_v35 = vadd.f32 %v1424_v6, %v1921_v32 }
 0x111   : > { %v1493_v43 = vpop.f32.mrf.mxu0  ;;  %v1532_v56 = vadd.f32 %v1531_v42, %v1530_v37 }
 0x112   : > { %v1533_v47 = vpop.f32.mrf.mxu1  ;;  %v1054_v51 = vadd.f32 %v1492_v41, %v989_v44  ;;  %v1005_v42 = vadd.f32 %v1464_v13, %v940_v35  ;;  %v1430_v44 = vadd.f32 %v1908_v26, %v1904_v24  ;;  %v1470_v24 = vadd.f32 %v1910_v27, %v1906_v25 }
 0x113   : > { %v1494_v48 = vpop.f32.mrf.mxu0 }
 0x114   : > { %v1495_v52 = vadd.f32 %v1494_v48, %v1493_v43  ;;  %v1534_v53 = vpop.f32.mrf.mxu1  ;;  %v1119_v63 = vadd.f32 %v1532_v56, %v1054_v51  ;;  %v1467_v43 = vadd.f32 %v1902_v23, %v1900_v21 }
 0x115   : > { %v1496_v54 = vpop.f32.mrf.mxu0  ;;  %v1535_v58 = vadd.f32 %v1534_v53, %v1533_v47 }
 0x116   : > { %v1057_v57 = vadd.f32 %v1495_v52, %v992_v49  ;;  %v1536_v59 = vpop.f32.mrf.mxu1  ;;  %v1008_v17 = vadd.f32 %v1467_v43, %v943_v16  ;;  %v948_v52 = vadd.f32 %v1430_v44, %v1921_v32 }
 0x117   : > { %v1497_v61 = vpop.f32.mrf.mxu0 }
 0x118   : > { %v1122_v0 = vadd.f32 %v1535_v58, %v1057_v57  ;;  %v1498_v1 = vadd.f32 %v1497_v61, %v1496_v54  ;;  %v1537_v2 = vpop.f32.mrf.mxu1 }
 0x119   : > { %v1499_v3 = vpop.f32.mrf.mxu0  ;;  %v1538_v36 = vadd.f32 %v1537_v2, %v1536_v59  ;;  %v1013_v59 = vadd.f32 %v1470_v24, %v948_v52 }
 0x11a   : > { %v1374_v7 = vpack.c.bf16 %v1122_v0, %v1119_v63  ;;  %v1539_v8 = vpop.f32.mrf.mxu1  ;;  %v1062_v12 = vadd.f32 %v1498_v1, %v997_v4  ;;  %v1016_v0 = vadd.f32 %v1473_v60, %v951_v55 }
 0x11b   : > { %v1500_v9 = vpop.f32.mrf.mxu0 }
 0x11c   : > { %1375 = vst [vmem:[%s1933_s29] sm:$0xff] %v1374_v7   ;;  %v1501_v14 = vadd.f32 %v1500_v9, %v1499_v3  ;;  %v1540_v30 = vpop.f32.mrf.mxu1  ;;  %v1127_v18 = vadd.f32 %v1538_v36, %v1062_v12 }
 0x11d   : > { %v1502_v34 = vpop.f32.mrf.mxu0  ;;  %v1541_v38 = vadd.f32 %v1540_v30, %v1539_v8 }
 0x11e   : > { %v1065_v37 = vadd.f32 %v1501_v14, %v1000_v10  ;;  %v1542_v39 = vpop.f32.mrf.mxu1 }
 0x11f   : > { %v1503_v15 = vpop.f32.mrf.mxu0 }
 0x120   : > { %v1130_v20 = vadd.f32 %v1541_v38, %v1065_v37  ;;  %v1504_v22 = vadd.f32 %v1503_v15, %v1502_v34  ;;  %v1543_v40 = vpop.f32.mrf.mxu1 }
 0x121   : > { %v1505_v41 = vpop.f32.mrf.mxu0  ;;  %v1544_v53 = vadd.f32 %v1543_v40, %v1542_v39 }
 0x122   : > { %v1379_v45 = vpack.c.bf16 %v1130_v20, %v1127_v18  ;;  %v1545_v46 = vpop.f32.mrf.mxu1  ;;  %v1070_v48 = vadd.f32 %v1504_v22, %v1005_v42 }
 0x123   : > { %v1506_v47 = vpop.f32.mrf.mxu0 }
 0x124   : > { %1391 = vst [vmem:[%s1933_s29 + $0x8] sm:$0xff] %v1379_v45   ;;  %v1507_v49 = vadd.f32 %v1506_v47, %v1505_v41  ;;  %v1546_v50 = vpop.f32.mrf.mxu1  ;;  %v1135_v56 = vadd.f32 %v1544_v53, %v1070_v48 }
 0x125   : > { %v1508_v51 = vpop.f32.mrf.mxu0  ;;  %v1547_v21 = vadd.f32 %v1546_v50, %v1545_v46 }
 0x126   : > { %v1073_v54 = vadd.f32 %v1507_v49, %v1008_v17  ;;  %v1548_v23 = vpop.f32.mrf.mxu1 }
 0x127   : > { %v1509_v26 = vpop.f32.mrf.mxu0 }
 0x128   : > { %v1138_v28 = vadd.f32 %v1547_v21, %v1073_v54  ;;  %v1510_v31 = vadd.f32 %v1509_v26, %v1508_v51  ;;  %v1549_v57 = vpop.f32.mrf.mxu1 }
 0x129   : > { %v1511_v58 = vpop.f32.mrf.mxu0  ;;  %v1550_v2 = vadd.f32 %v1549_v57, %v1548_v23 }
 0x12a   : > { %v1384_v61 = vpack.c.bf16 %v1138_v28, %v1135_v56  ;;  %v1551_v62 = vpop.f32.mrf.mxu1  ;;  %v1078_v1 = vadd.f32 %v1510_v31, %v1013_v59 }
 0x12b   : > { %v1512_v63 = vpop.f32.mrf.mxu0 }
 0x12c   : > { %1392 = vst [vmem:[%s1933_s29 + $0x10] sm:$0xff] %v1384_v61   ;;  %v1513_v25 = vadd.f32 %v1512_v63, %v1511_v58  ;;  %v1552_v27 = vpop.f32.mrf.mxu1  ;;  %v1143_v4 = vadd.f32 %v1550_v2, %v1078_v1 }
 0x12d   : > { %v1553_v3 = vadd.f32 %v1552_v27, %v1551_v62 }
 0x12e   : > { %v1081_v32 = vadd.f32 %v1513_v25, %v1016_v0 }
 0x130   : > { %v1146_v5 = vadd.f32 %v1553_v3, %v1081_v32 }
 0x132   : > { %v1389_v6 = vpack.c.bf16 %v1146_v5, %v1143_v4 }
 0x134   : > { %1393 = vst [vmem:[%s1933_s29 + $0x18] sm:$0xff] %v1389_v6  }
 0x135 PF: > { %s13_s12 = sadd.s32 1, %s1632_s12  }
 0x136   : > { %p10_p4 = scmp.ge.s32.totalorder %s13_s12, 4  }
 0x138   :  { %12 = sbr.rel (!%p10_p4) target bundleno = 1 (0x1), region = 62 }

// kernel: clf_img_forward.14
= control target key start
LH: loop header
LB: loop body
LE: loop exit
PB: predicated region body
PF: predicated region fallthrough
CT: control target
= control target key end

     0   :  { %s1749_s12 = smov 0   ;;  %s2077_s0 = inlined_call_operand.vmem [shape: bf16[32,1536], index: 0, kind: input, shape index: {}]   ;;  %s2078_s1 = inlined_call_operand.vmem [shape: bf16[1536,128], index: 1, kind: input, shape index: {}]   ;;  %s2079_s2 = inlined_call_operand.vmem [shape: f32[1,128], index: 2, kind: input, shape index: {}]   ;;  %s2080_s3 = inlined_call_operand.vmem [shape: bf16[32,128], index: 3, kind: output, shape index: {}]  }
   0x1 LB: > { %s1337_s13 = sadd.s32 4294967295, %s1727_s12   ;;  %p1341_p0 = scmp.ge.s32.totalorder %s1727_s12, 1  ;;  %s1727_s12 = sphi %s1749_s12, %s13_s12  }
   0x2   : > { %p139_p1 = scmp.lt.s32.totalorder %s1727_s12, 3 }
   0x4   : > { %p140_p2 = pnand %p1341_p0, %p139_p1 }
   0x5   : > { %s1342_s19 = sshll.u32 (!%p140_p2), %s1337_s13, 1 }
   0x6   : > { %143 = sbr.rel (%p140_p2) target bundleno = 317 (0x13d), region = 32  ;;  %p165_p3 = scmp.lt.s32.totalorder (!%p140_p2), %s1342_s19, 3 }
   0xb   : > { %v1607_v0 = vld [vmem:[%s2078_s1 + $0x78] sm:$0xff]   ;;  %v1611_v4 = vld [vmem:[%s2078_s1 + $0x70] sm:$0xff]   ;;  %v1615_v8 = vld [vmem:[%s2078_s1 + $0x68] sm:$0xff]   ;;  %s2082_s19 = smov (!%p165_p3, %s1342_s19), 3 }
   0xc   : > { %v1608_v1 = vld [vmem:[%s2078_s1 + $0xf8] sm:$0xff]   ;;  %1466 = vmatprep.subr.bf16.mxu0 %v1607_v0  ;;  %v1612_v5 = vld [vmem:[%s2078_s1 + $0xf0] sm:$0xff]   ;;  %v1616_v9 = vld [vmem:[%s2078_s1 + $0xe8] sm:$0xff]   ;;  %s1598_s16 = smul.u32 48, %s2082_s19 }
   0xd   : > { %v1609_v2 = vld [vmem:[%s2078_s1 + $0x38] sm:$0xff]   ;;  %1488 = vmatprep.subr.bf16.mxu1 %v1608_v1  ;;  %v1613_v6 = vld [vmem:[%s2078_s1 + $0x30] sm:$0xff]   ;;  %v1617_v10 = vld [vmem:[%s2078_s1 + $0x28] sm:$0xff]  }
   0xe   : > { %v1610_v3 = vld [vmem:[%s2078_s1 + $0xb8] sm:$0xff]   ;;  %1467 = vmatpush3.bf16.msra.mxu0 %v1609_v2  ;;  %v1614_v7 = vld [vmem:[%s2078_s1 + $0xb0] sm:$0xff]   ;;  %v1618_v11 = vld [vmem:[%s2078_s1 + $0xa8] sm:$0xff]   ;;  %s1855_s13 = scalar_lea.vmem %s2077_s0, %s1598_s16 }
   0xf   : > { %1489 = vmatpush3.bf16.msra.mxu1 %v1610_v3  ;;  %1468 = vmatprep.subr.bf16.mxu0 %v1611_v4  ;;  %v1619_v12 = vld [vmem:[%s2078_s1 + $0x60] sm:$0xff]   ;;  %v1623_v16 = vld [vmem:[%s2078_s1 + $0x58] sm:$0xff]   ;;  %v1627_v20 = vld [vmem:[%s2078_s1 + $0x50] sm:$0xff]  }
  0x10   : > { %1490 = vmatprep.subr.bf16.mxu1 %v1612_v5  ;;  %v1620_v13 = vld [vmem:[%s2078_s1 + $0xe0] sm:$0xff]   ;;  %v1624_v17 = vld [vmem:[%s2078_s1 + $0xd8] sm:$0xff]   ;;  %v1628_v21 = vld [vmem:[%s2078_s1 + $0xd0] sm:$0xff]  }
  0x11   : > { %v1621_v14 = vld [vmem:[%s2078_s1 + $0x20] sm:$0xff]   ;;  %v1625_v18 = vld [vmem:[%s2078_s1 + $0x18] sm:$0xff]   ;;  %v1629_v22 = vld [vmem:[%s2078_s1 + $0x10] sm:$0xff]  }
  0x12   : > { %1469 = vmatpush3.bf16.msra.mxu0 %v1613_v6  ;;  %v1622_v15 = vld [vmem:[%s2078_s1 + $0xa0] sm:$0xff]   ;;  %v1626_v19 = vld [vmem:[%s2078_s1 + $0x98] sm:$0xff]   ;;  %v1630_v23 = vld [vmem:[%s2078_s1 + $0x90] sm:$0xff]  }
  0x13   : > { %1491 = vmatpush3.bf16.msra.mxu1 %v1614_v7  ;;  %1470 = vmatprep.subr.bf16.mxu0 %v1615_v8  ;;  %v1631_v24 = vld [vmem:[%s2078_s1 + $0x48] sm:$0xff]   ;;  %v1635_v28 = vld [vmem:[%s2078_s1 + $0x40] sm:$0xff]   ;;  %v1645_v36 = vld [vmem:[%s2078_s1 + $0x178] sm:$0xff]  }
  0x14   : > { %1492 = vmatprep.subr.bf16.mxu1 %v1616_v9  ;;  %v1632_v25 = vld [vmem:[%s2078_s1 + $0xc8] sm:$0xff]   ;;  %v1636_v29 = vld [vmem:[%s2078_s1 + $0xc0] sm:$0xff]   ;;  %v1646_v37 = vld [vmem:[%s2078_s1 + $0x1f8] sm:$0xff]  }
  0x15   : > { %v1633_v26 = vld [vmem:[%s2078_s1 + $0x8] sm:$0xff]   ;;  %v1637_v30 = vld [vmem:[%s2078_s1] sm:$0xff]   ;;  %v1647_v38 = vld [vmem:[%s2078_s1 + $0x138] sm:$0xff]  }
  0x16   : > { %1471 = vmatpush3.bf16.msra.mxu0 %v1617_v10  ;;  %v1634_v27 = vld [vmem:[%s2078_s1 + $0x88] sm:$0xff]   ;;  %v1638_v31 = vld [vmem:[%s2078_s1 + $0x80] sm:$0xff]   ;;  %v1648_v39 = vld [vmem:[%s2078_s1 + $0x1b8] sm:$0xff]  }
  0x17   : > { %1493 = vmatpush3.bf16.msra.mxu1 %v1618_v11  ;;  %1472 = vmatprep.subr.bf16.mxu0 %v1619_v12  ;;  %v1639_v32 = vld [vmem:[%s1855_s13] ss:$48 sps:$4 sm:$0xff]   ;;  %v1641_v33 = vld [vmem:[%s1855_s13 + $0x4] ss:$48 sps:$4 sm:$0xff]   ;;  %v1642_v34 = vld [vmem:[%s1855_s13 + $0x8] ss:$48 sps:$4 sm:$0xff]  }
  0x18   : > { %1494 = vmatprep.subr.bf16.mxu1 %v1620_v13  ;;  %v1644_v35 = vld [vmem:[%s1855_s13 + $0xc] ss:$48 sps:$4 sm:$0xff]   ;;  %1057 = vmatprep.mubr.bf16.mxu0 %v1641_v33  ;;  %v1649_v40 = vld [vmem:[%s2078_s1 + $0x170] sm:$0xff]   ;;  %v1657_v48 = vld [vmem:[%s2078_s1 + $0x160] sm:$0xff]  }
  0x19   : > { %1098 = vmatprep.mubr.bf16.mxu1 %v1644_v35  ;;  %v1650_v41 = vld [vmem:[%s2078_s1 + $0x1f0] sm:$0xff]   ;;  %v1653_v44 = vld [vmem:[%s2078_s1 + $0x168] sm:$0xff]   ;;  %v1658_v49 = vld [vmem:[%s2078_s1 + $0x1e0] sm:$0xff]  }
  0x1a   : > { %1473 = vmatpush3.bf16.msra.mxu0 %v1621_v14  ;;  %v1651_v42 = vld [vmem:[%s2078_s1 + $0x130] sm:$0xff]   ;;  %v1654_v45 = vld [vmem:[%s2078_s1 + $0x1e8] sm:$0xff]   ;;  %v1659_v50 = vld [vmem:[%s2078_s1 + $0x120] sm:$0xff]  }
  0x1b   : > { %1495 = vmatpush3.bf16.msra.mxu1 %v1622_v15  ;;  %1474 = vmatprep.subr.bf16.mxu0 %v1623_v16  ;;  %v1652_v43 = vld [vmem:[%s2078_s1 + $0x1b0] sm:$0xff]   ;;  %v1655_v46 = vld [vmem:[%s2078_s1 + $0x128] sm:$0xff]   ;;  %v1660_v51 = vld [vmem:[%s2078_s1 + $0x1a0] sm:$0xff]  }
  0x1c   : > { %1496 = vmatprep.subr.bf16.mxu1 %v1624_v17  ;;  %v1656_v47 = vld [vmem:[%s2078_s1 + $0x1a8] sm:$0xff]   ;;  %v1661_v52 = vld [vmem:[%s2078_s1 + $0x158] sm:$0xff]   ;;  %v1665_v56 = vld [vmem:[%s2078_s1 + $0x150] sm:$0xff]  }
  0x1d   : > { %v1662_v53 = vld [vmem:[%s2078_s1 + $0x1d8] sm:$0xff]   ;;  %v1666_v57 = vld [vmem:[%s2078_s1 + $0x1d0] sm:$0xff]   ;;  %v1669_v60 = vld [vmem:[%s2078_s1 + $0x148] sm:$0xff]  }
  0x1e   : > { %1475 = vmatpush3.bf16.msra.mxu0 %v1625_v18  ;;  %v1663_v54 = vld [vmem:[%s2078_s1 + $0x118] sm:$0xff]   ;;  %v1667_v58 = vld [vmem:[%s2078_s1 + $0x110] sm:$0xff]   ;;  %v1670_v61 = vld [vmem:[%s2078_s1 + $0x1c8] sm:$0xff]  }
  0x1f   : > { %1497 = vmatpush3.bf16.msra.mxu1 %v1626_v19  ;;  %1476 = vmatprep.subr.bf16.mxu0 %v1627_v20  ;;  %v1664_v55 = vld [vmem:[%s2078_s1 + $0x198] sm:$0xff]   ;;  %v1668_v59 = vld [vmem:[%s2078_s1 + $0x190] sm:$0xff]   ;;  %v1671_v62 = vld [vmem:[%s2078_s1 + $0x108] sm:$0xff]  }
  0x20   : > { %1498 = vmatprep.subr.bf16.mxu1 %v1628_v21  ;;  %v1672_v63 = vld [vmem:[%s2078_s1 + $0x188] sm:$0xff]   ;;  %v1673_v0 = vld [vmem:[%s2078_s1 + $0x140] sm:$0xff]   ;;  %v1683_v8 = vld [vmem:[%s2078_s1 + $0x278] sm:$0xff]  }
  0x21   : > { %v1674_v1 = vld [vmem:[%s2078_s1 + $0x1c0] sm:$0xff]   ;;  %v1680_v6 = vld [vmem:[%s1855_s13 + $0x18] ss:$48 sps:$4 sm:$0xff]   ;;  %v1682_v7 = vld [vmem:[%s1855_s13 + $0x1c] ss:$48 sps:$4 sm:$0xff]  }
  0x22   : > { %1477 = vmatpush3.bf16.msra.mxu0 %v1629_v22  ;;  %v1675_v2 = vld [vmem:[%s2078_s1 + $0x100] sm:$0xff]   ;;  %v1684_v9 = vld [vmem:[%s2078_s1 + $0x2f8] sm:$0xff]   ;;  %v1687_v12 = vld [vmem:[%s2078_s1 + $0x270] sm:$0xff]  }
  0x23   : > { %1499 = vmatpush3.bf16.msra.mxu1 %v1630_v23  ;;  %1478 = vmatprep.subr.bf16.mxu0 %v1631_v24  ;;  %v1676_v3 = vld [vmem:[%s2078_s1 + $0x180] sm:$0xff]   ;;  %v1685_v10 = vld [vmem:[%s2078_s1 + $0x238] sm:$0xff]   ;;  %v1688_v13 = vld [vmem:[%s2078_s1 + $0x2f0] sm:$0xff]  }
  0x24   : > { %1500 = vmatprep.subr.bf16.mxu1 %v1632_v25  ;;  %v1677_v4 = vld [vmem:[%s1855_s13 + $0x10] ss:$48 sps:$4 sm:$0xff]   ;;  %v1679_v5 = vld [vmem:[%s1855_s13 + $0x14] ss:$48 sps:$4 sm:$0xff]   ;;  %v1686_v11 = vld [vmem:[%s2078_s1 + $0x2b8] sm:$0xff]  }
  0x25   : > { %v1689_v14 = vld [vmem:[%s2078_s1 + $0x230] sm:$0xff]   ;;  %v1691_v16 = vld [vmem:[%s2078_s1 + $0x268] sm:$0xff]   ;;  %v1695_v20 = vld [vmem:[%s2078_s1 + $0x260] sm:$0xff]  }
  0x26   : > { %1479 = vmatpush3.bf16.msra.mxu0 %v1633_v26  ;;  %v1690_v15 = vld [vmem:[%s2078_s1 + $0x2b0] sm:$0xff]   ;;  %v1692_v17 = vld [vmem:[%s2078_s1 + $0x2e8] sm:$0xff]   ;;  %v1696_v21 = vld [vmem:[%s2078_s1 + $0x2e0] sm:$0xff]  }
  0x27   : > { %1501 = vmatpush3.bf16.msra.mxu1 %v1634_v27  ;;  %1480 = vmatprep.subr.bf16.mxu0 %v1635_v28  ;;  %v1693_v18 = vld [vmem:[%s2078_s1 + $0x228] sm:$0xff]   ;;  %v1697_v22 = vld [vmem:[%s2078_s1 + $0x220] sm:$0xff]   ;;  %v1699_v24 = vld [vmem:[%s2078_s1 + $0x258] sm:$0xff]  }
  0x28   : > { %1502 = vmatprep.subr.bf16.mxu1 %v1636_v29  ;;  %v1694_v19 = vld [vmem:[%s2078_s1 + $0x2a8] sm:$0xff]   ;;  %v1698_v23 = vld [vmem:[%s2078_s1 + $0x2a0] sm:$0xff]   ;;  %v1700_v25 = vld [vmem:[%s2078_s1 + $0x2d8] sm:$0xff]  }
  0x29   : > { %v1701_v26 = vld [vmem:[%s2078_s1 + $0x218] sm:$0xff]   ;;  %v1703_v28 = vld [vmem:[%s2078_s1 + $0x250] sm:$0xff]   ;;  %v1708_v33 = vld [vmem:[%s2078_s1 + $0x2c8] sm:$0xff]  }
  0x2a   : > { %1481 = vmatpush3.bf16.msra.mxu0 %v1637_v30  ;;  %v1702_v27 = vld [vmem:[%s2078_s1 + $0x298] sm:$0xff]   ;;  %v1704_v29 = vld [vmem:[%s2078_s1 + $0x2d0] sm:$0xff]   ;;  %v1710_v35 = vld [vmem:[%s2078_s1 + $0x288] sm:$0xff]  }
  0x2b   : > { %1503 = vmatpush3.bf16.msra.mxu1 %v1638_v31  ;;  %1510 = vmatprep.subr.bf16.mxu0 %v1645_v36  ;;  %v1705_v30 = vld [vmem:[%s2078_s1 + $0x210] sm:$0xff]   ;;  %v1711_v36 = vld [vmem:[%s2078_s1 + $0x240] sm:$0xff]  }
  0x2c   : > { %1532 = vmatprep.subr.bf16.mxu1 %v1646_v37  ;;  %v1706_v31 = vld [vmem:[%s2078_s1 + $0x290] sm:$0xff]   ;;  %v1712_v37 = vld [vmem:[%s2078_s1 + $0x2c0] sm:$0xff]  }
  0x2d   : > { %1058 = vmatmul.mubr.bf16.vlgmr.msra.gmra.mxu0 %v1639_v32  ;;  %v1707_v32 = vld [vmem:[%s2078_s1 + $0x248] sm:$0xff]  }
  0x2e   : > { %1099 = vmatmul.mubr.bf16.vlgmr.msra.gmra.mxu1 %v1642_v34  ;;  %1511 = vmatpush3.bf16.msra.mxu0 %v1647_v38  ;;  %v1709_v34 = vld [vmem:[%s2078_s1 + $0x208] sm:$0xff]   ;;  %v1713_v38 = vld [vmem:[%s2078_s1 + $0x200] sm:$0xff]  }
  0x2f   : > { %1533 = vmatpush3.bf16.msra.mxu1 %v1648_v39  ;;  %1512 = vmatprep.subr.bf16.mxu0 %v1649_v40  ;;  %v1714_v39 = vld [vmem:[%s2078_s1 + $0x280] sm:$0xff]  }
  0x30   : > { %1534 = vmatprep.subr.bf16.mxu1 %v1650_v41  ;;  %1139 = vmatprep.mubr.bf16.mxu0 %v1679_v5  ;;  %v1715_v40 = vld [vmem:[%s1855_s13 + $0x20] ss:$48 sps:$4 sm:$0xff]   ;;  %v1717_v41 = vld [vmem:[%s1855_s13 + $0x24] ss:$48 sps:$4 sm:$0xff]  }
  0x31   : > { %1180 = vmatprep.mubr.bf16.mxu1 %v1682_v7 }
  0x32   : > { %1513 = vmatpush3.bf16.msra.mxu0 %v1651_v42  ;;  %v1718_v42 = vld [vmem:[%s1855_s13 + $0x28] ss:$48 sps:$4 sm:$0xff]  }
  0x33   : > { %1535 = vmatpush3.bf16.msra.mxu1 %v1652_v43  ;;  %1514 = vmatprep.subr.bf16.mxu0 %v1653_v44  ;;  %v1720_v43 = vld [vmem:[%s1855_s13 + $0x2c] ss:$48 sps:$4 sm:$0xff]   ;;  %s1345_s13 = sshll.u32 %s2082_s19, 2 }
  0x34   : > { %1536 = vmatprep.subr.bf16.mxu1 %v1654_v45  ;;  %s175_s20 = scalar_lea.vmem %s2080_s3, %s1345_s13 }
  0x36   : > { %1515 = vmatpush3.bf16.msra.mxu0 %v1655_v46 }
  0x37   : > { %1537 = vmatpush3.bf16.msra.mxu1 %v1656_v47  ;;  %1516 = vmatprep.subr.bf16.mxu0 %v1657_v48 }
  0x38   : > { %1538 = vmatprep.subr.bf16.mxu1 %v1658_v49 }
  0x3a   : > { %1517 = vmatpush3.bf16.msra.mxu0 %v1659_v50 }
  0x3b   : > { %1539 = vmatpush3.bf16.msra.mxu1 %v1660_v51  ;;  %1518 = vmatprep.subr.bf16.mxu0 %v1661_v52 }
  0x3c   : > { %1540 = vmatprep.subr.bf16.mxu1 %v1662_v53 }
  0x3e   : > { %1519 = vmatpush3.bf16.msra.mxu0 %v1663_v54 }
  0x3f   : > { %1541 = vmatpush3.bf16.msra.mxu1 %v1664_v55  ;;  %1520 = vmatprep.subr.bf16.mxu0 %v1665_v56 }
  0x40   : > { %1542 = vmatprep.subr.bf16.mxu1 %v1666_v57  ;;  %v1346_v57 = vld [vmem:[%s2079_s2] ss:$0 sm:$0xff] }
  0x42   : > { %1521 = vmatpush3.bf16.msra.mxu0 %v1667_v58 }
  0x43   : > { %1543 = vmatpush3.bf16.msra.mxu1 %v1668_v59  ;;  %1522 = vmatprep.subr.bf16.mxu0 %v1669_v60 }
  0x44   : > { %1544 = vmatprep.subr.bf16.mxu1 %v1670_v61 }
  0x46   : > { %1523 = vmatpush3.bf16.msra.mxu0 %v1671_v62 }
  0x47   : > { %1545 = vmatpush3.bf16.msra.mxu1 %v1672_v63  ;;  %1524 = vmatprep.subr.bf16.mxu0 %v1673_v0 }
  0x48   : > { %1546 = vmatprep.subr.bf16.mxu1 %v1674_v1 }
  0x4a   : > { %1525 = vmatpush3.bf16.msra.mxu0 %v1675_v2 }
  0x4b   : > { %1547 = vmatpush3.bf16.msra.mxu1 %v1676_v3  ;;  %1554 = vmatprep.subr.bf16.mxu0 %v1683_v8 }
  0x4c   : > { %1576 = vmatprep.subr.bf16.mxu1 %v1684_v9 }
  0x4d   : > { %1140 = vmatmul.mubr.bf16.vlgmr.msra.gmra.mxu0 %v1677_v4 }
  0x4e   : > { %1181 = vmatmul.mubr.bf16.vlgmr.msra.gmra.mxu1 %v1680_v6  ;;  %1555 = vmatpush3.bf16.msra.mxu0 %v1685_v10 }
  0x4f   : > { %1577 = vmatpush3.bf16.msra.mxu1 %v1686_v11  ;;  %1556 = vmatprep.subr.bf16.mxu0 %v1687_v12 }
  0x50   : > { %1578 = vmatprep.subr.bf16.mxu1 %v1688_v13  ;;  %1221 = vmatprep.mubr.bf16.mxu0 %v1717_v41 }
  0x51   : > { %1262 = vmatprep.mubr.bf16.mxu1 %v1720_v43 }
  0x52   : > { %1557 = vmatpush3.bf16.msra.mxu0 %v1689_v14 }
  0x53   : > { %1579 = vmatpush3.bf16.msra.mxu1 %v1690_v15  ;;  %1558 = vmatprep.subr.bf16.mxu0 %v1691_v16 }
  0x54   : > { %1580 = vmatprep.subr.bf16.mxu1 %v1692_v17 }
  0x56   : > { %1559 = vmatpush3.bf16.msra.mxu0 %v1693_v18 }
  0x57   : > { %1581 = vmatpush3.bf16.msra.mxu1 %v1694_v19  ;;  %1560 = vmatprep.subr.bf16.mxu0 %v1695_v20 }
  0x58   : > { %1582 = vmatprep.subr.bf16.mxu1 %v1696_v21 }
  0x5a   : > { %1561 = vmatpush3.bf16.msra.mxu0 %v1697_v22 }
  0x5b   : > { %1583 = vmatpush3.bf16.msra.mxu1 %v1698_v23  ;;  %1562 = vmatprep.subr.bf16.mxu0 %v1699_v24 }
  0x5c   : > { %1584 = vmatprep.subr.bf16.mxu1 %v1700_v25 }
  0x5e   : > { %1563 = vmatpush3.bf16.msra.mxu0 %v1701_v26 }
  0x5f   : > { %1585 = vmatpush3.bf16.msra.mxu1 %v1702_v27  ;;  %1564 = vmatprep.subr.bf16.mxu0 %v1703_v28 }
  0x60   : > { %1586 = vmatprep.subr.bf16.mxu1 %v1704_v29 }
  0x62   : > { %1565 = vmatpush3.bf16.msra.mxu0 %v1705_v30 }
  0x63   : > { %1587 = vmatpush3.bf16.msra.mxu1 %v1706_v31  ;;  %1566 = vmatprep.subr.bf16.mxu0 %v1707_v32 }
  0x64   : > { %1588 = vmatprep.subr.bf16.mxu1 %v1708_v33 }
  0x66   : > { %1567 = vmatpush3.bf16.msra.mxu0 %v1709_v34 }
  0x67   : > { %1589 = vmatpush3.bf16.msra.mxu1 %v1710_v35  ;;  %1568 = vmatprep.subr.bf16.mxu0 %v1711_v36 }
  0x68   : > { %1590 = vmatprep.subr.bf16.mxu1 %v1712_v37 }
  0x6a   : > { %1569 = vmatpush3.bf16.msra.mxu0 %v1713_v38 }
  0x6b   : > { %1591 = vmatpush3.bf16.msra.mxu1 %v1714_v39 }
  0x6d   : > { %1222 = vmatmul.mubr.bf16.vlgmr.msra.gmra.mxu0 %v1715_v40 }
  0x6e   : > { %1263 = vmatmul.mubr.bf16.vlgmr.msra.gmra.mxu1 %v1718_v42 }
  0xed   : > { %v1482_v44 = vpop.f32.mrf.mxu0 }
  0xee   : > { %v1504_v45 = vpop.f32.mrf.mxu1 }
  0xef   : > { %v1483_v46 = vpop.f32.mrf.mxu0 }
  0xf0   : > { %v1505_v47 = vpop.f32.mrf.mxu1  ;;  %v1484_v55 = vadd.f32 %v1483_v46, %v1482_v44 }
  0xf1   : > { %v1485_v48 = vpop.f32.mrf.mxu0  ;;  %v1506_v61 = vadd.f32 %v1505_v47, %v1504_v45 }
  0xf2   : > { %v1507_v49 = vpop.f32.mrf.mxu1  ;;  %v1060_v60 = vadd.f32 %v1484_v55, %v1346_v57 }
  0xf3   : > { %v1486_v50 = vpop.f32.mrf.mxu0 }
  0xf4   : > { %v1508_v52 = vpop.f32.mrf.mxu1  ;;  %v1487_v59 = vadd.f32 %v1486_v50, %v1485_v48  ;;  %v1101_v2 = vadd.f32 %v1506_v61, %v1060_v60 }
  0xf5   : > { %v1509_v3 = vadd.f32 %v1508_v52, %v1507_v49 }
  0xf6   : > { %v1063_v0 = vadd.f32 %v1487_v59, %v1346_v57 }
  0xf8   : > { %v1104_v7 = vadd.f32 %v1509_v3, %v1063_v0 }
 0x10d   : > { %v1526_v51 = vpop.f32.mrf.mxu0 }
 0x10e   : > { %v1548_v53 = vpop.f32.mrf.mxu1 }
 0x10f   : > { %v1527_v54 = vpop.f32.mrf.mxu0 }
 0x110   : > { %v1549_v56 = vpop.f32.mrf.mxu1  ;;  %v1528_v1 = vadd.f32 %v1527_v54, %v1526_v51 }
 0x111   : > { %v1529_v58 = vpop.f32.mrf.mxu0  ;;  %v1550_v9 = vadd.f32 %v1549_v56, %v1548_v53 }
 0x112   : > { %v1551_v62 = vpop.f32.mrf.mxu1  ;;  %v1142_v8 = vadd.f32 %v1528_v1, %v1101_v2 }
 0x113   : > { %v1530_v63 = vpop.f32.mrf.mxu0 }
 0x114   : > { %v1531_v4 = vadd.f32 %v1530_v63, %v1529_v58  ;;  %v1552_v5 = vpop.f32.mrf.mxu1  ;;  %v1183_v16 = vadd.f32 %v1550_v9, %v1142_v8 }
 0x115   : > { %v1553_v17 = vadd.f32 %v1552_v5, %v1551_v62 }
 0x116   : > { %v1145_v12 = vadd.f32 %v1531_v4, %v1104_v7 }
 0x118   : > { %v1186_v20 = vadd.f32 %v1553_v17, %v1145_v12 }
 0x12d   : > { %v1570_v6 = vpop.f32.mrf.mxu0 }
 0x12e   : > { %v1592_v10 = vpop.f32.mrf.mxu1 }
 0x12f   : > { %v1571_v11 = vpop.f32.mrf.mxu0 }
 0x130   : > { %v1572_v13 = vadd.f32 %v1571_v11, %v1570_v6  ;;  %v1593_v14 = vpop.f32.mrf.mxu1 }
 0x131   : > { %v1573_v15 = vpop.f32.mrf.mxu0  ;;  %v1594_v24 = vadd.f32 %v1593_v14, %v1592_v10 }
 0x132   : > { %v1595_v18 = vpop.f32.mrf.mxu1  ;;  %v1224_v21 = vadd.f32 %v1572_v13, %v1183_v16 }
 0x133   : > { %v1574_v19 = vpop.f32.mrf.mxu0 }
 0x134   : > { %v1575_v22 = vadd.f32 %v1574_v19, %v1573_v15  ;;  %v1596_v23 = vpop.f32.mrf.mxu1  ;;  %v1265_v27 = vadd.f32 %v1594_v24, %v1224_v21 }
 0x135   : > { %v1597_v26 = vadd.f32 %v1596_v23, %v1595_v18 }
 0x136   : > { %v1227_v25 = vadd.f32 %v1575_v22, %v1186_v20 }
 0x138   : > { %v1268_v28 = vadd.f32 %v1597_v26, %v1227_v25 }
 0x13a   : > { %v1464_v29 = vpack.c.bf16 %v1268_v28, %v1265_v27 }
 0x13c   : > { %1465 = vst [vmem:[%s175_s20] sm:$0xff] %v1464_v29  }
 0x13d PF: > { %s13_s12 = sadd.s32 1, %s1727_s12  }
 0x13e   : > { %p10_p4 = scmp.ge.s32.totalorder %s13_s12, 4  }
 0x140   :  { %12 = sbr.rel (!%p10_p4) target bundleno = 1 (0x1), region = 62 }

// kernel: clf_img_forward.15
= control target key start
LH: loop header
LB: loop body
LE: loop exit
PB: predicated region body
PF: predicated region fallthrough
CT: control target
= control target key end

     0   :  { %vm6528_vm0 = vmmov 0   ;;  %s8807_s1 = inlined_call_operand.vmem [shape: bf16[1024,128], index: 1, kind: input, shape index: {}]   ;;  %s8808_s0 = inlined_call_operand.vmem [shape: bf16[8,1024], index: 0, kind: input, shape index: {}]   ;;  %s8809_s5 = inlined_call_operand.vmem [shape: bf16[1024,1024], index: 5, kind: input, shape index: {}]   ;;  %s8810_s3 = inlined_call_operand.vmem [shape: f32[1,1024], index: 3, kind: input, shape index: {}]   ;;  %s8811_s4 = inlined_call_operand.vmem [shape: f32[1,1024], index: 4, kind: input, shape index: {}]   ;;  %s8812_s2 = inlined_call_operand.vmem [shape: f32[1,128], index: 2, kind: input, shape index: {}]   ;;  %s8813_s8 = inlined_call_operand.vmem [shape: bf16[1024,128], index: 8, kind: input, shape index: {}]   ;;  %s8814_s6 = inlined_call_operand.vmem [shape: f32[1,1024], index: 6, kind: input, shape index: {}]   ;;  %s8815_s7 = inlined_call_operand.vmem [shape: f32[1,1024], index: 7, kind: input, shape index: {}]   ;;  %s8816_s9 = inlined_call_operand.vmem [shape: bf16[128,128], index: 9, kind: input, shape index: {}]   ;;  %s8817_s10 = inlined_call_operand.vmem [shape: f32[1,128], index: 10, kind: input, shape index: {}]   ;;  %s8818_s11 = inlined_call_operand.vmem [shape: f32[8,128], index: 11, kind: output, shape index: {}]  }
   0x1   :  { %v6379_v0 = vld [vmem:[%s8807_s1 + $0x78] sm:$0xff]   ;;  %v6383_v4 = vld [vmem:[%s8807_s1 + $0x70] sm:$0xff]   ;;  %v6387_v8 = vld [vmem:[%s8807_s1 + $0x68] sm:$0xff]  }
   0x2   :  { %v6380_v1 = vld [vmem:[%s8807_s1 + $0xf8] sm:$0xff]   ;;  %6172 = vmatprep.subr.bf16.mxu0 %v6379_v0  ;;  %v6384_v5 = vld [vmem:[%s8807_s1 + $0xf0] sm:$0xff]   ;;  %v6388_v9 = vld [vmem:[%s8807_s1 + $0xe8] sm:$0xff]  }
   0x3   :  { %v6381_v2 = vld [vmem:[%s8807_s1 + $0x38] sm:$0xff]   ;;  %6194 = vmatprep.subr.bf16.mxu1 %v6380_v1  ;;  %v6385_v6 = vld [vmem:[%s8807_s1 + $0x30] sm:$0xff]   ;;  %v6389_v10 = vld [vmem:[%s8807_s1 + $0x28] sm:$0xff]  }
   0x4   :  { %v6382_v3 = vld [vmem:[%s8807_s1 + $0xb8] sm:$0xff]   ;;  %6173 = vmatpush3.bf16.msra.mxu0 %v6381_v2  ;;  %v6386_v7 = vld [vmem:[%s8807_s1 + $0xb0] sm:$0xff]   ;;  %v6390_v11 = vld [vmem:[%s8807_s1 + $0xa8] sm:$0xff]  }
   0x5   :  { %6195 = vmatpush3.bf16.msra.mxu1 %v6382_v3  ;;  %6174 = vmatprep.subr.bf16.mxu0 %v6383_v4  ;;  %v6391_v12 = vld [vmem:[%s8807_s1 + $0x60] sm:$0xff]   ;;  %v6395_v16 = vld [vmem:[%s8807_s1 + $0x58] sm:$0xff]   ;;  %v6399_v20 = vld [vmem:[%s8807_s1 + $0x50] sm:$0xff]  }
   0x6   :  { %6196 = vmatprep.subr.bf16.mxu1 %v6384_v5  ;;  %v6392_v13 = vld [vmem:[%s8807_s1 + $0xe0] sm:$0xff]   ;;  %v6396_v17 = vld [vmem:[%s8807_s1 + $0xd8] sm:$0xff]   ;;  %v6400_v21 = vld [vmem:[%s8807_s1 + $0xd0] sm:$0xff]   ;;  %v760_v5 = vlaneseq }
   0x7   :  { %v6393_v14 = vld [vmem:[%s8807_s1 + $0x20] sm:$0xff]   ;;  %v6397_v18 = vld [vmem:[%s8807_s1 + $0x18] sm:$0xff]   ;;  %v6401_v22 = vld [vmem:[%s8807_s1 + $0x10] sm:$0xff]  }
   0x8   :  { %6175 = vmatpush3.bf16.msra.mxu0 %v6385_v6  ;;  %v6394_v15 = vld [vmem:[%s8807_s1 + $0xa0] sm:$0xff]   ;;  %v6398_v19 = vld [vmem:[%s8807_s1 + $0x98] sm:$0xff]   ;;  %v6402_v23 = vld [vmem:[%s8807_s1 + $0x90] sm:$0xff]  }
   0x9   :  { %6197 = vmatpush3.bf16.msra.mxu1 %v6386_v7  ;;  %6176 = vmatprep.subr.bf16.mxu0 %v6387_v8  ;;  %v6403_v24 = vld [vmem:[%s8807_s1 + $0x48] sm:$0xff]   ;;  %v6407_v28 = vld [vmem:[%s8807_s1 + $0x40] sm:$0xff]   ;;  %v6415_v35 = vld [vmem:[%s8807_s1 + $0x178] sm:$0xff]  }
   0xa   :  { %6198 = vmatprep.subr.bf16.mxu1 %v6388_v9  ;;  %v6404_v25 = vld [vmem:[%s8807_s1 + $0xc8] sm:$0xff]   ;;  %v6408_v29 = vld [vmem:[%s8807_s1 + $0xc0] sm:$0xff]   ;;  %v6416_v37 = vld [vmem:[%s8807_s1 + $0x1f8] sm:$0xff]  }
   0xb   :  { %v6405_v26 = vld [vmem:[%s8807_s1 + $0x8] sm:$0xff]   ;;  %v6409_v30 = vld [vmem:[%s8807_s1] sm:$0xff]   ;;  %v6417_v39 = vld [vmem:[%s8807_s1 + $0x138] sm:$0xff]  }
   0xc   :  { %6177 = vmatpush3.bf16.msra.mxu0 %v6389_v10  ;;  %v6406_v27 = vld [vmem:[%s8807_s1 + $0x88] sm:$0xff]   ;;  %v6410_v31 = vld [vmem:[%s8807_s1 + $0x80] sm:$0xff]   ;;  %v6418_v41 = vld [vmem:[%s8807_s1 + $0x1b8] sm:$0xff]  }
   0xd   :  { %6199 = vmatpush3.bf16.msra.mxu1 %v6390_v11  ;;  %6178 = vmatprep.subr.bf16.mxu0 %v6391_v12  ;;  %v6688_v32 = vld [vmem:[%s8808_s0] sm:$0xff]  ;;  %v6693_v33 = vld [vmem:[%s8808_s0 + $0x8] sm:$0xff]  ;;  %v6419_v42 = vld [vmem:[%s8807_s1 + $0x170] sm:$0xff]  }
   0xe   :  { %6200 = vmatprep.subr.bf16.mxu1 %v6392_v13  ;;  %v5516_v34 = vcombine.high %v6688_v32, %v6688_v32  ;;  %v5518_v36 = vcombine.high %v6693_v33, %v6693_v33  ;;  %v5515_v38 = vcombine.low %v6688_v32, %v6688_v32  ;;  %v5517_v40 = vcombine.low %v6693_v33, %v6693_v33  ;;  %v6420_v43 = vld [vmem:[%s8807_s1 + $0x1f0] sm:$0xff]   ;;  %v6423_v46 = vld [vmem:[%s8807_s1 + $0x168] sm:$0xff]   ;;  %v6427_v50 = vld [vmem:[%s8807_s1 + $0x160] sm:$0xff]  }
   0xf   :  { %v6421_v44 = vld [vmem:[%s8807_s1 + $0x130] sm:$0xff]   ;;  %v6424_v47 = vld [vmem:[%s8807_s1 + $0x1e8] sm:$0xff]   ;;  %v6428_v51 = vld [vmem:[%s8807_s1 + $0x1e0] sm:$0xff]  }
  0x10   :  { %6179 = vmatpush3.bf16.msra.mxu0 %v6393_v14  ;;  %622 = vmatprep.mubr.bf16.mxu0 %v5516_v34  ;;  %v6422_v45 = vld [vmem:[%s8807_s1 + $0x1b0] sm:$0xff]   ;;  %v6425_v48 = vld [vmem:[%s8807_s1 + $0x128] sm:$0xff]   ;;  %v6429_v52 = vld [vmem:[%s8807_s1 + $0x120] sm:$0xff]  }
  0x11   :  { %6201 = vmatpush3.bf16.msra.mxu1 %v6394_v15  ;;  %6180 = vmatprep.subr.bf16.mxu0 %v6395_v16  ;;  %v6426_v49 = vld [vmem:[%s8807_s1 + $0x1a8] sm:$0xff]   ;;  %v6430_v53 = vld [vmem:[%s8807_s1 + $0x1a0] sm:$0xff]   ;;  %v6431_v54 = vld [vmem:[%s8807_s1 + $0x158] sm:$0xff]  }
  0x12   :  { %6202 = vmatprep.subr.bf16.mxu1 %v6396_v17  ;;  %662 = vmatprep.mubr.bf16.mxu1 %v5518_v36  ;;  %v6432_v55 = vld [vmem:[%s8807_s1 + $0x1d8] sm:$0xff]   ;;  %v6435_v58 = vld [vmem:[%s8807_s1 + $0x150] sm:$0xff]   ;;  %v6439_v62 = vld [vmem:[%s8807_s1 + $0x148] sm:$0xff]  }
  0x13   :  { %v6433_v56 = vld [vmem:[%s8807_s1 + $0x118] sm:$0xff]   ;;  %v6436_v59 = vld [vmem:[%s8807_s1 + $0x1d0] sm:$0xff]   ;;  %v6440_v63 = vld [vmem:[%s8807_s1 + $0x1c8] sm:$0xff]  }
  0x14   :  { %6181 = vmatpush3.bf16.msra.mxu0 %v6397_v18  ;;  %v6434_v57 = vld [vmem:[%s8807_s1 + $0x198] sm:$0xff]   ;;  %v6437_v60 = vld [vmem:[%s8807_s1 + $0x110] sm:$0xff]   ;;  %v6441_v0 = vld [vmem:[%s8807_s1 + $0x108] sm:$0xff]  }
  0x15   :  { %6203 = vmatpush3.bf16.msra.mxu1 %v6398_v19  ;;  %6182 = vmatprep.subr.bf16.mxu0 %v6399_v20  ;;  %v6438_v61 = vld [vmem:[%s8807_s1 + $0x190] sm:$0xff]   ;;  %v6442_v1 = vld [vmem:[%s8807_s1 + $0x188] sm:$0xff]   ;;  %v6443_v2 = vld [vmem:[%s8807_s1 + $0x140] sm:$0xff]   ;;  %v6838_v20 = vshrl.u32 %v760_v5, 7  ;;  %v753_v5 = vunpack.c.h.bf16 %v6693_v33 }
  0x16   :  { %6204 = vmatprep.subr.bf16.mxu1 %v6400_v21  ;;  %v6444_v3 = vld [vmem:[%s8807_s1 + $0x1c0] sm:$0xff]   ;;  %v6802_v7 = vld [vmem:[%s8808_s0 + $0x10] sm:$0xff]  ;;  %v6807_v8 = vld [vmem:[%s8808_s0 + $0x18] sm:$0xff] }
  0x17   :  { %v6445_v4 = vld [vmem:[%s8807_s1 + $0x100] sm:$0xff]   ;;  %v5520_v10 = vcombine.high %v6802_v7, %v6802_v7  ;;  %v5522_v11 = vcombine.high %v6807_v8, %v6807_v8  ;;  %v5519_v15 = vcombine.low %v6802_v7, %v6802_v7  ;;  %v5521_v16 = vcombine.low %v6807_v8, %v6807_v8 }
  0x18   :  { %6183 = vmatpush3.bf16.msra.mxu0 %v6401_v22  ;;  %v6446_v6 = vld [vmem:[%s8807_s1 + $0x180] sm:$0xff]   ;;  %v6856_v34 = vsub.s32 4, %v6838_v20 }
  0x19   :  { %6205 = vmatpush3.bf16.msra.mxu1 %v6402_v23  ;;  %6184 = vmatprep.subr.bf16.mxu0 %v6403_v24  ;;  %v930_v9 = vld [vmem:[%s8809_s5 + $0x1c0] sm:$0xff] }
  0x1a   :  { %6206 = vmatprep.subr.bf16.mxu1 %v6404_v25  ;;  %v934_v12 = vld [vmem:[%s8809_s5 + $0x1e0] sm:$0xff] }
  0x1b   :  { %v1058_v13 = vld [vmem:[%s8809_s5 + $0x5c0] sm:$0xff]  ;;  %v5643_v21 = vcombine.low %v930_v9, %v934_v12  ;;  %v5644_v22 = vcombine.high %v930_v9, %v934_v12 }
  0x1c   :  { %6185 = vmatpush3.bf16.msra.mxu0 %v6405_v26  ;;  %v1062_v14 = vld [vmem:[%s8809_s5 + $0x5e0] sm:$0xff] }
  0x1d   :  { %6207 = vmatpush3.bf16.msra.mxu1 %v6406_v27  ;;  %6186 = vmatprep.subr.bf16.mxu0 %v6407_v28  ;;  %v922_v17 = vld [vmem:[%s8809_s5 + $0x180] sm:$0xff]  ;;  %v5771_v23 = vcombine.low %v1058_v13, %v1062_v14  ;;  %v5772_v25 = vcombine.high %v1058_v13, %v1062_v14 }
  0x1e   :  { %6208 = vmatprep.subr.bf16.mxu1 %v6408_v29  ;;  %v926_v18 = vld [vmem:[%s8809_s5 + $0x1a0] sm:$0xff] }
  0x1f   :  { %v1050_v19 = vld [vmem:[%s8809_s5 + $0x580] sm:$0xff]  ;;  %v5636_v26 = vcombine.high %v922_v17, %v926_v18 }
  0x20   :  { %6187 = vmatpush3.bf16.msra.mxu0 %v6409_v30  ;;  %v1054_v24 = vld [vmem:[%s8809_s5 + $0x5a0] sm:$0xff] }
  0x21   :  { %6209 = vmatpush3.bf16.msra.mxu1 %v6410_v31  ;;  %6216 = vmatprep.subr.bf16.mxu0 %v6415_v35  ;;  %v914_v27 = vld [vmem:[%s8809_s5 + $0x140] sm:$0xff]  ;;  %v5764_v29 = vcombine.high %v1050_v19, %v1054_v24  ;;  %v5635_v35 = vcombine.low %v922_v17, %v926_v18  ;;  %v5763_v36 = vcombine.low %v1050_v19, %v1054_v24 }
  0x22   :  { %6238 = vmatprep.subr.bf16.mxu1 %v6416_v37  ;;  %v918_v28 = vld [vmem:[%s8809_s5 + $0x160] sm:$0xff] }
  0x23   :  { %623 = vmatmul.mubr.bf16.vlgmr.msra.gmra.mxu0 %v5515_v38  ;;  %v1042_v30 = vld [vmem:[%s8809_s5 + $0x540] sm:$0xff]  ;;  %v5628_v37 = vcombine.high %v914_v27, %v918_v28  ;;  %v6859_v38 = vsub.s32 6, %v6838_v20 }
  0x24   :  { %663 = vmatmul.mubr.bf16.vlgmr.msra.gmra.mxu1 %v5517_v40  ;;  %6217 = vmatpush3.bf16.msra.mxu0 %v6417_v39  ;;  %v1046_v31 = vld [vmem:[%s8809_s5 + $0x560] sm:$0xff] }
  0x25   :  { %6239 = vmatpush3.bf16.msra.mxu1 %v6418_v41  ;;  %6218 = vmatprep.subr.bf16.mxu0 %v6419_v42  ;;  %v6864_v39 = vld [vmem:[%s8810_s3] sm:$0xff]  ;;  %v5756_v40 = vcombine.high %v1042_v30, %v1046_v31 }
  0x26   :  { %6240 = vmatprep.subr.bf16.mxu1 %v6420_v43  ;;  %702 = vmatprep.mubr.bf16.mxu0 %v5520_v10  ;;  %v906_v41 = vld [vmem:[%s8809_s5 + $0x100] sm:$0xff]  ;;  %v754_v43 = vunpack.c.l.bf16 %v6802_v7 }
  0x27   :  { %742 = vmatprep.mubr.bf16.mxu1 %v5522_v11  ;;  %v910_v42 = vld [vmem:[%s8809_s5 + $0x120] sm:$0xff] }
  0x28   :  { %6219 = vmatpush3.bf16.msra.mxu0 %v6421_v44  ;;  %v1034_v44 = vld [vmem:[%s8809_s5 + $0x500] sm:$0xff] }
  0x29   :  { %6241 = vmatpush3.bf16.msra.mxu1 %v6422_v45  ;;  %6220 = vmatprep.subr.bf16.mxu0 %v6423_v46  ;;  %v1038_v45 = vld [vmem:[%s8809_s5 + $0x520] sm:$0xff]  ;;  %v779_v46 = vrot.slane %v6864_v39, %v6856_v34 }
  0x2a   :  { %6242 = vmatprep.subr.bf16.mxu1 %v6424_v47  ;;  %v5627_v47 = vcombine.low %v914_v27, %v918_v28  ;;  %v1018_v9 = vld [vmem:[%s8809_s5 + $0x480] sm:$0xff] }
  0x2b   :  { %v1022_v10 = vld [vmem:[%s8809_s5 + $0x4a0] sm:$0xff] }
  0x2c   :  { %6221 = vmatpush3.bf16.msra.mxu0 %v6425_v48  ;;  %v756_v48 = vunpack.c.l.bf16 %v6807_v8  ;;  %v5732_v14 = vcombine.high %v1018_v9, %v1022_v10  ;;  %v1010_v19 = vld [vmem:[%s8809_s5 + $0x440] sm:$0xff] }
  0x2d   :  { %6243 = vmatpush3.bf16.msra.mxu1 %v6426_v49  ;;  %6222 = vmatprep.subr.bf16.mxu0 %v6427_v50  ;;  %v5755_v49 = vcombine.low %v1042_v30, %v1046_v31  ;;  %v5620_v50 = vcombine.high %v906_v41, %v910_v42  ;;  %v6939_v24 = vld [vmem:[%s8811_s4] sm:$0xff] }
  0x2e   :  { %6244 = vmatprep.subr.bf16.mxu1 %v6428_v51  ;;  %v787_v51 = vrot.slane %v6864_v39, %v6859_v38  ;;  %v878_v30 = vld [vmem:[%s8809_s5 + $0x20] sm:$0xff] }
  0x2f   :  { %v1002_v31 = vld [vmem:[%s8809_s5 + $0x400] sm:$0xff] }
  0x30   :  { %6223 = vmatpush3.bf16.msra.mxu0 %v6429_v52  ;;  %v5748_v52 = vcombine.high %v1034_v44, %v1038_v45 }
  0x31   :  { %6245 = vmatpush3.bf16.msra.mxu1 %v6430_v53  ;;  %6224 = vmatprep.subr.bf16.mxu0 %v6431_v54  ;;  %v898_v53 = vld [vmem:[%s8809_s5 + $0xc0] sm:$0xff] }
  0x32   :  { %6246 = vmatprep.subr.bf16.mxu1 %v6432_v55  ;;  %v902_v54 = vld [vmem:[%s8809_s5 + $0xe0] sm:$0xff]  ;;  %v6891_v55 = vsub.s32 1, %v6838_v20 }
  0x33   :  { %v5611_v11 = vcombine.low %v898_v53, %v902_v54 }
  0x34   :  { %6225 = vmatpush3.bf16.msra.mxu0 %v6433_v56  ;;  %v6894_v56 = vsub.s32 3, %v6838_v20 }
  0x35   :  { %6247 = vmatpush3.bf16.msra.mxu1 %v6434_v57  ;;  %6226 = vmatprep.subr.bf16.mxu0 %v6435_v58  ;;  %v1026_v57 = vld [vmem:[%s8809_s5 + $0x4c0] sm:$0xff] }
  0x36   :  { %6248 = vmatprep.subr.bf16.mxu1 %v6436_v59  ;;  %v1030_v58 = vld [vmem:[%s8809_s5 + $0x4e0] sm:$0xff]  ;;  %v6902_v59 = vmul.f32 %v779_v46, %v754_v43  ;;  %v825_v27 = vrot.slane %v6939_v24, %v6894_v56 }
  0x37   :  { %v5739_v12 = vcombine.low %v1026_v57, %v1030_v58  ;;  %v994_v46 = vld [vmem:[%s8809_s5 + $0x3c0] sm:$0xff] }
  0x38   :  { %6227 = vmatpush3.bf16.msra.mxu0 %v6437_v60  ;;  %v5619_v60 = vcombine.low %v906_v41, %v910_v42 }
  0x39   :  { %6249 = vmatpush3.bf16.msra.mxu1 %v6438_v61  ;;  %6228 = vmatprep.subr.bf16.mxu0 %v6439_v62  ;;  %v5747_v61 = vcombine.low %v1034_v44, %v1038_v45  ;;  %v5612_v62 = vcombine.high %v898_v53, %v902_v54 }
  0x3a   :  { %6250 = vmatprep.subr.bf16.mxu1 %v6440_v63  ;;  %v6904_v63 = vmul.f32 %v787_v51, %v756_v48  ;;  %v1122_v48 = vld [vmem:[%s8809_s5 + $0x7c0] sm:$0xff] }
  0x3c   :  { %6229 = vmatpush3.bf16.msra.mxu0 %v6441_v0  ;;  %v5740_v0 = vcombine.high %v1026_v57, %v1030_v58  ;;  %v986_v58 = vld [vmem:[%s8809_s5 + $0x380] sm:$0xff] }
  0x3d   :  { %6251 = vmatpush3.bf16.msra.mxu1 %v6442_v1  ;;  %6230 = vmatprep.subr.bf16.mxu0 %v6443_v2  ;;  %v890_v1 = vld [vmem:[%s8809_s5 + $0x80] sm:$0xff] }
  0x3e   :  { %6252 = vmatprep.subr.bf16.mxu1 %v6444_v3  ;;  %v894_v2 = vld [vmem:[%s8809_s5 + $0xa0] sm:$0xff]  ;;  %v751_v3 = vunpack.c.h.bf16 %v6688_v32 }
  0x3f   :  { %v5604_v13 = vcombine.high %v890_v1, %v894_v2 }
  0x40   :  { %6231 = vmatpush3.bf16.msra.mxu0 %v6445_v4  ;;  %v767_v4 = vrot.slane %v6864_v39, %v6891_v55 }
  0x41   :  { %6253 = vmatpush3.bf16.msra.mxu1 %v6446_v6  ;;  %3946 = vmatprep.subr.bf16.mxu0 %v5644_v22  ;;  %v775_v6 = vrot.slane %v6864_v39, %v6894_v56  ;;  %v5603_v22 = vcombine.low %v890_v1, %v894_v2 }
  0x42   :  { %3987 = vmatprep.subr.bf16.mxu1 %v5772_v25  ;;  %v801_v17 = vmul.f32 %v767_v4, %v751_v3  ;;  %v978_v4 = vld [vmem:[%s8809_s5 + $0x340] sm:$0xff] }
  0x43   :  { %703 = vmatmul.mubr.bf16.vlgmr.msra.gmra.mxu0 %v5519_v15  ;;  %v882_v15 = vld [vmem:[%s8809_s5 + $0x40] sm:$0xff]  ;;  %v803_v18 = vmul.f32 %v775_v6, %v753_v5 }
  0x44   :  { %743 = vmatmul.mubr.bf16.vlgmr.msra.gmra.mxu1 %v5521_v16  ;;  %3947 = vmatpush1.bf16.msra.mxu0 %v5643_v21  ;;  %v886_v16 = vld [vmem:[%s8809_s5 + $0x60] sm:$0xff] }
  0x45   :  { %3988 = vmatpush1.bf16.msra.mxu1 %v5771_v23  ;;  %3948 = vmatprep.subr.bf16.mxu0 %v5636_v26  ;;  %v1014_v21 = vld [vmem:[%s8809_s5 + $0x460] sm:$0xff]  ;;  %v5731_v23 = vcombine.low %v1018_v9, %v1022_v10  ;;  %v5596_v25 = vcombine.high %v882_v15, %v886_v16  ;;  %v817_v26 = vrot.slane %v6939_v24, %v6891_v55 }
  0x46   :  { %3989 = vmatprep.subr.bf16.mxu1 %v5764_v29  ;;  %v5724_v28 = vcombine.high %v1010_v19, %v1014_v21  ;;  %v874_v29 = vld [vmem:[%s8809_s5] sm:$0xff]  ;;  %v5723_v41 = vcombine.low %v1010_v19, %v1014_v21 }
  0x47   :  { %v5588_v42 = vcombine.high %v874_v29, %v878_v30  ;;  %v982_v5 = vld [vmem:[%s8809_s5 + $0x360] sm:$0xff] }
  0x48   :  { %3949 = vmatpush1.bf16.msra.mxu0 %v5635_v35  ;;  %v1006_v35 = vld [vmem:[%s8809_s5 + $0x420] sm:$0xff] }
  0x49   :  { %3990 = vmatpush1.bf16.msra.mxu1 %v5763_v36  ;;  %3950 = vmatprep.subr.bf16.mxu0 %v5628_v37  ;;  %v851_v36 = vadd.f32 %v817_v26, %v801_v17  ;;  %v853_v37 = vadd.f32 %v825_v27, %v803_v18  ;;  %v5716_v45 = vcombine.high %v1002_v31, %v1006_v35  ;;  %v1106_v6 = vld [vmem:[%s8809_s5 + $0x740] sm:$0xff]  ;;  %v7018_v26 = vsub.s32 0, %v6838_v20 }
  0x4a   :  { %3991 = vmatprep.subr.bf16.mxu1 %v5756_v40  ;;  %v5595_v40 = vcombine.low %v882_v15, %v886_v16  ;;  %v5715_v53 = vcombine.low %v1002_v31, %v1006_v35  ;;  %v1110_v9 = vld [vmem:[%s8809_s5 + $0x760] sm:$0xff]  ;;  %v5691_v18 = vcombine.low %v978_v4, %v982_v5  ;;  %v7031_v31 = vsub.s32 2, %v6838_v20 }
  0x4b   :  { %v859_v43 = vmax.f32 %v851_v36, 0.0  ;;  %v861_v44 = vmax.f32 %v853_v37, 0.0  ;;  %v974_v15 = vld [vmem:[%s8809_s5 + $0x320] sm:$0xff]  ;;  %v5819_v19 = vcombine.low %v1106_v6, %v1110_v9 }
  0x4c   :  { %3951 = vmatpush1.bf16.msra.mxu0 %v5627_v47  ;;  %v998_v47 = vld [vmem:[%s8809_s5 + $0x3e0] sm:$0xff] }
  0x4d   :  { %3992 = vmatpush1.bf16.msra.mxu1 %v5755_v49  ;;  %3952 = vmatprep.subr.bf16.mxu0 %v5620_v50  ;;  %v1126_v49 = vld [vmem:[%s8809_s5 + $0x7e0] sm:$0xff]  ;;  %v6969_v50 = vpack.c.bf16 %v859_v43, %v859_v43  ;;  %v6971_v51 = vpack.c.bf16 %v861_v44, %v861_v44  ;;  %v5708_v54 = vcombine.high %v994_v46, %v998_v47 }
  0x4e   :  { %3993 = vmatprep.subr.bf16.mxu1 %v5748_v52  ;;  %v5587_v52 = vcombine.low %v874_v29, %v878_v30  ;;  %v5836_v57 = vcombine.high %v1122_v48, %v1126_v49  ;;  %v5835_v1 = vcombine.low %v1122_v48, %v1126_v49  ;;  %v1098_v16 = vld [vmem:[%s8809_s5 + $0x700] sm:$0xff]  ;;  %v829_v29 = vrot.slane %v6939_v24, %v6856_v34 }
  0x4f   :  { %3978 = vmatprep.mubr.bf16.mxu0 %v6969_v50  ;;  %4019 = vmatprep.mubr.bf16.mxu1 %v6971_v51  ;;  %v1102_v17 = vld [vmem:[%s8809_s5 + $0x720] sm:$0xff]  ;;  %v837_v30 = vrot.slane %v6939_v24, %v6859_v38  ;;  %v7058_v48 = vsub.s32 7, %v6838_v20  ;;  %v752_v49 = vunpack.c.l.bf16 %v6693_v33 }
  0x50   :  { %3953 = vmatpush1.bf16.msra.mxu0 %v5619_v60  ;;  %v990_v60 = vld [vmem:[%s8809_s5 + $0x3a0] sm:$0xff]  ;;  %v5811_v36 = vcombine.low %v1098_v16, %v1102_v17 }
  0x51   :  { %3994 = vmatpush1.bf16.msra.mxu1 %v5747_v61  ;;  %3954 = vmatprep.subr.bf16.mxu0 %v5612_v62  ;;  %v1114_v61 = vld [vmem:[%s8809_s5 + $0x780] sm:$0xff]  ;;  %v5700_v2 = vcombine.high %v986_v58, %v990_v60  ;;  %v5699_v10 = vcombine.low %v986_v58, %v990_v60 }
  0x52   :  { %3995 = vmatprep.subr.bf16.mxu1 %v5740_v0  ;;  %v1118_v62 = vld [vmem:[%s8809_s5 + $0x7a0] sm:$0xff]  ;;  %v5707_v0 = vcombine.low %v994_v46, %v998_v47  ;;  %v750_v46 = vunpack.c.l.bf16 %v6688_v32 }
  0x53   :  { %v5828_v3 = vcombine.high %v1114_v61, %v1118_v62  ;;  %v1090_v27 = vld [vmem:[%s8809_s5 + $0x6c0] sm:$0xff] }
  0x54   :  { %3955 = vmatpush1.bf16.msra.mxu0 %v5611_v11  ;;  %v5827_v11 = vcombine.low %v1114_v61, %v1118_v62  ;;  %v954_v43 = vld [vmem:[%s8809_s5 + $0x280] sm:$0xff]  ;;  %v757_v62 = vunpack.c.h.bf16 %v6807_v8  ;;  %v821_v8 = vrot.slane %v6939_v24, %v7031_v31 }
  0x55   :  { %3996 = vmatpush1.bf16.msra.mxu1 %v5739_v12  ;;  %3956 = vmatprep.subr.bf16.mxu0 %v5604_v13  ;;  %v5692_v12 = vcombine.high %v978_v4, %v982_v5  ;;  %v5820_v13 = vcombine.high %v1106_v6, %v1110_v9  ;;  %v958_v44 = vld [vmem:[%s8809_s5 + $0x2a0] sm:$0xff] }
  0x56   :  { %3997 = vmatprep.subr.bf16.mxu1 %v5732_v14  ;;  %v970_v14 = vld [vmem:[%s8809_s5 + $0x300] sm:$0xff]  ;;  %v5667_v4 = vcombine.low %v954_v43, %v958_v44 }
  0x57   :  { %v5684_v21 = vcombine.high %v970_v14, %v974_v15  ;;  %v5683_v35 = vcombine.low %v970_v14, %v974_v15  ;;  %v1086_v47 = vld [vmem:[%s8809_s5 + $0x6a0] sm:$0xff] }
  0x58   :  { %3957 = vmatpush1.bf16.msra.mxu0 %v5603_v22  ;;  %v5812_v22 = vcombine.high %v1098_v16, %v1102_v17  ;;  %v950_v33 = vld [vmem:[%s8809_s5 + $0x260] sm:$0xff]  ;;  %v841_v17 = vrot.slane %v6939_v24, %v7058_v48 }
  0x59   :  { %3998 = vmatpush1.bf16.msra.mxu1 %v5731_v23  ;;  %3958 = vmatprep.subr.bf16.mxu0 %v5596_v25  ;;  %v962_v23 = vld [vmem:[%s8809_s5 + $0x2c0] sm:$0xff] }
  0x5a   :  { %3999 = vmatprep.subr.bf16.mxu1 %v5724_v28  ;;  %v966_v25 = vld [vmem:[%s8809_s5 + $0x2e0] sm:$0xff] }
  0x5b   :  { %v1094_v28 = vld [vmem:[%s8809_s5 + $0x6e0] sm:$0xff]  ;;  %v5676_v37 = vcombine.high %v962_v23, %v966_v25  ;;  %v5675_v32 = vcombine.low %v962_v23, %v966_v25 }
  0x5c   :  { %3959 = vmatpush1.bf16.msra.mxu0 %v5595_v40  ;;  %v7034_v40 = vadd.f32 %v829_v29, %v6902_v59  ;;  %v763_v59 = vrot.slane %v6864_v39, %v7018_v26  ;;  %v1070_v14 = vld [vmem:[%s8809_s5 + $0x620] sm:$0xff] }
  0x5d   :  { %4000 = vmatpush1.bf16.msra.mxu1 %v5723_v41  ;;  %3960 = vmatprep.subr.bf16.mxu0 %v5588_v42  ;;  %v7037_v41 = vadd.f32 %v837_v30, %v6904_v63  ;;  %v5804_v42 = vcombine.high %v1090_v27, %v1094_v28  ;;  %v1082_v63 = vld [vmem:[%s8809_s5 + $0x680] sm:$0xff] }
  0x5e   :  { %4001 = vmatprep.subr.bf16.mxu1 %v5716_v45  ;;  %v7046_v45 = vsub.s32 5, %v6838_v20  ;;  %v5796_v58 = vcombine.high %v1082_v63, %v1086_v47  ;;  %v946_v20 = vld [vmem:[%s8809_s5 + $0x240] sm:$0xff]  ;;  %v800_v61 = vmul.f32 %v763_v59, %v750_v46  ;;  %v5795_v5 = vcombine.low %v1082_v63, %v1086_v47 }
  0x5f   :  { %v5660_v6 = vcombine.high %v946_v20, %v950_v33  ;;  %v1186_v25 = vld [vmem:[%s8809_s5 + $0x9c0] sm:$0xff] }
  0x60   :  { %3961 = vmatpush1.bf16.msra.mxu0 %v5587_v52  ;;  %v771_v52 = vrot.slane %v6864_v39, %v7031_v31  ;;  %v783_v60 = vrot.slane %v6864_v39, %v7046_v45  ;;  %v1318_v30 = vld [vmem:[%s8809_s5 + $0xde0] sm:$0xff] }
  0x61   :  { %4002 = vmatpush1.bf16.msra.mxu1 %v5715_v53  ;;  %3962 = vmatprep.subr.bf16.mxu0 %v5708_v54  ;;  %v5803_v53 = vcombine.low %v1090_v27, %v1094_v28  ;;  %v5668_v54 = vcombine.high %v954_v43, %v958_v44  ;;  %v1190_v27 = vld [vmem:[%s8809_s5 + $0x9e0] sm:$0xff] }
  0x62   :  { %4003 = vmatprep.subr.bf16.mxu1 %v5836_v57  ;;  %v755_v57 = vunpack.c.h.bf16 %v6802_v7  ;;  %v1074_v7 = vld [vmem:[%s8809_s5 + $0x640] sm:$0xff]  ;;  %v5900_v43 = vcombine.high %v1186_v25, %v1190_v27 }
  0x63   :  { %v1178_v46 = vld [vmem:[%s8809_s5 + $0x980] sm:$0xff] }
  0x64   :  { %3963 = vmatpush2.bf16.msra.mxu0 %v5707_v0  ;;  %v1078_v0 = vld [vmem:[%s8809_s5 + $0x660] sm:$0xff] }
  0x65   :  { %4004 = vmatpush2.bf16.msra.mxu1 %v5835_v1  ;;  %3964 = vmatprep.subr.bf16.mxu0 %v5700_v2  ;;  %v813_v1 = vrot.slane %v6939_v24, %v7018_v26  ;;  %v791_v2 = vrot.slane %v6864_v39, %v7058_v48  ;;  %v5788_v9 = vcombine.high %v1074_v7, %v1078_v0  ;;  %v942_v39 = vld [vmem:[%s8809_s5 + $0x220] sm:$0xff] }
  0x66   :  { %4005 = vmatprep.subr.bf16.mxu1 %v5828_v3  ;;  %v802_v3 = vmul.f32 %v771_v52, %v752_v49  ;;  %v1182_v59 = vld [vmem:[%s8809_s5 + $0x9a0] sm:$0xff] }
  0x67   :  { %v850_v15 = vadd.f32 %v813_v1, %v800_v61  ;;  %v807_v16 = vmul.f32 %v791_v2, %v757_v62  ;;  %v1306_v49 = vld [vmem:[%s8809_s5 + $0xd80] sm:$0xff]  ;;  %v5891_v1 = vcombine.low %v1178_v46, %v1182_v59 }
  0x68   :  { %3965 = vmatpush2.bf16.msra.mxu0 %v5699_v10  ;;  %v938_v10 = vld [vmem:[%s8809_s5 + $0x200] sm:$0xff] }
  0x69   :  { %4006 = vmatpush2.bf16.msra.mxu1 %v5827_v11  ;;  %3966 = vmatprep.subr.bf16.mxu0 %v5692_v12  ;;  %v805_v11 = vmul.f32 %v783_v60, %v755_v57  ;;  %v833_v12 = vrot.slane %v6939_v24, %v7046_v45  ;;  %v858_v29 = vmax.f32 %v850_v15, 0.0  ;;  %v1314_v24 = vld [vmem:[%s8809_s5 + $0xdc0] sm:$0xff] }
  0x6a   :  { %4007 = vmatprep.subr.bf16.mxu1 %v5820_v13  ;;  %v1066_v13 = vld [vmem:[%s8809_s5 + $0x600] sm:$0xff]  ;;  %v6028_v44 = vcombine.high %v1314_v24, %v1318_v30  ;;  %v6027_v57 = vcombine.low %v1314_v24, %v1318_v30 }
  0x6b   :  { %v5780_v23 = vcombine.high %v1066_v13, %v1070_v14  ;;  %v855_v28 = vadd.f32 %v833_v12, %v805_v11  ;;  %v7119_v47 = vpack.c.bf16 %v858_v29, %v858_v29  ;;  %v1310_v52 = vld [vmem:[%s8809_s5 + $0xda0] sm:$0xff] }
  0x6c   :  { %3967 = vmatpush2.bf16.msra.mxu0 %v5691_v18  ;;  %v5659_v18 = vcombine.low %v946_v20, %v950_v33  ;;  %v6020_v20 = vcombine.high %v1306_v49, %v1310_v52  ;;  %v1170_v33 = vld [vmem:[%s8809_s5 + $0x940] sm:$0xff]  ;;  %v6019_v2 = vcombine.low %v1306_v49, %v1310_v52 }
  0x6d   :  { %4008 = vmatpush2.bf16.msra.mxu1 %v5819_v19  ;;  %3968 = vmatprep.subr.bf16.mxu0 %v5684_v21  ;;  %v852_v19 = vadd.f32 %v821_v8, %v802_v3  ;;  %v5787_v21 = vcombine.low %v1074_v7, %v1078_v0  ;;  %v863_v63 = vmax.f32 %v855_v28, 0.0  ;;  %v1174_v60 = vld [vmem:[%s8809_s5 + $0x960] sm:$0xff] }
  0x6e   :  { %4009 = vmatprep.subr.bf16.mxu1 %v5812_v22  ;;  %v5652_v22 = vcombine.high %v938_v10, %v942_v39  ;;  %v1298_v62 = vld [vmem:[%s8809_s5 + $0xd40] sm:$0xff]  ;;  %v5884_v3 = vcombine.high %v1170_v33, %v1174_v60 }
  0x6f   :  { %v7135_v61 = vpack.c.bf16 %v863_v63, %v863_v63  ;;  %v1302_v7 = vld [vmem:[%s8809_s5 + $0xd60] sm:$0xff] }
  0x70   :  { %3969 = vmatpush2.bf16.msra.mxu0 %v5683_v35  ;;  %v857_v35 = vadd.f32 %v841_v17, %v807_v16  ;;  %v1162_v8 = vld [vmem:[%s8809_s5 + $0x900] sm:$0xff] }
  0x71   :  { %4010 = vmatpush2.bf16.msra.mxu1 %v5811_v36  ;;  %3970 = vmatprep.subr.bf16.mxu0 %v5676_v37  ;;  %v5651_v36 = vcombine.low %v938_v10, %v942_v39  ;;  %v860_v37 = vmax.f32 %v852_v19, 0.0  ;;  %v5883_v10 = vcombine.low %v1170_v33, %v1174_v60  ;;  %v6011_v39 = vcombine.low %v1298_v62, %v1302_v7  ;;  %v1282_v15 = vld [vmem:[%s8809_s5 + $0xcc0] sm:$0xff] }
  0x72   :  { %4011 = vmatprep.subr.bf16.mxu1 %v5804_v42  ;;  %v5779_v42 = vcombine.low %v1066_v13, %v1070_v14  ;;  %v1154_v13 = vld [vmem:[%s8809_s5 + $0x8c0] sm:$0xff] }
  0x73   :  { %v1158_v14 = vld [vmem:[%s8809_s5 + $0x8e0] sm:$0xff] }
  0x74   :  { %3971 = vmatpush2.bf16.msra.mxu0 %v5675_v32  ;;  %v865_v32 = vmax.f32 %v857_v35, 0.0  ;;  %v1286_v16 = vld [vmem:[%s8809_s5 + $0xce0] sm:$0xff]  ;;  %v5868_v19 = vcombine.high %v1154_v13, %v1158_v14  ;;  %v5867_v28 = vcombine.low %v1154_v13, %v1158_v14 }
  0x75   :  { %4012 = vmatpush2.bf16.msra.mxu1 %v5803_v53  ;;  %3972 = vmatprep.subr.bf16.mxu0 %v5668_v54  ;;  %v7127_v53 = vpack.c.bf16 %v860_v37, %v860_v37  ;;  %v5899_v54 = vcombine.low %v1186_v25, %v1190_v27  ;;  %v1274_v25 = vld [vmem:[%s8809_s5 + $0xc80] sm:$0xff]  ;;  %v5995_v29 = vcombine.low %v1282_v15, %v1286_v16 }
  0x76   :  { %4013 = vmatprep.subr.bf16.mxu1 %v5796_v58  ;;  %v5892_v58 = vcombine.high %v1178_v46, %v1182_v59  ;;  %v7144_v0 = vpack.c.bf16 %v865_v32, %v865_v32  ;;  %v1278_v27 = vld [vmem:[%s8809_s5 + $0xca0] sm:$0xff] }
  0x77   :  { %v5988_v30 = vcombine.high %v1274_v25, %v1278_v27  ;;  %v1138_v35 = vld [vmem:[%s8809_s5 + $0x840] sm:$0xff] }
  0x78   :  { %3973 = vmatpush2.bf16.msra.mxu0 %v5667_v4  ;;  %v6012_v4 = vcombine.high %v1298_v62, %v1302_v7  ;;  %v1266_v37 = vld [vmem:[%s8809_s5 + $0xc40] sm:$0xff] }
  0x79   :  { %4014 = vmatpush2.bf16.msra.mxu1 %v5795_v5  ;;  %3974 = vmatprep.subr.bf16.mxu0 %v5660_v6  ;;  %v1166_v5 = vld [vmem:[%s8809_s5 + $0x920] sm:$0xff] }
  0x7a   :  { %4015 = vmatprep.subr.bf16.mxu1 %v5788_v9  ;;  %v1290_v6 = vld [vmem:[%s8809_s5 + $0xd00] sm:$0xff]  ;;  %v5876_v11 = vcombine.high %v1162_v8, %v1166_v5  ;;  %v5875_v17 = vcombine.low %v1162_v8, %v1166_v5 }
  0x7b   :  { %v1294_v9 = vld [vmem:[%s8809_s5 + $0xd20] sm:$0xff] }
  0x7c   :  { %3975 = vmatpush2.bf16.msra.mxu0 %v5659_v18  ;;  %v6004_v12 = vcombine.high %v1290_v6, %v1294_v9  ;;  %v6003_v18 = vcombine.low %v1290_v6, %v1294_v9  ;;  %v1130_v63 = vld [vmem:[%s8809_s5 + $0x800] sm:$0xff] }
  0x7d   :  { %4016 = vmatpush2.bf16.msra.mxu1 %v5787_v21  ;;  %3976 = vmatprep.subr.bf16.mxu0 %v5652_v22  ;;  %v5996_v21 = vcombine.high %v1282_v15, %v1286_v16  ;;  %v1146_v22 = vld [vmem:[%s8809_s5 + $0x880] sm:$0xff] }
  0x7e   :  { %4017 = vmatprep.subr.bf16.mxu1 %v5780_v23  ;;  %v1150_v23 = vld [vmem:[%s8809_s5 + $0x8a0] sm:$0xff] }
  0x7f   :  { %v5860_v24 = vcombine.high %v1146_v22, %v1150_v23  ;;  %v1134_v49 = vld [vmem:[%s8809_s5 + $0x820] sm:$0xff] }
  0x80   :  { %3977 = vmatpush2.bf16.msra.mxu0 %v5651_v36  ;;  %v1142_v36 = vld [vmem:[%s8809_s5 + $0x860] sm:$0xff] }
  0x81   :  { %4018 = vmatpush2.bf16.msra.mxu1 %v5779_v42  ;;  %4028 = vmatprep.subr.bf16.mxu0 %v5900_v43  ;;  %v1270_v42 = vld [vmem:[%s8809_s5 + $0xc60] sm:$0xff]  ;;  %v5859_v43 = vcombine.low %v1146_v22, %v1150_v23  ;;  %v5852_v46 = vcombine.high %v1138_v35, %v1142_v36 }
  0x82   :  { %4069 = vmatprep.subr.bf16.mxu1 %v6028_v44  ;;  %v5987_v44 = vcombine.low %v1274_v25, %v1278_v27  ;;  %v5980_v59 = vcombine.high %v1266_v37, %v1270_v42  ;;  %v1258_v52 = vld [vmem:[%s8809_s5 + $0xc00] sm:$0xff] }
  0x83   :  { %3979 = vmatmul.mubr.bf16.vlgmr.msra.gmra.mxu0 %v7119_v47  ;;  %v1262_v32 = vld [vmem:[%s8809_s5 + $0xc20] sm:$0xff] }
  0x84   :  { %4020 = vmatmul.mubr.bf16.vlgmr.msra.gmra.mxu1 %v7127_v53  ;;  %4029 = vmatpush1.bf16.msra.mxu0 %v5899_v54  ;;  %v5851_v54 = vcombine.low %v1138_v35, %v1142_v36  ;;  %v1250_v33 = vld [vmem:[%s8809_s5 + $0xbc0] sm:$0xff] }
  0x85   :  { %4070 = vmatpush1.bf16.msra.mxu1 %v6027_v57  ;;  %4030 = vmatprep.subr.bf16.mxu0 %v5892_v58  ;;  %v5979_v57 = vcombine.low %v1266_v37, %v1270_v42  ;;  %v5844_v58 = vcombine.high %v1130_v63, %v1134_v49  ;;  %v1254_v60 = vld [vmem:[%s8809_s5 + $0xbe0] sm:$0xff] }
  0x86   :  { %4071 = vmatprep.subr.bf16.mxu1 %v6020_v20  ;;  %4060 = vmatprep.mubr.bf16.mxu0 %v7135_v61  ;;  %v5972_v20 = vcombine.high %v1258_v52, %v1262_v32  ;;  %v1378_v62 = vld [vmem:[%s8809_s5 + $0xfc0] sm:$0xff] }
  0x87   :  { %4101 = vmatprep.mubr.bf16.mxu1 %v7144_v0  ;;  %v1382_v7 = vld [vmem:[%s8809_s5 + $0xfe0] sm:$0xff] }
  0x88   :  { %4031 = vmatpush1.bf16.msra.mxu0 %v5891_v1  ;;  %v5843_v1 = vcombine.low %v1130_v63, %v1134_v49  ;;  %v1242_v8 = vld [vmem:[%s8809_s5 + $0xb80] sm:$0xff] }
  0x89   :  { %4072 = vmatpush1.bf16.msra.mxu1 %v6019_v2  ;;  %4032 = vmatprep.subr.bf16.mxu0 %v5884_v3  ;;  %v5971_v2 = vcombine.low %v1258_v52, %v1262_v32  ;;  %v5964_v3 = vcombine.high %v1250_v33, %v1254_v60  ;;  %v1246_v5 = vld [vmem:[%s8809_s5 + $0xba0] sm:$0xff] }
  0x8a   :  { %4073 = vmatprep.subr.bf16.mxu1 %v6012_v4  ;;  %v6092_v4 = vcombine.high %v1378_v62, %v1382_v7  ;;  %v1370_v6 = vld [vmem:[%s8809_s5 + $0xf80] sm:$0xff] }
  0x8b   :  { %v1374_v9 = vld [vmem:[%s8809_s5 + $0xfa0] sm:$0xff] }
  0x8c   :  { %4033 = vmatpush1.bf16.msra.mxu0 %v5883_v10  ;;  %v5963_v10 = vcombine.low %v1250_v33, %v1254_v60  ;;  %v1234_v13 = vld [vmem:[%s8809_s5 + $0xb40] sm:$0xff] }
  0x8d   :  { %4074 = vmatpush1.bf16.msra.mxu1 %v6011_v39  ;;  %4034 = vmatprep.subr.bf16.mxu0 %v5876_v11  ;;  %v6091_v39 = vcombine.low %v1378_v62, %v1382_v7  ;;  %v5956_v11 = vcombine.high %v1242_v8, %v1246_v5  ;;  %v1238_v14 = vld [vmem:[%s8809_s5 + $0xb60] sm:$0xff] }
  0x8e   :  { %4075 = vmatprep.subr.bf16.mxu1 %v6004_v12  ;;  %v6084_v12 = vcombine.high %v1370_v6, %v1374_v9  ;;  %v1362_v15 = vld [vmem:[%s8809_s5 + $0xf40] sm:$0xff] }
  0x8f   :  { %v1366_v16 = vld [vmem:[%s8809_s5 + $0xf60] sm:$0xff] }
  0x90   :  { %4035 = vmatpush1.bf16.msra.mxu0 %v5875_v17  ;;  %v5955_v17 = vcombine.low %v1242_v8, %v1246_v5  ;;  %v1226_v22 = vld [vmem:[%s8809_s5 + $0xb00] sm:$0xff] }
  0x91   :  { %4076 = vmatpush1.bf16.msra.mxu1 %v6003_v18  ;;  %4036 = vmatprep.subr.bf16.mxu0 %v5868_v19  ;;  %v6083_v18 = vcombine.low %v1370_v6, %v1374_v9  ;;  %v5948_v19 = vcombine.high %v1234_v13, %v1238_v14  ;;  %v1230_v23 = vld [vmem:[%s8809_s5 + $0xb20] sm:$0xff] }
  0x92   :  { %4077 = vmatprep.subr.bf16.mxu1 %v5996_v21  ;;  %v6076_v21 = vcombine.high %v1362_v15, %v1366_v16  ;;  %v1354_v25 = vld [vmem:[%s8809_s5 + $0xf00] sm:$0xff] }
  0x93   :  { %v1358_v27 = vld [vmem:[%s8809_s5 + $0xf20] sm:$0xff] }
  0x94   :  { %4037 = vmatpush1.bf16.msra.mxu0 %v5867_v28  ;;  %v5947_v28 = vcombine.low %v1234_v13, %v1238_v14  ;;  %v1218_v35 = vld [vmem:[%s8809_s5 + $0xac0] sm:$0xff]  ;;  %v931_v13 = vld [vmem:[%s8809_s5 + $0x1c8] sm:$0xff] }
  0x95   :  { %4078 = vmatpush1.bf16.msra.mxu1 %v5995_v29  ;;  %4038 = vmatprep.subr.bf16.mxu0 %v5860_v24  ;;  %v6075_v29 = vcombine.low %v1362_v15, %v1366_v16  ;;  %v5940_v24 = vcombine.high %v1226_v22, %v1230_v23  ;;  %v1222_v36 = vld [vmem:[%s8809_s5 + $0xae0] sm:$0xff]  ;;  %v935_v14 = vld [vmem:[%s8809_s5 + $0x1e8] sm:$0xff]  ;;  %v862_v15 = vmax.f32 %v7034_v40, 0.0 }
  0x96   :  { %4079 = vmatprep.subr.bf16.mxu1 %v5988_v30  ;;  %v6068_v30 = vcombine.high %v1354_v25, %v1358_v27  ;;  %v1346_v37 = vld [vmem:[%s8809_s5 + $0xec0] sm:$0xff]  ;;  %v1059_v16 = vld [vmem:[%s8809_s5 + $0x5c8] sm:$0xff] }
  0x97   :  { %v1350_v42 = vld [vmem:[%s8809_s5 + $0xee0] sm:$0xff]  ;;  %v923_v40 = vld [vmem:[%s8809_s5 + $0x188] sm:$0xff] }
  0x98   :  { %4039 = vmatpush1.bf16.msra.mxu0 %v5859_v43  ;;  %v5939_v43 = vcombine.low %v1226_v22, %v1230_v23  ;;  %v1210_v63 = vld [vmem:[%s8809_s5 + $0xa80] sm:$0xff]  ;;  %v5646_v22 = vcombine.high %v931_v13, %v935_v14 }
  0x99   :  { %4080 = vmatpush1.bf16.msra.mxu1 %v5987_v44  ;;  %4040 = vmatprep.subr.bf16.mxu0 %v5852_v46  ;;  %v6067_v44 = vcombine.low %v1354_v25, %v1358_v27  ;;  %v5932_v46 = vcombine.high %v1218_v35, %v1222_v36  ;;  %v1214_v49 = vld [vmem:[%s8809_s5 + $0xaa0] sm:$0xff]  ;;  %v927_v25 = vld [vmem:[%s8809_s5 + $0x1a8] sm:$0xff]  ;;  %v7325_v27 = vpack.c.bf16 %v862_v15, %v862_v15 }
  0x9a   :  { %4081 = vmatprep.subr.bf16.mxu1 %v5980_v59  ;;  %v6060_v59 = vcombine.high %v1346_v37, %v1350_v42  ;;  %v1338_v52 = vld [vmem:[%s8809_s5 + $0xe80] sm:$0xff]  ;;  %v883_v15 = vld [vmem:[%s8809_s5 + $0x48] sm:$0xff] }
  0x9b   :  { %v1342_v32 = vld [vmem:[%s8809_s5 + $0xea0] sm:$0xff] }
  0x9c   :  { %4041 = vmatpush1.bf16.msra.mxu0 %v5851_v54  ;;  %v5931_v54 = vcombine.low %v1218_v35, %v1222_v36  ;;  %v1202_v33 = vld [vmem:[%s8809_s5 + $0xa40] sm:$0xff]  ;;  %v5638_v35 = vcombine.high %v923_v40, %v927_v25 }
  0x9d   :  { %4082 = vmatpush1.bf16.msra.mxu1 %v5979_v57  ;;  %4042 = vmatprep.subr.bf16.mxu0 %v5844_v58  ;;  %v6059_v57 = vcombine.low %v1346_v37, %v1350_v42  ;;  %v5924_v58 = vcombine.high %v1210_v63, %v1214_v49  ;;  %v1206_v60 = vld [vmem:[%s8809_s5 + $0xa60] sm:$0xff]  ;;  %v915_v37 = vld [vmem:[%s8809_s5 + $0x148] sm:$0xff] }
  0x9e   :  { %4083 = vmatprep.subr.bf16.mxu1 %v5972_v20  ;;  %v6052_v20 = vcombine.high %v1338_v52, %v1342_v32  ;;  %v1330_v62 = vld [vmem:[%s8809_s5 + $0xe40] sm:$0xff]  ;;  %v919_v42 = vld [vmem:[%s8809_s5 + $0x168] sm:$0xff] }
  0x9f   :  { %v1334_v7 = vld [vmem:[%s8809_s5 + $0xe60] sm:$0xff] }
  0xa0   :  { %4043 = vmatpush1.bf16.msra.mxu0 %v5843_v1  ;;  %v5923_v1 = vcombine.low %v1210_v63, %v1214_v49  ;;  %v1194_v8 = vld [vmem:[%s8809_s5 + $0xa00] sm:$0xff]  ;;  %v5630_v63 = vcombine.high %v915_v37, %v919_v42 }
  0xa1   :  { %4084 = vmatpush1.bf16.msra.mxu1 %v5971_v2  ;;  %4044 = vmatprep.subr.bf16.mxu0 %v5964_v3  ;;  %v6051_v2 = vcombine.low %v1338_v52, %v1342_v32  ;;  %v5916_v3 = vcombine.high %v1202_v33, %v1206_v60  ;;  %v1198_v5 = vld [vmem:[%s8809_s5 + $0xa20] sm:$0xff]  ;;  %v907_v52 = vld [vmem:[%s8809_s5 + $0x108] sm:$0xff] }
  0xa2   :  { %4085 = vmatprep.subr.bf16.mxu1 %v6092_v4  ;;  %v6044_v4 = vcombine.high %v1330_v62, %v1334_v7  ;;  %v1322_v6 = vld [vmem:[%s8809_s5 + $0xe00] sm:$0xff]  ;;  %v911_v32 = vld [vmem:[%s8809_s5 + $0x128] sm:$0xff] }
  0xa3   :  { %v1326_v9 = vld [vmem:[%s8809_s5 + $0xe20] sm:$0xff] }
  0xa4   :  { %4045 = vmatpush2.bf16.msra.mxu0 %v5963_v10  ;;  %v5915_v10 = vcombine.low %v1202_v33, %v1206_v60  ;;  %v5622_v33 = vcombine.high %v907_v52, %v911_v32 }
  0xa5   :  { %4086 = vmatpush2.bf16.msra.mxu1 %v6091_v39  ;;  %4046 = vmatprep.subr.bf16.mxu0 %v5956_v11  ;;  %v6043_v39 = vcombine.low %v1330_v62, %v1334_v7  ;;  %v5908_v11 = vcombine.high %v1194_v8, %v1198_v5  ;;  %v899_v62 = vld [vmem:[%s8809_s5 + $0xc8] sm:$0xff] }
  0xa6   :  { %4087 = vmatprep.subr.bf16.mxu1 %v6084_v12  ;;  %v6036_v12 = vcombine.high %v1322_v6, %v1326_v9  ;;  %v903_v7 = vld [vmem:[%s8809_s5 + $0xe8] sm:$0xff] }
  0xa8   :  { %4047 = vmatpush2.bf16.msra.mxu0 %v5955_v17  ;;  %v1063_v17 = vld [vmem:[%s8809_s5 + $0x5e8] sm:$0xff] }
  0xa9   :  { %4088 = vmatpush2.bf16.msra.mxu1 %v6083_v18  ;;  %4048 = vmatprep.subr.bf16.mxu0 %v5948_v19  ;;  %v5907_v18 = vcombine.low %v1194_v8, %v1198_v5  ;;  %v864_v19 = vmax.f32 %v7037_v41, 0.0  ;;  %v5774_v23 = vcombine.high %v1059_v16, %v1063_v17  ;;  %v1051_v41 = vld [vmem:[%s8809_s5 + $0x588] sm:$0xff]  ;;  %v5614_v8 = vcombine.high %v899_v62, %v903_v7 }
  0xaa   :  { %4089 = vmatprep.subr.bf16.mxu1 %v6076_v21  ;;  %v6035_v21 = vcombine.low %v1322_v6, %v1326_v9  ;;  %v891_v6 = vld [vmem:[%s8809_s5 + $0x88] sm:$0xff] }
  0xab   :  { %v895_v9 = vld [vmem:[%s8809_s5 + $0xa8] sm:$0xff] }
  0xac   :  { %4049 = vmatpush2.bf16.msra.mxu0 %v5947_v28  ;;  %v1055_v28 = vld [vmem:[%s8809_s5 + $0x5a8] sm:$0xff] }
  0xad   :  { %4090 = vmatpush2.bf16.msra.mxu1 %v6075_v29  ;;  %4050 = vmatprep.subr.bf16.mxu0 %v5940_v24  ;;  %v7333_v29 = vpack.c.bf16 %v864_v19, %v864_v19  ;;  %v5645_v24 = vcombine.low %v931_v13, %v935_v14  ;;  %v5766_v36 = vcombine.high %v1051_v41, %v1055_v28 }
  0xae   :  { %4091 = vmatprep.subr.bf16.mxu1 %v6068_v30  ;;  %v5773_v30 = vcombine.low %v1059_v16, %v1063_v17  ;;  %v5606_v13 = vcombine.high %v891_v6, %v895_v9  ;;  %v887_v16 = vld [vmem:[%s8809_s5 + $0x68] sm:$0xff]  ;;  %v5605_v19 = vcombine.low %v891_v6, %v895_v9 }
  0xaf   :  { %v1011_v17 = vld [vmem:[%s8809_s5 + $0x448] sm:$0xff] }
  0xb0   :  { %4051 = vmatpush2.bf16.msra.mxu0 %v5939_v43  ;;  %v1043_v43 = vld [vmem:[%s8809_s5 + $0x548] sm:$0xff] }
  0xb1   :  { %4092 = vmatpush2.bf16.msra.mxu1 %v6067_v44  ;;  %4052 = vmatprep.subr.bf16.mxu0 %v5932_v46  ;;  %v1047_v44 = vld [vmem:[%s8809_s5 + $0x568] sm:$0xff]  ;;  %v5637_v46 = vcombine.low %v923_v40, %v927_v25 }
  0xb2   :  { %4093 = vmatprep.subr.bf16.mxu1 %v6060_v59  ;;  %v5765_v59 = vcombine.low %v1051_v41, %v1055_v28  ;;  %v5758_v49 = vcombine.high %v1043_v43, %v1047_v44  ;;  %v875_v40 = vld [vmem:[%s8809_s5 + $0x8] sm:$0xff] }
  0xb3   :  { %v879_v25 = vld [vmem:[%s8809_s5 + $0x28] sm:$0xff] }
  0xb4   :  { %4053 = vmatpush2.bf16.msra.mxu0 %v5931_v54  ;;  %v1035_v54 = vld [vmem:[%s8809_s5 + $0x508] sm:$0xff] }
  0xb5   :  { %4094 = vmatpush2.bf16.msra.mxu1 %v6059_v57  ;;  %4054 = vmatprep.subr.bf16.mxu0 %v5924_v58  ;;  %v1039_v57 = vld [vmem:[%s8809_s5 + $0x528] sm:$0xff]  ;;  %v5629_v58 = vcombine.low %v915_v37, %v919_v42 }
  0xb6   :  { %4095 = vmatprep.subr.bf16.mxu1 %v6052_v20  ;;  %v5757_v20 = vcombine.low %v1043_v43, %v1047_v44  ;;  %v5750_v60 = vcombine.high %v1035_v54, %v1039_v57  ;;  %v1003_v41 = vld [vmem:[%s8809_s5 + $0x408] sm:$0xff] }
  0xb7   :  { %v1007_v28 = vld [vmem:[%s8809_s5 + $0x428] sm:$0xff] }
  0xb8   :  { %4055 = vmatpush2.bf16.msra.mxu0 %v5923_v1  ;;  %v1027_v1 = vld [vmem:[%s8809_s5 + $0x4c8] sm:$0xff] }
  0xb9   :  { %4096 = vmatpush2.bf16.msra.mxu1 %v6051_v2  ;;  %4056 = vmatprep.subr.bf16.mxu0 %v5916_v3  ;;  %v1031_v2 = vld [vmem:[%s8809_s5 + $0x4e8] sm:$0xff]  ;;  %v5621_v3 = vcombine.low %v907_v52, %v911_v32 }
  0xba   :  { %4097 = vmatprep.subr.bf16.mxu1 %v6044_v4  ;;  %v5749_v4 = vcombine.low %v1035_v54, %v1039_v57  ;;  %v5742_v5 = vcombine.high %v1027_v1, %v1031_v2  ;;  %v995_v37 = vld [vmem:[%s8809_s5 + $0x3c8] sm:$0xff] }
  0xbb   :  { %v999_v42 = vld [vmem:[%s8809_s5 + $0x3e8] sm:$0xff] }
  0xbc   :  { %4057 = vmatpush2.bf16.msra.mxu0 %v5915_v10  ;;  %v1019_v10 = vld [vmem:[%s8809_s5 + $0x488] sm:$0xff] }
  0xbd   :  { %4098 = vmatpush2.bf16.msra.mxu1 %v6043_v39  ;;  %4058 = vmatprep.subr.bf16.mxu0 %v5908_v11  ;;  %v1023_v39 = vld [vmem:[%s8809_s5 + $0x4a8] sm:$0xff]  ;;  %v5613_v11 = vcombine.low %v899_v62, %v903_v7 }
  0xbe   :  { %4099 = vmatprep.subr.bf16.mxu1 %v6036_v12  ;;  %v5741_v12 = vcombine.low %v1027_v1, %v1031_v2  ;;  %v5734_v14 = vcombine.high %v1019_v10, %v1023_v39  ;;  %v1123_v43 = vld [vmem:[%s8809_s5 + $0x7c8] sm:$0xff] }
  0xbf   :  { %v1127_v44 = vld [vmem:[%s8809_s5 + $0x7e8] sm:$0xff] }
  0xc0   :  { %4059 = vmatpush2.bf16.msra.mxu0 %v5907_v18  ;;  %v1015_v18 = vld [vmem:[%s8809_s5 + $0x468] sm:$0xff] }
  0xc1   :  { %4100 = vmatpush2.bf16.msra.mxu1 %v6035_v21  ;;  %4110 = vmatprep.subr.bf16.mxu0 %v5646_v22  ;;  %v5733_v21 = vcombine.low %v1019_v10, %v1023_v39  ;;  %v5598_v22 = vcombine.high %v883_v15, %v887_v16  ;;  %v987_v52 = vld [vmem:[%s8809_s5 + $0x388] sm:$0xff] }
  0xc2   :  { %4151 = vmatprep.subr.bf16.mxu1 %v5774_v23  ;;  %v5726_v23 = vcombine.high %v1011_v17, %v1015_v18  ;;  %v991_v32 = vld [vmem:[%s8809_s5 + $0x3a8] sm:$0xff] }
  0xc3   :  { %4061 = vmatmul.mubr.bf16.vlgmr.msra.gmra.mxu0 %v7325_v27  ;;  %v1115_v54 = vld [vmem:[%s8809_s5 + $0x788] sm:$0xff]  ;;  %v5701_v6 = vcombine.low %v987_v52, %v991_v32 }
  0xc4   :  { %4102 = vmatmul.mubr.bf16.vlgmr.msra.gmra.mxu1 %v7333_v29  ;;  %4111 = vmatpush1.bf16.msra.mxu0 %v5645_v24  ;;  %v5597_v24 = vcombine.low %v883_v15, %v887_v16  ;;  %v1119_v57 = vld [vmem:[%s8809_s5 + $0x7a8] sm:$0xff] }
  0xc5   :  { %4152 = vmatpush1.bf16.msra.mxu1 %v5773_v30  ;;  %4112 = vmatprep.subr.bf16.mxu0 %v5638_v35  ;;  %v5725_v30 = vcombine.low %v1011_v17, %v1015_v18  ;;  %v5590_v35 = vcombine.high %v875_v40, %v879_v25  ;;  %v5830_v62 = vcombine.high %v1115_v54, %v1119_v57  ;;  %v979_v7 = vld [vmem:[%s8809_s5 + $0x348] sm:$0xff] }
  0xc6   :  { %4153 = vmatprep.subr.bf16.mxu1 %v5766_v36  ;;  %4142 = vmatprep.mubr.bf16.mxu0 %v6969_v50  ;;  %v5718_v36 = vcombine.high %v1003_v41, %v1007_v28  ;;  %v983_v1 = vld [vmem:[%s8809_s5 + $0x368] sm:$0xff]  ;;  %v5829_v39 = vcombine.low %v1115_v54, %v1119_v57 }
  0xc7   :  { %4183 = vmatprep.mubr.bf16.mxu1 %v6971_v51  ;;  %v971_v15 = vld [vmem:[%s8809_s5 + $0x308] sm:$0xff] }
  0xc8   :  { %4113 = vmatpush1.bf16.msra.mxu0 %v5637_v46  ;;  %v5589_v46 = vcombine.low %v875_v40, %v879_v25  ;;  %v975_v16 = vld [vmem:[%s8809_s5 + $0x328] sm:$0xff] }
  0xc9   :  { %4154 = vmatpush1.bf16.msra.mxu1 %v5765_v59  ;;  %4114 = vmatprep.subr.bf16.mxu0 %v5630_v63  ;;  %v5717_v59 = vcombine.low %v1003_v41, %v1007_v28  ;;  %v5710_v63 = vcombine.high %v995_v37, %v999_v42  ;;  %v5686_v28 = vcombine.high %v971_v15, %v975_v16 }
  0xca   :  { %4155 = vmatprep.subr.bf16.mxu1 %v5758_v49  ;;  %v5838_v49 = vcombine.high %v1123_v43, %v1127_v44 }
  0xcc   :  { %4115 = vmatpush1.bf16.msra.mxu0 %v5629_v58  ;;  %v5709_v58 = vcombine.low %v995_v37, %v999_v42  ;;  %v1095_v37 = vld [vmem:[%s8809_s5 + $0x6e8] sm:$0xff]  ;;  %v5685_v42 = vcombine.low %v971_v15, %v975_v16 }
  0xcd   :  { %4156 = vmatpush1.bf16.msra.mxu1 %v5757_v20  ;;  %4116 = vmatprep.subr.bf16.mxu0 %v5622_v33  ;;  %v5837_v20 = vcombine.low %v1123_v43, %v1127_v44  ;;  %v5702_v33 = vcombine.high %v987_v52, %v991_v32  ;;  %v1087_v52 = vld [vmem:[%s8809_s5 + $0x6a8] sm:$0xff] }
  0xce   :  { %4157 = vmatprep.subr.bf16.mxu1 %v5750_v60  ;;  %v1319_v15 = vld [vmem:[%s8809_s5 + $0xde8] sm:$0xff] }
  0xd0   :  { %4117 = vmatpush1.bf16.msra.mxu0 %v5621_v3  ;;  %v1107_v3 = vld [vmem:[%s8809_s5 + $0x748] sm:$0xff] }
  0xd1   :  { %4158 = vmatpush1.bf16.msra.mxu1 %v5749_v4  ;;  %4118 = vmatprep.subr.bf16.mxu0 %v5614_v8  ;;  %v1111_v4 = vld [vmem:[%s8809_s5 + $0x768] sm:$0xff]  ;;  %v5514_v8 = vld [vmem:[%s8812_s2] ss:$0 sm:$0xff] }
  0xd2   :  { %4159 = vmatprep.subr.bf16.mxu1 %v5742_v5  ;;  %v5821_v41 = vcombine.low %v1107_v3, %v1111_v4 }
  0xd4   :  { %4119 = vmatpush1.bf16.msra.mxu0 %v5613_v11  ;;  %v5694_v11 = vcombine.high %v979_v7, %v983_v1 }
  0xd5   :  { %4160 = vmatpush1.bf16.msra.mxu1 %v5741_v12  ;;  %4120 = vmatprep.subr.bf16.mxu0 %v5606_v13 }
  0xd6   :  { %4161 = vmatprep.subr.bf16.mxu1 %v5734_v14  ;;  %v5822_v14 = vcombine.high %v1107_v3, %v1111_v4  ;;  %v939_v4 = vld [vmem:[%s8809_s5 + $0x208] sm:$0xff] }
  0xd8   :  { %4121 = vmatpush1.bf16.msra.mxu0 %v5605_v19  ;;  %v1099_v19 = vld [vmem:[%s8809_s5 + $0x708] sm:$0xff] }
  0xd9   :  { %4162 = vmatpush1.bf16.msra.mxu1 %v5733_v21  ;;  %4122 = vmatprep.subr.bf16.mxu0 %v5598_v22  ;;  %v1103_v21 = vld [vmem:[%s8809_s5 + $0x728] sm:$0xff] }
  0xda   :  { %4163 = vmatprep.subr.bf16.mxu1 %v5726_v23  ;;  %v5693_v23 = vcombine.low %v979_v7, %v983_v1  ;;  %v5813_v43 = vcombine.low %v1099_v19, %v1103_v21 }
  0xdc   :  { %4123 = vmatpush1.bf16.msra.mxu0 %v5597_v24  ;;  %v5814_v24 = vcombine.high %v1099_v19, %v1103_v21  ;;  %v1179_v21 = vld [vmem:[%s8809_s5 + $0x988] sm:$0xff] }
  0xdd   :  { %4164 = vmatpush1.bf16.msra.mxu1 %v5725_v30  ;;  %4124 = vmatprep.subr.bf16.mxu0 %v5590_v35  ;;  %v963_v30 = vld [vmem:[%s8809_s5 + $0x2c8] sm:$0xff] }
  0xde   :  { %4165 = vmatprep.subr.bf16.mxu1 %v5718_v36  ;;  %v967_v35 = vld [vmem:[%s8809_s5 + $0x2e8] sm:$0xff] }
  0xdf   :  { %v1091_v36 = vld [vmem:[%s8809_s5 + $0x6c8] sm:$0xff]  ;;  %v5678_v44 = vcombine.high %v963_v30, %v967_v35  ;;  %v5677_v32 = vcombine.low %v963_v30, %v967_v35 }
  0xe0   :  { %4125 = vmatpush1.bf16.msra.mxu0 %v5589_v46  ;;  %v5806_v46 = vcombine.high %v1091_v36, %v1095_v37  ;;  %v5805_v54 = vcombine.low %v1091_v36, %v1095_v37  ;;  %v1171_v36 = vld [vmem:[%s8809_s5 + $0x948] sm:$0xff] }
  0xe1   :  { %4166 = vmatpush1.bf16.msra.mxu1 %v5717_v59  ;;  %4126 = vmatprep.subr.bf16.mxu0 %v5710_v63  ;;  %v955_v59 = vld [vmem:[%s8809_s5 + $0x288] sm:$0xff] }
  0xe2   :  { %4167 = vmatprep.subr.bf16.mxu1 %v5838_v49  ;;  %v959_v63 = vld [vmem:[%s8809_s5 + $0x2a8] sm:$0xff] }
  0xe3   :  { %v6188_v60 = vpop.f32.mrf.mxu0  ;;  %v1083_v49 = vld [vmem:[%s8809_s5 + $0x688] sm:$0xff]  ;;  %v5670_v57 = vcombine.high %v955_v59, %v959_v63  ;;  %v5669_v7 = vcombine.low %v955_v59, %v959_v63 }
  0xe4   :  { %v6210_v2 = vpop.f32.mrf.mxu1  ;;  %4127 = vmatpush2.bf16.msra.mxu0 %v5709_v58  ;;  %v5798_v58 = vcombine.high %v1083_v49, %v1087_v52  ;;  %v5797_v1 = vcombine.low %v1083_v49, %v1087_v52  ;;  %v1175_v37 = vld [vmem:[%s8809_s5 + $0x968] sm:$0xff] }
  0xe5   :  { %v6189_v5 = vpop.f32.mrf.mxu0  ;;  %4168 = vmatpush2.bf16.msra.mxu1 %v5837_v20  ;;  %4128 = vmatprep.subr.bf16.mxu0 %v5702_v33  ;;  %v947_v20 = vld [vmem:[%s8809_s5 + $0x248] sm:$0xff] }
  0xe6   :  { %v6190_v9 = vadd.f32 %v6189_v5, %v6188_v60  ;;  %v6211_v10 = vpop.f32.mrf.mxu1  ;;  %4169 = vmatprep.subr.bf16.mxu1 %v5830_v62  ;;  %v951_v33 = vld [vmem:[%s8809_s5 + $0x268] sm:$0xff] }
  0xe7   :  { %v6212_v12 = vadd.f32 %v6211_v10, %v6210_v2  ;;  %v6191_v13 = vpop.f32.mrf.mxu0  ;;  %v1075_v60 = vld [vmem:[%s8809_s5 + $0x648] sm:$0xff]  ;;  %v5662_v2 = vcombine.high %v947_v20, %v951_v33 }
  0xe8   :  { %v625_v17 = vadd.f32 %v6190_v9, %v5514_v8  ;;  %v6213_v18 = vpop.f32.mrf.mxu1  ;;  %4129 = vmatpush2.bf16.msra.mxu0 %v5701_v6  ;;  %v1079_v62 = vld [vmem:[%s8809_s5 + $0x668] sm:$0xff]  ;;  %v5661_v9 = vcombine.low %v947_v20, %v951_v33 }
  0xe9   :  { %v6192_v22 = vpop.f32.mrf.mxu0  ;;  %4170 = vmatpush2.bf16.msra.mxu1 %v5829_v39  ;;  %4130 = vmatprep.subr.bf16.mxu0 %v5694_v11  ;;  %v5790_v3 = vcombine.high %v1075_v60, %v1079_v62  ;;  %v943_v8 = vld [vmem:[%s8809_s5 + $0x228] sm:$0xff]  ;;  %v5789_v10 = vcombine.low %v1075_v60, %v1079_v62 }
  0xea   :  { %v7462_v40 = vadd.f32 %v6212_v12, %v625_v17  ;;  %v6214_v25 = vpop.f32.mrf.mxu1  ;;  %4171 = vmatprep.subr.bf16.mxu1 %v5822_v14  ;;  %v1067_v5 = vld [vmem:[%s8809_s5 + $0x608] sm:$0xff]  ;;  %v5654_v39 = vcombine.high %v939_v4, %v943_v8  ;;  %v5653_v16 = vcombine.low %v939_v4, %v943_v8 }
  0xeb   :  { %v1071_v6 = vld [vmem:[%s8809_s5 + $0x628] sm:$0xff] }
  0xec   :  { %4131 = vmatpush2.bf16.msra.mxu0 %v5693_v23  ;;  %v5782_v11 = vcombine.high %v1067_v5, %v1071_v6  ;;  %v1187_v12 = vld [vmem:[%s8809_s5 + $0x9c8] sm:$0xff]  ;;  %v5781_v17 = vcombine.low %v1067_v5, %v1071_v6 }
  0xed   :  { %4172 = vmatpush2.bf16.msra.mxu1 %v5821_v41  ;;  %4132 = vmatprep.subr.bf16.mxu0 %v5686_v28  ;;  %v1191_v13 = vld [vmem:[%s8809_s5 + $0x9e8] sm:$0xff] }
  0xee   :  { %4173 = vmatprep.subr.bf16.mxu1 %v5814_v24  ;;  %v1315_v14 = vld [vmem:[%s8809_s5 + $0xdc8] sm:$0xff]  ;;  %v5902_v18 = vcombine.high %v1187_v12, %v1191_v13  ;;  %v5901_v41 = vcombine.low %v1187_v12, %v1191_v13 }
  0xef   :  { %v6030_v19 = vcombine.high %v1315_v14, %v1319_v15  ;;  %v1183_v22 = vld [vmem:[%s8809_s5 + $0x9a8] sm:$0xff]  ;;  %v6029_v28 = vcombine.low %v1315_v14, %v1319_v15 }
  0xf0   :  { %4133 = vmatpush2.bf16.msra.mxu0 %v5685_v42  ;;  %v1307_v23 = vld [vmem:[%s8809_s5 + $0xd88] sm:$0xff]  ;;  %v5894_v24 = vcombine.high %v1179_v21, %v1183_v22  ;;  %v5893_v59 = vcombine.low %v1179_v21, %v1183_v22 }
  0xf1   :  { %4174 = vmatpush2.bf16.msra.mxu1 %v5813_v43  ;;  %4134 = vmatprep.subr.bf16.mxu0 %v5678_v44  ;;  %v1311_v25 = vld [vmem:[%s8809_s5 + $0xda8] sm:$0xff] }
  0xf2   :  { %4175 = vmatprep.subr.bf16.mxu1 %v5806_v46  ;;  %v6022_v35 = vcombine.high %v1307_v23, %v1311_v25  ;;  %v1299_v43 = vld [vmem:[%s8809_s5 + $0xd48] sm:$0xff]  ;;  %v6021_v52 = vcombine.low %v1307_v23, %v1311_v25 }
  0xf3   :  { %v1303_v44 = vld [vmem:[%s8809_s5 + $0xd68] sm:$0xff] }
  0xf4   :  { %4135 = vmatpush2.bf16.msra.mxu0 %v5677_v32  ;;  %v5886_v32 = vcombine.high %v1171_v36, %v1175_v37  ;;  %v1163_v20 = vld [vmem:[%s8809_s5 + $0x908] sm:$0xff] }
  0xf5   :  { %4176 = vmatpush2.bf16.msra.mxu1 %v5805_v54  ;;  %4136 = vmatprep.subr.bf16.mxu0 %v5670_v57  ;;  %v1167_v33 = vld [vmem:[%s8809_s5 + $0x928] sm:$0xff] }
  0xf6   :  { %4177 = vmatprep.subr.bf16.mxu1 %v5798_v58  ;;  %v6014_v58 = vcombine.high %v1299_v43, %v1303_v44  ;;  %v5878_v5 = vcombine.high %v1163_v20, %v1167_v33  ;;  %v5877_v12 = vcombine.low %v1163_v20, %v1167_v33  ;;  %v1383_v20 = vld [vmem:[%s8809_s5 + $0xfe8] sm:$0xff] }
  0xf8   :  { %4137 = vmatpush2.bf16.msra.mxu0 %v5669_v7  ;;  %v1291_v7 = vld [vmem:[%s8809_s5 + $0xd08] sm:$0xff] }
  0xf9   :  { %4178 = vmatpush2.bf16.msra.mxu1 %v5797_v1  ;;  %4138 = vmatprep.subr.bf16.mxu0 %v5662_v2  ;;  %v1295_v1 = vld [vmem:[%s8809_s5 + $0xd28] sm:$0xff] }
  0xfa   :  { %4179 = vmatprep.subr.bf16.mxu1 %v5790_v3  ;;  %v5885_v3 = vcombine.low %v1171_v36, %v1175_v37  ;;  %v6006_v6 = vcombine.high %v1291_v7, %v1295_v1  ;;  %v6005_v13 = vcombine.low %v1291_v7, %v1295_v1  ;;  %v1243_v1 = vld [vmem:[%s8809_s5 + $0xb88] sm:$0xff] }
  0xfc   :  { %4139 = vmatpush2.bf16.msra.mxu0 %v5661_v9  ;;  %v1155_v9 = vld [vmem:[%s8809_s5 + $0x8c8] sm:$0xff] }
  0xfd   :  { %4180 = vmatpush2.bf16.msra.mxu1 %v5789_v10  ;;  %4140 = vmatprep.subr.bf16.mxu0 %v5654_v39  ;;  %v1159_v10 = vld [vmem:[%s8809_s5 + $0x8e8] sm:$0xff] }
  0xfe   :  { %4181 = vmatprep.subr.bf16.mxu1 %v5782_v11  ;;  %v1283_v39 = vld [vmem:[%s8809_s5 + $0xcc8] sm:$0xff]  ;;  %v5870_v14 = vcombine.high %v1155_v9, %v1159_v10  ;;  %v5869_v21 = vcombine.low %v1155_v9, %v1159_v10 }
  0xff   :  { %v1287_v11 = vld [vmem:[%s8809_s5 + $0xce8] sm:$0xff] }
 0x100   :  { %4141 = vmatpush2.bf16.msra.mxu0 %v5653_v16  ;;  %v5998_v15 = vcombine.high %v1283_v39, %v1287_v11  ;;  %v1147_v16 = vld [vmem:[%s8809_s5 + $0x888] sm:$0xff]  ;;  %v5997_v22 = vcombine.low %v1283_v39, %v1287_v11 }
 0x101   :  { %4182 = vmatpush2.bf16.msra.mxu1 %v5781_v17  ;;  %4192 = vmatprep.subr.bf16.mxu0 %v5902_v18  ;;  %v1151_v17 = vld [vmem:[%s8809_s5 + $0x8a8] sm:$0xff] }
 0x102   :  { %4233 = vmatprep.subr.bf16.mxu1 %v6030_v19  ;;  %v1275_v18 = vld [vmem:[%s8809_s5 + $0xc88] sm:$0xff]  ;;  %v5862_v23 = vcombine.high %v1147_v16, %v1151_v17 }
 0x103   :  { %v6232_v30 = vpop.f32.mrf.mxu0  ;;  %4143 = vmatmul.mubr.bf16.vlgmr.msra.gmra.mxu0 %v7119_v47  ;;  %v1279_v19 = vld [vmem:[%s8809_s5 + $0xca8] sm:$0xff] }
 0x104   :  { %v6254_v42 = vpop.f32.mrf.mxu1  ;;  %4184 = vmatmul.mubr.bf16.vlgmr.msra.gmra.mxu1 %v7127_v53  ;;  %4193 = vmatpush1.bf16.msra.mxu0 %v5901_v41  ;;  %v5990_v25 = vcombine.high %v1275_v18, %v1279_v19  ;;  %v1139_v41 = vld [vmem:[%s8809_s5 + $0x848] sm:$0xff]  ;;  %v5989_v36 = vcombine.low %v1275_v18, %v1279_v19 }
 0x105   :  { %v6233_v46 = vpop.f32.mrf.mxu0  ;;  %4234 = vmatpush1.bf16.msra.mxu1 %v6029_v28  ;;  %4194 = vmatprep.subr.bf16.mxu0 %v5894_v24  ;;  %v1143_v28 = vld [vmem:[%s8809_s5 + $0x868] sm:$0xff] }
 0x106   :  { %v6234_v63 = vadd.f32 %v6233_v46, %v6232_v30  ;;  %v6255_v49 = vpop.f32.mrf.mxu1  ;;  %4235 = vmatprep.subr.bf16.mxu1 %v6022_v35  ;;  %4224 = vmatprep.mubr.bf16.mxu0 %v7135_v61  ;;  %v1267_v24 = vld [vmem:[%s8809_s5 + $0xc48] sm:$0xff]  ;;  %v5861_v35 = vcombine.low %v1147_v16, %v1151_v17  ;;  %v5854_v37 = vcombine.high %v1139_v41, %v1143_v28 }
 0x107   :  { %v6256_v54 = vadd.f32 %v6255_v49, %v6254_v42  ;;  %v6235_v57 = vpop.f32.mrf.mxu0  ;;  %4265 = vmatprep.mubr.bf16.mxu1 %v7144_v0  ;;  %v1271_v30 = vld [vmem:[%s8809_s5 + $0xc68] sm:$0xff] }
 0x108   :  { %v705_v60 = vadd.f32 %v6234_v63, %v7462_v40  ;;  %v6257_v62 = vpop.f32.mrf.mxu1  ;;  %4195 = vmatpush1.bf16.msra.mxu0 %v5893_v59  ;;  %v6013_v40 = vcombine.low %v1299_v43, %v1303_v44  ;;  %v5982_v42 = vcombine.high %v1267_v24, %v1271_v30  ;;  %v1131_v43 = vld [vmem:[%s8809_s5 + $0x808] sm:$0xff]  ;;  %v5853_v63 = vcombine.low %v1139_v41, %v1143_v28 }
 0x109   :  { %v6236_v2 = vpop.f32.mrf.mxu0  ;;  %4236 = vmatpush1.bf16.msra.mxu1 %v6021_v52  ;;  %4196 = vmatprep.subr.bf16.mxu0 %v5886_v32  ;;  %v1135_v44 = vld [vmem:[%s8809_s5 + $0x828] sm:$0xff]  ;;  %v5981_v49 = vcombine.low %v1267_v24, %v1271_v30 }
 0x10a   :  { %v7565_v4 = vadd.f32 %v6256_v54, %v705_v60  ;;  %v6258_v8 = vpop.f32.mrf.mxu1  ;;  %4237 = vmatprep.subr.bf16.mxu1 %v6014_v58  ;;  %v1259_v46 = vld [vmem:[%s8809_s5 + $0xc08] sm:$0xff]  ;;  %v5846_v52 = vcombine.high %v1131_v43, %v1135_v44  ;;  %v5845_v33 = vcombine.low %v1131_v43, %v1135_v44 }
 0x10b   :  { %v1263_v59 = vld [vmem:[%s8809_s5 + $0xc28] sm:$0xff] }
 0x10c   :  { %4197 = vmatpush1.bf16.msra.mxu0 %v5885_v3  ;;  %v5974_v32 = vcombine.high %v1259_v46, %v1263_v59  ;;  %v1251_v54 = vld [vmem:[%s8809_s5 + $0xbc8] sm:$0xff]  ;;  %v5973_v60 = vcombine.low %v1259_v46, %v1263_v59 }
 0x10d   :  { %4238 = vmatpush1.bf16.msra.mxu1 %v6013_v40  ;;  %4198 = vmatprep.subr.bf16.mxu0 %v5878_v5  ;;  %v1255_v57 = vld [vmem:[%s8809_s5 + $0xbe8] sm:$0xff] }
 0x10e   :  { %4239 = vmatprep.subr.bf16.mxu1 %v6006_v6  ;;  %v1379_v58 = vld [vmem:[%s8809_s5 + $0xfc8] sm:$0xff]  ;;  %v5966_v62 = vcombine.high %v1251_v54, %v1255_v57  ;;  %v5965_v40 = vcombine.low %v1251_v54, %v1255_v57 }
 0x10f   :  { %v6094_v7 = vcombine.high %v1379_v58, %v1383_v20  ;;  %v1247_v2 = vld [vmem:[%s8809_s5 + $0xba8] sm:$0xff]  ;;  %v6093_v5 = vcombine.low %v1379_v58, %v1383_v20 }
 0x110   :  { %4199 = vmatpush1.bf16.msra.mxu0 %v5877_v12  ;;  %v1371_v3 = vld [vmem:[%s8809_s5 + $0xf88] sm:$0xff]  ;;  %v5958_v6 = vcombine.high %v1243_v1, %v1247_v2 }
 0x111   :  { %4240 = vmatpush1.bf16.msra.mxu1 %v6005_v13  ;;  %4200 = vmatprep.subr.bf16.mxu0 %v5870_v14  ;;  %v1375_v8 = vld [vmem:[%s8809_s5 + $0xfa8] sm:$0xff]  ;;  %v5957_v13 = vcombine.low %v1243_v1, %v1247_v2 }
 0x112   :  { %4241 = vmatprep.subr.bf16.mxu1 %v5998_v15  ;;  %v6086_v9 = vcombine.high %v1371_v3, %v1375_v8  ;;  %v1235_v10 = vld [vmem:[%s8809_s5 + $0xb48] sm:$0xff]  ;;  %v6085_v14 = vcombine.low %v1371_v3, %v1375_v8 }
 0x113   :  { %v1239_v39 = vld [vmem:[%s8809_s5 + $0xb68] sm:$0xff] }
 0x114   :  { %4201 = vmatpush1.bf16.msra.mxu0 %v5869_v21  ;;  %v1363_v11 = vld [vmem:[%s8809_s5 + $0xf48] sm:$0xff]  ;;  %v5950_v15 = vcombine.high %v1235_v10, %v1239_v39 }
 0x115   :  { %4242 = vmatpush1.bf16.msra.mxu1 %v5997_v22  ;;  %4202 = vmatprep.subr.bf16.mxu0 %v5862_v23  ;;  %v1367_v12 = vld [vmem:[%s8809_s5 + $0xf68] sm:$0xff]  ;;  %v5949_v22 = vcombine.low %v1235_v10, %v1239_v39  ;;  %v932_v39 = vld [vmem:[%s8809_s5 + $0x1d0] sm:$0xff] }
 0x116   :  { %4243 = vmatprep.subr.bf16.mxu1 %v5990_v25  ;;  %v6078_v16 = vcombine.high %v1363_v11, %v1367_v12  ;;  %v1227_v17 = vld [vmem:[%s8809_s5 + $0xb08] sm:$0xff]  ;;  %v6077_v23 = vcombine.low %v1363_v11, %v1367_v12  ;;  %v936_v11 = vld [vmem:[%s8809_s5 + $0x1f0] sm:$0xff] }
 0x117   :  { %v1231_v18 = vld [vmem:[%s8809_s5 + $0xb28] sm:$0xff]  ;;  %v1060_v12 = vld [vmem:[%s8809_s5 + $0x5d0] sm:$0xff] }
 0x118   :  { %4203 = vmatpush1.bf16.msra.mxu0 %v5861_v35  ;;  %v1355_v19 = vld [vmem:[%s8809_s5 + $0xf08] sm:$0xff]  ;;  %v5942_v25 = vcombine.high %v1227_v17, %v1231_v18 }
 0x119   :  { %4244 = vmatpush1.bf16.msra.mxu1 %v5989_v36  ;;  %4204 = vmatprep.subr.bf16.mxu0 %v5854_v37  ;;  %v1359_v21 = vld [vmem:[%s8809_s5 + $0xf28] sm:$0xff]  ;;  %v5941_v36 = vcombine.low %v1227_v17, %v1231_v18  ;;  %v924_v18 = vld [vmem:[%s8809_s5 + $0x190] sm:$0xff] }
 0x11a   :  { %4245 = vmatprep.subr.bf16.mxu1 %v5982_v42  ;;  %v6070_v41 = vcombine.high %v1355_v19, %v1359_v21  ;;  %v1219_v28 = vld [vmem:[%s8809_s5 + $0xac8] sm:$0xff]  ;;  %v6069_v37 = vcombine.low %v1355_v19, %v1359_v21  ;;  %v928_v19 = vld [vmem:[%s8809_s5 + $0x1b0] sm:$0xff] }
 0x11b   :  { %v1223_v24 = vld [vmem:[%s8809_s5 + $0xae8] sm:$0xff]  ;;  %v1052_v21 = vld [vmem:[%s8809_s5 + $0x590] sm:$0xff] }
 0x11c   :  { %4205 = vmatpush1.bf16.msra.mxu0 %v5853_v63  ;;  %v1347_v30 = vld [vmem:[%s8809_s5 + $0xec8] sm:$0xff]  ;;  %v5934_v42 = vcombine.high %v1219_v28, %v1223_v24 }
 0x11d   :  { %4246 = vmatpush1.bf16.msra.mxu1 %v5981_v49  ;;  %4206 = vmatprep.subr.bf16.mxu0 %v5846_v52  ;;  %v1351_v35 = vld [vmem:[%s8809_s5 + $0xee8] sm:$0xff]  ;;  %v5933_v49 = vcombine.low %v1219_v28, %v1223_v24  ;;  %v916_v24 = vld [vmem:[%s8809_s5 + $0x150] sm:$0xff] }
 0x11e   :  { %4247 = vmatprep.subr.bf16.mxu1 %v5974_v32  ;;  %v6062_v43 = vcombine.high %v1347_v30, %v1351_v35  ;;  %v1211_v44 = vld [vmem:[%s8809_s5 + $0xa88] sm:$0xff]  ;;  %v6061_v52 = vcombine.low %v1347_v30, %v1351_v35  ;;  %v920_v30 = vld [vmem:[%s8809_s5 + $0x170] sm:$0xff] }
 0x11f   :  { %v1215_v46 = vld [vmem:[%s8809_s5 + $0xaa8] sm:$0xff] }
 0x120   :  { %4207 = vmatpush1.bf16.msra.mxu0 %v5845_v33  ;;  %v1339_v59 = vld [vmem:[%s8809_s5 + $0xe88] sm:$0xff]  ;;  %v5926_v32 = vcombine.high %v1211_v44, %v1215_v46 }
 0x121   :  { %4248 = vmatpush1.bf16.msra.mxu1 %v5973_v60  ;;  %4208 = vmatprep.subr.bf16.mxu0 %v5966_v62  ;;  %v1343_v63 = vld [vmem:[%s8809_s5 + $0xea8] sm:$0xff]  ;;  %v5925_v60 = vcombine.low %v1211_v44, %v1215_v46 }
 0x122   :  { %4249 = vmatprep.subr.bf16.mxu1 %v6094_v7  ;;  %v6054_v54 = vcombine.high %v1339_v59, %v1343_v63  ;;  %v1203_v57 = vld [vmem:[%s8809_s5 + $0xa48] sm:$0xff]  ;;  %v6053_v62 = vcombine.low %v1339_v59, %v1343_v63  ;;  %v5632_v63 = vcombine.high %v916_v24, %v920_v30 }
 0x123   :  { %v1207_v58 = vld [vmem:[%s8809_s5 + $0xa68] sm:$0xff] }
 0x124   :  { %4209 = vmatpush2.bf16.msra.mxu0 %v5965_v40  ;;  %v1331_v20 = vld [vmem:[%s8809_s5 + $0xe48] sm:$0xff]  ;;  %v5918_v7 = vcombine.high %v1203_v57, %v1207_v58 }
 0x125   :  { %4250 = vmatpush2.bf16.msra.mxu1 %v6093_v5  ;;  %4210 = vmatprep.subr.bf16.mxu0 %v5958_v6  ;;  %v1335_v33 = vld [vmem:[%s8809_s5 + $0xe68] sm:$0xff]  ;;  %v5917_v5 = vcombine.low %v1203_v57, %v1207_v58 }
 0x126   :  { %4251 = vmatprep.subr.bf16.mxu1 %v6086_v9  ;;  %v6046_v1 = vcombine.high %v1331_v20, %v1335_v33  ;;  %v1195_v2 = vld [vmem:[%s8809_s5 + $0xa08] sm:$0xff]  ;;  %v6045_v6 = vcombine.low %v1331_v20, %v1335_v33  ;;  %v1036_v20 = vld [vmem:[%s8809_s5 + $0x510] sm:$0xff] }
 0x127   :  { %v1199_v3 = vld [vmem:[%s8809_s5 + $0xa28] sm:$0xff]  ;;  %v1040_v33 = vld [vmem:[%s8809_s5 + $0x530] sm:$0xff] }
 0x128   :  { %4211 = vmatpush2.bf16.msra.mxu0 %v5957_v13  ;;  %v1323_v8 = vld [vmem:[%s8809_s5 + $0xe08] sm:$0xff]  ;;  %v5910_v9 = vcombine.high %v1195_v2, %v1199_v3  ;;  %v1064_v13 = vld [vmem:[%s8809_s5 + $0x5f0] sm:$0xff] }
 0x129   :  { %4252 = vmatpush2.bf16.msra.mxu1 %v6085_v14  ;;  %4212 = vmatprep.subr.bf16.mxu0 %v5950_v15  ;;  %v1327_v40 = vld [vmem:[%s8809_s5 + $0xe28] sm:$0xff]  ;;  %v5909_v14 = vcombine.low %v1195_v2, %v1199_v3  ;;  %v5776_v17 = vcombine.high %v1060_v12, %v1064_v13 }
 0x12a   :  { %4253 = vmatprep.subr.bf16.mxu1 %v6078_v16  ;;  %v6038_v10 = vcombine.high %v1323_v8, %v1327_v40  ;;  %v6037_v15 = vcombine.low %v1323_v8, %v1327_v40  ;;  %v5648_v16 = vcombine.high %v932_v39, %v936_v11  ;;  %v5752_v8 = vcombine.high %v1036_v20, %v1040_v33  ;;  %v900_v40 = vld [vmem:[%s8809_s5 + $0xd0] sm:$0xff] }
 0x12c   :  { %4213 = vmatpush2.bf16.msra.mxu0 %v5949_v22  ;;  %v1056_v22 = vld [vmem:[%s8809_s5 + $0x5b0] sm:$0xff] }
 0x12d   :  { %4254 = vmatpush2.bf16.msra.mxu1 %v6077_v23  ;;  %4214 = vmatprep.subr.bf16.mxu0 %v5942_v25  ;;  %v5647_v23 = vcombine.low %v932_v39, %v936_v11  ;;  %v5775_v25 = vcombine.low %v1060_v12, %v1064_v13  ;;  %v5768_v28 = vcombine.high %v1052_v21, %v1056_v22  ;;  %v892_v13 = vld [vmem:[%s8809_s5 + $0x90] sm:$0xff] }
 0x12e   :  { %4255 = vmatprep.subr.bf16.mxu1 %v6070_v41  ;;  %v5640_v41 = vcombine.high %v924_v18, %v928_v19  ;;  %v5767_v59 = vcombine.low %v1052_v21, %v1056_v22  ;;  %v5751_v39 = vcombine.low %v1036_v20, %v1040_v33  ;;  %v884_v22 = vld [vmem:[%s8809_s5 + $0x50] sm:$0xff] }
 0x130   :  { %4215 = vmatpush2.bf16.msra.mxu0 %v5941_v36  ;;  %v1044_v36 = vld [vmem:[%s8809_s5 + $0x550] sm:$0xff] }
 0x131   :  { %4256 = vmatpush2.bf16.msra.mxu1 %v6069_v37  ;;  %4216 = vmatprep.subr.bf16.mxu0 %v5934_v42  ;;  %v1048_v37 = vld [vmem:[%s8809_s5 + $0x570] sm:$0xff] }
 0x132   :  { %4257 = vmatprep.subr.bf16.mxu1 %v6062_v43  ;;  %v5639_v43 = vcombine.low %v924_v18, %v928_v19 }
 0x134   :  { %4217 = vmatpush2.bf16.msra.mxu0 %v5933_v49 }
 0x135   :  { %4258 = vmatpush2.bf16.msra.mxu1 %v6061_v52  ;;  %4218 = vmatprep.subr.bf16.mxu0 %v5926_v32  ;;  %v5760_v52 = vcombine.high %v1044_v36, %v1048_v37  ;;  %v908_v32 = vld [vmem:[%s8809_s5 + $0x110] sm:$0xff] }
 0x136   :  { %4259 = vmatprep.subr.bf16.mxu1 %v6054_v54  ;;  %v912_v54 = vld [vmem:[%s8809_s5 + $0x130] sm:$0xff] }
 0x137   :  { %v5624_v2 = vcombine.high %v908_v32, %v912_v54 }
 0x138   :  { %4219 = vmatpush2.bf16.msra.mxu0 %v5925_v60 }
 0x139   :  { %4260 = vmatpush2.bf16.msra.mxu1 %v6053_v62  ;;  %4220 = vmatprep.subr.bf16.mxu0 %v5918_v7  ;;  %v5631_v62 = vcombine.low %v916_v24, %v920_v30 }
 0x13a   :  { %4261 = vmatprep.subr.bf16.mxu1 %v6046_v1  ;;  %v5759_v1 = vcombine.low %v1044_v36, %v1048_v37  ;;  %v876_v36 = vld [vmem:[%s8809_s5 + $0x10] sm:$0xff] }
 0x13b   :  { %v880_v37 = vld [vmem:[%s8809_s5 + $0x30] sm:$0xff] }
 0x13c   :  { %4221 = vmatpush2.bf16.msra.mxu0 %v5917_v5  ;;  %v904_v5 = vld [vmem:[%s8809_s5 + $0xf0] sm:$0xff]  ;;  %v5591_v20 = vcombine.low %v876_v36, %v880_v37 }
 0x13d   :  { %4262 = vmatpush2.bf16.msra.mxu1 %v6045_v6  ;;  %4222 = vmatprep.subr.bf16.mxu0 %v5910_v9  ;;  %v1028_v6 = vld [vmem:[%s8809_s5 + $0x4d0] sm:$0xff]  ;;  %v5616_v11 = vcombine.high %v900_v40, %v904_v5 }
 0x13e   :  { %4263 = vmatprep.subr.bf16.mxu1 %v6038_v10  ;;  %v1032_v9 = vld [vmem:[%s8809_s5 + $0x4f0] sm:$0xff]  ;;  %v5623_v10 = vcombine.low %v908_v32, %v912_v54 }
 0x13f   :  { %v5744_v12 = vcombine.high %v1028_v6, %v1032_v9  ;;  %v5743_v18 = vcombine.low %v1028_v6, %v1032_v9  ;;  %v1000_v32 = vld [vmem:[%s8809_s5 + $0x3f0] sm:$0xff] }
 0x140   :  { %4223 = vmatpush2.bf16.msra.mxu0 %v5909_v14  ;;  %v896_v14 = vld [vmem:[%s8809_s5 + $0xb0] sm:$0xff] }
 0x141   :  { %4264 = vmatpush2.bf16.msra.mxu1 %v6037_v15  ;;  %4274 = vmatprep.subr.bf16.mxu0 %v5648_v16  ;;  %v1020_v15 = vld [vmem:[%s8809_s5 + $0x490] sm:$0xff]  ;;  %v5608_v19 = vcombine.high %v892_v13, %v896_v14 }
 0x142   :  { %4315 = vmatprep.subr.bf16.mxu1 %v5776_v17  ;;  %v1024_v16 = vld [vmem:[%s8809_s5 + $0x4b0] sm:$0xff]  ;;  %v5615_v17 = vcombine.low %v900_v40, %v904_v5 }
 0x143   :  { %v3980_v35 = vpop.f32.mrf.mxu0  ;;  %4225 = vmatmul.mubr.bf16.vlgmr.msra.gmra.mxu0 %v7325_v27  ;;  %v5736_v21 = vcombine.high %v1020_v15, %v1024_v16  ;;  %v5735_v24 = vcombine.low %v1020_v15, %v1024_v16  ;;  %v1124_v54 = vld [vmem:[%s8809_s5 + $0x7d0] sm:$0xff] }
 0x144   :  { %v4021_v42 = vpop.f32.mrf.mxu1  ;;  %4266 = vmatmul.mubr.bf16.vlgmr.msra.gmra.mxu1 %v7333_v29  ;;  %4275 = vmatpush1.bf16.msra.mxu0 %v5647_v23  ;;  %v888_v23 = vld [vmem:[%s8809_s5 + $0x70] sm:$0xff] }
 0x145   :  { %v7749_v44 = vadd.f32 %v4021_v42, %v3980_v35  ;;  %4316 = vmatpush1.bf16.msra.mxu1 %v5775_v25  ;;  %v3982_v46 = vpop.f32.mrf.mxu0  ;;  %4276 = vmatprep.subr.bf16.mxu0 %v5640_v41  ;;  %v1012_v25 = vld [vmem:[%s8809_s5 + $0x450] sm:$0xff]  ;;  %v5600_v30 = vcombine.high %v884_v22, %v888_v23 }
 0x146   :  { %v4023_v49 = vpop.f32.mrf.mxu1  ;;  %4317 = vmatprep.subr.bf16.mxu1 %v5768_v28  ;;  %4306 = vmatprep.mubr.bf16.mxu0 %v6969_v50  ;;  %v1016_v41 = vld [vmem:[%s8809_s5 + $0x470] sm:$0xff]  ;;  %v5607_v28 = vcombine.low %v892_v13, %v896_v14 }
 0x147   :  { %v7758_v57 = vadd.f32 %v4023_v49, %v3982_v46  ;;  %v3984_v58 = vpop.f32.mrf.mxu0  ;;  %4347 = vmatprep.mubr.bf16.mxu1 %v6971_v51  ;;  %v5728_v35 = vcombine.high %v1012_v25, %v1016_v41  ;;  %v1004_v42 = vld [vmem:[%s8809_s5 + $0x410] sm:$0xff]  ;;  %v5599_v46 = vcombine.low %v884_v22, %v888_v23 }
 0x148   :  { %v4025_v60 = vpop.f32.mrf.mxu1  ;;  %4277 = vmatpush1.bf16.msra.mxu0 %v5639_v43  ;;  %v1008_v43 = vld [vmem:[%s8809_s5 + $0x430] sm:$0xff] }
 0x149   :  { %4318 = vmatpush1.bf16.msra.mxu1 %v5767_v59  ;;  %v3985_v7 = vpop.f32.mrf.mxu0  ;;  %4278 = vmatprep.subr.bf16.mxu0 %v5632_v63  ;;  %v5727_v59 = vcombine.low %v1012_v25, %v1016_v41  ;;  %v5592_v63 = vcombine.high %v876_v36, %v880_v37  ;;  %v5720_v49 = vcombine.high %v1004_v42, %v1008_v43  ;;  %v1128_v58 = vld [vmem:[%s8809_s5 + $0x7f0] sm:$0xff] }
 0x14a   :  { %v4026_v3 = vpop.f32.mrf.mxu1  ;;  %4319 = vmatprep.subr.bf16.mxu1 %v5760_v52  ;;  %v996_v52 = vld [vmem:[%s8809_s5 + $0x3d0] sm:$0xff]  ;;  %v5719_v33 = vcombine.low %v1004_v42, %v1008_v43  ;;  %v5839_v40 = vcombine.low %v1124_v54, %v1128_v58 }
 0x14b   :  { %v5712_v60 = vcombine.high %v996_v52, %v1000_v32  ;;  %v988_v7 = vld [vmem:[%s8809_s5 + $0x390] sm:$0xff] }
 0x14c   :  { %4279 = vmatpush1.bf16.msra.mxu0 %v5631_v62  ;;  %v5840_v62 = vcombine.high %v1124_v54, %v1128_v58  ;;  %v1120_v3 = vld [vmem:[%s8809_s5 + $0x7b0] sm:$0xff] }
 0x14d   :  { %4320 = vmatpush1.bf16.msra.mxu1 %v5759_v1  ;;  %4280 = vmatprep.subr.bf16.mxu0 %v5624_v2  ;;  %v992_v1 = vld [vmem:[%s8809_s5 + $0x3b0] sm:$0xff] }
 0x14e   :  { %4321 = vmatprep.subr.bf16.mxu1 %v5752_v8  ;;  %v1116_v2 = vld [vmem:[%s8809_s5 + $0x790] sm:$0xff]  ;;  %v5711_v8 = vcombine.low %v996_v52, %v1000_v32  ;;  %v5704_v5 = vcombine.high %v988_v7, %v992_v1 }
 0x14f   :  { %v5832_v6 = vcombine.high %v1116_v2, %v1120_v3  ;;  %v980_v9 = vld [vmem:[%s8809_s5 + $0x350] sm:$0xff]  ;;  %v5831_v13 = vcombine.low %v1116_v2, %v1120_v3 }
 0x150   :  { %4281 = vmatpush1.bf16.msra.mxu0 %v5623_v10  ;;  %v984_v10 = vld [vmem:[%s8809_s5 + $0x370] sm:$0xff] }
 0x151   :  { %4322 = vmatpush1.bf16.msra.mxu1 %v5751_v39  ;;  %4282 = vmatprep.subr.bf16.mxu0 %v5616_v11  ;;  %v1108_v39 = vld [vmem:[%s8809_s5 + $0x750] sm:$0xff]  ;;  %v5696_v14 = vcombine.high %v980_v9, %v984_v10 }
 0x152   :  { %4323 = vmatprep.subr.bf16.mxu1 %v5744_v12  ;;  %v1112_v11 = vld [vmem:[%s8809_s5 + $0x770] sm:$0xff]  ;;  %v5703_v12 = vcombine.low %v988_v7, %v992_v1 }
 0x153   :  { %v5824_v15 = vcombine.high %v1108_v39, %v1112_v11  ;;  %v972_v16 = vld [vmem:[%s8809_s5 + $0x310] sm:$0xff]  ;;  %v5823_v22 = vcombine.low %v1108_v39, %v1112_v11 }
 0x154   :  { %4283 = vmatpush1.bf16.msra.mxu0 %v5615_v17  ;;  %v976_v17 = vld [vmem:[%s8809_s5 + $0x330] sm:$0xff] }
 0x155   :  { %4324 = vmatpush1.bf16.msra.mxu1 %v5743_v18  ;;  %4284 = vmatprep.subr.bf16.mxu0 %v5608_v19  ;;  %v1100_v18 = vld [vmem:[%s8809_s5 + $0x710] sm:$0xff]  ;;  %v5688_v23 = vcombine.high %v972_v16, %v976_v17 }
 0x156   :  { %4325 = vmatprep.subr.bf16.mxu1 %v5736_v21  ;;  %v1104_v19 = vld [vmem:[%s8809_s5 + $0x730] sm:$0xff]  ;;  %v5695_v21 = vcombine.low %v980_v9, %v984_v10 }
 0x157   :  { %v5816_v25 = vcombine.high %v1100_v18, %v1104_v19  ;;  %v964_v41 = vld [vmem:[%s8809_s5 + $0x2d0] sm:$0xff]  ;;  %v5815_v36 = vcombine.low %v1100_v18, %v1104_v19 }
 0x158   :  { %4285 = vmatpush1.bf16.msra.mxu0 %v5607_v28  ;;  %v968_v28 = vld [vmem:[%s8809_s5 + $0x2f0] sm:$0xff] }
 0x159   :  { %4326 = vmatpush1.bf16.msra.mxu1 %v5735_v24  ;;  %4286 = vmatprep.subr.bf16.mxu0 %v5600_v30  ;;  %v1092_v24 = vld [vmem:[%s8809_s5 + $0x6d0] sm:$0xff]  ;;  %v5680_v37 = vcombine.high %v964_v41, %v968_v28 }
 0x15a   :  { %4327 = vmatprep.subr.bf16.mxu1 %v5728_v35  ;;  %v1096_v30 = vld [vmem:[%s8809_s5 + $0x6f0] sm:$0xff]  ;;  %v5687_v35 = vcombine.low %v972_v16, %v976_v17 }
 0x15b   :  { %v5808_v42 = vcombine.high %v1092_v24, %v1096_v30  ;;  %v956_v43 = vld [vmem:[%s8809_s5 + $0x290] sm:$0xff]  ;;  %v5807_v52 = vcombine.low %v1092_v24, %v1096_v30 }
 0x15c   :  { %4287 = vmatpush1.bf16.msra.mxu0 %v5599_v46  ;;  %v960_v46 = vld [vmem:[%s8809_s5 + $0x2b0] sm:$0xff] }
 0x15d   :  { %4328 = vmatpush1.bf16.msra.mxu1 %v5727_v59  ;;  %4288 = vmatprep.subr.bf16.mxu0 %v5592_v63  ;;  %v1084_v59 = vld [vmem:[%s8809_s5 + $0x690] sm:$0xff]  ;;  %v5672_v32 = vcombine.high %v956_v43, %v960_v46 }
 0x15e   :  { %4329 = vmatprep.subr.bf16.mxu1 %v5720_v49  ;;  %v1088_v63 = vld [vmem:[%s8809_s5 + $0x6b0] sm:$0xff]  ;;  %v5679_v49 = vcombine.low %v964_v41, %v968_v28 }
 0x15f   :  { %v5800_v54 = vcombine.high %v1084_v59, %v1088_v63  ;;  %v948_v58 = vld [vmem:[%s8809_s5 + $0x250] sm:$0xff]  ;;  %v5799_v7 = vcombine.low %v1084_v59, %v1088_v63 }
 0x160   :  { %4289 = vmatpush1.bf16.msra.mxu0 %v5591_v20  ;;  %v952_v20 = vld [vmem:[%s8809_s5 + $0x270] sm:$0xff] }
 0x161   :  { %4330 = vmatpush1.bf16.msra.mxu1 %v5719_v33  ;;  %4290 = vmatprep.subr.bf16.mxu0 %v5712_v60  ;;  %v1076_v33 = vld [vmem:[%s8809_s5 + $0x650] sm:$0xff]  ;;  %v5664_v1 = vcombine.high %v948_v58, %v952_v20 }
 0x162   :  { %4331 = vmatprep.subr.bf16.mxu1 %v5840_v62  ;;  %v1080_v60 = vld [vmem:[%s8809_s5 + $0x670] sm:$0xff]  ;;  %v5671_v62 = vcombine.low %v956_v43, %v960_v46 }
 0x163   :  { %v5792_v2 = vcombine.high %v1076_v33, %v1080_v60  ;;  %v940_v3 = vld [vmem:[%s8809_s5 + $0x210] sm:$0xff]  ;;  %v5791_v9 = vcombine.low %v1076_v33, %v1080_v60 }
 0x164   :  { %4291 = vmatpush2.bf16.msra.mxu0 %v5711_v8  ;;  %v944_v8 = vld [vmem:[%s8809_s5 + $0x230] sm:$0xff] }
 0x165   :  { %4332 = vmatpush2.bf16.msra.mxu1 %v5839_v40  ;;  %4292 = vmatprep.subr.bf16.mxu0 %v5704_v5  ;;  %v1068_v40 = vld [vmem:[%s8809_s5 + $0x610] sm:$0xff]  ;;  %v5656_v10 = vcombine.high %v940_v3, %v944_v8 }
 0x166   :  { %4333 = vmatprep.subr.bf16.mxu1 %v5832_v6  ;;  %v1072_v5 = vld [vmem:[%s8809_s5 + $0x630] sm:$0xff]  ;;  %v5663_v6 = vcombine.low %v948_v58, %v952_v20 }
 0x167   :  { %v5784_v39 = vcombine.high %v1068_v40, %v1072_v5  ;;  %v1188_v11 = vld [vmem:[%s8809_s5 + $0x9d0] sm:$0xff]  ;;  %v5783_v16 = vcombine.low %v1068_v40, %v1072_v5 }
 0x168   :  { %4293 = vmatpush2.bf16.msra.mxu0 %v5703_v12  ;;  %v1192_v12 = vld [vmem:[%s8809_s5 + $0x9f0] sm:$0xff] }
 0x169   :  { %4334 = vmatpush2.bf16.msra.mxu1 %v5831_v13  ;;  %4294 = vmatprep.subr.bf16.mxu0 %v5696_v14  ;;  %v1316_v13 = vld [vmem:[%s8809_s5 + $0xdd0] sm:$0xff]  ;;  %v5904_v17 = vcombine.high %v1188_v11, %v1192_v12 }
 0x16a   :  { %4335 = vmatprep.subr.bf16.mxu1 %v5824_v15  ;;  %v1320_v14 = vld [vmem:[%s8809_s5 + $0xdf0] sm:$0xff]  ;;  %v5655_v15 = vcombine.low %v940_v3, %v944_v8 }
 0x16b   :  { %v6032_v18 = vcombine.high %v1316_v13, %v1320_v14  ;;  %v1180_v19 = vld [vmem:[%s8809_s5 + $0x990] sm:$0xff]  ;;  %v6031_v41 = vcombine.low %v1316_v13, %v1320_v14 }
 0x16c   :  { %4295 = vmatpush2.bf16.msra.mxu0 %v5695_v21  ;;  %v1184_v21 = vld [vmem:[%s8809_s5 + $0x9b0] sm:$0xff] }
 0x16d   :  { %4336 = vmatpush2.bf16.msra.mxu1 %v5823_v22  ;;  %4296 = vmatprep.subr.bf16.mxu0 %v5688_v23  ;;  %v1308_v22 = vld [vmem:[%s8809_s5 + $0xd90] sm:$0xff]  ;;  %v5896_v28 = vcombine.high %v1180_v19, %v1184_v21  ;;  %v5895_v59 = vcombine.low %v1180_v19, %v1184_v21 }
 0x16e   :  { %4337 = vmatprep.subr.bf16.mxu1 %v5816_v25  ;;  %v1312_v23 = vld [vmem:[%s8809_s5 + $0xdb0] sm:$0xff]  ;;  %v5903_v25 = vcombine.low %v1188_v11, %v1192_v12 }
 0x16f   :  { %v6024_v24 = vcombine.high %v1308_v22, %v1312_v23  ;;  %v1172_v30 = vld [vmem:[%s8809_s5 + $0x950] sm:$0xff] }
 0x170   :  { %4297 = vmatpush2.bf16.msra.mxu0 %v5687_v35  ;;  %v1176_v35 = vld [vmem:[%s8809_s5 + $0x970] sm:$0xff] }
 0x171   :  { %4338 = vmatpush2.bf16.msra.mxu1 %v5815_v36  ;;  %4298 = vmatprep.subr.bf16.mxu0 %v5680_v37  ;;  %v1300_v37 = vld [vmem:[%s8809_s5 + $0xd50] sm:$0xff] }
 0x172   :  { %4339 = vmatprep.subr.bf16.mxu1 %v5808_v42  ;;  %v1304_v42 = vld [vmem:[%s8809_s5 + $0xd70] sm:$0xff] }
 0x173   :  { %v6016_v20 = vcombine.high %v1300_v37, %v1304_v42  ;;  %v1168_v33 = vld [vmem:[%s8809_s5 + $0x930] sm:$0xff]  ;;  %v6015_v8 = vcombine.low %v1300_v37, %v1304_v42 }
 0x174   :  { %4299 = vmatpush2.bf16.msra.mxu0 %v5679_v49  ;;  %v6023_v49 = vcombine.low %v1308_v22, %v1312_v23  ;;  %v1288_v11 = vld [vmem:[%s8809_s5 + $0xcf0] sm:$0xff] }
 0x175   :  { %4340 = vmatpush2.bf16.msra.mxu1 %v5807_v52  ;;  %4300 = vmatprep.subr.bf16.mxu0 %v5672_v32  ;;  %v5888_v52 = vcombine.high %v1172_v30, %v1176_v35  ;;  %v1280_v19 = vld [vmem:[%s8809_s5 + $0xcb0] sm:$0xff] }
 0x176   :  { %4341 = vmatprep.subr.bf16.mxu1 %v5800_v54 }
 0x178   :  { %4301 = vmatpush2.bf16.msra.mxu0 %v5671_v62  ;;  %v1292_v62 = vld [vmem:[%s8809_s5 + $0xd10] sm:$0xff] }
 0x179   :  { %4342 = vmatpush2.bf16.msra.mxu1 %v5799_v7  ;;  %4302 = vmatprep.subr.bf16.mxu0 %v5664_v1 }
 0x17a   :  { %4343 = vmatprep.subr.bf16.mxu1 %v5792_v2  ;;  %v5887_v2 = vcombine.low %v1172_v30, %v1176_v35  ;;  %v1272_v30 = vld [vmem:[%s8809_s5 + $0xc70] sm:$0xff] }
 0x17c   :  { %4303 = vmatpush2.bf16.msra.mxu0 %v5663_v6 }
 0x17d   :  { %4344 = vmatpush2.bf16.msra.mxu1 %v5791_v9  ;;  %4304 = vmatprep.subr.bf16.mxu0 %v5656_v10  ;;  %v1156_v9 = vld [vmem:[%s8809_s5 + $0x8d0] sm:$0xff] }
 0x17e   :  { %4345 = vmatprep.subr.bf16.mxu1 %v5784_v39  ;;  %v1160_v10 = vld [vmem:[%s8809_s5 + $0x8f0] sm:$0xff] }
 0x17f   :  { %v1284_v39 = vld [vmem:[%s8809_s5 + $0xcd0] sm:$0xff]  ;;  %v5872_v14 = vcombine.high %v1156_v9, %v1160_v10  ;;  %v5871_v21 = vcombine.low %v1156_v9, %v1160_v10 }
 0x180   :  { %4305 = vmatpush2.bf16.msra.mxu0 %v5655_v15  ;;  %v6000_v15 = vcombine.high %v1284_v39, %v1288_v11  ;;  %v5999_v22 = vcombine.low %v1284_v39, %v1288_v11  ;;  %v1236_v11 = vld [vmem:[%s8809_s5 + $0xb50] sm:$0xff] }
 0x181   :  { %4346 = vmatpush2.bf16.msra.mxu1 %v5783_v16  ;;  %4356 = vmatprep.subr.bf16.mxu0 %v5904_v17  ;;  %v1148_v16 = vld [vmem:[%s8809_s5 + $0x890] sm:$0xff] }
 0x182   :  { %4397 = vmatprep.subr.bf16.mxu1 %v6032_v18  ;;  %v1152_v17 = vld [vmem:[%s8809_s5 + $0x8b0] sm:$0xff] }
 0x183   :  { %v4062_v36 = vpop.f32.mrf.mxu0  ;;  %4307 = vmatmul.mubr.bf16.vlgmr.msra.gmra.mxu0 %v7119_v47  ;;  %v1276_v18 = vld [vmem:[%s8809_s5 + $0xc90] sm:$0xff]  ;;  %v5864_v23 = vcombine.high %v1148_v16, %v1152_v17  ;;  %v5863_v35 = vcombine.low %v1148_v16, %v1152_v17 }
 0x184   :  { %v4063_v43 = vadd.f32 %v4062_v36, %v7749_v44  ;;  %v4103_v46 = vpop.f32.mrf.mxu1  ;;  %4348 = vmatmul.mubr.bf16.vlgmr.msra.gmra.mxu1 %v7127_v53  ;;  %4357 = vmatpush1.bf16.msra.mxu0 %v5903_v25  ;;  %v1164_v44 = vld [vmem:[%s8809_s5 + $0x910] sm:$0xff]  ;;  %v5992_v25 = vcombine.high %v1276_v18, %v1280_v19  ;;  %v5991_v36 = vcombine.low %v1276_v18, %v1280_v19 }
 0x185   :  { %4398 = vmatpush1.bf16.msra.mxu1 %v6031_v41  ;;  %v4064_v63 = vpop.f32.mrf.mxu0  ;;  %4358 = vmatprep.subr.bf16.mxu0 %v5896_v28  ;;  %v5880_v40 = vcombine.high %v1164_v44, %v1168_v33  ;;  %v5879_v12 = vcombine.low %v1164_v44, %v1168_v33  ;;  %v1140_v41 = vld [vmem:[%s8809_s5 + $0x850] sm:$0xff] }
 0x186   :  { %v7950_v32 = vadd.f32 %v4103_v46, %v4063_v43  ;;  %v4065_v54 = vadd.f32 %v4064_v63, %v7758_v57  ;;  %v4105_v58 = vpop.f32.mrf.mxu1  ;;  %4399 = vmatprep.subr.bf16.mxu1 %v6024_v24  ;;  %4388 = vmatprep.mubr.bf16.mxu0 %v7135_v61  ;;  %v1296_v57 = vld [vmem:[%s8809_s5 + $0xd30] sm:$0xff] }
 0x187   :  { %v4066_v60 = vpop.f32.mrf.mxu0  ;;  %4429 = vmatprep.mubr.bf16.mxu1 %v7144_v0  ;;  %v6008_v6 = vcombine.high %v1292_v62, %v1296_v57  ;;  %v6007_v13 = vcombine.low %v1292_v62, %v1296_v57  ;;  %v1144_v28 = vld [vmem:[%s8809_s5 + $0x870] sm:$0xff] }
 0x188   :  { %v7967_v7 = vadd.f32 %v4105_v58, %v4065_v54  ;;  %v4107_v1 = vpop.f32.mrf.mxu1  ;;  %4359 = vmatpush1.bf16.msra.mxu0 %v5895_v59  ;;  %v1268_v24 = vld [vmem:[%s8809_s5 + $0xc50] sm:$0xff]  ;;  %v5856_v37 = vcombine.high %v1140_v41, %v1144_v28 }
 0x189   :  { %4400 = vmatpush1.bf16.msra.mxu1 %v6023_v49  ;;  %v4067_v3 = vpop.f32.mrf.mxu0  ;;  %4360 = vmatprep.subr.bf16.mxu0 %v5888_v52  ;;  %v5984_v42 = vcombine.high %v1268_v24, %v1272_v30  ;;  %v1132_v43 = vld [vmem:[%s8809_s5 + $0x810] sm:$0xff]  ;;  %v5855_v49 = vcombine.low %v1140_v41, %v1144_v28  ;;  %v5983_v52 = vcombine.low %v1268_v24, %v1272_v30 }
 0x18a   :  { %v4108_v5 = vpop.f32.mrf.mxu1  ;;  %4401 = vmatprep.subr.bf16.mxu1 %v6016_v20  ;;  %v1136_v46 = vld [vmem:[%s8809_s5 + $0x830] sm:$0xff] }
 0x18b   :  { %v1260_v59 = vld [vmem:[%s8809_s5 + $0xc10] sm:$0xff]  ;;  %v5848_v54 = vcombine.high %v1132_v43, %v1136_v46  ;;  %v5847_v62 = vcombine.low %v1132_v43, %v1136_v46 }
 0x18c   :  { %4361 = vmatpush1.bf16.msra.mxu0 %v5887_v2  ;;  %v1264_v63 = vld [vmem:[%s8809_s5 + $0xc30] sm:$0xff] }
 0x18d   :  { %4402 = vmatpush1.bf16.msra.mxu1 %v6015_v8  ;;  %4362 = vmatprep.subr.bf16.mxu0 %v5880_v40  ;;  %v5976_v58 = vcombine.high %v1260_v59, %v1264_v63  ;;  %v1252_v20 = vld [vmem:[%s8809_s5 + $0xbd0] sm:$0xff]  ;;  %v5975_v57 = vcombine.low %v1260_v59, %v1264_v63 }
 0x18e   :  { %4403 = vmatprep.subr.bf16.mxu1 %v6008_v6  ;;  %v1256_v44 = vld [vmem:[%s8809_s5 + $0xbf0] sm:$0xff] }
 0x18f   :  { %v1380_v33 = vld [vmem:[%s8809_s5 + $0xfd0] sm:$0xff]  ;;  %v5968_v1 = vcombine.high %v1252_v20, %v1256_v44  ;;  %v5967_v6 = vcombine.low %v1252_v20, %v1256_v44 }
 0x190   :  { %4363 = vmatpush1.bf16.msra.mxu0 %v5879_v12  ;;  %v1384_v60 = vld [vmem:[%s8809_s5 + $0xff0] sm:$0xff] }
 0x191   :  { %4404 = vmatpush1.bf16.msra.mxu1 %v6007_v13  ;;  %4364 = vmatprep.subr.bf16.mxu0 %v5872_v14  ;;  %v6096_v2 = vcombine.high %v1380_v33, %v1384_v60  ;;  %v1244_v3 = vld [vmem:[%s8809_s5 + $0xb90] sm:$0xff]  ;;  %v6095_v9 = vcombine.low %v1380_v33, %v1384_v60 }
 0x192   :  { %4405 = vmatprep.subr.bf16.mxu1 %v6000_v15  ;;  %v1248_v8 = vld [vmem:[%s8809_s5 + $0xbb0] sm:$0xff] }
 0x193   :  { %v1372_v40 = vld [vmem:[%s8809_s5 + $0xf90] sm:$0xff]  ;;  %v5960_v10 = vcombine.high %v1244_v3, %v1248_v8  ;;  %v5959_v15 = vcombine.low %v1244_v3, %v1248_v8 }
 0x194   :  { %4365 = vmatpush1.bf16.msra.mxu0 %v5871_v21  ;;  %v1376_v5 = vld [vmem:[%s8809_s5 + $0xfb0] sm:$0xff] }
 0x195   :  { %4406 = vmatpush1.bf16.msra.mxu1 %v5999_v22  ;;  %4366 = vmatprep.subr.bf16.mxu0 %v5864_v23  ;;  %v6088_v39 = vcombine.high %v1372_v40, %v1376_v5  ;;  %v1240_v12 = vld [vmem:[%s8809_s5 + $0xb70] sm:$0xff]  ;;  %v6087_v16 = vcombine.low %v1372_v40, %v1376_v5 }
 0x196   :  { %4407 = vmatprep.subr.bf16.mxu1 %v5992_v25  ;;  %v1364_v13 = vld [vmem:[%s8809_s5 + $0xf50] sm:$0xff]  ;;  %v5952_v17 = vcombine.high %v1236_v11, %v1240_v12  ;;  %v5951_v25 = vcombine.low %v1236_v11, %v1240_v12 }
 0x197   :  { %v1368_v14 = vld [vmem:[%s8809_s5 + $0xf70] sm:$0xff] }
 0x198   :  { %4367 = vmatpush1.bf16.msra.mxu0 %v5863_v35  ;;  %v6080_v18 = vcombine.high %v1364_v13, %v1368_v14  ;;  %v1228_v19 = vld [vmem:[%s8809_s5 + $0xb10] sm:$0xff]  ;;  %v6079_v41 = vcombine.low %v1364_v13, %v1368_v14  ;;  %v933_v14 = vld [vmem:[%s8809_s5 + $0x1d8] sm:$0xff] }
 0x199   :  { %4408 = vmatpush1.bf16.msra.mxu1 %v5991_v36  ;;  %4368 = vmatprep.subr.bf16.mxu0 %v5856_v37  ;;  %v1232_v21 = vld [vmem:[%s8809_s5 + $0xb30] sm:$0xff] }
 0x19a   :  { %4409 = vmatprep.subr.bf16.mxu1 %v5984_v42  ;;  %v1356_v22 = vld [vmem:[%s8809_s5 + $0xf10] sm:$0xff]  ;;  %v5944_v28 = vcombine.high %v1228_v19, %v1232_v21  ;;  %v5943_v42 = vcombine.low %v1228_v19, %v1232_v21 }
 0x19b   :  { %v1360_v23 = vld [vmem:[%s8809_s5 + $0xf30] sm:$0xff] }
 0x19c   :  { %4369 = vmatpush1.bf16.msra.mxu0 %v5855_v49  ;;  %v6072_v24 = vcombine.high %v1356_v22, %v1360_v23  ;;  %v1220_v30 = vld [vmem:[%s8809_s5 + $0xad0] sm:$0xff]  ;;  %v6071_v43 = vcombine.low %v1356_v22, %v1360_v23  ;;  %v925_v23 = vld [vmem:[%s8809_s5 + $0x198] sm:$0xff] }
 0x19d   :  { %4410 = vmatpush1.bf16.msra.mxu1 %v5983_v52  ;;  %4370 = vmatprep.subr.bf16.mxu0 %v5848_v54  ;;  %v1224_v35 = vld [vmem:[%s8809_s5 + $0xaf0] sm:$0xff] }
 0x19e   :  { %4411 = vmatprep.subr.bf16.mxu1 %v5976_v58  ;;  %v1348_v36 = vld [vmem:[%s8809_s5 + $0xed0] sm:$0xff]  ;;  %v5936_v46 = vcombine.high %v1220_v30, %v1224_v35  ;;  %v5935_v58 = vcombine.low %v1220_v30, %v1224_v35 }
 0x19f   :  { %v1352_v37 = vld [vmem:[%s8809_s5 + $0xef0] sm:$0xff] }
 0x1a0   :  { %4371 = vmatpush1.bf16.msra.mxu0 %v5847_v62  ;;  %v6064_v59 = vcombine.high %v1348_v36, %v1352_v37  ;;  %v1212_v63 = vld [vmem:[%s8809_s5 + $0xa90] sm:$0xff]  ;;  %v6063_v20 = vcombine.low %v1348_v36, %v1352_v37  ;;  %v917_v36 = vld [vmem:[%s8809_s5 + $0x158] sm:$0xff] }
 0x1a1   :  { %4412 = vmatpush1.bf16.msra.mxu1 %v5975_v57  ;;  %4372 = vmatprep.subr.bf16.mxu0 %v5968_v1  ;;  %v1216_v49 = vld [vmem:[%s8809_s5 + $0xab0] sm:$0xff]  ;;  %v921_v37 = vld [vmem:[%s8809_s5 + $0x178] sm:$0xff] }
 0x1a2   :  { %4413 = vmatprep.subr.bf16.mxu1 %v6096_v2  ;;  %v1340_v52 = vld [vmem:[%s8809_s5 + $0xe90] sm:$0xff]  ;;  %v5928_v44 = vcombine.high %v1212_v63, %v1216_v49  ;;  %v5927_v2 = vcombine.low %v1212_v63, %v1216_v49 }
 0x1a3   :  { %v1344_v54 = vld [vmem:[%s8809_s5 + $0xeb0] sm:$0xff] }
 0x1a4   :  { %4373 = vmatpush2.bf16.msra.mxu0 %v5967_v6  ;;  %v6056_v33 = vcombine.high %v1340_v52, %v1344_v54  ;;  %v1204_v60 = vld [vmem:[%s8809_s5 + $0xa50] sm:$0xff]  ;;  %v6055_v3 = vcombine.low %v1340_v52, %v1344_v54  ;;  %v909_v52 = vld [vmem:[%s8809_s5 + $0x118] sm:$0xff] }
 0x1a5   :  { %4414 = vmatpush2.bf16.msra.mxu1 %v6095_v9  ;;  %4374 = vmatprep.subr.bf16.mxu0 %v5960_v10  ;;  %v1208_v62 = vld [vmem:[%s8809_s5 + $0xa70] sm:$0xff] }
 0x1a6   :  { %4415 = vmatprep.subr.bf16.mxu1 %v6088_v39  ;;  %v1332_v57 = vld [vmem:[%s8809_s5 + $0xe50] sm:$0xff]  ;;  %v5920_v8 = vcombine.high %v1204_v60, %v1208_v62  ;;  %v5919_v39 = vcombine.low %v1204_v60, %v1208_v62 }
 0x1a7   :  { %v1336_v1 = vld [vmem:[%s8809_s5 + $0xe70] sm:$0xff] }
 0x1a8   :  { %4375 = vmatpush2.bf16.msra.mxu0 %v5959_v15  ;;  %v6048_v40 = vcombine.high %v1332_v57, %v1336_v1  ;;  %v1196_v5 = vld [vmem:[%s8809_s5 + $0xa10] sm:$0xff]  ;;  %v6047_v11 = vcombine.low %v1332_v57, %v1336_v1  ;;  %v937_v15 = vld [vmem:[%s8809_s5 + $0x1f8] sm:$0xff] }
 0x1a9   :  { %4416 = vmatpush2.bf16.msra.mxu1 %v6087_v16  ;;  %4376 = vmatprep.subr.bf16.mxu0 %v5952_v17  ;;  %v1200_v6 = vld [vmem:[%s8809_s5 + $0xa30] sm:$0xff]  ;;  %v1061_v16 = vld [vmem:[%s8809_s5 + $0x5d8] sm:$0xff]  ;;  %v5650_v21 = vcombine.high %v933_v14, %v937_v15 }
 0x1aa   :  { %4417 = vmatprep.subr.bf16.mxu1 %v6080_v18  ;;  %v1324_v9 = vld [vmem:[%s8809_s5 + $0xe10] sm:$0xff]  ;;  %v5912_v12 = vcombine.high %v1196_v5, %v1200_v6  ;;  %v1065_v17 = vld [vmem:[%s8809_s5 + $0x5f8] sm:$0xff]  ;;  %v5911_v18 = vcombine.low %v1196_v5, %v1200_v6 }
 0x1ab   :  { %v1328_v10 = vld [vmem:[%s8809_s5 + $0xe30] sm:$0xff]  ;;  %v5778_v22 = vcombine.high %v1061_v16, %v1065_v17  ;;  %v5777_v30 = vcombine.low %v1061_v16, %v1065_v17  ;;  %v897_v17 = vld [vmem:[%s8809_s5 + $0xb8] sm:$0xff] }
 0x1ac   :  { %4377 = vmatpush2.bf16.msra.mxu0 %v5951_v25  ;;  %v6040_v13 = vcombine.high %v1324_v9, %v1328_v10  ;;  %v6039_v19 = vcombine.low %v1324_v9, %v1328_v10  ;;  %v929_v25 = vld [vmem:[%s8809_s5 + $0x1b8] sm:$0xff] }
 0x1ad   :  { %4418 = vmatpush2.bf16.msra.mxu1 %v6079_v41  ;;  %4378 = vmatprep.subr.bf16.mxu0 %v5944_v28  ;;  %v1053_v41 = vld [vmem:[%s8809_s5 + $0x598] sm:$0xff]  ;;  %v5642_v35 = vcombine.high %v925_v23, %v929_v25  ;;  %v5641_v49 = vcombine.low %v925_v23, %v929_v25 }
 0x1ae   :  { %4419 = vmatprep.subr.bf16.mxu1 %v6072_v24  ;;  %v1057_v28 = vld [vmem:[%s8809_s5 + $0x5b8] sm:$0xff]  ;;  %v5649_v24 = vcombine.low %v933_v14, %v937_v15 }
 0x1af   :  { %v905_v10 = vld [vmem:[%s8809_s5 + $0xf8] sm:$0xff] }
 0x1b0   :  { %4379 = vmatpush2.bf16.msra.mxu0 %v5943_v42  ;;  %v5770_v42 = vcombine.high %v1053_v41, %v1057_v28  ;;  %v893_v14 = vld [vmem:[%s8809_s5 + $0x98] sm:$0xff] }
 0x1b1   :  { %4420 = vmatpush2.bf16.msra.mxu1 %v6071_v43  ;;  %4380 = vmatprep.subr.bf16.mxu0 %v5936_v46  ;;  %v1045_v43 = vld [vmem:[%s8809_s5 + $0x558] sm:$0xff] }
 0x1b2   :  { %4421 = vmatprep.subr.bf16.mxu1 %v6064_v59  ;;  %v1049_v59 = vld [vmem:[%s8809_s5 + $0x578] sm:$0xff] }
 0x1b3   :  { %v5762_v62 = vcombine.high %v1045_v43, %v1049_v59  ;;  %v5761_v6 = vcombine.low %v1045_v43, %v1049_v59  ;;  %v885_v23 = vld [vmem:[%s8809_s5 + $0x58] sm:$0xff] }
 0x1b4   :  { %4381 = vmatpush2.bf16.msra.mxu0 %v5935_v58 }
 0x1b5   :  { %4422 = vmatpush2.bf16.msra.mxu1 %v6063_v20  ;;  %4382 = vmatprep.subr.bf16.mxu0 %v5928_v44  ;;  %v5769_v20 = vcombine.low %v1053_v41, %v1057_v28  ;;  %v5634_v44 = vcombine.high %v917_v36, %v921_v37  ;;  %v5610_v41 = vcombine.high %v893_v14, %v897_v17  ;;  %v889_v28 = vld [vmem:[%s8809_s5 + $0x78] sm:$0xff] }
 0x1b6   :  { %4423 = vmatprep.subr.bf16.mxu1 %v6056_v33  ;;  %v913_v33 = vld [vmem:[%s8809_s5 + $0x138] sm:$0xff]  ;;  %v5602_v43 = vcombine.high %v885_v23, %v889_v28 }
 0x1b7   :  { %v5626_v9 = vcombine.high %v909_v52, %v913_v33 }
 0x1b8   :  { %4383 = vmatpush2.bf16.msra.mxu0 %v5927_v2  ;;  %v1037_v2 = vld [vmem:[%s8809_s5 + $0x518] sm:$0xff] }
 0x1b9   :  { %4424 = vmatpush2.bf16.msra.mxu1 %v6055_v3  ;;  %4384 = vmatprep.subr.bf16.mxu0 %v5920_v8  ;;  %v1041_v3 = vld [vmem:[%s8809_s5 + $0x538] sm:$0xff] }
 0x1ba   :  { %4425 = vmatprep.subr.bf16.mxu1 %v6048_v40  ;;  %v5633_v40 = vcombine.low %v917_v36, %v921_v37  ;;  %v5753_v15 = vcombine.low %v1037_v2, %v1041_v3  ;;  %v5609_v36 = vcombine.low %v893_v14, %v897_v17  ;;  %v877_v37 = vld [vmem:[%s8809_s5 + $0x18] sm:$0xff] }
 0x1bb   :  { %v1113_v14 = vld [vmem:[%s8809_s5 + $0x778] sm:$0xff] }
 0x1bc   :  { %4385 = vmatpush2.bf16.msra.mxu0 %v5919_v39  ;;  %v973_v17 = vld [vmem:[%s8809_s5 + $0x318] sm:$0xff] }
 0x1bd   :  { %4426 = vmatpush2.bf16.msra.mxu1 %v6047_v11  ;;  %4386 = vmatprep.subr.bf16.mxu0 %v5912_v12  ;;  %v5754_v11 = vcombine.high %v1037_v2, %v1041_v3  ;;  %v1033_v12 = vld [vmem:[%s8809_s5 + $0x4f8] sm:$0xff] }
 0x1be   :  { %4427 = vmatprep.subr.bf16.mxu1 %v6040_v13  ;;  %v5625_v13 = vcombine.low %v909_v52, %v913_v33  ;;  %v5601_v52 = vcombine.low %v885_v23, %v889_v28  ;;  %v1001_v33 = vld [vmem:[%s8809_s5 + $0x3f8] sm:$0xff] }
 0x1bf   :  { %v989_v3 = vld [vmem:[%s8809_s5 + $0x398] sm:$0xff] }
 0x1c0   :  { %4387 = vmatpush2.bf16.msra.mxu0 %v5911_v18  ;;  %v1105_v23 = vld [vmem:[%s8809_s5 + $0x738] sm:$0xff] }
 0x1c1   :  { %4428 = vmatpush2.bf16.msra.mxu1 %v6039_v19  ;;  %4438 = vmatprep.subr.bf16.mxu0 %v5650_v21  ;;  %v1021_v19 = vld [vmem:[%s8809_s5 + $0x498] sm:$0xff] }
 0x1c2   :  { %4479 = vmatprep.subr.bf16.mxu1 %v5778_v22  ;;  %v1025_v21 = vld [vmem:[%s8809_s5 + $0x4b8] sm:$0xff] }
 0x1c3   :  { %v4144_v46 = vpop.f32.mrf.mxu0  ;;  %4389 = vmatmul.mubr.bf16.vlgmr.msra.gmra.mxu0 %v7325_v27  ;;  %v965_v28 = vld [vmem:[%s8809_s5 + $0x2d8] sm:$0xff] }
 0x1c4   :  { %v4185_v63 = vpop.f32.mrf.mxu1  ;;  %4430 = vmatmul.mubr.bf16.vlgmr.msra.gmra.mxu1 %v7333_v29  ;;  %4439 = vmatpush1.bf16.msra.mxu0 %v5649_v24  ;;  %v5738_v24 = vcombine.high %v1021_v19, %v1025_v21 }
 0x1c5   :  { %v8154_v54 = vadd.f32 %v4185_v63, %v4144_v46  ;;  %4480 = vmatpush1.bf16.msra.mxu1 %v5777_v30  ;;  %v4146_v58 = vpop.f32.mrf.mxu0  ;;  %4440 = vmatprep.subr.bf16.mxu0 %v5642_v35  ;;  %v1013_v30 = vld [vmem:[%s8809_s5 + $0x458] sm:$0xff] }
 0x1c6   :  { %v4187_v60 = vpop.f32.mrf.mxu1  ;;  %4481 = vmatprep.subr.bf16.mxu1 %v5770_v42  ;;  %4470 = vmatprep.mubr.bf16.mxu0 %v6969_v50  ;;  %v901_v50 = vld [vmem:[%s8809_s5 + $0xd8] sm:$0xff]  ;;  %v5737_v42 = vcombine.low %v1021_v19, %v1025_v21 }
 0x1c7   :  { %v8160_v57 = vadd.f32 %v4187_v60, %v4146_v58  ;;  %v4148_v1 = vpop.f32.mrf.mxu0  ;;  %4511 = vmatprep.mubr.bf16.mxu1 %v6971_v51  ;;  %v1029_v51 = vld [vmem:[%s8809_s5 + $0x4d8] sm:$0xff]  ;;  %v5618_v16 = vcombine.high %v901_v50, %v905_v10  ;;  %v5617_v22 = vcombine.low %v901_v50, %v905_v10 }
 0x1c8   :  { %v4189_v8 = vpop.f32.mrf.mxu1  ;;  %4441 = vmatpush1.bf16.msra.mxu0 %v5641_v49  ;;  %v5746_v18 = vcombine.high %v1029_v51, %v1033_v12  ;;  %v5745_v25 = vcombine.low %v1029_v51, %v1033_v12  ;;  %v1017_v35 = vld [vmem:[%s8809_s5 + $0x478] sm:$0xff] }
 0x1c9   :  { %4482 = vmatpush1.bf16.msra.mxu1 %v5769_v20  ;;  %v4149_v5 = vpop.f32.mrf.mxu0  ;;  %4442 = vmatprep.subr.bf16.mxu0 %v5634_v44  ;;  %v881_v46 = vld [vmem:[%s8809_s5 + $0x38] sm:$0xff]  ;;  %v5730_v59 = vcombine.high %v1013_v30, %v1017_v35  ;;  %v5729_v20 = vcombine.low %v1013_v30, %v1017_v35 }
 0x1ca   :  { %v4190_v39 = vpop.f32.mrf.mxu1  ;;  %4483 = vmatprep.subr.bf16.mxu1 %v5762_v62  ;;  %v1005_v63 = vld [vmem:[%s8809_s5 + $0x418] sm:$0xff]  ;;  %v5594_v44 = vcombine.high %v877_v37, %v881_v46  ;;  %v5593_v2 = vcombine.low %v877_v37, %v881_v46 }
 0x1cb   :  { %v1009_v49 = vld [vmem:[%s8809_s5 + $0x438] sm:$0xff] }
 0x1cc   :  { %4443 = vmatpush1.bf16.msra.mxu0 %v5633_v40  ;;  %v997_v58 = vld [vmem:[%s8809_s5 + $0x3d8] sm:$0xff]  ;;  %v5722_v60 = vcombine.high %v1005_v63, %v1009_v49  ;;  %v5721_v8 = vcombine.low %v1005_v63, %v1009_v49 }
 0x1cd   :  { %4484 = vmatpush1.bf16.msra.mxu1 %v5761_v6  ;;  %4444 = vmatprep.subr.bf16.mxu0 %v5626_v9  ;;  %v1125_v62 = vld [vmem:[%s8809_s5 + $0x7d8] sm:$0xff]  ;;  %v5714_v40 = vcombine.high %v997_v58, %v1001_v33  ;;  %v5713_v10 = vcombine.low %v997_v58, %v1001_v33 }
 0x1ce   :  { %4485 = vmatprep.subr.bf16.mxu1 %v5754_v11  ;;  %v1129_v1 = vld [vmem:[%s8809_s5 + $0x7f8] sm:$0xff] }
 0x1cf   :  { %v993_v50 = vld [vmem:[%s8809_s5 + $0x3b8] sm:$0xff]  ;;  %v5842_v5 = vcombine.high %v1125_v62, %v1129_v1  ;;  %v5841_v51 = vcombine.low %v1125_v62, %v1129_v1 }
 0x1d0   :  { %4445 = vmatpush1.bf16.msra.mxu0 %v5625_v13  ;;  %v1117_v6 = vld [vmem:[%s8809_s5 + $0x798] sm:$0xff]  ;;  %v5706_v12 = vcombine.high %v989_v3, %v993_v50 }
 0x1d1   :  { %4486 = vmatpush1.bf16.msra.mxu1 %v5753_v15  ;;  %4446 = vmatprep.subr.bf16.mxu0 %v5618_v16  ;;  %v1121_v9 = vld [vmem:[%s8809_s5 + $0x7b8] sm:$0xff]  ;;  %v5705_v16 = vcombine.low %v989_v3, %v993_v50 }
 0x1d2   :  { %4487 = vmatprep.subr.bf16.mxu1 %v5746_v18  ;;  %v981_v39 = vld [vmem:[%s8809_s5 + $0x358] sm:$0xff]  ;;  %v5834_v15 = vcombine.high %v1117_v6, %v1121_v9  ;;  %v5833_v19 = vcombine.low %v1117_v6, %v1121_v9 }
 0x1d3   :  { %v985_v11 = vld [vmem:[%s8809_s5 + $0x378] sm:$0xff] }
 0x1d4   :  { %4447 = vmatpush1.bf16.msra.mxu0 %v5617_v22  ;;  %v1109_v13 = vld [vmem:[%s8809_s5 + $0x758] sm:$0xff]  ;;  %v5698_v21 = vcombine.high %v981_v39, %v985_v11 }
 0x1d5   :  { %4488 = vmatpush1.bf16.msra.mxu1 %v5745_v25  ;;  %4448 = vmatprep.subr.bf16.mxu0 %v5610_v41  ;;  %v977_v18 = vld [vmem:[%s8809_s5 + $0x338] sm:$0xff]  ;;  %v5826_v25 = vcombine.high %v1109_v13, %v1113_v14  ;;  %v5697_v41 = vcombine.low %v981_v39, %v985_v11  ;;  %v5825_v30 = vcombine.low %v1109_v13, %v1113_v14 }
 0x1d6   :  { %4489 = vmatprep.subr.bf16.mxu1 %v5738_v24  ;;  %v1101_v22 = vld [vmem:[%s8809_s5 + $0x718] sm:$0xff]  ;;  %v5690_v35 = vcombine.high %v973_v17, %v977_v18 }
 0x1d7   :  { %v969_v24 = vld [vmem:[%s8809_s5 + $0x2f8] sm:$0xff]  ;;  %v5817_v63 = vcombine.low %v1101_v22, %v1105_v23 }
 0x1d8   :  { %4449 = vmatpush1.bf16.msra.mxu0 %v5609_v36  ;;  %v1093_v36 = vld [vmem:[%s8809_s5 + $0x6d8] sm:$0xff]  ;;  %v5682_v49 = vcombine.high %v965_v28, %v969_v24 }
 0x1d9   :  { %4490 = vmatpush1.bf16.msra.mxu1 %v5737_v42  ;;  %4450 = vmatprep.subr.bf16.mxu0 %v5602_v43  ;;  %v1097_v37 = vld [vmem:[%s8809_s5 + $0x6f8] sm:$0xff]  ;;  %v5818_v42 = vcombine.high %v1101_v22, %v1105_v23  ;;  %v5689_v43 = vcombine.low %v973_v17, %v977_v18 }
 0x1da   :  { %4491 = vmatprep.subr.bf16.mxu1 %v5730_v59  ;;  %v957_v46 = vld [vmem:[%s8809_s5 + $0x298] sm:$0xff]  ;;  %v5809_v62 = vcombine.low %v1093_v36, %v1097_v37 }
 0x1db   :  { %v961_v59 = vld [vmem:[%s8809_s5 + $0x2b8] sm:$0xff] }
 0x1dc   :  { %4451 = vmatpush1.bf16.msra.mxu0 %v5601_v52  ;;  %v1085_v52 = vld [vmem:[%s8809_s5 + $0x698] sm:$0xff]  ;;  %v5674_v1 = vcombine.high %v957_v46, %v961_v59 }
 0x1dd   :  { %4492 = vmatpush1.bf16.msra.mxu1 %v5729_v20  ;;  %4452 = vmatprep.subr.bf16.mxu0 %v5594_v44  ;;  %v1089_v58 = vld [vmem:[%s8809_s5 + $0x6b8] sm:$0xff]  ;;  %v5810_v20 = vcombine.high %v1093_v36, %v1097_v37  ;;  %v5681_v44 = vcombine.low %v965_v28, %v969_v24 }
 0x1de   :  { %4493 = vmatprep.subr.bf16.mxu1 %v5722_v60  ;;  %v949_v33 = vld [vmem:[%s8809_s5 + $0x258] sm:$0xff]  ;;  %v5801_v6 = vcombine.low %v1085_v52, %v1089_v58 }
 0x1df   :  { %v953_v60 = vld [vmem:[%s8809_s5 + $0x278] sm:$0xff] }
 0x1e0   :  { %4453 = vmatpush1.bf16.msra.mxu0 %v5593_v2  ;;  %v1077_v2 = vld [vmem:[%s8809_s5 + $0x658] sm:$0xff]  ;;  %v5666_v9 = vcombine.high %v949_v33, %v953_v60 }
 0x1e1   :  { %4494 = vmatpush1.bf16.msra.mxu1 %v5721_v8  ;;  %4454 = vmatprep.subr.bf16.mxu0 %v5714_v40  ;;  %v1081_v3 = vld [vmem:[%s8809_s5 + $0x678] sm:$0xff]  ;;  %v5802_v8 = vcombine.high %v1085_v52, %v1089_v58  ;;  %v5673_v40 = vcombine.low %v957_v46, %v961_v59 }
 0x1e2   :  { %4495 = vmatprep.subr.bf16.mxu1 %v5842_v5  ;;  %v941_v50 = vld [vmem:[%s8809_s5 + $0x218] sm:$0xff]  ;;  %v5794_v11 = vcombine.high %v1077_v2, %v1081_v3 }
 0x1e3   :  { %v945_v5 = vld [vmem:[%s8809_s5 + $0x238] sm:$0xff] }
 0x1e4   :  { %4455 = vmatpush2.bf16.msra.mxu0 %v5713_v10  ;;  %v1069_v10 = vld [vmem:[%s8809_s5 + $0x618] sm:$0xff]  ;;  %v5658_v13 = vcombine.high %v941_v50, %v945_v5 }
 0x1e5   :  { %4496 = vmatpush2.bf16.msra.mxu1 %v5841_v51  ;;  %4456 = vmatprep.subr.bf16.mxu0 %v5706_v12  ;;  %v1073_v39 = vld [vmem:[%s8809_s5 + $0x638] sm:$0xff]  ;;  %v5665_v51 = vcombine.low %v949_v33, %v953_v60  ;;  %v5793_v12 = vcombine.low %v1077_v2, %v1081_v3 }
 0x1e6   :  { %4497 = vmatprep.subr.bf16.mxu1 %v5834_v15  ;;  %v5786_v14 = vcombine.high %v1069_v10, %v1073_v39  ;;  %v1189_v15 = vld [vmem:[%s8809_s5 + $0x9d8] sm:$0xff] }
 0x1e7   :  { %v1317_v17 = vld [vmem:[%s8809_s5 + $0xdd8] sm:$0xff] }
 0x1e8   :  { %4457 = vmatpush2.bf16.msra.mxu0 %v5705_v16  ;;  %v1193_v16 = vld [vmem:[%s8809_s5 + $0x9f8] sm:$0xff] }
 0x1e9   :  { %4498 = vmatpush2.bf16.msra.mxu1 %v5833_v19  ;;  %4458 = vmatprep.subr.bf16.mxu0 %v5698_v21  ;;  %v1321_v18 = vld [vmem:[%s8809_s5 + $0xdf8] sm:$0xff]  ;;  %v5657_v19 = vcombine.low %v941_v50, %v945_v5  ;;  %v5785_v21 = vcombine.low %v1069_v10, %v1073_v39  ;;  %v5906_v22 = vcombine.high %v1189_v15, %v1193_v16 }
 0x1ea   :  { %4499 = vmatprep.subr.bf16.mxu1 %v5826_v25  ;;  %v6034_v23 = vcombine.high %v1317_v17, %v1321_v18  ;;  %v1181_v25 = vld [vmem:[%s8809_s5 + $0x998] sm:$0xff] }
 0x1eb   :  { %v1309_v28 = vld [vmem:[%s8809_s5 + $0xd98] sm:$0xff] }
 0x1ec   :  { %4459 = vmatpush2.bf16.msra.mxu0 %v5697_v41  ;;  %v1185_v41 = vld [vmem:[%s8809_s5 + $0x9b8] sm:$0xff] }
 0x1ed   :  { %4500 = vmatpush2.bf16.msra.mxu1 %v5825_v30  ;;  %4460 = vmatprep.subr.bf16.mxu0 %v5690_v35  ;;  %v1313_v24 = vld [vmem:[%s8809_s5 + $0xdb8] sm:$0xff]  ;;  %v5905_v30 = vcombine.low %v1189_v15, %v1193_v16  ;;  %v6033_v35 = vcombine.low %v1317_v17, %v1321_v18  ;;  %v5898_v36 = vcombine.high %v1181_v25, %v1185_v41 }
 0x1ee   :  { %4501 = vmatprep.subr.bf16.mxu1 %v5818_v42  ;;  %v6026_v37 = vcombine.high %v1309_v28, %v1313_v24  ;;  %v1173_v42 = vld [vmem:[%s8809_s5 + $0x958] sm:$0xff]  ;;  %v5897_v58 = vcombine.low %v1181_v25, %v1185_v41 }
 0x1ef   :  { %v1301_v59 = vld [vmem:[%s8809_s5 + $0xd58] sm:$0xff] }
 0x1f0   :  { %4461 = vmatpush2.bf16.msra.mxu0 %v5689_v43  ;;  %v1177_v43 = vld [vmem:[%s8809_s5 + $0x978] sm:$0xff] }
 0x1f1   :  { %4502 = vmatpush2.bf16.msra.mxu1 %v5817_v63  ;;  %4462 = vmatprep.subr.bf16.mxu0 %v5682_v49  ;;  %v1305_v63 = vld [vmem:[%s8809_s5 + $0xd78] sm:$0xff] }
 0x1f2   :  { %4503 = vmatprep.subr.bf16.mxu1 %v5810_v20  ;;  %v1293_v2 = vld [vmem:[%s8809_s5 + $0xd18] sm:$0xff]  ;;  %v6017_v5 = vcombine.low %v1301_v59, %v1305_v63 }
 0x1f3   :  { %v1297_v3 = vld [vmem:[%s8809_s5 + $0xd38] sm:$0xff] }
 0x1f4   :  { %4463 = vmatpush2.bf16.msra.mxu0 %v5681_v44  ;;  %v5890_v44 = vcombine.high %v1173_v42, %v1177_v43  ;;  %v1157_v10 = vld [vmem:[%s8809_s5 + $0x8d8] sm:$0xff] }
 0x1f5   :  { %4504 = vmatpush2.bf16.msra.mxu1 %v5809_v62  ;;  %4464 = vmatprep.subr.bf16.mxu0 %v5674_v1  ;;  %v6018_v62 = vcombine.high %v1301_v59, %v1305_v63  ;;  %v1161_v39 = vld [vmem:[%s8809_s5 + $0x8f8] sm:$0xff] }
 0x1f6   :  { %4505 = vmatprep.subr.bf16.mxu1 %v5802_v8  ;;  %v1149_v15 = vld [vmem:[%s8809_s5 + $0x898] sm:$0xff] }
 0x1f7   :  { %v1153_v16 = vld [vmem:[%s8809_s5 + $0x8b8] sm:$0xff] }
 0x1f8   :  { %4465 = vmatpush2.bf16.msra.mxu0 %v5673_v40  ;;  %v5889_v40 = vcombine.low %v1173_v42, %v1177_v43  ;;  %v1277_v17 = vld [vmem:[%s8809_s5 + $0xc98] sm:$0xff] }
 0x1f9   :  { %4506 = vmatpush2.bf16.msra.mxu1 %v5801_v6  ;;  %4466 = vmatprep.subr.bf16.mxu0 %v5666_v9  ;;  %v6010_v9 = vcombine.high %v1293_v2, %v1297_v3  ;;  %v1281_v18 = vld [vmem:[%s8809_s5 + $0xcb8] sm:$0xff] }
 0x1fa   :  { %4507 = vmatprep.subr.bf16.mxu1 %v5794_v11  ;;  %v1289_v11 = vld [vmem:[%s8809_s5 + $0xcf8] sm:$0xff] }
 0x1fb   :  { %v1141_v25 = vld [vmem:[%s8809_s5 + $0x858] sm:$0xff] }
 0x1fc   :  { %4467 = vmatpush2.bf16.msra.mxu0 %v5665_v51  ;;  %v1145_v41 = vld [vmem:[%s8809_s5 + $0x878] sm:$0xff] }
 0x1fd   :  { %4508 = vmatpush2.bf16.msra.mxu1 %v5793_v12  ;;  %4468 = vmatprep.subr.bf16.mxu0 %v5658_v13  ;;  %v6009_v12 = vcombine.low %v1293_v2, %v1297_v3  ;;  %v5874_v13 = vcombine.high %v1157_v10, %v1161_v39  ;;  %v1133_v42 = vld [vmem:[%s8809_s5 + $0x818] sm:$0xff]  ;;  %v5857_v63 = vcombine.low %v1141_v25, %v1145_v41 }
 0x1fe   :  { %4509 = vmatprep.subr.bf16.mxu1 %v5786_v14  ;;  %v1137_v43 = vld [vmem:[%s8809_s5 + $0x838] sm:$0xff] }
 0x1ff   :  { %v1265_v59 = vld [vmem:[%s8809_s5 + $0xc38] sm:$0xff] }
 0x200   :  { %4469 = vmatpush2.bf16.msra.mxu0 %v5657_v19  ;;  %v5873_v19 = vcombine.low %v1157_v10, %v1161_v39  ;;  %v1237_v39 = vld [vmem:[%s8809_s5 + $0xb58] sm:$0xff] }
 0x201   :  { %4510 = vmatpush2.bf16.msra.mxu1 %v5785_v21  ;;  %4520 = vmatprep.subr.bf16.mxu0 %v5906_v22  ;;  %v5866_v22 = vcombine.high %v1149_v15, %v1153_v16 }
 0x202   :  { %4561 = vmatprep.subr.bf16.mxu1 %v6034_v23  ;;  %v5994_v23 = vcombine.high %v1277_v17, %v1281_v18 }
 0x203   :  { %v4226_v46 = vpop.f32.mrf.mxu0  ;;  %4471 = vmatmul.mubr.bf16.vlgmr.msra.gmra.mxu0 %v7119_v47  ;;  %v6025_v47 = vcombine.low %v1309_v28, %v1313_v24  ;;  %v1269_v28 = vld [vmem:[%s8809_s5 + $0xc58] sm:$0xff] }
 0x204   :  { %v4227_v49 = vadd.f32 %v4226_v46, %v8154_v54  ;;  %v4267_v52 = vpop.f32.mrf.mxu1  ;;  %4512 = vmatmul.mubr.bf16.vlgmr.msra.gmra.mxu1 %v7127_v53  ;;  %4521 = vmatpush1.bf16.msra.mxu0 %v5905_v30  ;;  %v1165_v54 = vld [vmem:[%s8809_s5 + $0x918] sm:$0xff]  ;;  %v5865_v30 = vcombine.low %v1149_v15, %v1153_v16 }
 0x205   :  { %4562 = vmatpush1.bf16.msra.mxu1 %v6033_v35  ;;  %v8352_v20 = vpop.f32.mrf.mxu0  ;;  %4522 = vmatprep.subr.bf16.mxu0 %v5898_v36  ;;  %v1169_v53 = vld [vmem:[%s8809_s5 + $0x938] sm:$0xff]  ;;  %v5993_v35 = vcombine.low %v1277_v17, %v1281_v18  ;;  %v5858_v36 = vcombine.high %v1141_v25, %v1145_v41 }
 0x206   :  { %v8354_v33 = vadd.f32 %v4267_v52, %v4227_v49  ;;  %v8356_v60 = vpop.f32.mrf.mxu1  ;;  %4563 = vmatprep.subr.bf16.mxu1 %v6026_v37  ;;  %4552 = vmatprep.mubr.bf16.mxu0 %v7135_v61  ;;  %v5882_v6 = vcombine.high %v1165_v54, %v1169_v53  ;;  %v5881_v51 = vcombine.low %v1165_v54, %v1169_v53  ;;  %v1273_v24 = vld [vmem:[%s8809_s5 + $0xc78] sm:$0xff] }
 0x207   :  { %v4230_v1 = vpop.f32.mrf.mxu0  ;;  %4593 = vmatprep.mubr.bf16.mxu1 %v7144_v0  ;;  %v1285_v0 = vld [vmem:[%s8809_s5 + $0xcd8] sm:$0xff]  ;;  %v5986_v37 = vcombine.high %v1269_v28, %v1273_v24  ;;  %v5985_v49 = vcombine.low %v1269_v28, %v1273_v24  ;;  %v5850_v52 = vcombine.high %v1133_v42, %v1137_v43  ;;  %v5849_v53 = vcombine.low %v1133_v42, %v1137_v43 }
 0x208   :  { %v4271_v8 = vpop.f32.mrf.mxu1  ;;  %4523 = vmatpush1.bf16.msra.mxu0 %v5897_v58  ;;  %v6002_v14 = vcombine.high %v1285_v0, %v1289_v11  ;;  %v6001_v21 = vcombine.low %v1285_v0, %v1289_v11  ;;  %v1261_v46 = vld [vmem:[%s8809_s5 + $0xc18] sm:$0xff] }
 0x209   :  { %4564 = vmatpush1.bf16.msra.mxu1 %v6025_v47  ;;  %v4231_v50 = vpop.f32.mrf.mxu0  ;;  %4524 = vmatprep.subr.bf16.mxu0 %v5890_v44  ;;  %v5978_v58 = vcombine.high %v1261_v46, %v1265_v59  ;;  %v1253_v47 = vld [vmem:[%s8809_s5 + $0xbd8] sm:$0xff]  ;;  %v5977_v1 = vcombine.low %v1261_v46, %v1265_v59 }
 0x20a   :  { %v4272_v61 = vpop.f32.mrf.mxu1  ;;  %4565 = vmatprep.subr.bf16.mxu1 %v6018_v62  ;;  %v1257_v44 = vld [vmem:[%s8809_s5 + $0xbf8] sm:$0xff] }
 0x20b   :  { %v1381_v62 = vld [vmem:[%s8809_s5 + $0xfd8] sm:$0xff]  ;;  %v5970_v2 = vcombine.high %v1253_v47, %v1257_v44 }
 0x20c   :  { %4525 = vmatpush1.bf16.msra.mxu0 %v5889_v40  ;;  %v1385_v54 = vld [vmem:[%s8809_s5 + $0xff8] sm:$0xff] }
 0x20d   :  { %4566 = vmatpush1.bf16.msra.mxu1 %v6017_v5  ;;  %4526 = vmatprep.subr.bf16.mxu0 %v5882_v6  ;;  %v6098_v3 = vcombine.high %v1381_v62, %v1385_v54  ;;  %v1245_v8 = vld [vmem:[%s8809_s5 + $0xb98] sm:$0xff]  ;;  %v5969_v6 = vcombine.low %v1253_v47, %v1257_v44  ;;  %v6097_v61 = vcombine.low %v1381_v62, %v1385_v54  ;;  %v8497_v44 = vld [vmem:[%s8814_s6] sm:$0xff] }
 0x20e   :  { %4567 = vmatprep.subr.bf16.mxu1 %v6010_v9  ;;  %v1249_v40 = vld [vmem:[%s8809_s5 + $0xbb8] sm:$0xff] }
 0x20f   :  { %v1373_v50 = vld [vmem:[%s8809_s5 + $0xf98] sm:$0xff]  ;;  %v5962_v9 = vcombine.high %v1245_v8, %v1249_v40 }
 0x210   :  { %4527 = vmatpush1.bf16.msra.mxu0 %v5881_v51  ;;  %v1377_v5 = vld [vmem:[%s8809_s5 + $0xfb8] sm:$0xff] }
 0x211   :  { %4568 = vmatpush1.bf16.msra.mxu1 %v6009_v12  ;;  %4528 = vmatprep.subr.bf16.mxu0 %v5874_v13  ;;  %v6090_v10 = vcombine.high %v1373_v50, %v1377_v5  ;;  %v1241_v0 = vld [vmem:[%s8809_s5 + $0xb78] sm:$0xff]  ;;  %v5961_v12 = vcombine.low %v1245_v8, %v1249_v40  ;;  %v6089_v13 = vcombine.low %v1373_v50, %v1377_v5  ;;  %v8519_v5 = vld [vmem:[%s8815_s7] sm:$0xff] }
 0x212   :  { %4569 = vmatprep.subr.bf16.mxu1 %v6002_v14  ;;  %v1365_v11 = vld [vmem:[%s8809_s5 + $0xf58] sm:$0xff]  ;;  %v5954_v14 = vcombine.high %v1237_v39, %v1241_v0 }
 0x213   :  { %v1369_v51 = vld [vmem:[%s8809_s5 + $0xf78] sm:$0xff] }
 0x214   :  { %4529 = vmatpush1.bf16.msra.mxu0 %v5873_v19  ;;  %v6082_v15 = vcombine.high %v1365_v11, %v1369_v51  ;;  %v1229_v16 = vld [vmem:[%s8809_s5 + $0xb18] sm:$0xff] }
 0x215   :  { %4570 = vmatpush1.bf16.msra.mxu1 %v6001_v21  ;;  %4530 = vmatprep.subr.bf16.mxu0 %v5866_v22  ;;  %v1233_v17 = vld [vmem:[%s8809_s5 + $0xb38] sm:$0xff]  ;;  %v5953_v21 = vcombine.low %v1237_v39, %v1241_v0  ;;  %v6081_v22 = vcombine.low %v1365_v11, %v1369_v51  ;;  %v4669_v51 = vrot.slane %v8519_v5, %v6894_v56 }
 0x216   :  { %4571 = vmatprep.subr.bf16.mxu1 %v5994_v23  ;;  %v1357_v18 = vld [vmem:[%s8809_s5 + $0xf18] sm:$0xff]  ;;  %v5946_v23 = vcombine.high %v1229_v16, %v1233_v17 }
 0x217   :  { %v1361_v19 = vld [vmem:[%s8809_s5 + $0xf38] sm:$0xff] }
 0x218   :  { %4531 = vmatpush1.bf16.msra.mxu0 %v5865_v30  ;;  %v6074_v25 = vcombine.high %v1357_v18, %v1361_v19  ;;  %v1221_v41 = vld [vmem:[%s8809_s5 + $0xad8] sm:$0xff] }
 0x219   :  { %4572 = vmatpush1.bf16.msra.mxu1 %v5993_v35  ;;  %4532 = vmatprep.subr.bf16.mxu0 %v5858_v36  ;;  %v1225_v28 = vld [vmem:[%s8809_s5 + $0xaf8] sm:$0xff]  ;;  %v5945_v35 = vcombine.low %v1229_v16, %v1233_v17  ;;  %v6073_v36 = vcombine.low %v1357_v18, %v1361_v19 }
 0x21a   :  { %4573 = vmatprep.subr.bf16.mxu1 %v5986_v37  ;;  %v1349_v24 = vld [vmem:[%s8809_s5 + $0xed8] sm:$0xff]  ;;  %v5938_v37 = vcombine.high %v1221_v41, %v1225_v28 }
 0x21b   :  { %v1353_v30 = vld [vmem:[%s8809_s5 + $0xef8] sm:$0xff] }
 0x21c   :  { %4533 = vmatpush1.bf16.msra.mxu0 %v5857_v63  ;;  %v6066_v42 = vcombine.high %v1349_v24, %v1353_v30  ;;  %v1213_v43 = vld [vmem:[%s8809_s5 + $0xa98] sm:$0xff] }
 0x21d   :  { %4574 = vmatpush1.bf16.msra.mxu1 %v5985_v49  ;;  %4534 = vmatprep.subr.bf16.mxu0 %v5850_v52  ;;  %v1217_v46 = vld [vmem:[%s8809_s5 + $0xab8] sm:$0xff]  ;;  %v4229_v49 = vadd.f32 %v8352_v20, %v8160_v57  ;;  %v5937_v52 = vcombine.low %v1221_v41, %v1225_v28  ;;  %v4611_v20 = vrot.slane %v8497_v44, %v6891_v55 }
 0x21e   :  { %4575 = vmatprep.subr.bf16.mxu1 %v5978_v58  ;;  %v1341_v59 = vld [vmem:[%s8809_s5 + $0xe98] sm:$0xff]  ;;  %v6065_v58 = vcombine.low %v1349_v24, %v1353_v30  ;;  %v5930_v47 = vcombine.high %v1213_v43, %v1217_v46  ;;  %v5929_v8 = vcombine.low %v1213_v43, %v1217_v46  ;;  %v6456_v24 = vld [vmem:[%s8813_s8 + $0xf0] sm:$0xff]   ;;  %v6460_v46 = vld [vmem:[%s8813_s8 + $0xe8] sm:$0xff]  }
 0x21f   :  { %v1345_v63 = vld [vmem:[%s8809_s5 + $0xeb8] sm:$0xff] }
 0x220   :  { %4535 = vmatpush1.bf16.msra.mxu0 %v5849_v53  ;;  %v6058_v62 = vcombine.high %v1341_v59, %v1345_v63  ;;  %v1205_v54 = vld [vmem:[%s8809_s5 + $0xa58] sm:$0xff]  ;;  %v6057_v40 = vcombine.low %v1341_v59, %v1345_v63 }
 0x221   :  { %4576 = vmatpush1.bf16.msra.mxu1 %v5977_v1  ;;  %4536 = vmatprep.subr.bf16.mxu0 %v5970_v2  ;;  %v1209_v57 = vld [vmem:[%s8809_s5 + $0xa78] sm:$0xff]  ;;  %v4270_v2 = vadd.f32 %v8356_v60, %v4229_v49  ;;  %v6461_v49 = vld [vmem:[%s8813_s8 + $0x28] sm:$0xff]  }
 0x222   :  { %4577 = vmatprep.subr.bf16.mxu1 %v6098_v3  ;;  %v1333_v53 = vld [vmem:[%s8809_s5 + $0xe58] sm:$0xff]  ;;  %v4619_v3 = vrot.slane %v8497_v44, %v6894_v56  ;;  %v5922_v50 = vcombine.high %v1205_v54, %v1209_v57 }
 0x223   :  { %v1337_v1 = vld [vmem:[%s8809_s5 + $0xe78] sm:$0xff] }
 0x224   :  { %4537 = vmatpush2.bf16.msra.mxu0 %v5969_v6  ;;  %v6050_v6 = vcombine.high %v1333_v53, %v1337_v1  ;;  %v1197_v60 = vld [vmem:[%s8809_s5 + $0xa18] sm:$0xff]  ;;  %v4647_v11 = vmul.f32 %v4619_v3, %v4270_v2  ;;  %v4607_v3 = vrot.slane %v8497_v44, %v7018_v26 }
 0x225   :  { %4578 = vmatpush2.bf16.msra.mxu1 %v6097_v61  ;;  %4538 = vmatprep.subr.bf16.mxu0 %v5962_v9  ;;  %v1201_v61 = vld [vmem:[%s8809_s5 + $0xa38] sm:$0xff]  ;;  %v4645_v9 = vmul.f32 %v4611_v20, %v7967_v7  ;;  %v6049_v7 = vcombine.low %v1333_v53, %v1337_v1  ;;  %v6466_v20 = vld [vmem:[%s8813_s8 + $0xa0] sm:$0xff]  }
 0x226   :  { %4579 = vmatprep.subr.bf16.mxu1 %v6090_v10  ;;  %v4661_v10 = vrot.slane %v8519_v5, %v6891_v55  ;;  %v1325_v39 = vld [vmem:[%s8809_s5 + $0xe18] sm:$0xff]  ;;  %v5913_v16 = vcombine.low %v1197_v60, %v1201_v61 }
 0x227   :  { %v1329_v0 = vld [vmem:[%s8809_s5 + $0xe38] sm:$0xff] }
 0x228   :  { %4539 = vmatpush2.bf16.msra.mxu0 %v5961_v12  ;;  %v5921_v12 = vcombine.low %v1205_v54, %v1209_v57  ;;  %v6042_v55 = vcombine.high %v1325_v39, %v1329_v0  ;;  %v6041_v17 = vcombine.low %v1325_v39, %v1329_v0  ;;  %v6451_v18 = vld [vmem:[%s8813_s8 + $0x78] sm:$0xff]   ;;  %v6464_v54 = vld [vmem:[%s8813_s8 + $0xe0] sm:$0xff]   ;;  %v6475_v39 = vld [vmem:[%s8813_s8 + $0x48] sm:$0xff]  }
 0x229   :  { %4580 = vmatpush2.bf16.msra.mxu1 %v6089_v13  ;;  %4540 = vmatprep.subr.bf16.mxu0 %v5954_v14  ;;  %v5914_v13 = vcombine.high %v1197_v60, %v1201_v61  ;;  %v4695_v14 = vadd.f32 %v4661_v10, %v4645_v9  ;;  %v6452_v56 = vld [vmem:[%s8813_s8 + $0xf8] sm:$0xff]   ;;  %v6465_v57 = vld [vmem:[%s8813_s8 + $0x20] sm:$0xff]   ;;  %v6473_v60 = vld [vmem:[%s8813_s8 + $0x10] sm:$0xff]   ;;  %v4644_v61 = vmul.f32 %v4607_v3, %v7950_v32 }
 0x22a   :  { %4581 = vmatprep.subr.bf16.mxu1 %v6082_v15  ;;  %v4697_v15 = vadd.f32 %v4669_v51, %v4647_v11  ;;  %v6467_v53 = vld [vmem:[%s8813_s8 + $0x58] sm:$0xff]   ;;  %v4657_v9 = vrot.slane %v8519_v5, %v7018_v26  ;;  %v6474_v10 = vld [vmem:[%s8813_s8 + $0x90] sm:$0xff]   ;;  %v4665_v11 = vrot.slane %v8519_v5, %v7031_v31  ;;  %v6476_v26 = vld [vmem:[%s8813_s8 + $0xc8] sm:$0xff]   ;;  %v4623_v3 = vrot.slane %v8497_v44, %v6856_v34 }
 0x22b   :  { %v4703_v19 = vmax.f32 %v4695_v14, 0.0  ;;  %v6468_v1 = vld [vmem:[%s8813_s8 + $0xd8] sm:$0xff]   ;;  %v6477_v32 = vld [vmem:[%s8813_s8 + $0x8] sm:$0xff]   ;;  %v6482_v14 = vld [vmem:[%s8813_s8 + $0x80] sm:$0xff]  }
 0x22c   :  { %4541 = vmatpush2.bf16.msra.mxu0 %v5953_v21  ;;  %v6453_v21 = vld [vmem:[%s8813_s8 + $0x38] sm:$0xff]   ;;  %v4694_v51 = vadd.f32 %v4657_v9, %v4644_v61 }
 0x22d   :  { %4582 = vmatpush2.bf16.msra.mxu1 %v6081_v22  ;;  %4542 = vmatprep.subr.bf16.mxu0 %v5946_v23  ;;  %v4705_v22 = vmax.f32 %v4697_v15, 0.0  ;;  %v6454_v23 = vld [vmem:[%s8813_s8 + $0xb8] sm:$0xff]   ;;  %v4711_v28 = vpack.c.bf16 %v4703_v19, %v4703_v19  ;;  %v6485_v19 = vld [vmem:[%s8813_s8 + $0x170] sm:$0xff]  }
 0x22e   :  { %4583 = vmatprep.subr.bf16.mxu1 %v6074_v25  ;;  %v6455_v25 = vld [vmem:[%s8813_s8 + $0x70] sm:$0xff]   ;;  %v6469_v2 = vld [vmem:[%s8813_s8 + $0x18] sm:$0xff]  }
 0x22f   :  { %v6483_v15 = vld [vmem:[%s8813_s8 + $0x178] sm:$0xff]  }
 0x230   :  { %4543 = vmatpush2.bf16.msra.mxu0 %v5945_v35  ;;  %v4713_v35 = vpack.c.bf16 %v4705_v22, %v4705_v22 }
 0x231   :  { %4584 = vmatpush2.bf16.msra.mxu1 %v6073_v36  ;;  %4544 = vmatprep.subr.bf16.mxu0 %v5938_v37  ;;  %v6457_v36 = vld [vmem:[%s8813_s8 + $0x30] sm:$0xff]  }
 0x232   :  { %4585 = vmatprep.subr.bf16.mxu1 %v6066_v42 }
 0x234   :  { %4545 = vmatpush2.bf16.msra.mxu0 %v5937_v52 }
 0x235   :  { %4586 = vmatpush2.bf16.msra.mxu1 %v6065_v58  ;;  %4546 = vmatprep.subr.bf16.mxu0 %v5930_v47  ;;  %v6462_v58 = vld [vmem:[%s8813_s8 + $0xa8] sm:$0xff]   ;;  %v6463_v47 = vld [vmem:[%s8813_s8 + $0x60] sm:$0xff]  }
 0x236   :  { %4587 = vmatprep.subr.bf16.mxu1 %v6058_v62 }
 0x238   :  { %4547 = vmatpush2.bf16.msra.mxu0 %v5929_v8  ;;  %v6470_v8 = vld [vmem:[%s8813_s8 + $0x98] sm:$0xff]  }
 0x239   :  { %4588 = vmatpush2.bf16.msra.mxu1 %v6057_v40  ;;  %4548 = vmatprep.subr.bf16.mxu0 %v5922_v50  ;;  %v6471_v40 = vld [vmem:[%s8813_s8 + $0x50] sm:$0xff]   ;;  %v4615_v50 = vrot.slane %v8497_v44, %v7031_v31  ;;  %v6479_v31 = vld [vmem:[%s8813_s8 + $0x40] sm:$0xff]  }
 0x23a   :  { %4589 = vmatprep.subr.bf16.mxu1 %v6050_v6  ;;  %v6472_v6 = vld [vmem:[%s8813_s8 + $0xd0] sm:$0xff]  }
 0x23b   :  { %v4646_v0 = vmul.f32 %v4615_v50, %v8354_v33  ;;  %v6478_v33 = vld [vmem:[%s8813_s8 + $0x88] sm:$0xff]  }
 0x23c   :  { %4549 = vmatpush2.bf16.msra.mxu0 %v5921_v12 }
 0x23d   :  { %4590 = vmatpush2.bf16.msra.mxu1 %v6049_v7  ;;  %4550 = vmatprep.subr.bf16.mxu0 %v5914_v13  ;;  %v4696_v12 = vadd.f32 %v4665_v11, %v4646_v0  ;;  %v6480_v7 = vld [vmem:[%s8813_s8 + $0xc0] sm:$0xff]  }
 0x23e   :  { %4591 = vmatprep.subr.bf16.mxu1 %v6042_v55  ;;  %v6481_v13 = vld [vmem:[%s8813_s8] sm:$0xff]   ;;  %v4702_v55 = vmax.f32 %v4694_v51, 0.0 }
 0x240   :  { %4551 = vmatpush2.bf16.msra.mxu0 %v5913_v16  ;;  %v4704_v16 = vmax.f32 %v4696_v12, 0.0 }
 0x241   :  { %4592 = vmatpush2.bf16.msra.mxu1 %v6041_v17  ;;  %6260 = vmatprep.subr.bf16.mxu0 %v6451_v18  ;;  %v6499_v17 = vld [vmem:[%s8813_s8 + $0x1f8] sm:$0xff]  }
 0x242   :  { %6282 = vmatprep.subr.bf16.mxu1 %v6452_v56  ;;  %v6484_v18 = vld [vmem:[%s8813_s8 + $0x138] sm:$0xff]   ;;  %v4710_v56 = vpack.c.bf16 %v4702_v55, %v4702_v55  ;;  %v4712_v22 = vpack.c.bf16 %v4704_v16, %v4704_v16  ;;  %v6514_v55 = vld [vmem:[%s8813_s8 + $0x180] sm:$0xff]  }
 0x243   :  { %v4308_v41 = vpop.f32.mrf.mxu0  ;;  %4553 = vmatmul.mubr.bf16.vlgmr.msra.gmra.mxu0 %v7325_v27  ;;  %v6458_v27 = vld [vmem:[%s8813_s8 + $0xb0] sm:$0xff]  }
 0x244   :  { %v4349_v30 = vpop.f32.mrf.mxu1  ;;  %4594 = vmatmul.mubr.bf16.vlgmr.msra.gmra.mxu1 %v7333_v29  ;;  %6261 = vmatpush3.bf16.msra.mxu0 %v6453_v21  ;;  %v6459_v29 = vld [vmem:[%s8813_s8 + $0x68] sm:$0xff]   ;;  %v6500_v21 = vld [vmem:[%s8813_s8 + $0x1b8] sm:$0xff]  }
 0x245   :  { %v8561_v37 = vadd.f32 %v4349_v30, %v4308_v41  ;;  %5262 = vmatprep.mubr.bf16.mxu0 %v4711_v28  ;;  %6283 = vmatpush3.bf16.msra.mxu1 %v6454_v23  ;;  %v8563_v42 = vpop.f32.mrf.mxu0  ;;  %v6501_v23 = vld [vmem:[%s8813_s8 + $0x1f0] sm:$0xff]   ;;  %v6487_v41 = vld [vmem:[%s8813_s8 + $0x168] sm:$0xff]  }
 0x246   :  { %5302 = vmatprep.mubr.bf16.mxu1 %v4713_v35  ;;  %v8571_v43 = vpop.f32.mrf.mxu1  ;;  %6262 = vmatprep.subr.bf16.mxu0 %v6455_v25  ;;  %v6486_v25 = vld [vmem:[%s8813_s8 + $0x130] sm:$0xff]   ;;  %v6488_v30 = vld [vmem:[%s8813_s8 + $0x128] sm:$0xff]   ;;  %v6489_v35 = vld [vmem:[%s8813_s8 + $0x160] sm:$0xff]  }
 0x247   :  { %v4312_v59 = vpop.f32.mrf.mxu0  ;;  %6284 = vmatprep.subr.bf16.mxu1 %v6456_v24  ;;  %v6502_v28 = vld [vmem:[%s8813_s8 + $0x1b0] sm:$0xff]   ;;  %v6503_v24 = vld [vmem:[%s8813_s8 + $0x1e8] sm:$0xff]  }
 0x248   :  { %v4353_v63 = vpop.f32.mrf.mxu1  ;;  %6263 = vmatpush3.bf16.msra.mxu0 %v6457_v36  ;;  %v6504_v36 = vld [vmem:[%s8813_s8 + $0x1a8] sm:$0xff]   ;;  %v6506_v59 = vld [vmem:[%s8813_s8 + $0x1a0] sm:$0xff]  }
 0x249   :  { %6285 = vmatpush3.bf16.msra.mxu1 %v6458_v27  ;;  %v4313_v52 = vpop.f32.mrf.mxu0  ;;  %6264 = vmatprep.subr.bf16.mxu0 %v6459_v29  ;;  %v6505_v27 = vld [vmem:[%s8813_s8 + $0x1e0] sm:$0xff]   ;;  %v6492_v63 = vld [vmem:[%s8813_s8 + $0x118] sm:$0xff]  }
 0x24a   :  { %v4354_v62 = vpop.f32.mrf.mxu1  ;;  %6286 = vmatprep.subr.bf16.mxu1 %v6460_v46  ;;  %v6490_v29 = vld [vmem:[%s8813_s8 + $0x120] sm:$0xff]   ;;  %v6491_v46 = vld [vmem:[%s8813_s8 + $0x158] sm:$0xff]   ;;  %v6494_v52 = vld [vmem:[%s8813_s8 + $0x110] sm:$0xff]  }
 0x24b   :  { %v6497_v62 = vld [vmem:[%s8813_s8 + $0x140] sm:$0xff]  }
 0x24c   :  { %6265 = vmatpush3.bf16.msra.mxu0 %v6461_v49  ;;  %v6493_v49 = vld [vmem:[%s8813_s8 + $0x150] sm:$0xff]  }
 0x24d   :  { %6287 = vmatpush3.bf16.msra.mxu1 %v6462_v58  ;;  %6266 = vmatprep.subr.bf16.mxu0 %v6463_v47  ;;  %v6495_v58 = vld [vmem:[%s8813_s8 + $0x148] sm:$0xff]  }
 0x24e   :  { %6288 = vmatprep.subr.bf16.mxu1 %v6464_v54  ;;  %v6496_v47 = vld [vmem:[%s8813_s8 + $0x108] sm:$0xff]   ;;  %v6498_v54 = vld [vmem:[%s8813_s8 + $0x100] sm:$0xff]  }
 0x250   :  { %6267 = vmatpush3.bf16.msra.mxu0 %v6465_v57 }
 0x251   :  { %6289 = vmatpush3.bf16.msra.mxu1 %v6466_v20  ;;  %6268 = vmatprep.subr.bf16.mxu0 %v6467_v53  ;;  %v6507_v20 = vld [vmem:[%s8813_s8 + $0x1d8] sm:$0xff]   ;;  %v4352_v53 = vadd.f32 %v8571_v43, %v8563_v42  ;;  %v4627_v42 = vrot.slane %v8497_v44, %v7046_v45  ;;  %v6509_v43 = vld [vmem:[%s8813_s8 + $0x1d0] sm:$0xff]  }
 0x252   :  { %6290 = vmatprep.subr.bf16.mxu1 %v6468_v1 }
 0x254   :  { %6269 = vmatpush3.bf16.msra.mxu0 %v6469_v2 }
 0x255   :  { %6291 = vmatpush3.bf16.msra.mxu1 %v6470_v8  ;;  %6270 = vmatprep.subr.bf16.mxu0 %v6471_v40  ;;  %v6508_v8 = vld [vmem:[%s8813_s8 + $0x198] sm:$0xff]  }
 0x256   :  { %6292 = vmatprep.subr.bf16.mxu1 %v6472_v6  ;;  %v4673_v6 = vrot.slane %v8519_v5, %v6856_v34  ;;  %v6510_v34 = vld [vmem:[%s8813_s8 + $0x190] sm:$0xff]  }
 0x258   :  { %6271 = vmatpush3.bf16.msra.mxu0 %v6473_v60 }
 0x259   :  { %6293 = vmatpush3.bf16.msra.mxu1 %v6474_v10  ;;  %6272 = vmatprep.subr.bf16.mxu0 %v6475_v39  ;;  %v4677_v39 = vrot.slane %v8519_v5, %v7046_v45  ;;  %v6512_v45 = vld [vmem:[%s8813_s8 + $0x188] sm:$0xff]  }
 0x25a   :  { %6294 = vmatprep.subr.bf16.mxu1 %v6476_v26 }
 0x25c   :  { %6273 = vmatpush3.bf16.msra.mxu0 %v6477_v32 }
 0x25d   :  { %6295 = vmatpush3.bf16.msra.mxu1 %v6478_v33  ;;  %6274 = vmatprep.subr.bf16.mxu0 %v6479_v31  ;;  %v6511_v33 = vld [vmem:[%s8813_s8 + $0x1c8] sm:$0xff]  }
 0x25e   :  { %6296 = vmatprep.subr.bf16.mxu1 %v6480_v7 }
 0x260   :  { %6275 = vmatpush3.bf16.msra.mxu0 %v6481_v13  ;;  %v6513_v13 = vld [vmem:[%s8813_s8 + $0x1c0] sm:$0xff]  }
 0x261   :  { %6297 = vmatpush3.bf16.msra.mxu1 %v6482_v14  ;;  %6304 = vmatprep.subr.bf16.mxu0 %v6483_v15 }
 0x262   :  { %6326 = vmatprep.subr.bf16.mxu1 %v6499_v17 }
 0x263   :  { %5263 = vmatmul.mubr.bf16.vlgmr.msra.gmra.mxu0 %v4710_v56 }
 0x264   :  { %5303 = vmatmul.mubr.bf16.vlgmr.msra.gmra.mxu1 %v4712_v22  ;;  %6305 = vmatpush3.bf16.msra.mxu0 %v6484_v18 }
 0x265   :  { %6306 = vmatprep.subr.bf16.mxu0 %v6485_v19  ;;  %6327 = vmatpush3.bf16.msra.mxu1 %v6500_v21 }
 0x266   :  { %6328 = vmatprep.subr.bf16.mxu1 %v6501_v23 }
 0x268   :  { %6307 = vmatpush3.bf16.msra.mxu0 %v6486_v25 }
 0x269   :  { %6308 = vmatprep.subr.bf16.mxu0 %v6487_v41  ;;  %6329 = vmatpush3.bf16.msra.mxu1 %v6502_v28  ;;  %v6527_v41 = vmov 0.0   ;;  %v6515_v28 = vld [vmem:[%s8816_s9 + $0x38] sm:$0xff]  }
 0x26a   :  { %6330 = vmatprep.subr.bf16.mxu1 %v6503_v24  ;;  %v6516_v24 = vld [vmem:[%s8816_s9 + $0x30] sm:$0xff]  }
 0x26c   :  { %6309 = vmatpush3.bf16.msra.mxu0 %v6488_v30  ;;  %v6517_v30 = vld [vmem:[%s8816_s9 + $0x28] sm:$0xff]  }
 0x26d   :  { %6310 = vmatprep.subr.bf16.mxu0 %v6489_v35  ;;  %6331 = vmatpush3.bf16.msra.mxu1 %v6504_v36  ;;  %v6518_v35 = vld [vmem:[%s8816_s9 + $0x20] sm:$0xff]   ;;  %v6519_v36 = vld [vmem:[%s8816_s9 + $0x18] sm:$0xff]  }
 0x26e   :  { %6332 = vmatprep.subr.bf16.mxu1 %v6505_v27 }
 0x270   :  { %6311 = vmatpush3.bf16.msra.mxu0 %v6490_v29 }
 0x271   :  { %6312 = vmatprep.subr.bf16.mxu0 %v6491_v46  ;;  %6333 = vmatpush3.bf16.msra.mxu1 %v6506_v59 }
 0x272   :  { %6334 = vmatprep.subr.bf16.mxu1 %v6507_v20 }
 0x274   :  { %6313 = vmatpush3.bf16.msra.mxu0 %v6492_v63  ;;  %v4631_v63 = vrot.slane %v8497_v44, %v6859_v38 }
 0x275   :  { %6314 = vmatprep.subr.bf16.mxu0 %v6493_v49  ;;  %6335 = vmatpush3.bf16.msra.mxu1 %v6508_v8 }
 0x276   :  { %6336 = vmatprep.subr.bf16.mxu1 %v6509_v43 }
 0x278   :  { %6315 = vmatpush3.bf16.msra.mxu0 %v6494_v52 }
 0x279   :  { %6316 = vmatprep.subr.bf16.mxu0 %v6495_v58  ;;  %6337 = vmatpush3.bf16.msra.mxu1 %v6510_v34  ;;  %v4681_v58 = vrot.slane %v8519_v5, %v6859_v38 }
 0x27a   :  { %6338 = vmatprep.subr.bf16.mxu1 %v6511_v33 }
 0x27c   :  { %6317 = vmatpush3.bf16.msra.mxu0 %v6496_v47 }
 0x27d   :  { %6318 = vmatprep.subr.bf16.mxu0 %v6497_v62  ;;  %6339 = vmatpush3.bf16.msra.mxu1 %v6512_v45  ;;  %v6521_v45 = vld [vmem:[%s8816_s9 + $0x8] sm:$0xff]  }
 0x27e   :  { %6340 = vmatprep.subr.bf16.mxu1 %v6513_v13  ;;  %v6522_v13 = vld [vmem:[%s8816_s9] sm:$0xff]  }
 0x280   :  { %6319 = vmatpush3.bf16.msra.mxu0 %v6498_v54  ;;  %v4635_v54 = vrot.slane %v8497_v44, %v7058_v48 }
 0x281   :  { %6341 = vmatpush3.bf16.msra.mxu1 %v6514_v55  ;;  %6357 = vmatprep.subr.bf16.mxu0 %v6527_v41 }
 0x283   :  { %v4390_v57 = vpop.f32.mrf.mxu0 }
 0x284   :  { %v4391_v1 = vadd.f32 %v4390_v57, %v8561_v37  ;;  %v4431_v2 = vpop.f32.mrf.mxu1 }
 0x285   :  { %v4392_v40 = vpop.f32.mrf.mxu0 }
 0x286   :  { %v4432_v50 = vadd.f32 %v4431_v2, %v4391_v1  ;;  %v4393_v60 = vadd.f32 %v4392_v40, %v4352_v53  ;;  %v4433_v61 = vpop.f32.mrf.mxu1  ;;  %v4685_v1 = vrot.slane %v8519_v5, %v7058_v48 }
 0x287   :  { %v4394_v37 = vpop.f32.mrf.mxu0 }
 0x288   :  { %v4648_v9 = vmul.f32 %v4623_v3, %v4432_v50  ;;  %v4434_v10 = vadd.f32 %v4433_v61, %v4393_v60  ;;  %v4435_v0 = vpop.f32.mrf.mxu1 }
 0x289   :  { %v4395_v11 = vpop.f32.mrf.mxu0 }
 0x28a   :  { %v4698_v26 = vadd.f32 %v4673_v6, %v4648_v9  ;;  %v4649_v32 = vmul.f32 %v4627_v42, %v4434_v10  ;;  %v4436_v51 = vpop.f32.mrf.mxu1 }
 0x28c   :  { %v4699_v31 = vadd.f32 %v4677_v39, %v4649_v32  ;;  %v4706_v12 = vmax.f32 %v4698_v26, 0.0  ;;  %v6520_v32 = vld [vmem:[%s8816_s9 + $0x10] sm:$0xff]  }
 0x28e   :  { %v4707_v7 = vmax.f32 %v4699_v31, 0.0  ;;  %v4714_v15 = vpack.c.bf16 %v4706_v12, %v4706_v12 }
 0x290   :  { %v4715_v14 = vpack.c.bf16 %v4707_v7, %v4707_v7 }
 0x292   :  { %5342 = vmatprep.mubr.bf16.mxu0 %v4715_v14 }
 0x293   :  { %5343 = vmatmul.mubr.bf16.vlgmr.msra.gmra.mxu0 %v4714_v15 }
 0x294   :  { %6358 = vmatpush3.bf16.msra.mxu0 %v6515_v28  ;;  %6373 = vmatprep.mubr.msk.bf16.mxu0 %vm6528_vm0, %v6527_v41 }
 0x295   :  { %6359 = vmatprep.subr.bf16.mxu0 %v6527_v41 }
 0x298   :  { %6360 = vmatpush3.bf16.msra.mxu0 %v6516_v24 }
 0x299   :  { %6361 = vmatprep.subr.bf16.mxu0 %v6527_v41 }
 0x29c   :  { %6362 = vmatpush3.bf16.msra.mxu0 %v6517_v30 }
 0x29d   :  { %6363 = vmatprep.subr.bf16.mxu0 %v6527_v41 }
 0x2a0   :  { %6364 = vmatpush3.bf16.msra.mxu0 %v6518_v35 }
 0x2a1   :  { %6365 = vmatprep.subr.bf16.mxu0 %v6527_v41 }
 0x2a4   :  { %6366 = vmatpush3.bf16.msra.mxu0 %v6519_v36 }
 0x2a5   :  { %6367 = vmatprep.subr.bf16.mxu0 %v6527_v41 }
 0x2a8   :  { %6368 = vmatpush3.bf16.msra.mxu0 %v6520_v32 }
 0x2a9   :  { %6369 = vmatprep.subr.bf16.mxu0 %v6527_v41 }
 0x2ac   :  { %6370 = vmatpush3.bf16.msra.mxu0 %v6521_v45 }
 0x2ad   :  { %6371 = vmatprep.subr.bf16.mxu0 %v6527_v41 }
 0x2b0   :  { %6372 = vmatpush3.bf16.msra.mxu0 %v6522_v13 }
 0x2c3   :  { %v4472_v16 = vpop.f32.mrf.mxu0 }
 0x2c4   :  { %v4513_v17 = vpop.f32.mrf.mxu1 }
 0x2c5   :  { %v4514_v18 = vadd.f32 %v4513_v17, %v4472_v16  ;;  %v4474_v56 = vpop.f32.mrf.mxu0 }
 0x2c6   :  { %v4515_v19 = vpop.f32.mrf.mxu1 }
 0x2c7   :  { %v4476_v21 = vpop.f32.mrf.mxu0  ;;  %v4516_v29 = vadd.f32 %v4515_v19, %v4474_v56 }
 0x2c8   :  { %v4517_v22 = vpop.f32.mrf.mxu1  ;;  %v6163_v21 = vld [vmem:[%s8817_s10] ss:$0 sm:$0xff] }
 0x2c9   :  { %v4477_v23 = vpop.f32.mrf.mxu0 }
 0x2ca   :  { %v4518_v25 = vpop.f32.mrf.mxu1 }
 0x303   :  { %v4554_v27 = vpop.f32.mrf.mxu0 }
 0x304   :  { %v4555_v46 = vadd.f32 %v4554_v27, %v4514_v18  ;;  %v4595_v59 = vpop.f32.mrf.mxu1 }
 0x305   :  { %v4556_v49 = vpop.f32.mrf.mxu0 }
 0x306   :  { %v4596_v52 = vadd.f32 %v4595_v59, %v4555_v46  ;;  %v4557_v47 = vadd.f32 %v4556_v49, %v4516_v29  ;;  %v4597_v62 = vpop.f32.mrf.mxu1 }
 0x307   :  { %v4558_v57 = vpop.f32.mrf.mxu0 }
 0x308   :  { %v4650_v20 = vmul.f32 %v4631_v63, %v4596_v52  ;;  %v4598_v53 = vadd.f32 %v4597_v62, %v4557_v47  ;;  %v4599_v2 = vpop.f32.mrf.mxu1 }
 0x309   :  { %v4559_v3 = vpop.f32.mrf.mxu0 }
 0x30a   :  { %v4700_v8 = vadd.f32 %v4681_v58, %v4650_v20  ;;  %v4651_v40 = vmul.f32 %v4635_v54, %v4598_v53  ;;  %v4600_v50 = vpop.f32.mrf.mxu1 }
 0x30c   :  { %v4701_v6 = vadd.f32 %v4685_v1, %v4651_v40  ;;  %v4708_v60 = vmax.f32 %v4700_v8, 0.0 }
 0x30e   :  { %v4709_v61 = vmax.f32 %v4701_v6, 0.0  ;;  %v4716_v42 = vpack.c.bf16 %v4708_v60, %v4708_v60 }
 0x310   :  { %v4717_v38 = vpack.c.bf16 %v4709_v61, %v4709_v61 }
 0x312   :  { %5382 = vmatprep.mubr.bf16.mxu1 %v4717_v38 }
 0x313   :  { %5383 = vmatmul.mubr.bf16.vlgmr.msra.gmra.mxu1 %v4716_v42 }
 0x323   :  { %v6276_v37 = vpop.f32.mrf.mxu0 }
 0x324   :  { %v6298_v44 = vpop.f32.mrf.mxu1 }
 0x325   :  { %v6277_v43 = vpop.f32.mrf.mxu0 }
 0x326   :  { %v6278_v9 = vadd.f32 %v6277_v43, %v6276_v37  ;;  %v6299_v10 = vpop.f32.mrf.mxu1 }
 0x327   :  { %v6300_v39 = vadd.f32 %v6299_v10, %v6298_v44  ;;  %v6279_v0 = vpop.f32.mrf.mxu0 }
 0x328   :  { %v6301_v48 = vpop.f32.mrf.mxu1 }
 0x329   :  { %v5305_v5 = vadd.f32 %v6300_v39, %v6278_v9  ;;  %v6280_v34 = vpop.f32.mrf.mxu0 }
 0x32a   :  { %v6302_v11 = vpop.f32.mrf.mxu1 }
 0x353   :  { %v6320_v26 = vpop.f32.mrf.mxu0 }
 0x355   :  { %v6321_v51 = vpop.f32.mrf.mxu0 }
 0x356   :  { %v6322_v33 = vadd.f32 %v6321_v51, %v6320_v26 }
 0x357   :  { %v6323_v31 = vpop.f32.mrf.mxu0 }
 0x358   :  { %v5345_v12 = vadd.f32 %v6322_v33, %v5305_v5 }
 0x359   :  { %v6324_v7 = vpop.f32.mrf.mxu0 }
 0x3d3   :  { %v6342_v55 = vpop.f32.mrf.mxu1 }
 0x3d5   :  { %v6343_v14 = vpop.f32.mrf.mxu1 }
 0x3d6   :  { %v6344_v15 = vadd.f32 %v6343_v14, %v6342_v55 }
 0x3d7   :  { %v6345_v16 = vpop.f32.mrf.mxu1 }
 0x3d8   :  { %v5385_v17 = vadd.f32 %v6344_v15, %v5345_v12 }
 0x3d9   :  { %v6346_v18 = vpop.f32.mrf.mxu1 }
 0x3da   :  { %v5390_v56 = vadd.f32 %v5385_v17, %v7565_v4 }
 0x3dc   :  { %v5391_v19 = vpack.c.bf16 %v5390_v56, %v5390_v56 }
 0x3de   :  { %6374 = vmatmul.mubr.bf16.vlgmr.msra.gmra.mxu0 %v5391_v19 }
 0x49e   :  { %v5497_v22 = vpop.f32.mrf.mxu0 }
 0x49f   :  { %v5498_v23 = vadd.f32 %v6163_v21, %v5497_v22 }
 0x4a0   :  { %v6375_v25 = vpop.f32.mrf.mxu0 }
 0x4a1   :  { %v5503_v28 = vsub.f32 0.0, %v5498_v23 }
 0x4a2   :  { %v5500_v24 = vpop.f32.mrf.mxu0 }
 0x4a3   :  { %v5504_v41 = vmul.f32 1.442695, %v5503_v28 }
 0x4a4   :  { %v6376_v30 = vpop.f32.mrf.mxu0 }
 0x4a5   :  { %6523 = vpow2.f32 %v5504_v41 }
 0x4b2   :  { %v6524_v35 = vpop.eup %6523 }
 0x4b3   :  { %v5506_v36 = vadd.f32 1.0, %v6524_v35 }
 0x4b5   :  { %6525 = vrcp.f32 %v5506_v36 }
 0x4c2   :  { %v6526_v27 = vpop.eup %6525 }
 0x4c3   :  { %5509 = vst [vmem:[%s8818_s11] sm:$0xff] %v6526_v27 }

</bundles_post_ra>
